<compile_context>
chip_gen: v7x
topology: tpu7x:2x2x1
jax: 0.10.0
libtpu: 0.0.40
codegen_flags: <defaults>
</compile_context>

<pallas_src>
import jax
import jax.numpy as jnp
from jax import lax
from jax.experimental import pallas as pl
from jax.experimental.pallas import tpu as pltpu

H0, W0 = 28, 28            # spatial input size (fc expects 7*7*32)
C0, C1, C2 = 1, 16, 32
K, PAD = 5, 2
NCLS = 10
EPS = 1e-5

HP = H0 + 2 * PAD          # 32   padded H / W for layer1 input
H1 = H0                    # 28   conv1 output spatial
H2 = H0 // 2               # 14   pooled1 / conv2 output spatial
H4 = H0 // 4               # 7    pooled2 spatial
KIN1 = K * HP              # 160  layer1 im2col K  (kh*32 + w_pad)
L1C = H1 * C1              # 448  conv1 out lanes: (w%2)*224 + (w//2)*16 + c
L1H = H2 * C1              # 224  pooled1 lanes (dense): w*16 + c
L2C = H2 * C2              # 448  conv2 out lanes: (w%2)*224 + (w//2)*32 + c
L2H = H4 * C2              # 224  pooled2 lanes (dense): w*32 + c
NOUT = 128                 # lane-dense logits (first NCLS lanes valid)


# ---------------------------------------------------------------------------
# Kernel: one batch block per grid step, everything fused.
# ---------------------------------------------------------------------------
def _cnn_kernel(x_ref, w1_ref, s1_ref, t1_ref, w2_ref, s2_ref, t2_ref,
                fw_ref, fb_ref, out_ref):
    Bb = x_ref.shape[1]

    # ---- layer1: conv 5x5 (1 -> 16) as ONE fused-kh banded MXU matmul ------
    xs1 = x_ref[...].reshape(H1 * Bb, KIN1)             # (28*Bb, 160) bf16
    acc1 = jnp.dot(xs1, w1_ref[...], preferred_element_type=jnp.float32)
    # folded BatchNorm (inference) + conv bias, then ReLU (f32 VPU math)
    h1 = jnp.maximum(acc1 * s1_ref[...] + t1_ref[...], 0.0)   # (28*Bb, 448)

    # ---- maxpool 2x2 --------------------------------------------------------
    # W-pool: even/odd output columns live in the two 224-lane halves
    m1 = jnp.maximum(h1[:, :L1H], h1[:, L1H:])          # (28*Bb, 224) dense
    # H-pool: rows are (h, b); regroup to (h//2, parity*Bb + b) and max halves
    m1 = m1.reshape(H2, 2 * Bb, L1H)
    p1 = jnp.maximum(m1[:, :Bb, :], m1[:, Bb:, :])      # (14, Bb, 224) f32
    p1 = p1.astype(jnp.bfloat16)                        # bf16 operand for layer2

    # ---- H padding for layer2 (W padding folded into the band weights) -----
    zpad = jnp.zeros((PAD, Bb, L1H), jnp.bfloat16)
    x2 = jnp.concatenate([zpad, p1, zpad], axis=0)      # (18, Bb, 224)

    # ---- layer2: conv 5x5 (16 -> 32) as 5 dense-K banded MXU matmuls -------
    acc2 = jnp.zeros((H2 * Bb, L2C), jnp.float32)
    for kh in range(K):
        xs = x2[kh:kh + H2].reshape(H2 * Bb, L1H)       # (14*Bb, 224) bf16
        acc2 = acc2 + jnp.dot(xs, w2_ref[kh],
                              preferred_element_type=jnp.float32)
    h2 = jnp.maximum(acc2 * s2_ref[...] + t2_ref[...], 0.0)   # (14*Bb, 448)

    # ---- maxpool 2x2 --------------------------------------------------------
    m2 = jnp.maximum(h2[:, :L2H], h2[:, L2H:])          # (14*Bb, 224) dense
    m2 = m2.reshape(H4, 2 * Bb, L2H)
    p2 = jnp.maximum(m2[:, :Bb, :], m2[:, Bb:, :]).astype(jnp.bfloat16)  # (7,Bb,224)

    # ---- fc: 7 x (Bb,224)@(224,128) into lane-dense 128-wide logits --------
    acc3 = jnp.zeros((Bb, NOUT), jnp.float32)
    for h in range(H4):
        acc3 = acc3 + jnp.dot(p2[h], fw_ref[h],
                              preferred_element_type=jnp.float32)
    out_ref[...] = acc3 + fb_ref[...]                   # unmasked 128-lane store


# ---------------------------------------------------------------------------
# Wrapper-side weight preprocessing (pure JAX, outside the kernel).
# ---------------------------------------------------------------------------
def _l1_band(w1):
    """(5,5,1,16) HWIO -> (160, 448).  Row = kh*32 + w_in_pad;
    col = (w_out%2)*224 + (w_out//2)*16 + c (pool-friendly permuted lanes)."""
    w1k = w1[:, :, 0, :]                                          # (kh, kw, c)
    wi = jnp.arange(HP)[:, None]                                  # padded input col
    wo = jnp.arange(H1)[None, :]                                  # output col
    kw = wi - wo
    valid = (kw >= 0) & (kw < K)
    band = jnp.where(valid[None, :, :, None],
                     w1k[:, jnp.clip(kw, 0, K - 1), :], 0.0)      # (5,32,28,16)
    band = band.reshape(K, HP, H2, 2, C1)                         # w_out -> (q, r)
    band = jnp.transpose(band, (0, 1, 3, 2, 4))                   # (kh, wi, r, q, c)
    return band.reshape(KIN1, L1C).astype(jnp.bfloat16)           # (160, 448)


def _l2_band(w2):
    """(5,5,16,32) HWIO -> (5, 224, 448).  Row = w_in*16 + ci (dense pooled1
    lanes); col = (w_out%2)*224 + (w_out//2)*32 + c2; W padding folded in."""
    wi = jnp.arange(H2)[:, None]                                  # pooled input col
    wo = jnp.arange(H2)[None, :]                                  # output col
    kw = wi - wo + PAD
    valid = (kw >= 0) & (kw < K)
    band = jnp.where(valid[None, :, :, None, None],
                     w2[:, jnp.clip(kw, 0, K - 1), :, :], 0.0)    # (5,14,14,16,32)
    band = jnp.transpose(band, (0, 1, 3, 2, 4))                   # (kh, wi, ci, wo, co)
    band = band.reshape(K, H2, C1, H4, 2, C2)                     # w_out -> (q, r)
    band = jnp.transpose(band, (0, 1, 2, 4, 3, 5))                # (kh, wi, ci, r, q, co)
    return band.reshape(K, L1H, L2C).astype(jnp.bfloat16)         # (5, 224, 448)


def _fc_w(fcw):
    """(10, 32*7*7) CHW-flatten -> (7, 224, 128); rows = w*32 + c2 per pooled
    row h; cols padded to 128 lanes (zeros beyond class 10)."""
    f = fcw.reshape(NCLS, C2, H4, H4)                             # (n, c, h, w)
    f = jnp.transpose(f, (2, 3, 1, 0))                            # (h, w, c, n)
    f = f.reshape(H4, H4 * C2, NCLS)                              # (7, 224, 10)
    f = jnp.pad(f, ((0, 0), (0, 0), (0, NOUT - NCLS)))
    return f.astype(jnp.bfloat16)                                 # (7, 224, 128)


def _fold_bn(gamma, beta, mean, var, bias):
    s = gamma / jnp.sqrt(var + EPS)
    t = (bias - mean) * s + beta
    return s, t


def _round_up(v, m):
    return -(-v // m) * m


# ---------------------------------------------------------------------------
# pallas_call wrapper
# ---------------------------------------------------------------------------
def cnn_pallas(x_im2col, w1b, s1t, t1t, w2b, s2t, t2t, fwb, fb, block_b):
    _, Bp, _ = x_im2col.shape
    grid = (Bp // block_b,)
    return pl.pallas_call(
        _cnn_kernel,
        out_shape=jax.ShapeDtypeStruct((Bp, NOUT), jnp.float32),
        grid_spec=pltpu.PrefetchScalarGridSpec(
            num_scalar_prefetch=0,
            grid=grid,
            in_specs=[
                pl.BlockSpec((H1, block_b, KIN1), lambda i: (0, i, 0)),  # im2col input
                pl.BlockSpec((KIN1, L1C), lambda i: (0, 0)),             # layer1 weights
                pl.BlockSpec((1, L1C), lambda i: (0, 0)),                # s1 (tiled)
                pl.BlockSpec((1, L1C), lambda i: (0, 0)),                # t1 (tiled)
                pl.BlockSpec((K, L1H, L2C), lambda i: (0, 0, 0)),        # layer2 band weights
                pl.BlockSpec((1, L2C), lambda i: (0, 0)),                # s2 (tiled)
                pl.BlockSpec((1, L2C), lambda i: (0, 0)),                # t2 (tiled)
                pl.BlockSpec((H4, L2H, NOUT), lambda i: (0, 0, 0)),      # fc weights
                pl.BlockSpec((1, NOUT), lambda i: (0, 0)),               # fc bias (padded)
            ],
            out_specs=pl.BlockSpec((block_b, NOUT), lambda i: (i, 0)),
        ),
        compiler_params=pltpu.CompilerParams(
            dimension_semantics=("parallel",),           # shard batch axis over TCs
            vmem_limit_bytes=48 * 1024 * 1024),
    )(x_im2col, w1b, s1t, t1t, w2b, s2t, t2t, fwb, fb)


@jax.jit
def cnn_forward(x_nchw, p):
    """Forward pass matching the PyTorch CNN module (inference-mode BN)."""
    B = x_nchw.shape[0]
    # bf16 activations tile at 16 sublanes -> block_b multiple of 16.
    # Grid is forced >= 2 (and even) so the "parallel" axis uses both v7x TCs.
    block_b = min(64, max(16, _round_up(_round_up(B, 2) // 2, 16)))
    n_steps = _round_up(max(2, -(-B // block_b)), 2)
    Bp = n_steps * block_b

    x = x_nchw[:, 0, :, :]                                        # squeeze C0=1 -> (B,28,28)
    xp = jnp.pad(x, ((0, Bp - B), (PAD, PAD), (PAD, PAD)))        # (Bp,32,32)
    # kh-im2col built in the wrapper: lanes = kh*32 + w_pad (layer1 -> one K=160 matmul)
    xi = jnp.stack([xp[:, kh:kh + H1, :] for kh in range(K)], axis=2)  # (Bp,28,5,32)
    xi = xi.reshape(Bp, H1, KIN1)
    xi = jnp.transpose(xi, (1, 0, 2)).astype(jnp.bfloat16)        # (28, Bp, 160)

    s1, t1 = _fold_bn(p["g1"], p["be1"], p["m1"], p["v1"], p["b1"])
    s2, t2 = _fold_bn(p["g2"], p["be2"], p["m2"], p["v2"], p["b2"])
    s1t = jnp.tile(s1, H1).reshape(1, L1C)
    t1t = jnp.tile(t1, H1).reshape(1, L1C)
    s2t = jnp.tile(s2, H2).reshape(1, L2C)
    t2t = jnp.tile(t2, H2).reshape(1, L2C)
    fb = jnp.pad(p["fcb"], (0, NOUT - NCLS)).reshape(1, NOUT)

    out = cnn_pallas(xi, _l1_band(p["w1"]), s1t, t1t,
                     _l2_band(p["w2"]), s2t, t2t,
                     _fc_w(p["fcw"]), fb, block_b)
    return out[:B, :NCLS]


# ---------------------------------------------------------------------------
# Pure-JAX reference (for verification) and parameter init
# ---------------------------------------------------------------------------
def cnn_reference(x_nchw, p):
    x = jnp.transpose(x_nchw, (0, 2, 3, 1))

    def conv(h, w_hwio, b):
        y = lax.conv_general_dilated(h, w_hwio, (1, 1), ((PAD, PAD), (PAD, PAD)),
                                     dimension_numbers=("NHWC", "HWIO", "NHWC"))
        return y + b

    def pool(h):
        return lax.reduce_window(h, -jnp.inf, lax.max, (1, 2, 2, 1), (1, 2, 2, 1), "VALID")

    h = conv(x, p["w1"], p["b1"])
    h = (h - p["m1"]) / jnp.sqrt(p["v1"] + EPS) * p["g1"] + p["be1"]
    h = pool(jnp.maximum(h, 0.0))
    h = conv(h, p["w2"], p["b2"])
    h = (h - p["m2"]) / jnp.sqrt(p["v2"] + EPS) * p["g2"] + p["be2"]
    h = pool(jnp.maximum(h, 0.0))
    flat = jnp.transpose(h, (0, 3, 1, 2)).reshape(x.shape[0], -1)  # PyTorch CHW flatten
    return flat @ p["fcw"].T + p["fcb"]


def init_params(key):
    ks = jax.random.split(key, 10)
    f32 = jnp.float32
    return {
        "w1": 0.1 * jax.random.normal(ks[0], (K, K, C0, C1), f32),
        "b1": 0.1 * jax.random.normal(ks[1], (C1,), f32),
        "g1": 1.0 + 0.1 * jax.random.normal(ks[2], (C1,), f32),
        "be1": 0.1 * jax.random.normal(ks[3], (C1,), f32),
        "m1": 0.05 * jax.random.normal(ks[4], (C1,), f32),
        "v1": 0.5 + jnp.abs(jax.random.normal(ks[5], (C1,), f32)),
        "w2": 0.05 * jax.random.normal(ks[6], (K, K, C1, C2), f32),
        "b2": 0.1 * jax.random.normal(ks[7], (C2,), f32),
        "g2": 1.0 + 0.1 * jax.random.normal(ks[8], (C2,), f32),
        "be2": 0.1 * jax.random.normal(ks[9], (C2,), f32),
        "m2": 0.05 * jax.random.normal(jax.random.fold_in(key, 11), (C2,), f32),
        "v2": 0.5 + jnp.abs(jax.random.normal(jax.random.fold_in(key, 12), (C2,), f32)),
        "fcw": 0.02 * jax.random.normal(jax.random.fold_in(key, 13),
                                        (NCLS, H4 * H4 * C2), f32),
        "fcb": 0.1 * jax.random.normal(jax.random.fold_in(key, 14), (NCLS,), f32),
    }


if __name__ == "__main__":
    key = jax.random.PRNGKey(0)
    params = init_params(jax.random.fold_in(key, 1))
    B = 2
    x = jax.random.normal(key, (B, C0, H0, W0), jnp.float32)   # NCHW like PyTorch

    logits = cnn_forward(x, params)
    logits = jax.block_until_ready(logits)
    assert logits.shape == (B, NCLS)

    ref = cnn_reference(x, params)
    err = float(jnp.max(jnp.abs(logits - ref)))
    # bf16 MXU operands with f32 accumulation -> slightly looser tolerance.
    assert jnp.allclose(logits, ref, atol=5e-2, rtol=5e-2), f"max abs err = {err}"

    print("KERNEL_OK")
</pallas_src>

<mosaic_0001>
module attributes {stable_mosaic.version = 11 : i64} {
  func.func @_cnn_kernel(%arg0: i32, %arg1: memref<28x16x160xbf16, #tpu.memory_space<vmem>>, %arg2: memref<160x448xbf16, #tpu.memory_space<vmem>>, %arg3: memref<1x448xf32, #tpu.memory_space<vmem>>, %arg4: memref<1x448xf32, #tpu.memory_space<vmem>>, %arg5: memref<5x224x448xbf16, #tpu.memory_space<vmem>>, %arg6: memref<1x448xf32, #tpu.memory_space<vmem>>, %arg7: memref<1x448xf32, #tpu.memory_space<vmem>>, %arg8: memref<7x224x128xbf16, #tpu.memory_space<vmem>>, %arg9: memref<1x128xf32, #tpu.memory_space<vmem>>, %arg10: memref<16x128xf32, #tpu.memory_space<vmem>>) attributes {dimension_semantics = [#tpu.dimension_semantics<parallel>], iteration_bounds = array<i64: 2>, scalar_prefetch = 0 : i64, scratch_operands = 0 : i64, tpu.core_type = #tpu.core_type<tc>, window_params = [{transform_indices = @transform_0, window_bounds = array<i64: 28, 16, 160>}, {pipeline_mode = #tpu.pipeline_mode<synchronous>, transform_indices = @transform_1, window_bounds = array<i64: 160, 448>}, {pipeline_mode = #tpu.pipeline_mode<synchronous>, transform_indices = @transform_2, window_bounds = array<i64: 1, 448>}, {pipeline_mode = #tpu.pipeline_mode<synchronous>, transform_indices = @transform_3, window_bounds = array<i64: 1, 448>}, {pipeline_mode = #tpu.pipeline_mode<synchronous>, transform_indices = @transform_4, window_bounds = array<i64: 5, 224, 448>}, {pipeline_mode = #tpu.pipeline_mode<synchronous>, transform_indices = @transform_5, window_bounds = array<i64: 1, 448>}, {pipeline_mode = #tpu.pipeline_mode<synchronous>, transform_indices = @transform_6, window_bounds = array<i64: 1, 448>}, {pipeline_mode = #tpu.pipeline_mode<synchronous>, transform_indices = @transform_7, window_bounds = array<i64: 7, 224, 128>}, {pipeline_mode = #tpu.pipeline_mode<synchronous>, transform_indices = @transform_8, window_bounds = array<i64: 1, 128>}, {transform_indices = @transform_9, window_bounds = array<i64: 16, 128>}]} {
    %c0 = arith.constant 0 : index
    %c0_0 = arith.constant 0 : index
    %c0_1 = arith.constant 0 : index
    %0 = vector.load %arg1[%c0, %c0_0, %c0_1] : memref<28x16x160xbf16, #tpu.memory_space<vmem>>, vector<28x16x160xbf16>
    %1 = vector.shape_cast %0 : vector<28x16x160xbf16> to vector<448x160xbf16>
    %c0_2 = arith.constant 0 : index
    %c0_3 = arith.constant 0 : index
    %2 = vector.load %arg2[%c0_2, %c0_3] : memref<160x448xbf16, #tpu.memory_space<vmem>>, vector<160x448xbf16>
    %cst = arith.constant dense<0.000000e+00> : vector<448x448xf32>
    %3 = tpu.matmul %1, %2, %cst {dimension_numbers = #tpu.dot_dimension_numbers<[1], [0], [0], [1], [0, 0, 1, 1], [], []>} : vector<448x160xbf16>, vector<160x448xbf16>, vector<448x448xf32> -> vector<448x448xf32>
    %c0_4 = arith.constant 0 : index
    %c0_5 = arith.constant 0 : index
    %4 = vector.load %arg3[%c0_4, %c0_5] : memref<1x448xf32, #tpu.memory_space<vmem>>, vector<1x448xf32>
    %5 = vector.broadcast %4 : vector<1x448xf32> to vector<448x448xf32>
    %6 = arith.mulf %3, %5 : vector<448x448xf32>
    %c0_6 = arith.constant 0 : index
    %c0_7 = arith.constant 0 : index
    %7 = vector.load %arg4[%c0_6, %c0_7] : memref<1x448xf32, #tpu.memory_space<vmem>>, vector<1x448xf32>
    %8 = vector.broadcast %7 : vector<1x448xf32> to vector<448x448xf32>
    %9 = arith.addf %6, %8 : vector<448x448xf32>
    %cst_8 = arith.constant 0.000000e+00 : f32
    %10 = vector.broadcast %cst_8 : f32 to vector<448x448xf32>
    %11 = arith.maximumf %9, %10 : vector<448x448xf32>
    %12 = vector.extract_strided_slice %11 {offsets = [0, 0], sizes = [448, 224], strides = [1, 1]} : vector<448x448xf32> to vector<448x224xf32>
    %13 = vector.extract_strided_slice %11 {offsets = [0, 224], sizes = [448, 224], strides = [1, 1]} : vector<448x448xf32> to vector<448x224xf32>
    %14 = arith.maximumf %12, %13 : vector<448x224xf32>
    %15 = vector.shape_cast %14 : vector<448x224xf32> to vector<14x32x224xf32>
    %16 = vector.extract_strided_slice %15 {offsets = [0, 0, 0], sizes = [14, 16, 224], strides = [1, 1, 1]} : vector<14x32x224xf32> to vector<14x16x224xf32>
    %17 = vector.extract_strided_slice %15 {offsets = [0, 16, 0], sizes = [14, 16, 224], strides = [1, 1, 1]} : vector<14x32x224xf32> to vector<14x16x224xf32>
    %18 = arith.maximumf %16, %17 : vector<14x16x224xf32>
    %19 = arith.truncf %18 : vector<14x16x224xf32> to vector<14x16x224xbf16>
    %cst_9 = arith.constant 0.000000e+00 : bf16
    %20 = vector.broadcast %cst_9 : bf16 to vector<2x16x224xbf16>
    %21 = tpu.concatenate %20, %19, %20 in 0 : vector<2x16x224xbf16>, vector<14x16x224xbf16>, vector<2x16x224xbf16> -> vector<18x16x224xbf16>
    %cst_10 = arith.constant 0.000000e+00 : f32
    %22 = vector.broadcast %cst_10 : f32 to vector<224x448xf32>
    %23 = vector.extract_strided_slice %21 {offsets = [0, 0, 0], sizes = [14, 16, 224], strides = [1, 1, 1]} : vector<18x16x224xbf16> to vector<14x16x224xbf16>
    %24 = vector.shape_cast %23 : vector<14x16x224xbf16> to vector<224x224xbf16>
    %c0_11 = arith.constant 0 : index
    %c0_12 = arith.constant 0 : index
    %c0_13 = arith.constant 0 : index
    %25 = vector.load %arg5[%c0_11, %c0_12, %c0_13] : memref<5x224x448xbf16, #tpu.memory_space<vmem>>, vector<1x224x448xbf16>
    %26 = vector.shape_cast %25 : vector<1x224x448xbf16> to vector<224x448xbf16>
    %cst_14 = arith.constant dense<0.000000e+00> : vector<224x448xf32>
    %27 = tpu.matmul %24, %26, %cst_14 {dimension_numbers = #tpu.dot_dimension_numbers<[1], [0], [0], [1], [0, 0, 1, 1], [], []>} : vector<224x224xbf16>, vector<224x448xbf16>, vector<224x448xf32> -> vector<224x448xf32>
    %28 = arith.addf %22, %27 : vector<224x448xf32>
    %29 = vector.extract_strided_slice %21 {offsets = [1, 0, 0], sizes = [14, 16, 224], strides = [1, 1, 1]} : vector<18x16x224xbf16> to vector<14x16x224xbf16>
    %30 = vector.shape_cast %29 : vector<14x16x224xbf16> to vector<224x224xbf16>
    %c1 = arith.constant 1 : index
    %c0_15 = arith.constant 0 : index
    %c0_16 = arith.constant 0 : index
    %31 = vector.load %arg5[%c1, %c0_15, %c0_16] : memref<5x224x448xbf16, #tpu.memory_space<vmem>>, vector<1x224x448xbf16>
    %32 = vector.shape_cast %31 : vector<1x224x448xbf16> to vector<224x448xbf16>
    %cst_17 = arith.constant dense<0.000000e+00> : vector<224x448xf32>
    %33 = tpu.matmul %30, %32, %cst_17 {dimension_numbers = #tpu.dot_dimension_numbers<[1], [0], [0], [1], [0, 0, 1, 1], [], []>} : vector<224x224xbf16>, vector<224x448xbf16>, vector<224x448xf32> -> vector<224x448xf32>
    %34 = arith.addf %28, %33 : vector<224x448xf32>
    %35 = vector.extract_strided_slice %21 {offsets = [2, 0, 0], sizes = [14, 16, 224], strides = [1, 1, 1]} : vector<18x16x224xbf16> to vector<14x16x224xbf16>
    %36 = vector.shape_cast %35 : vector<14x16x224xbf16> to vector<224x224xbf16>
    %c2 = arith.constant 2 : index
    %c0_18 = arith.constant 0 : index
    %c0_19 = arith.constant 0 : index
    %37 = vector.load %arg5[%c2, %c0_18, %c0_19] : memref<5x224x448xbf16, #tpu.memory_space<vmem>>, vector<1x224x448xbf16>
    %38 = vector.shape_cast %37 : vector<1x224x448xbf16> to vector<224x448xbf16>
    %cst_20 = arith.constant dense<0.000000e+00> : vector<224x448xf32>
    %39 = tpu.matmul %36, %38, %cst_20 {dimension_numbers = #tpu.dot_dimension_numbers<[1], [0], [0], [1], [0, 0, 1, 1], [], []>} : vector<224x224xbf16>, vector<224x448xbf16>, vector<224x448xf32> -> vector<224x448xf32>
    %40 = arith.addf %34, %39 : vector<224x448xf32>
    %41 = vector.extract_strided_slice %21 {offsets = [3, 0, 0], sizes = [14, 16, 224], strides = [1, 1, 1]} : vector<18x16x224xbf16> to vector<14x16x224xbf16>
    %42 = vector.shape_cast %41 : vector<14x16x224xbf16> to vector<224x224xbf16>
    %c3 = arith.constant 3 : index
    %c0_21 = arith.constant 0 : index
    %c0_22 = arith.constant 0 : index
    %43 = vector.load %arg5[%c3, %c0_21, %c0_22] : memref<5x224x448xbf16, #tpu.memory_space<vmem>>, vector<1x224x448xbf16>
    %44 = vector.shape_cast %43 : vector<1x224x448xbf16> to vector<224x448xbf16>
    %cst_23 = arith.constant dense<0.000000e+00> : vector<224x448xf32>
    %45 = tpu.matmul %42, %44, %cst_23 {dimension_numbers = #tpu.dot_dimension_numbers<[1], [0], [0], [1], [0, 0, 1, 1], [], []>} : vector<224x224xbf16>, vector<224x448xbf16>, vector<224x448xf32> -> vector<224x448xf32>
    %46 = arith.addf %40, %45 : vector<224x448xf32>
    %47 = vector.extract_strided_slice %21 {offsets = [4, 0, 0], sizes = [14, 16, 224], strides = [1, 1, 1]} : vector<18x16x224xbf16> to vector<14x16x224xbf16>
    %48 = vector.shape_cast %47 : vector<14x16x224xbf16> to vector<224x224xbf16>
    %c4 = arith.constant 4 : index
    %c0_24 = arith.constant 0 : index
    %c0_25 = arith.constant 0 : index
    %49 = vector.load %arg5[%c4, %c0_24, %c0_25] : memref<5x224x448xbf16, #tpu.memory_space<vmem>>, vector<1x224x448xbf16>
    %50 = vector.shape_cast %49 : vector<1x224x448xbf16> to vector<224x448xbf16>
    %cst_26 = arith.constant dense<0.000000e+00> : vector<224x448xf32>
    %51 = tpu.matmul %48, %50, %cst_26 {dimension_numbers = #tpu.dot_dimension_numbers<[1], [0], [0], [1], [0, 0, 1, 1], [], []>} : vector<224x224xbf16>, vector<224x448xbf16>, vector<224x448xf32> -> vector<224x448xf32>
    %52 = arith.addf %46, %51 : vector<224x448xf32>
    %c0_27 = arith.constant 0 : index
    %c0_28 = arith.constant 0 : index
    %53 = vector.load %arg6[%c0_27, %c0_28] : memref<1x448xf32, #tpu.memory_space<vmem>>, vector<1x448xf32>
    %54 = vector.broadcast %53 : vector<1x448xf32> to vector<224x448xf32>
    %55 = arith.mulf %52, %54 : vector<224x448xf32>
    %c0_29 = arith.constant 0 : index
    %c0_30 = arith.constant 0 : index
    %56 = vector.load %arg7[%c0_29, %c0_30] : memref<1x448xf32, #tpu.memory_space<vmem>>, vector<1x448xf32>
    %57 = vector.broadcast %56 : vector<1x448xf32> to vector<224x448xf32>
    %58 = arith.addf %55, %57 : vector<224x448xf32>
    %cst_31 = arith.constant 0.000000e+00 : f32
    %59 = vector.broadcast %cst_31 : f32 to vector<224x448xf32>
    %60 = arith.maximumf %58, %59 : vector<224x448xf32>
    %61 = vector.extract_strided_slice %60 {offsets = [0, 0], sizes = [224, 224], strides = [1, 1]} : vector<224x448xf32> to vector<224x224xf32>
    %62 = vector.extract_strided_slice %60 {offsets = [0, 224], sizes = [224, 224], strides = [1, 1]} : vector<224x448xf32> to vector<224x224xf32>
    %63 = arith.maximumf %61, %62 : vector<224x224xf32>
    %64 = vector.shape_cast %63 : vector<224x224xf32> to vector<7x32x224xf32>
    %65 = vector.extract_strided_slice %64 {offsets = [0, 0, 0], sizes = [7, 16, 224], strides = [1, 1, 1]} : vector<7x32x224xf32> to vector<7x16x224xf32>
    %66 = vector.extract_strided_slice %64 {offsets = [0, 16, 0], sizes = [7, 16, 224], strides = [1, 1, 1]} : vector<7x32x224xf32> to vector<7x16x224xf32>
    %67 = arith.maximumf %65, %66 : vector<7x16x224xf32>
    %68 = arith.truncf %67 : vector<7x16x224xf32> to vector<7x16x224xbf16>
    %cst_32 = arith.constant 0.000000e+00 : f32
    %69 = vector.broadcast %cst_32 : f32 to vector<16x128xf32>
    %70 = vector.extract_strided_slice %68 {offsets = [0, 0, 0], sizes = [1, 16, 224], strides = [1, 1, 1]} : vector<7x16x224xbf16> to vector<1x16x224xbf16>
    %71 = vector.shape_cast %70 : vector<1x16x224xbf16> to vector<16x224xbf16>
    %c0_33 = arith.constant 0 : index
    %c0_34 = arith.constant 0 : index
    %c0_35 = arith.constant 0 : index
    %72 = vector.load %arg8[%c0_33, %c0_34, %c0_35] : memref<7x224x128xbf16, #tpu.memory_space<vmem>>, vector<1x224x128xbf16>
    %73 = vector.shape_cast %72 : vector<1x224x128xbf16> to vector<224x128xbf16>
    %cst_36 = arith.constant dense<0.000000e+00> : vector<16x128xf32>
    %74 = tpu.matmul %71, %73, %cst_36 {dimension_numbers = #tpu.dot_dimension_numbers<[1], [0], [0], [1], [0, 0, 1, 1], [], []>} : vector<16x224xbf16>, vector<224x128xbf16>, vector<16x128xf32> -> vector<16x128xf32>
    %75 = arith.addf %69, %74 : vector<16x128xf32>
    %76 = vector.extract_strided_slice %68 {offsets = [1, 0, 0], sizes = [1, 16, 224], strides = [1, 1, 1]} : vector<7x16x224xbf16> to vector<1x16x224xbf16>
    %77 = vector.shape_cast %76 : vector<1x16x224xbf16> to vector<16x224xbf16>
    %c1_37 = arith.constant 1 : index
    %c0_38 = arith.constant 0 : index
    %c0_39 = arith.constant 0 : index
    %78 = vector.load %arg8[%c1_37, %c0_38, %c0_39] : memref<7x224x128xbf16, #tpu.memory_space<vmem>>, vector<1x224x128xbf16>
    %79 = vector.shape_cast %78 : vector<1x224x128xbf16> to vector<224x128xbf16>
    %cst_40 = arith.constant dense<0.000000e+00> : vector<16x128xf32>
    %80 = tpu.matmul %77, %79, %cst_40 {dimension_numbers = #tpu.dot_dimension_numbers<[1], [0], [0], [1], [0, 0, 1, 1], [], []>} : vector<16x224xbf16>, vector<224x128xbf16>, vector<16x128xf32> -> vector<16x128xf32>
    %81 = arith.addf %75, %80 : vector<16x128xf32>
    %82 = vector.extract_strided_slice %68 {offsets = [2, 0, 0], sizes = [1, 16, 224], strides = [1, 1, 1]} : vector<7x16x224xbf16> to vector<1x16x224xbf16>
    %83 = vector.shape_cast %82 : vector<1x16x224xbf16> to vector<16x224xbf16>
    %c2_41 = arith.constant 2 : index
    %c0_42 = arith.constant 0 : index
    %c0_43 = arith.constant 0 : index
    %84 = vector.load %arg8[%c2_41, %c0_42, %c0_43] : memref<7x224x128xbf16, #tpu.memory_space<vmem>>, vector<1x224x128xbf16>
    %85 = vector.shape_cast %84 : vector<1x224x128xbf16> to vector<224x128xbf16>
    %cst_44 = arith.constant dense<0.000000e+00> : vector<16x128xf32>
    %86 = tpu.matmul %83, %85, %cst_44 {dimension_numbers = #tpu.dot_dimension_numbers<[1], [0], [0], [1], [0, 0, 1, 1], [], []>} : vector<16x224xbf16>, vector<224x128xbf16>, vector<16x128xf32> -> vector<16x128xf32>
    %87 = arith.addf %81, %86 : vector<16x128xf32>
    %88 = vector.extract_strided_slice %68 {offsets = [3, 0, 0], sizes = [1, 16, 224], strides = [1, 1, 1]} : vector<7x16x224xbf16> to vector<1x16x224xbf16>
    %89 = vector.shape_cast %88 : vector<1x16x224xbf16> to vector<16x224xbf16>
    %c3_45 = arith.constant 3 : index
    %c0_46 = arith.constant 0 : index
    %c0_47 = arith.constant 0 : index
    %90 = vector.load %arg8[%c3_45, %c0_46, %c0_47] : memref<7x224x128xbf16, #tpu.memory_space<vmem>>, vector<1x224x128xbf16>
    %91 = vector.shape_cast %90 : vector<1x224x128xbf16> to vector<224x128xbf16>
    %cst_48 = arith.constant dense<0.000000e+00> : vector<16x128xf32>
    %92 = tpu.matmul %89, %91, %cst_48 {dimension_numbers = #tpu.dot_dimension_numbers<[1], [0], [0], [1], [0, 0, 1, 1], [], []>} : vector<16x224xbf16>, vector<224x128xbf16>, vector<16x128xf32> -> vector<16x128xf32>
    %93 = arith.addf %87, %92 : vector<16x128xf32>
    %94 = vector.extract_strided_slice %68 {offsets = [4, 0, 0], sizes = [1, 16, 224], strides = [1, 1, 1]} : vector<7x16x224xbf16> to vector<1x16x224xbf16>
    %95 = vector.shape_cast %94 : vector<1x16x224xbf16> to vector<16x224xbf16>
    %c4_49 = arith.constant 4 : index
    %c0_50 = arith.constant 0 : index
    %c0_51 = arith.constant 0 : index
    %96 = vector.load %arg8[%c4_49, %c0_50, %c0_51] : memref<7x224x128xbf16, #tpu.memory_space<vmem>>, vector<1x224x128xbf16>
    %97 = vector.shape_cast %96 : vector<1x224x128xbf16> to vector<224x128xbf16>
    %cst_52 = arith.constant dense<0.000000e+00> : vector<16x128xf32>
    %98 = tpu.matmul %95, %97, %cst_52 {dimension_numbers = #tpu.dot_dimension_numbers<[1], [0], [0], [1], [0, 0, 1, 1], [], []>} : vector<16x224xbf16>, vector<224x128xbf16>, vector<16x128xf32> -> vector<16x128xf32>
    %99 = arith.addf %93, %98 : vector<16x128xf32>
    %100 = vector.extract_strided_slice %68 {offsets = [5, 0, 0], sizes = [1, 16, 224], strides = [1, 1, 1]} : vector<7x16x224xbf16> to vector<1x16x224xbf16>
    %101 = vector.shape_cast %100 : vector<1x16x224xbf16> to vector<16x224xbf16>
    %c5 = arith.constant 5 : index
    %c0_53 = arith.constant 0 : index
    %c0_54 = arith.constant 0 : index
    %102 = vector.load %arg8[%c5, %c0_53, %c0_54] : memref<7x224x128xbf16, #tpu.memory_space<vmem>>, vector<1x224x128xbf16>
    %103 = vector.shape_cast %102 : vector<1x224x128xbf16> to vector<224x128xbf16>
    %cst_55 = arith.constant dense<0.000000e+00> : vector<16x128xf32>
    %104 = tpu.matmul %101, %103, %cst_55 {dimension_numbers = #tpu.dot_dimension_numbers<[1], [0], [0], [1], [0, 0, 1, 1], [], []>} : vector<16x224xbf16>, vector<224x128xbf16>, vector<16x128xf32> -> vector<16x128xf32>
    %105 = arith.addf %99, %104 : vector<16x128xf32>
    %106 = vector.extract_strided_slice %68 {offsets = [6, 0, 0], sizes = [1, 16, 224], strides = [1, 1, 1]} : vector<7x16x224xbf16> to vector<1x16x224xbf16>
    %107 = vector.shape_cast %106 : vector<1x16x224xbf16> to vector<16x224xbf16>
    %c6 = arith.constant 6 : index
    %c0_56 = arith.constant 0 : index
    %c0_57 = arith.constant 0 : index
    %108 = vector.load %arg8[%c6, %c0_56, %c0_57] : memref<7x224x128xbf16, #tpu.memory_space<vmem>>, vector<1x224x128xbf16>
    %109 = vector.shape_cast %108 : vector<1x224x128xbf16> to vector<224x128xbf16>
    %cst_58 = arith.constant dense<0.000000e+00> : vector<16x128xf32>
    %110 = tpu.matmul %107, %109, %cst_58 {dimension_numbers = #tpu.dot_dimension_numbers<[1], [0], [0], [1], [0, 0, 1, 1], [], []>} : vector<16x224xbf16>, vector<224x128xbf16>, vector<16x128xf32> -> vector<16x128xf32>
    %111 = arith.addf %105, %110 : vector<16x128xf32>
    %c0_59 = arith.constant 0 : index
    %c0_60 = arith.constant 0 : index
    %112 = vector.load %arg9[%c0_59, %c0_60] : memref<1x128xf32, #tpu.memory_space<vmem>>, vector<1x128xf32>
    %113 = vector.broadcast %112 : vector<1x128xf32> to vector<16x128xf32>
    %114 = arith.addf %111, %113 : vector<16x128xf32>
    %c0_61 = arith.constant 0 : index
    %c0_62 = arith.constant 0 : index
    %115 = vector.load %arg10[%c0_61, %c0_62] : memref<16x128xf32, #tpu.memory_space<vmem>>, vector<16x128xf32>
    tpu.vector_store %arg10[%c0_61, %c0_62], %114 {strides = array<i32>} : memref<16x128xf32, #tpu.memory_space<vmem>>, vector<16x128xf32>,
    return
  }
  func.func @transform_0(%arg0: i32) -> (i32, i32, i32) {
    %c0_i32 = arith.constant 0 : i32
    %c0_i32_0 = arith.constant 0 : i32
    %c0_i32_1 = arith.constant 0 : i32
    return %c0_i32, %arg0, %c0_i32_0 : i32, i32, i32
  }
  func.func @transform_1(%arg0: i32) -> (i32, i32) {
    %c0_i32 = arith.constant 0 : i32
    %c0_i32_0 = arith.constant 0 : i32
    %c0_i32_1 = arith.constant 0 : i32
    return %c0_i32, %c0_i32_0 : i32, i32
  }
  func.func @transform_2(%arg0: i32) -> (i32, i32) {
    %c0_i32 = arith.constant 0 : i32
    %c0_i32_0 = arith.constant 0 : i32
    %c0_i32_1 = arith.constant 0 : i32
    return %c0_i32, %c0_i32_0 : i32, i32
  }
  func.func @transform_3(%arg0: i32) -> (i32, i32) {
    %c0_i32 = arith.constant 0 : i32
    %c0_i32_0 = arith.constant 0 : i32
    %c0_i32_1 = arith.constant 0 : i32
    return %c0_i32, %c0_i32_0 : i32, i32
  }
  func.func @transform_4(%arg0: i32) -> (i32, i32, i32) {
    %c0_i32 = arith.constant 0 : i32
    %c0_i32_0 = arith.constant 0 : i32
    %c0_i32_1 = arith.constant 0 : i32
    %c0_i32_2 = arith.constant 0 : i32
    return %c0_i32, %c0_i32_0, %c0_i32_1 : i32, i32, i32
  }
  func.func @transform_5(%arg0: i32) -> (i32, i32) {
    %c0_i32 = arith.constant 0 : i32
    %c0_i32_0 = arith.constant 0 : i32
    %c0_i32_1 = arith.constant 0 : i32
    return %c0_i32, %c0_i32_0 : i32, i32
  }
  func.func @transform_6(%arg0: i32) -> (i32, i32) {
    %c0_i32 = arith.constant 0 : i32
    %c0_i32_0 = arith.constant 0 : i32
    %c0_i32_1 = arith.constant 0 : i32
    return %c0_i32, %c0_i32_0 : i32, i32
  }
  func.func @transform_7(%arg0: i32) -> (i32, i32, i32) {
    %c0_i32 = arith.constant 0 : i32
    %c0_i32_0 = arith.constant 0 : i32
    %c0_i32_1 = arith.constant 0 : i32
    %c0_i32_2 = arith.constant 0 : i32
    return %c0_i32, %c0_i32_0, %c0_i32_1 : i32, i32, i32
  }
  func.func @transform_8(%arg0: i32) -> (i32, i32) {
    %c0_i32 = arith.constant 0 : i32
    %c0_i32_0 = arith.constant 0 : i32
    %c0_i32_1 = arith.constant 0 : i32
    return %c0_i32, %c0_i32_0 : i32, i32
  }
  func.func @transform_9(%arg0: i32) -> (i32, i32) {
    %c0_i32 = arith.constant 0 : i32
    %c0_i32_0 = arith.constant 0 : i32
    return %arg0, %c0_i32 : i32, i32
  }
}

</mosaic_0001>

<bundles_post_ra>
// kernel: tile.23
= control target key start
LH: loop header
LB: loop body
LE: loop exit
PB: predicated region body
PF: predicated region fallthrough
CT: control target
= control target key end

     0   :  { %s40_s0 = inlined_call_operand.vmem [shape: f32[16], index: 0, kind: input, shape index: {}]   ;;  %s41_s1 = inlined_call_operand.vmem [shape: f32[28,16], index: 1, kind: output, shape index: {}]  }
   0x1   :  { %v4_v0 = vld [vmem:[%s40_s0] ss:$0 sm:$0xff] }
   0x2   :  { %5 = vst [vmem:[%s41_s1] sm:$0xff] %v4_v0  ;;  %12 = vst [vmem:[%s41_s1 + $0x8] sm:$0xff] %v4_v0 }
   0x3   :  { %13 = vst [vmem:[%s41_s1 + $0x10] sm:$0xff] %v4_v0  ;;  %14 = vst [vmem:[%s41_s1 + $0x18] sm:$0xff] %v4_v0 }

// kernel: tile.24
= control target key start
LH: loop header
LB: loop body
LE: loop exit
PB: predicated region body
PF: predicated region fallthrough
CT: control target
= control target key end

     0   :  { %s89_s8 = smov 112   ;;  %s90_s11 = smov 80   ;;  %vm3_vm0 = vcmask 130048   ;;  %vm9_vm1 = vcmask 1048448   ;;  %vm15_vm2 = vcmask 917248   ;;  %vm21_vm3 = vcmask 786048   ;;  %s142_s0 = inlined_call_operand.vmem [shape: f32[28,16], index: 0, kind: input, shape index: {}]   ;;  %s143_s1 = inlined_call_operand.vmem [shape: f32[1,448], index: 1, kind: output, shape index: {}]  }
   0x1   :  { %v72_v0 = vld [vmem:[%s142_s0 + $0x7] ss:$8 sm:$0x7]   ;;  %v74_v1 = vld [vmem:[%s142_s0 + $0x5] ss:$8 sm:$0x7]  }
   0x2   :  { %7 = vrot.lane.b32.xlu0 %v72_v0, %s89_s8  ;;  %19 = vrot.lane.b32.xlu1 %v74_v1, %s90_s11  ;;  %v73_v2 = vld [vmem:[%s142_s0 + $0x6] ss:$8 sm:$0x7]   ;;  %v75_v3 = vld [vmem:[%s142_s0 + $0x4] ss:$8 sm:$0x7]  }
   0x3   :  { %s91_s16 = smov 96   ;;  %v2_v4 = vld [vmem:[%s142_s0] ss:$8 sm:$0xf]   ;;  %s92_s19 = smov 64   ;;  %vm27_vm4 = vcmask 654848  }
   0x4   :  { %v76_v5 = vld [vmem:[%s142_s0 + $0x3] ss:$8 sm:$0xf]   ;;  %4 = vst.msk [vmem:[#allocation0] ss:$8 sm:$0xf] %vm3_vm0, %v2_v4  }
   0x5   :  { %v77_v6 = vld [vmem:[%s142_s0 + $0x2] ss:$8 sm:$0xf]   ;;  %s93_s24 = smov 48   ;;  %s94_s25 = smov 32   ;;  %vm33_vm5 = vcmask 523648  }
   0x6   :  { %13 = vrot.lane.b32.xlu0 %v73_v2, %s91_s16  ;;  %25 = vrot.lane.b32.xlu1 %v75_v3, %s92_s19  ;;  %v78_v7 = vld [vmem:[%s142_s0 + $0x1] ss:$8 sm:$0xf]   ;;  %s95_s0 = smov 16   ;;  %vm39_vm6 = vcmask 392448   ;;  %vm45_vm7 = vcmask 261248  }
   0xa   :  { %31 = vrot.lane.b32.xlu0 %v76_v5, %s93_s24  ;;  %37 = vrot.lane.b32.xlu1 %v77_v6, %s94_s25 }
   0xe   :  { %43 = vrot.lane.b32.xlu0 %v78_v7, %s95_s0 }
  0x74   :  { %v8_v8 = vpop.permute.xlu0 %7   ;;  %v20_v9 = vpop.permute.xlu1 %19  }
  0x75   :  { %10 = vst.msk [vmem:[#allocation0] ss:$8 sm:$0x7] %vm9_vm1, %v8_v8  }
  0x78   :  { %v14_v10 = vpop.permute.xlu0 %13   ;;  %v26_v11 = vpop.permute.xlu1 %25  }
  0x79   :  { %16 = vst.msk [vmem:[#allocation0] ss:$8 sm:$0x7] %vm15_vm2, %v14_v10  }
  0x7a   :  { %22 = vst.msk [vmem:[#allocation0] ss:$8 sm:$0x7] %vm21_vm3, %v20_v9  }
  0x7b   :  { %28 = vst.msk [vmem:[#allocation0] ss:$8 sm:$0x7] %vm27_vm4, %v26_v11  }
  0x7c   :  { %v32_v12 = vpop.permute.xlu0 %31   ;;  %v38_v13 = vpop.permute.xlu1 %37  }
  0x7d   :  { %34 = vst.msk [vmem:[#allocation0] ss:$8 sm:$0xf] %vm33_vm5, %v32_v12  }
  0x7e   :  { %40 = vst.msk [vmem:[#allocation0] ss:$8 sm:$0xf] %vm39_vm6, %v38_v13  }
  0x80   :  { %v44_v14 = vpop.permute.xlu0 %43  }
  0x81   :  { %46 = vst.msk [vmem:[#allocation0] ss:$8 sm:$0xf] %vm45_vm7, %v44_v14  }
  0x88   :  { %v50_v15 = vld [vmem:[#allocation0] sm:$0x1]  ;;  %v54_v16 = vld [vmem:[#allocation0 + $0x8] sm:$0x1]  ;;  %v59_v17 = vld [vmem:[#allocation0 + $0x10] sm:$0x1] }
  0x89   :  { %52 = vst [vmem:[%s143_s1] sm:$0x1] %v50_v15  ;;  %79 = vst [vmem:[%s143_s1 + $0x1] sm:$0x1] %v54_v16  ;;  %v65_v18 = vld [vmem:[#allocation0 + $0x18] sm:$0x1] }
  0x8a   :  { %80 = vst [vmem:[%s143_s1 + $0x2] sm:$0x1] %v59_v17  ;;  %81 = vst [vmem:[%s143_s1 + $0x3] sm:$0x1] %v65_v18 }

// kernel: tile.33
= control target key start
LH: loop header
LB: loop body
LE: loop exit
PB: predicated region body
PF: predicated region fallthrough
CT: control target
= control target key end

     0   :  { %s28_s0 = inlined_call_operand.vmem [shape: f32[32], index: 0, kind: input, shape index: {}]   ;;  %s29_s1 = inlined_call_operand.vmem [shape: f32[14,32], index: 1, kind: output, shape index: {}]  }
   0x1   :  { %v4_v0 = vld [vmem:[%s28_s0] ss:$0 sm:$0xff] }
   0x2   :  { %5 = vst [vmem:[%s29_s1] sm:$0xff] %v4_v0  ;;  %8 = vst [vmem:[%s29_s1 + $0x8] sm:$0xff] %v4_v0 }

// kernel: tile.34
= control target key start
LH: loop header
LB: loop body
LE: loop exit
PB: predicated region body
PF: predicated region fallthrough
CT: control target
= control target key end

     0   :  { %s57_s8 = smov 96   ;;  %vm3_vm0 = vcmask 261120   ;;  %s59_s15 = smov 64   ;;  %vm9_vm1 = vcmask 1048320   ;;  %vm15_vm2 = vcmask 785920   ;;  %vm21_vm3 = vcmask 523520   ;;  %s94_s0 = inlined_call_operand.vmem [shape: f32[14,32], index: 0, kind: input, shape index: {}]   ;;  %s95_s1 = inlined_call_operand.vmem [shape: f32[1,448], index: 1, kind: output, shape index: {}]  }
   0x1   :  { %v48_v0 = vld [vmem:[%s94_s0 + $0x3] ss:$4 sm:$0x7]   ;;  %v49_v1 = vld [vmem:[%s94_s0 + $0x2] ss:$4 sm:$0x7]  }
   0x2   :  { %7 = vrot.lane.b32.xlu0 %v48_v0, %s57_s8  ;;  %v50_v2 = vld [vmem:[%s94_s0 + $0x1] ss:$4 sm:$0xf]   ;;  %v2_v3 = vld [vmem:[%s94_s0] ss:$4 sm:$0xf]  }
   0x3   :  { %s58_s0 = smov 32   ;;  %4 = vst.msk [vmem:[#allocation0] ss:$8 sm:$0xf] %vm3_vm0, %v2_v3  }
   0x4   :  { %19 = vrot.lane.b32.xlu1 %v50_v2, %s58_s0 }
   0x6   :  { %13 = vrot.lane.b32.xlu0 %v49_v1, %s59_s15 }
  0x74   :  { %v8_v4 = vpop.permute.xlu0 %7  }
  0x75   :  { %10 = vst.msk [vmem:[#allocation0] ss:$8 sm:$0x7] %vm9_vm1, %v8_v4  }
  0x76   :  { %v20_v5 = vpop.permute.xlu1 %19  }
  0x78   :  { %v14_v6 = vpop.permute.xlu0 %13  }
  0x79   :  { %16 = vst.msk [vmem:[#allocation0] ss:$8 sm:$0x7] %vm15_vm2, %v14_v6  }
  0x7a   :  { %22 = vst.msk [vmem:[#allocation0] ss:$8 sm:$0xf] %vm21_vm3, %v20_v5  }
  0x81   :  { %v26_v7 = vld [vmem:[#allocation0] sm:$0x1]  ;;  %v30_v8 = vld [vmem:[#allocation0 + $0x8] sm:$0x1]  ;;  %v35_v9 = vld [vmem:[#allocation0 + $0x10] sm:$0x1] }
  0x82   :  { %28 = vst [vmem:[%s95_s1] sm:$0x1] %v26_v7  ;;  %51 = vst [vmem:[%s95_s1 + $0x1] sm:$0x1] %v30_v8  ;;  %v41_v10 = vld [vmem:[#allocation0 + $0x18] sm:$0x1] }
  0x83   :  { %52 = vst [vmem:[%s95_s1 + $0x2] sm:$0x1] %v35_v9  ;;  %53 = vst [vmem:[%s95_s1 + $0x3] sm:$0x1] %v41_v10 }

// kernel: cnn_forward.1
= control target key start
LH: loop header
LB: loop body
LE: loop exit
PB: predicated region body
PF: predicated region fallthrough
CT: control target
= control target key end

     0   :  { %s12226_s30 = smov 0   ;;  %s12228_s10 = smov 0   ;;  %s16981_s0 = inlined_call_operand.vmem [shape: bf16[28,32,160], index: 0, kind: input, shape index: {}]   ;;  %s16982_s1 = inlined_call_operand.vmem [shape: bf16[160,448], index: 1, kind: input, shape index: {}]   ;;  %s16983_s2 = inlined_call_operand.vmem [shape: f32[1,448], index: 2, kind: input, shape index: {}]   ;;  %s16984_s3 = inlined_call_operand.vmem [shape: f32[1,448], index: 3, kind: input, shape index: {}]   ;;  %s16985_s4 = inlined_call_operand.vmem [shape: bf16[5,224,448], index: 4, kind: input, shape index: {}]   ;;  %s16986_s5 = inlined_call_operand.vmem [shape: f32[1,448], index: 5, kind: input, shape index: {}]   ;;  %s16987_s6 = inlined_call_operand.vmem [shape: f32[1,448], index: 6, kind: input, shape index: {}]   ;;  %s16988_s7 = inlined_call_operand.vmem [shape: bf16[7,224,128], index: 7, kind: input, shape index: {}]   ;;  %s16989_s8 = inlined_call_operand.vmem [shape: f32[1,128], index: 8, kind: input, shape index: {}]   ;;  %s16990_s9 = inlined_call_operand.vmem [shape: f32[32,128], index: 9, kind: output, shape index: {}]  }
   0x1   :  { %s12230_s11 = smov 0  }
   0x2 LB: > { %s9310_s12 = sadd.s32 4294967295, %s12172_s11   ;;  %s12243_s13 = sadd.s32 1, %s12172_s11   ;;  %s12172_s11 = sphi %s12230_s11, %s17566_s11   ;;  %s12168_s10 = sphi %s12228_s10, %s17565_s10   ;;  %s12164_s30 = sphi %s12226_s30, %s17564_s30  }
   0x3   : > { %s23_s14 = ssub.s32 %s12172_s11, %s12243_s13  ;;  %s26_s15 = sadd.s32 1, %s12168_s10 }
   0x4   : > { %p24_p0 = scmp.eq.s32.totalorder %s23_s14, 0  ;;  %p33_p1 = scmp.ne.s32.totalorder %s12168_s10, %s12164_s30 }
   0x5   : > { %p34_p2 = scmp.eq.s32.totalorder %s12172_s11, 0  ;;  %p9313_p4 = scmp.ge.s32.totalorder %s12172_s11, 2 }
   0x6   : > { %s12252_s16 = scalar_select %p24_p0, %s12168_s10, %s26_s15  }
   0x7   : > { %p35_p3 = por %p34_p2, %p33_p1  ;;  %277 = sbr.rel (%p9313_p4) target bundleno = 46 (0x2e), region = 48 }
   0xe   : > { %280 = sbr.rel (!%p35_p3) target bundleno = 46 (0x2e), region = 52  ;;  %s282_s17 = sand.u32 (%p35_p3), 1, %s12168_s10  }
   0xf   : > { %s10381_s18 = sshll.u32 (%p35_p3), %s12172_s11, 4  ;;  %s10830_s19 = smul.u32 (%p35_p3), 448, %s282_s17 }
  0x10   : > { %s12260_s22 = scalar_lea.vmem (%p35_p3), %s16981_s0, %s10381_s18 }
  0x11   : > { %v426_v0 = vld [vmem:[%s12260_s22] sm:$0xff] (%p35_p3)  ;;  %v428_v1 = vld [vmem:[%s12260_s22 + $0x8] sm:$0xff] (%p35_p3)  ;;  %s12268_s23 = scalar_lea.vmem (%p35_p3), [#allocation2], %s10830_s19 }
  0x12   : > { %v430_v2 = vld [vmem:[%s12260_s22 + $0x20] sm:$0xff] (%p35_p3)  ;;  %v432_v3 = vld [vmem:[%s12260_s22 + $0x28] sm:$0xff] (%p35_p3)  ;;  %427 = vst [vmem:[%s12268_s23] sm:$0xff] (%p35_p3), %v426_v0  ;;  %429 = vst [vmem:[%s12268_s23 + $0x8] sm:$0xff] (%p35_p3), %v428_v1 }
  0x13   : > { %v434_v4 = vld [vmem:[%s12260_s22 + $0x40] sm:$0xff] (%p35_p3)  ;;  %v436_v5 = vld [vmem:[%s12260_s22 + $0x48] sm:$0xff] (%p35_p3)  ;;  %431 = vst [vmem:[%s12268_s23 + $0x10] sm:$0xff] (%p35_p3), %v430_v2  ;;  %433 = vst [vmem:[%s12268_s23 + $0x18] sm:$0xff] (%p35_p3), %v432_v3 }
  0x14   : > { %435 = vst [vmem:[%s12268_s23 + $0x20] sm:$0xff] (%p35_p3), %v434_v4  ;;  %437 = vst [vmem:[%s12268_s23 + $0x28] sm:$0xff] (%p35_p3), %v436_v5  ;;  %v438_v6 = vld [vmem:[%s12260_s22 + $0x60] sm:$0xff] (%p35_p3)  ;;  %v440_v7 = vld [vmem:[%s12260_s22 + $0x68] sm:$0xff] (%p35_p3) }
  0x15   : > { %v442_v8 = vld [vmem:[%s12260_s22 + $0x80] sm:$0xff]  ;;  %439 = vst [vmem:[%s12268_s23 + $0x30] sm:$0xff] %v438_v6  ;;  %441 = vst [vmem:[%s12268_s23 + $0x38] sm:$0xff] %v440_v7  ;;  %v444_v9 = vld [vmem:[%s12260_s22 + $0x88] sm:$0xff] }
  0x16   : > { %443 = vst [vmem:[%s12268_s23 + $0x40] sm:$0xff] %v442_v8  ;;  %v446_v10 = vld [vmem:[%s12260_s22 + $0xa0] sm:$0xff]  ;;  %v448_v11 = vld [vmem:[%s12260_s22 + $0xa8] sm:$0xff]  ;;  %445 = vst [vmem:[%s12268_s23 + $0x48] sm:$0xff] %v444_v9 }
  0x17   : > { %447 = vst [vmem:[%s12268_s23 + $0x50] sm:$0xff] %v446_v10  ;;  %449 = vst [vmem:[%s12268_s23 + $0x58] sm:$0xff] %v448_v11  ;;  %v450_v12 = vld [vmem:[%s12260_s22 + $0xc0] sm:$0xff]  ;;  %v452_v13 = vld [vmem:[%s12260_s22 + $0xc8] sm:$0xff] }
  0x18   : > { %v454_v14 = vld [vmem:[%s12260_s22 + $0xe0] sm:$0xff]  ;;  %451 = vst [vmem:[%s12268_s23 + $0x60] sm:$0xff] %v450_v12  ;;  %453 = vst [vmem:[%s12268_s23 + $0x68] sm:$0xff] %v452_v13  ;;  %v456_v15 = vld [vmem:[%s12260_s22 + $0xe8] sm:$0xff] }
  0x19   : > { %455 = vst [vmem:[%s12268_s23 + $0x70] sm:$0xff] %v454_v14  ;;  %v458_v16 = vld [vmem:[%s12260_s22 + $0x100] sm:$0xff]  ;;  %v460_v17 = vld [vmem:[%s12260_s22 + $0x108] sm:$0xff]  ;;  %457 = vst [vmem:[%s12268_s23 + $0x78] sm:$0xff] %v456_v15 }
  0x1a   : > { %459 = vst [vmem:[%s12268_s23 + $0x80] sm:$0xff] %v458_v16  ;;  %461 = vst [vmem:[%s12268_s23 + $0x88] sm:$0xff] %v460_v17  ;;  %v462_v18 = vld [vmem:[%s12260_s22 + $0x120] sm:$0xff]  ;;  %v464_v19 = vld [vmem:[%s12260_s22 + $0x128] sm:$0xff] }
  0x1b   : > { %v466_v20 = vld [vmem:[%s12260_s22 + $0x140] sm:$0xff]  ;;  %463 = vst [vmem:[%s12268_s23 + $0x90] sm:$0xff] %v462_v18  ;;  %465 = vst [vmem:[%s12268_s23 + $0x98] sm:$0xff] %v464_v19  ;;  %v468_v21 = vld [vmem:[%s12260_s22 + $0x148] sm:$0xff] }
  0x1c   : > { %467 = vst [vmem:[%s12268_s23 + $0xa0] sm:$0xff] %v466_v20  ;;  %v470_v22 = vld [vmem:[%s12260_s22 + $0x160] sm:$0xff]  ;;  %v472_v23 = vld [vmem:[%s12260_s22 + $0x168] sm:$0xff]  ;;  %469 = vst [vmem:[%s12268_s23 + $0xa8] sm:$0xff] %v468_v21 }
  0x1d   : > { %471 = vst [vmem:[%s12268_s23 + $0xb0] sm:$0xff] %v470_v22  ;;  %473 = vst [vmem:[%s12268_s23 + $0xb8] sm:$0xff] %v472_v23  ;;  %v474_v24 = vld [vmem:[%s12260_s22 + $0x180] sm:$0xff]  ;;  %v476_v25 = vld [vmem:[%s12260_s22 + $0x188] sm:$0xff] }
  0x1e   : > { %v478_v26 = vld [vmem:[%s12260_s22 + $0x1a0] sm:$0xff]  ;;  %475 = vst [vmem:[%s12268_s23 + $0xc0] sm:$0xff] %v474_v24  ;;  %477 = vst [vmem:[%s12268_s23 + $0xc8] sm:$0xff] %v476_v25  ;;  %v480_v27 = vld [vmem:[%s12260_s22 + $0x1a8] sm:$0xff] }
  0x1f   : > { %479 = vst [vmem:[%s12268_s23 + $0xd0] sm:$0xff] %v478_v26  ;;  %v482_v28 = vld [vmem:[%s12260_s22 + $0x1c0] sm:$0xff]  ;;  %v484_v29 = vld [vmem:[%s12260_s22 + $0x1c8] sm:$0xff]  ;;  %481 = vst [vmem:[%s12268_s23 + $0xd8] sm:$0xff] %v480_v27 }
  0x20   : > { %483 = vst [vmem:[%s12268_s23 + $0xe0] sm:$0xff] %v482_v28  ;;  %485 = vst [vmem:[%s12268_s23 + $0xe8] sm:$0xff] %v484_v29  ;;  %v486_v30 = vld [vmem:[%s12260_s22 + $0x1e0] sm:$0xff]  ;;  %v488_v31 = vld [vmem:[%s12260_s22 + $0x1e8] sm:$0xff] }
  0x21   : > { %v490_v32 = vld [vmem:[%s12260_s22 + $0x200] sm:$0xff]  ;;  %487 = vst [vmem:[%s12268_s23 + $0xf0] sm:$0xff] %v486_v30  ;;  %489 = vst [vmem:[%s12268_s23 + $0xf8] sm:$0xff] %v488_v31  ;;  %v492_v33 = vld [vmem:[%s12260_s22 + $0x208] sm:$0xff] }
  0x22   : > { %491 = vst [vmem:[%s12268_s23 + $0x100] sm:$0xff] %v490_v32  ;;  %v494_v34 = vld [vmem:[%s12260_s22 + $0x220] sm:$0xff]  ;;  %v496_v35 = vld [vmem:[%s12260_s22 + $0x228] sm:$0xff]  ;;  %493 = vst [vmem:[%s12268_s23 + $0x108] sm:$0xff] %v492_v33 }
  0x23   : > { %495 = vst [vmem:[%s12268_s23 + $0x110] sm:$0xff] %v494_v34  ;;  %497 = vst [vmem:[%s12268_s23 + $0x118] sm:$0xff] %v496_v35  ;;  %v498_v36 = vld [vmem:[%s12260_s22 + $0x240] sm:$0xff]  ;;  %v500_v37 = vld [vmem:[%s12260_s22 + $0x248] sm:$0xff] }
  0x24   : > { %v502_v38 = vld [vmem:[%s12260_s22 + $0x260] sm:$0xff]  ;;  %499 = vst [vmem:[%s12268_s23 + $0x120] sm:$0xff] %v498_v36  ;;  %501 = vst [vmem:[%s12268_s23 + $0x128] sm:$0xff] %v500_v37  ;;  %v504_v39 = vld [vmem:[%s12260_s22 + $0x268] sm:$0xff] }
  0x25   : > { %503 = vst [vmem:[%s12268_s23 + $0x130] sm:$0xff] %v502_v38  ;;  %v506_v40 = vld [vmem:[%s12260_s22 + $0x280] sm:$0xff]  ;;  %v508_v41 = vld [vmem:[%s12260_s22 + $0x288] sm:$0xff]  ;;  %505 = vst [vmem:[%s12268_s23 + $0x138] sm:$0xff] %v504_v39 }
  0x26   : > { %507 = vst [vmem:[%s12268_s23 + $0x140] sm:$0xff] %v506_v40  ;;  %509 = vst [vmem:[%s12268_s23 + $0x148] sm:$0xff] %v508_v41  ;;  %v510_v42 = vld [vmem:[%s12260_s22 + $0x2a0] sm:$0xff]  ;;  %v512_v43 = vld [vmem:[%s12260_s22 + $0x2a8] sm:$0xff] }
  0x27   : > { %v514_v44 = vld [vmem:[%s12260_s22 + $0x2c0] sm:$0xff]  ;;  %511 = vst [vmem:[%s12268_s23 + $0x150] sm:$0xff] %v510_v42  ;;  %513 = vst [vmem:[%s12268_s23 + $0x158] sm:$0xff] %v512_v43  ;;  %v516_v45 = vld [vmem:[%s12260_s22 + $0x2c8] sm:$0xff] }
  0x28   : > { %515 = vst [vmem:[%s12268_s23 + $0x160] sm:$0xff] %v514_v44  ;;  %v518_v46 = vld [vmem:[%s12260_s22 + $0x2e0] sm:$0xff]  ;;  %v520_v47 = vld [vmem:[%s12260_s22 + $0x2e8] sm:$0xff]  ;;  %517 = vst [vmem:[%s12268_s23 + $0x168] sm:$0xff] %v516_v45 }
  0x29   : > { %519 = vst [vmem:[%s12268_s23 + $0x170] sm:$0xff] %v518_v46  ;;  %521 = vst [vmem:[%s12268_s23 + $0x178] sm:$0xff] %v520_v47  ;;  %v522_v48 = vld [vmem:[%s12260_s22 + $0x300] sm:$0xff]  ;;  %v524_v49 = vld [vmem:[%s12260_s22 + $0x308] sm:$0xff] }
  0x2a   : > { %v526_v50 = vld [vmem:[%s12260_s22 + $0x320] sm:$0xff]  ;;  %523 = vst [vmem:[%s12268_s23 + $0x180] sm:$0xff] %v522_v48  ;;  %525 = vst [vmem:[%s12268_s23 + $0x188] sm:$0xff] %v524_v49  ;;  %v528_v51 = vld [vmem:[%s12260_s22 + $0x328] sm:$0xff] }
  0x2b   : > { %527 = vst [vmem:[%s12268_s23 + $0x190] sm:$0xff] %v526_v50  ;;  %v530_v52 = vld [vmem:[%s12260_s22 + $0x340] sm:$0xff]  ;;  %v532_v53 = vld [vmem:[%s12260_s22 + $0x348] sm:$0xff]  ;;  %529 = vst [vmem:[%s12268_s23 + $0x198] sm:$0xff] %v528_v51 }
  0x2c   : > { %531 = vst [vmem:[%s12268_s23 + $0x1a0] sm:$0xff] %v530_v52  ;;  %533 = vst [vmem:[%s12268_s23 + $0x1a8] sm:$0xff] %v532_v53  ;;  %v534_v54 = vld [vmem:[%s12260_s22 + $0x360] sm:$0xff]  ;;  %v536_v55 = vld [vmem:[%s12260_s22 + $0x368] sm:$0xff] }
  0x2d   : > { %535 = vst [vmem:[%s12268_s23 + $0x1b0] sm:$0xff] %v534_v54  ;;  %537 = vst [vmem:[%s12268_s23 + $0x1b8] sm:$0xff] %v536_v55 }
  0x2e PF: > { %p9317_p5 = scmp.ge.s32.totalorder %s12172_s11, 1  ;;  %p542_p6 = scmp.lt.s32.totalorder %s12172_s11, 3 }
  0x30   : > { %p543_p7 = pnand %p9317_p5, %p542_p6 }
  0x32   : > { %546 = sbr.rel (%p543_p7) target bundleno = 1795 (0x703), region = 90 }
  0x39   : > { %v11488_v56 = vld [vmem:[%s16982_s1 + $0xc] ss:$16 sps:$4 sm:$0xff]   ;;  %v11490_v57 = vld [vmem:[%s16982_s1 + $0x4] ss:$16 sps:$4 sm:$0xff]   ;;  %v11492_v58 = vld [vmem:[%s16982_s1 + $0x8] ss:$16 sps:$4 sm:$0xff]  }
  0x3a   : > { %1538 = vmatprep.subr.bf16.mxu1 %v11488_v56  ;;  %v11493_v59 = vld [vmem:[%s16982_s1] ss:$16 sps:$4 sm:$0xff]   ;;  %1225 = vmatprep.subr.bf16.mxu0 %v11490_v57  ;;  %v11494_v60 = vld [vmem:[%s16982_s1 + $0x2c] ss:$16 sps:$4 sm:$0xff]   ;;  %v11496_v61 = vld [vmem:[%s16982_s1 + $0x24] ss:$16 sps:$4 sm:$0xff]  }
  0x3b   : > { %1539 = vmatpush1.bf16.msra.mxu1 %v11492_v58  ;;  %1226 = vmatpush1.bf16.msra.mxu0 %v11493_v59  ;;  %v11498_v62 = vld [vmem:[%s16982_s1 + $0x28] ss:$16 sps:$4 sm:$0xff]   ;;  %v11499_v63 = vld [vmem:[%s16982_s1 + $0x20] ss:$16 sps:$4 sm:$0xff]   ;;  %v11500_v0 = vld [vmem:[%s16982_s1 + $0x4c] ss:$16 sps:$4 sm:$0xff]  }
  0x3c   : > { %1540 = vmatprep.subr.bf16.mxu1 %v11494_v60  ;;  %1227 = vmatprep.subr.bf16.mxu0 %v11496_v61  ;;  %v11502_v1 = vld [vmem:[%s16982_s1 + $0x44] ss:$16 sps:$4 sm:$0xff]   ;;  %v11504_v2 = vld [vmem:[%s16982_s1 + $0x48] ss:$16 sps:$4 sm:$0xff]   ;;  %v11505_v3 = vld [vmem:[%s16982_s1 + $0x40] ss:$16 sps:$4 sm:$0xff]  }
  0x3d   : > { %v11506_v4 = vld [vmem:[%s16982_s1 + $0x6c] ss:$16 sps:$4 sm:$0xff]   ;;  %v11508_v5 = vld [vmem:[%s16982_s1 + $0x64] ss:$16 sps:$4 sm:$0xff]   ;;  %v11510_v6 = vld [vmem:[%s16982_s1 + $0x68] ss:$16 sps:$4 sm:$0xff]  }
  0x3e   : > { %v11511_v7 = vld [vmem:[%s16982_s1 + $0x60] ss:$16 sps:$4 sm:$0xff]   ;;  %v11512_v8 = vld [vmem:[%s16982_s1 + $0x8c] ss:$16 sps:$4 sm:$0xff]   ;;  %v11514_v9 = vld [vmem:[%s16982_s1 + $0x84] ss:$16 sps:$4 sm:$0xff]  }
  0x3f   : > { %1541 = vmatpush1.bf16.msra.mxu1 %v11498_v62  ;;  %1228 = vmatpush1.bf16.msra.mxu0 %v11499_v63  ;;  %v11516_v10 = vld [vmem:[%s16982_s1 + $0x88] ss:$16 sps:$4 sm:$0xff]   ;;  %v11517_v11 = vld [vmem:[%s16982_s1 + $0x80] ss:$16 sps:$4 sm:$0xff]   ;;  %v11518_v12 = vld [vmem:[%s16982_s1 + $0xac] ss:$16 sps:$4 sm:$0xff]  }
  0x40   : > { %1542 = vmatprep.subr.bf16.mxu1 %v11500_v0  ;;  %1229 = vmatprep.subr.bf16.mxu0 %v11502_v1  ;;  %v11520_v13 = vld [vmem:[%s16982_s1 + $0xa4] ss:$16 sps:$4 sm:$0xff]   ;;  %s549_s23 = sand.u32 1, %s12164_s30   ;;  %v11522_v14 = vld [vmem:[%s16982_s1 + $0xa8] ss:$16 sps:$4 sm:$0xff]   ;;  %vm1140_vm0 = vcmask 261120  }
  0x41   : > { %v11523_v15 = vld [vmem:[%s16982_s1 + $0xa0] ss:$16 sps:$4 sm:$0xff]   ;;  %v11524_v16 = vld [vmem:[%s16982_s1 + $0xcc] ss:$16 sps:$4 sm:$0xff]   ;;  %s10831_s14 = smul.u32 448, %s549_s23  ;;  %s12174_s29 = smov 32  }
  0x42   : > { %v11526_v17 = vld [vmem:[%s16982_s1 + $0xc4] ss:$16 sps:$4 sm:$0xff]   ;;  %v11528_v18 = vld [vmem:[%s16982_s1 + $0xc8] ss:$16 sps:$4 sm:$0xff]   ;;  %v11529_v19 = vld [vmem:[%s16982_s1 + $0xc0] ss:$16 sps:$4 sm:$0xff]  }
  0x43   : > { %1543 = vmatpush1.bf16.msra.mxu1 %v11504_v2  ;;  %1230 = vmatpush1.bf16.msra.mxu0 %v11505_v3  ;;  %v11530_v20 = vld [vmem:[%s16982_s1 + $0xec] ss:$16 sps:$4 sm:$0xff]   ;;  %v11532_v21 = vld [vmem:[%s16982_s1 + $0xe4] ss:$16 sps:$4 sm:$0xff]   ;;  %v11534_v22 = vld [vmem:[%s16982_s1 + $0xe8] ss:$16 sps:$4 sm:$0xff]  }
  0x44   : > { %1544 = vmatprep.subr.bf16.mxu1 %v11506_v4  ;;  %1231 = vmatprep.subr.bf16.mxu0 %v11508_v5  ;;  %s12472_s27 = scalar_lea.vmem [#allocation2], %s10831_s14  ;;  %v11535_v23 = vld [vmem:[%s16982_s1 + $0xe0] ss:$16 sps:$4 sm:$0xff]   ;;  %v11536_v25 = vld [vmem:[%s16982_s1 + $0x10c] ss:$16 sps:$4 sm:$0xff]   ;;  %vm3884_vm1 = vcmask 785408  }
  0x45   : > { %v11550_v24 = vld [vmem:[%s12472_s27 + $0x4] ss:$8 sps:$4 sm:$0xff]   ;;  %v11540_v27 = vld [vmem:[%s16982_s1 + $0x108] ss:$16 sps:$4 sm:$0xff]   ;;  %v11541_v28 = vld [vmem:[%s16982_s1 + $0x100] ss:$16 sps:$4 sm:$0xff]  }
  0x46   : > { %v11538_v26 = vld [vmem:[%s16982_s1 + $0x104] ss:$16 sps:$4 sm:$0xff]   ;;  %9444 = vmatprep.mubr.msk.bf16.mxu1 %vm1140_vm0, %v11550_v24  ;;  %9416 = vmatprep.mubr.msk.bf16.mxu0 %vm1140_vm0, %v11550_v24  ;;  %v11542_v29 = vld [vmem:[%s16982_s1 + $0x12c] ss:$16 sps:$4 sm:$0xff]   ;;  %v11546_v31 = vld [vmem:[%s16982_s1 + $0x128] ss:$16 sps:$4 sm:$0xff]  }
  0x47   : > { %1545 = vmatpush1.bf16.msra.mxu1 %v11510_v6  ;;  %1232 = vmatpush1.bf16.msra.mxu0 %v11511_v7  ;;  %v11544_v30 = vld [vmem:[%s16982_s1 + $0x124] ss:$16 sps:$4 sm:$0xff]   ;;  %v11547_v32 = vld [vmem:[%s16982_s1 + $0x120] ss:$16 sps:$4 sm:$0xff]   ;;  %v11626_v61 = vld [vmem:[%s16985_s4 + $0x1c8] ss:$16 sps:$4 sm:$0xff]  }
  0x48   : > { %1546 = vmatprep.subr.bf16.mxu1 %v11512_v8  ;;  %1233 = vmatprep.subr.bf16.mxu0 %v11514_v9  ;;  %v11548_v33 = vld [vmem:[%s12472_s27] ss:$8 sps:$4 sm:$0xff]   ;;  %v11551_v34 = vld [vmem:[%s12472_s27 + $0x14] ss:$8 sps:$4 sm:$0xff]   ;;  %v11553_v35 = vld [vmem:[%s12472_s27 + $0x10] ss:$8 sps:$4 sm:$0xff]  }
  0x49   : > { %v11554_v36 = vld [vmem:[%s12472_s27 + $0x24] ss:$8 sps:$4 sm:$0xff]   ;;  %v11556_v37 = vld [vmem:[%s12472_s27 + $0x20] ss:$8 sps:$4 sm:$0xff]   ;;  %v11557_v38 = vld [vmem:[%s12472_s27 + $0x34] ss:$8 sps:$4 sm:$0xff]  }
  0x4a   : > { %v11559_v39 = vld [vmem:[%s12472_s27 + $0x30] ss:$8 sps:$4 sm:$0xff]   ;;  %v11560_v40 = vld [vmem:[%s12472_s27 + $0x44] ss:$8 sps:$4 sm:$0xff]   ;;  %v11562_v41 = vld [vmem:[%s12472_s27 + $0x40] ss:$8 sps:$4 sm:$0xff]  }
  0x4b   : > { %1547 = vmatpush1.bf16.msra.mxu1 %v11516_v10  ;;  %1234 = vmatpush1.bf16.msra.mxu0 %v11517_v11  ;;  %v11563_v42 = vld [vmem:[%s12472_s27 + $0x54] ss:$8 sps:$4 sm:$0xff]   ;;  %v11565_v43 = vld [vmem:[%s12472_s27 + $0x50] ss:$8 sps:$4 sm:$0xff]   ;;  %v11566_v44 = vld [vmem:[%s12472_s27 + $0x64] ss:$8 sps:$4 sm:$0xff]  }
  0x4c   : > { %1548 = vmatprep.subr.bf16.mxu1 %v11518_v12  ;;  %1235 = vmatprep.subr.bf16.mxu0 %v11520_v13  ;;  %v11568_v45 = vld [vmem:[%s12472_s27 + $0x60] ss:$8 sps:$4 sm:$0xff]   ;;  %v11569_v46 = vld [vmem:[%s12472_s27 + $0x74] ss:$8 sps:$4 sm:$0xff]   ;;  %v11571_v47 = vld [vmem:[%s12472_s27 + $0x70] ss:$8 sps:$4 sm:$0xff]  }
  0x4d   : > { %v11572_v48 = vld [vmem:[%s12472_s27 + $0x84] ss:$8 sps:$4 sm:$0xff]   ;;  %v11574_v49 = vld [vmem:[%s12472_s27 + $0x80] ss:$8 sps:$4 sm:$0xff]   ;;  %v11575_v50 = vld [vmem:[%s12472_s27 + $0x94] ss:$8 sps:$4 sm:$0xff]  }
  0x4e   : > { %v11577_v51 = vld [vmem:[%s12472_s27 + $0x90] ss:$8 sps:$4 sm:$0xff]   ;;  %v11578_v52 = vld [vmem:[%s12472_s27 + $0xa4] ss:$8 sps:$4 sm:$0xff]   ;;  %v11580_v53 = vld [vmem:[%s12472_s27 + $0xa0] ss:$8 sps:$4 sm:$0xff]  }
  0x4f   : > { %1549 = vmatpush1.bf16.msra.mxu1 %v11522_v14  ;;  %1236 = vmatpush1.bf16.msra.mxu0 %v11523_v15  ;;  %v11581_v54 = vld [vmem:[%s12472_s27 + $0xb4] ss:$8 sps:$4 sm:$0xff]   ;;  %v11583_v55 = vld [vmem:[%s12472_s27 + $0xb0] ss:$8 sps:$4 sm:$0xff]   ;;  %v11584_v56 = vld [vmem:[%s12472_s27 + $0xc4] ss:$8 sps:$4 sm:$0xff]  }
  0x50   : > { %1550 = vmatprep.subr.bf16.mxu1 %v11524_v16  ;;  %1237 = vmatprep.subr.bf16.mxu0 %v11526_v17  ;;  %v11586_v57 = vld [vmem:[%s12472_s27 + $0xc0] ss:$8 sps:$4 sm:$0xff]   ;;  %v11587_v58 = vld [vmem:[%s12472_s27 + $0xd4] ss:$8 sps:$4 sm:$0xff]   ;;  %v11589_v59 = vld [vmem:[%s12472_s27 + $0xd0] ss:$8 sps:$4 sm:$0xff]  }
  0x51   : > { %v11590_v60 = vld [vmem:[%s12472_s27 + $0xe4] ss:$8 sps:$4 sm:$0xff]   ;;  %v11629_v63 = vld [vmem:[%s16985_s4 + $0x1c0] ss:$16 sps:$4 sm:$0xff]   ;;  %v11593_v2 = vld [vmem:[%s12472_s27 + $0xf4] ss:$8 sps:$4 sm:$0xff]  }
  0x52   : > { %v11628_v62 = vld [vmem:[%s16985_s4 + $0x1cc] ss:$16 sps:$4 sm:$0xff]   ;;  %v11631_v0 = vld [vmem:[%s16985_s4 + $0x1c4] ss:$16 sps:$4 sm:$0xff]   ;;  %v11592_v1 = vld [vmem:[%s12472_s27 + $0xe0] ss:$8 sps:$4 sm:$0xff]  }
  0x53   : > { %1551 = vmatpush1.bf16.msra.mxu1 %v11528_v18  ;;  %1238 = vmatpush1.bf16.msra.mxu0 %v11529_v19  ;;  %v11595_v3 = vld [vmem:[%s12472_s27 + $0xf0] ss:$8 sps:$4 sm:$0xff]   ;;  %v11596_v4 = vld [vmem:[%s12472_s27 + $0x104] ss:$8 sps:$4 sm:$0xff]   ;;  %v11598_v9 = vld [vmem:[%s12472_s27 + $0x100] ss:$8 sps:$4 sm:$0xff]  }
  0x54   : > { %1552 = vmatprep.subr.bf16.mxu1 %v11530_v20  ;;  %1239 = vmatprep.subr.bf16.mxu0 %v11532_v21  ;;  %v11632_v5 = vld [vmem:[%s16985_s4 + $0x1e8] ss:$16 sps:$4 sm:$0xff]   ;;  %v11634_v6 = vld [vmem:[%s16985_s4 + $0x1ec] ss:$16 sps:$4 sm:$0xff]   ;;  %v11635_v7 = vld [vmem:[%s16985_s4 + $0x1e0] ss:$16 sps:$4 sm:$0xff]  }
  0x55   : > { %v11637_v8 = vld [vmem:[%s16985_s4 + $0x1e4] ss:$16 sps:$4 sm:$0xff]   ;;  %v11601_v11 = vld [vmem:[%s12472_s27 + $0x110] ss:$8 sps:$4 sm:$0xff]   ;;  %v11640_v14 = vld [vmem:[%s16985_s4 + $0x20c] ss:$16 sps:$4 sm:$0xff]  }
  0x56   : > { %v11599_v10 = vld [vmem:[%s12472_s27 + $0x114] ss:$8 sps:$4 sm:$0xff]   ;;  %v11602_v12 = vld [vmem:[%s12472_s27 + $0x124] ss:$8 sps:$4 sm:$0xff]   ;;  %v11638_v13 = vld [vmem:[%s16985_s4 + $0x208] ss:$16 sps:$4 sm:$0xff]  }
  0x57   : > { %1553 = vmatpush1.bf16.msra.mxu1 %v11534_v22  ;;  %1240 = vmatpush1.bf16.msra.mxu0 %v11535_v23  ;;  %v11641_v15 = vld [vmem:[%s16985_s4 + $0x200] ss:$16 sps:$4 sm:$0xff]   ;;  %v11643_v16 = vld [vmem:[%s16985_s4 + $0x204] ss:$16 sps:$4 sm:$0xff]   ;;  %v11644_v21 = vld [vmem:[%s16985_s4 + $0x228] ss:$16 sps:$4 sm:$0xff]  }
  0x58   : > { %1554 = vmatprep.subr.bf16.mxu1 %v11536_v25  ;;  %1241 = vmatprep.subr.bf16.mxu0 %v11538_v26  ;;  %v11604_v17 = vld [vmem:[%s12472_s27 + $0x120] ss:$8 sps:$4 sm:$0xff]   ;;  %v11605_v18 = vld [vmem:[%s12472_s27 + $0x134] ss:$8 sps:$4 sm:$0xff]   ;;  %v11607_v19 = vld [vmem:[%s12472_s27 + $0x130] ss:$8 sps:$4 sm:$0xff]  }
  0x59   : > { %v11608_v20 = vld [vmem:[%s12472_s27 + $0x144] ss:$8 sps:$4 sm:$0xff]   ;;  %v11647_v23 = vld [vmem:[%s16985_s4 + $0x220] ss:$16 sps:$4 sm:$0xff]   ;;  %v11611_v26 = vld [vmem:[%s12472_s27 + $0x154] ss:$8 sps:$4 sm:$0xff]  }
  0x5a   : > { %v11646_v22 = vld [vmem:[%s16985_s4 + $0x22c] ss:$16 sps:$4 sm:$0xff]   ;;  %v11649_v24 = vld [vmem:[%s16985_s4 + $0x224] ss:$16 sps:$4 sm:$0xff]   ;;  %v11610_v25 = vld [vmem:[%s12472_s27 + $0x140] ss:$8 sps:$4 sm:$0xff]  }
  0x5b   : > { %1555 = vmatpush1.bf16.msra.mxu1 %v11540_v27  ;;  %1242 = vmatpush1.bf16.msra.mxu0 %v11541_v28  ;;  %v11613_v27 = vld [vmem:[%s12472_s27 + $0x150] ss:$8 sps:$4 sm:$0xff]   ;;  %v11614_v28 = vld [vmem:[%s12472_s27 + $0x164] ss:$8 sps:$4 sm:$0xff]   ;;  %s9318_s19 = sshll.u32 %s9310_s12, 1 }
  0x5c   : > { %1556 = vmatprep.subr.bf16.mxu1 %v11542_v29  ;;  %1243 = vmatprep.subr.bf16.mxu0 %v11544_v30  ;;  %v11653_v29 = vld [vmem:[%s16985_s4 + $0x248] ss:$16 sps:$4 sm:$0xff]   ;;  %v11655_v30 = vld [vmem:[%s16985_s4 + $0x24c] ss:$16 sps:$4 sm:$0xff]   ;;  %p586_p8 = scmp.lt.s32.totalorder %s9318_s19, 3 }
  0x5e   : > { %s17568_s19 = smov (!%p586_p8, %s9318_s19), 3 }
  0x5f   : > { %1557 = vmatpush1.bf16.msra.mxu1 %v11546_v31  ;;  %1244 = vmatpush1.bf16.msra.mxu0 %v11547_v32  ;;  %v11656_v31 = vld [vmem:[%s16985_s4 + $0x240] ss:$16 sps:$4 sm:$0xff]   ;;  %v11658_v32 = vld [vmem:[%s16985_s4 + $0x244] ss:$16 sps:$4 sm:$0xff]   ;;  %s9319_s20 = sshll.u32 %s17568_s19, 3 }
  0x60   : > { %4100 = vmatprep.subr.bf16.mxu1 %v11628_v62  ;;  %3927 = vmatprep.subr.bf16.mxu0 %v11631_v0  ;;  %s589_s24 = scalar_lea.vmem %s16990_s9, %s9319_s20 }
  0x62   : > { %1571 = vmatmul.mubr.bf16.vlgmr.msra.gmra.mrb[0].mxu1 %v11548_v33  ;;  %1258 = vmatmul.mubr.bf16.vlgmr.msra.gmra.mrb[0].mxu0 %v11548_v33  ;;  %v11616_v33 = vld [vmem:[%s12472_s27 + $0x160] ss:$8 sps:$4 sm:$0xff]  }
  0x63   : > { %9445 = vmatprep.mubr.msk.bf16.mxu1 %vm1140_vm0, %v11551_v34  ;;  %9417 = vmatprep.mubr.msk.bf16.mxu0 %vm1140_vm0, %v11551_v34  ;;  %v11617_v34 = vld [vmem:[%s12472_s27 + $0x174] ss:$8 sps:$4 sm:$0xff]  }
  0x64   : > { %4101 = vmatpush1.bf16.msra.mxu1 %v11626_v61  ;;  %3928 = vmatpush1.bf16.msra.mxu0 %v11629_v63  ;;  %v12725_v61 = vld [vmem:[%s16983_s2] sm:$0xf]  ;;  %v11659_v63 = vld [vmem:[%s12472_s27 + $0x1b4] ss:$8 sps:$4 sm:$0xff]  }
  0x65   : > { %4102 = vmatprep.subr.bf16.mxu1 %v11634_v6  ;;  %3929 = vmatprep.subr.bf16.mxu0 %v11637_v8  ;;  %v11689_v6 = vld [vmem:[%s16985_s4 + $0x2e8] ss:$16 sps:$4 sm:$0xff]  }
  0x68   : > { %4103 = vmatpush1.bf16.msra.mxu1 %v11632_v5  ;;  %3930 = vmatpush1.bf16.msra.mxu0 %v11635_v7  ;;  %v11686_v5 = vld [vmem:[%s16985_s4 + $0x2e0] ss:$16 sps:$4 sm:$0xff]  }
  0x69   : > { %4104 = vmatprep.subr.bf16.mxu1 %v11640_v14  ;;  %3931 = vmatprep.subr.bf16.mxu0 %v11643_v16  ;;  %v11697_v14 = vld [vmem:[%s16985_s4 + $0x30c] ss:$16 sps:$4 sm:$0xff]  }
  0x6a   : > { %1581 = vmatmul.mubr.bf16.gmra.mrb[4].mxu1 %v11553_v35  ;;  %1268 = vmatmul.mubr.bf16.gmra.mrb[4].mxu0 %v11553_v35  ;;  %v11619_v35 = vld [vmem:[%s12472_s27 + $0x170] ss:$8 sps:$4 sm:$0xff]  }
  0x6b   : > { %9446 = vmatprep.mubr.msk.bf16.mxu1 %vm1140_vm0, %v11554_v36  ;;  %9418 = vmatprep.mubr.msk.bf16.mxu0 %vm1140_vm0, %v11554_v36  ;;  %v11620_v36 = vld [vmem:[%s12472_s27 + $0x184] ss:$8 sps:$4 sm:$0xff]  }
  0x6c   : > { %4105 = vmatpush1.bf16.msra.mxu1 %v11638_v13  ;;  %3932 = vmatpush1.bf16.msra.mxu0 %v11641_v15  ;;  %v11694_v13 = vld [vmem:[%s16985_s4 + $0x304] ss:$16 sps:$4 sm:$0xff]  }
  0x6d   : > { %4106 = vmatprep.subr.bf16.mxu1 %v11646_v22  ;;  %3933 = vmatprep.subr.bf16.mxu0 %v11649_v24 }
  0x70   : > { %4107 = vmatpush1.bf16.msra.mxu1 %v11644_v21  ;;  %3934 = vmatpush1.bf16.msra.mxu0 %v11647_v23  ;;  %v11695_v23 = vld [vmem:[%s16985_s4 + $0x308] ss:$16 sps:$4 sm:$0xff]  }
  0x71   : > { %4108 = vmatprep.subr.bf16.mxu1 %v11655_v30  ;;  %3935 = vmatprep.subr.bf16.mxu0 %v11658_v32 }
  0x72   : > { %1591 = vmatmul.mubr.bf16.gmra.mrb[8].mxu1 %v11556_v37  ;;  %1278 = vmatmul.mubr.bf16.gmra.mrb[8].mxu0 %v11556_v37  ;;  %v11662_v37 = vld [vmem:[%s16985_s4 + $0x268] ss:$16 sps:$4 sm:$0xff]  }
  0x73   : > { %9447 = vmatprep.mubr.msk.bf16.mxu1 %vm1140_vm0, %v11557_v38  ;;  %9419 = vmatprep.mubr.msk.bf16.mxu0 %vm1140_vm0, %v11557_v38  ;;  %v11664_v38 = vld [vmem:[%s16985_s4 + $0x26c] ss:$16 sps:$4 sm:$0xff]  }
  0x74   : > { %4109 = vmatpush1.bf16.msra.mxu1 %v11653_v29  ;;  %3936 = vmatpush1.bf16.msra.mxu0 %v11656_v31 }
  0x75   : > { %4110 = vmatprep.subr.bf16.mxu1 %v11664_v38 }
  0x78   : > { %4111 = vmatpush1.bf16.msra.mxu1 %v11662_v37  ;;  %v11698_v37 = vld [vmem:[%s16985_s4 + $0x320] ss:$16 sps:$4 sm:$0xff]  }
  0x7a   : > { %1601 = vmatmul.mubr.bf16.gmra.mrb[12].mxu1 %v11559_v39  ;;  %1288 = vmatmul.mubr.bf16.gmra.mrb[12].mxu0 %v11559_v39  ;;  %v11665_v39 = vld [vmem:[%s16985_s4 + $0x260] ss:$16 sps:$4 sm:$0xff]  }
  0x7b   : > { %9448 = vmatprep.mubr.msk.bf16.mxu1 %vm1140_vm0, %v11560_v40  ;;  %9420 = vmatprep.mubr.msk.bf16.mxu0 %vm1140_vm0, %v11560_v40  ;;  %v11667_v40 = vld [vmem:[%s16985_s4 + $0x264] ss:$16 sps:$4 sm:$0xff]  }
  0x7c   : > { %3937 = vmatprep.subr.bf16.mxu0 %v11667_v40 }
  0x7d   : > { %3938 = vmatpush1.bf16.msra.mxu0 %v11665_v39 }
  0x82   : > { %1611 = vmatmul.mubr.bf16.gmra.mrb[16].mxu1 %v11562_v41  ;;  %1298 = vmatmul.mubr.bf16.gmra.mrb[16].mxu0 %v11562_v41  ;;  %v11622_v41 = vld [vmem:[%s12472_s27 + $0x180] ss:$8 sps:$4 sm:$0xff]  }
  0x83   : > { %9449 = vmatprep.mubr.msk.bf16.mxu1 %vm1140_vm0, %v11563_v42  ;;  %9421 = vmatprep.mubr.msk.bf16.mxu0 %vm1140_vm0, %v11563_v42  ;;  %v11623_v42 = vld [vmem:[%s12472_s27 + $0x194] ss:$8 sps:$4 sm:$0xff]  }
  0x8a   : > { %1621 = vmatmul.mubr.bf16.gmra.mrb[20].mxu1 %v11565_v43  ;;  %1308 = vmatmul.mubr.bf16.gmra.mrb[20].mxu0 %v11565_v43  ;;  %v11668_v43 = vld [vmem:[%s16985_s4 + $0x288] ss:$16 sps:$4 sm:$0xff]  }
  0x8b   : > { %9450 = vmatprep.mubr.msk.bf16.mxu1 %vm1140_vm0, %v11566_v44  ;;  %9422 = vmatprep.mubr.msk.bf16.mxu0 %vm1140_vm0, %v11566_v44  ;;  %v11670_v44 = vld [vmem:[%s16985_s4 + $0x28c] ss:$16 sps:$4 sm:$0xff]  }
  0x8c   : > { %4112 = vmatprep.subr.bf16.mxu1 %v11670_v44 }
  0x8d   : > { %4113 = vmatpush1.bf16.msra.mxu1 %v11668_v43 }
  0x92   : > { %1631 = vmatmul.mubr.bf16.gmra.mrb[24].mxu1 %v11568_v45  ;;  %1318 = vmatmul.mubr.bf16.gmra.mrb[24].mxu0 %v11568_v45  ;;  %v11671_v45 = vld [vmem:[%s16985_s4 + $0x280] ss:$16 sps:$4 sm:$0xff]  }
  0x93   : > { %9451 = vmatprep.mubr.msk.bf16.mxu1 %vm1140_vm0, %v11569_v46  ;;  %9423 = vmatprep.mubr.msk.bf16.mxu0 %vm1140_vm0, %v11569_v46  ;;  %v11625_v46 = vld [vmem:[%s12472_s27 + $0x190] ss:$8 sps:$4 sm:$0xff]  }
  0x9a   : > { %1641 = vmatmul.mubr.bf16.gmra.mrb[28].mxu1 %v11571_v47  ;;  %1328 = vmatmul.mubr.bf16.gmra.mrb[28].mxu0 %v11571_v47  ;;  %v1853_v47 = vlaneseq }
  0x9b   : > { %9452 = vmatprep.mubr.msk.bf16.mxu1 %vm1140_vm0, %v11572_v48  ;;  %9424 = vmatprep.mubr.msk.bf16.mxu0 %vm1140_vm0, %v11572_v48  ;;  %v11673_v48 = vld [vmem:[%s16985_s4 + $0x284] ss:$16 sps:$4 sm:$0xff]  }
  0x9c   : > { %3939 = vmatprep.subr.bf16.mxu0 %v11673_v48  ;;  %v11706_v48 = vld [vmem:[%s16985_s4 + $0x344] ss:$16 sps:$4 sm:$0xff]  }
  0x9d   : > { %3940 = vmatpush1.bf16.msra.mxu0 %v11671_v45 }
  0xa2   : > { %1651 = vmatmul.mubr.bf16.gmra.mrb[32].mxu1 %v11574_v49  ;;  %1338 = vmatmul.mubr.bf16.gmra.mrb[32].mxu0 %v11574_v49  ;;  %v11650_v49 = vld [vmem:[%s12472_s27 + $0x1a4] ss:$8 sps:$4 sm:$0xff]  }
  0xa3   : > { %9453 = vmatprep.mubr.msk.bf16.mxu1 %vm1140_vm0, %v11575_v50  ;;  %9425 = vmatprep.mubr.msk.bf16.mxu0 %vm1140_vm0, %v11575_v50  ;;  %v11676_v50 = vld [vmem:[%s16985_s4 + $0x2a4] ss:$16 sps:$4 sm:$0xff]  }
  0xa4   : > { %3941 = vmatprep.subr.bf16.mxu0 %v11676_v50 }
  0xaa   : > { %1661 = vmatmul.mubr.bf16.gmra.mrb[36].mxu1 %v11577_v51  ;;  %1348 = vmatmul.mubr.bf16.gmra.mrb[36].mxu0 %v11577_v51  ;;  %v11679_v51 = vld [vmem:[%s16985_s4 + $0x2ac] ss:$16 sps:$4 sm:$0xff]  }
  0xab   : > { %9454 = vmatprep.mubr.msk.bf16.mxu1 %vm1140_vm0, %v11578_v52  ;;  %9426 = vmatprep.mubr.msk.bf16.mxu0 %vm1140_vm0, %v11578_v52  ;;  %v12696_v52 = vshrl.u32 %v1853_v47, 7 }
  0xac   : > { %4114 = vmatprep.subr.bf16.mxu1 %v11679_v51 }
  0xad   : > { %v12728_v62 = vsub.s32 3, %v12696_v52  ;;  %v12732_v0 = vsub.s32 1, %v12696_v52 }
  0xaf   : > { %17145 = vst [vmem:[#allocation4_spill] sm:$0xff] %v12728_v62  ;;  %17146 = vst [vmem:[#allocation5_spill] sm:$0xff] %v12732_v0  ;;  %v12757_v7 = vrot.slane %v12725_v61, %v12728_v62 }
  0xb2   : > { %1671 = vmatmul.mubr.bf16.gmra.mrb[40].mxu1 %v11580_v53  ;;  %1358 = vmatmul.mubr.bf16.gmra.mrb[40].mxu0 %v11580_v53  ;;  %v11674_v53 = vld [vmem:[%s16985_s4 + $0x2a0] ss:$16 sps:$4 sm:$0xff]  }
  0xb3   : > { %9455 = vmatprep.mubr.msk.bf16.mxu1 %vm1140_vm0, %v11581_v54  ;;  %9427 = vmatprep.mubr.msk.bf16.mxu0 %vm1140_vm0, %v11581_v54  ;;  %v11677_v54 = vld [vmem:[%s16985_s4 + $0x2a8] ss:$16 sps:$4 sm:$0xff]  }
  0xb4   : > { %3942 = vmatpush1.bf16.msra.mxu0 %v11674_v53  ;;  %4115 = vmatpush1.bf16.msra.mxu1 %v11677_v54  ;;  %v11704_v53 = vld [vmem:[%s16985_s4 + $0x340] ss:$16 sps:$4 sm:$0xff]  }
  0xba   : > { %1681 = vmatmul.mubr.bf16.gmra.mrb[44].mxu1 %v11583_v55  ;;  %1368 = vmatmul.mubr.bf16.gmra.mrb[44].mxu0 %v11583_v55  ;;  %v11680_v55 = vld [vmem:[%s16985_s4 + $0x2c0] ss:$16 sps:$4 sm:$0xff]  }
  0xbb   : > { %9456 = vmatprep.mubr.msk.bf16.mxu1 %vm1140_vm0, %v11584_v56  ;;  %9428 = vmatprep.mubr.msk.bf16.mxu0 %vm1140_vm0, %v11584_v56  ;;  %v11682_v56 = vld [vmem:[%s16985_s4 + $0x2c4] ss:$16 sps:$4 sm:$0xff]  }
  0xbc   : > { %3943 = vmatprep.subr.bf16.mxu0 %v11682_v56 }
  0xbd   : > { %3944 = vmatpush1.bf16.msra.mxu0 %v11680_v55 }
  0xc2   : > { %1691 = vmatmul.mubr.bf16.gmra.mrb[48].mxu1 %v11586_v57  ;;  %1378 = vmatmul.mubr.bf16.gmra.mrb[48].mxu0 %v11586_v57  ;;  %v11683_v57 = vld [vmem:[%s16985_s4 + $0x2c8] ss:$16 sps:$4 sm:$0xff]  }
  0xc3   : > { %9457 = vmatprep.mubr.msk.bf16.mxu1 %vm1140_vm0, %v11587_v58  ;;  %9429 = vmatprep.mubr.msk.bf16.mxu0 %vm1140_vm0, %v11587_v58  ;;  %v12716_v58 = vsub.s32 2, %v12696_v52 }
  0xc5   : > { %17144 = vst [vmem:[#allocation3_spill] sm:$0xff] %v12716_v58 }
  0xca   : > { %1701 = vmatmul.mubr.bf16.gmra.mrb[52].mxu1 %v11589_v59  ;;  %1388 = vmatmul.mubr.bf16.gmra.mrb[52].mxu0 %v11589_v59  ;;  %v11652_v59 = vld [vmem:[%s12472_s27 + $0x1a0] ss:$8 sps:$4 sm:$0xff]  }
  0xcb   : > { %9458 = vmatprep.mubr.msk.bf16.mxu1 %vm1140_vm0, %v11590_v60  ;;  %9430 = vmatprep.mubr.msk.bf16.mxu0 %vm1140_vm0, %v11590_v60  ;;  %v11685_v60 = vld [vmem:[%s16985_s4 + $0x2cc] ss:$16 sps:$4 sm:$0xff]  }
  0xcc   : > { %4116 = vmatprep.subr.bf16.mxu1 %v11685_v60 }
  0xcd   : > { %4117 = vmatpush1.bf16.msra.mxu1 %v11683_v57 }
  0xd2   : > { %1711 = vmatmul.mubr.bf16.gmra.mrb[56].mxu1 %v11592_v1  ;;  %1398 = vmatmul.mubr.bf16.gmra.mrb[56].mxu0 %v11592_v1  ;;  %v12737_v1 = vld [vmem:[%s16984_s3] sm:$0xf] }
  0xd3   : > { %9459 = vmatprep.mubr.msk.bf16.mxu1 %vm1140_vm0, %v11593_v2  ;;  %9431 = vmatprep.mubr.msk.bf16.mxu0 %vm1140_vm0, %v11593_v2  ;;  %v11688_v2 = vld [vmem:[%s16985_s4 + $0x2e4] ss:$16 sps:$4 sm:$0xff]   ;;  %v12763_v8 = vrot.slane %v12737_v1, %v12716_v58 }
  0xd4   : > { %3945 = vmatprep.subr.bf16.mxu0 %v11688_v2 }
  0xd5   : > { %3946 = vmatpush1.bf16.msra.mxu0 %v11686_v5 }
  0xd6   : > { %3947 = vmatprep.subr.bf16.mxu0 %v11694_v13 }
  0xda   : > { %1721 = vmatmul.mubr.bf16.gmra.mrb[60].mxu1 %v11595_v3  ;;  %1408 = vmatmul.mubr.bf16.gmra.mrb[60].mxu0 %v11595_v3  ;;  %v11691_v3 = vld [vmem:[%s16985_s4 + $0x2ec] ss:$16 sps:$4 sm:$0xff]  }
  0xdb   : > { %9460 = vmatprep.mubr.msk.bf16.mxu1 %vm1140_vm0, %v11596_v4  ;;  %9432 = vmatprep.mubr.msk.bf16.mxu0 %vm1140_vm0, %v11596_v4  ;;  %v12747_v4 = vrot.slane %v12725_v61, %v12716_v58 }
  0xdc   : > { %4118 = vmatprep.subr.bf16.mxu1 %v11691_v3 }
  0xdd   : > { %4119 = vmatpush1.bf16.msra.mxu1 %v11689_v6 }
  0xde   : > { %4120 = vmatprep.subr.bf16.mxu1 %v11697_v14 }
  0xe1   : > { %4121 = vmatpush1.bf16.msra.mxu1 %v11695_v23 }
  0xe2   : > { %1731 = vmatmul.mubr.bf16.gmra.mrb[64].mxu1 %v11598_v9  ;;  %1418 = vmatmul.mubr.bf16.gmra.mrb[64].mxu0 %v11598_v9  ;;  %v12767_v9 = vrot.slane %v12725_v61, %v12732_v0 }
  0xe3   : > { %9461 = vmatprep.mubr.msk.bf16.mxu1 %vm1140_vm0, %v11599_v10  ;;  %9433 = vmatprep.mubr.msk.bf16.mxu0 %vm1140_vm0, %v11599_v10 }
  0xea   : > { %1741 = vmatmul.mubr.bf16.gmra.mrb[68].mxu1 %v11601_v11  ;;  %1428 = vmatmul.mubr.bf16.gmra.mrb[68].mxu0 %v11601_v11 }
  0xeb   : > { %9462 = vmatprep.mubr.msk.bf16.mxu1 %vm1140_vm0, %v11602_v12  ;;  %9434 = vmatprep.mubr.msk.bf16.mxu0 %vm1140_vm0, %v11602_v12  ;;  %v12773_v12 = vrot.slane %v12737_v1, %v12728_v62 }
  0xf2   : > { %1751 = vmatmul.mubr.bf16.gmra.mrb[72].mxu1 %v11604_v17  ;;  %1438 = vmatmul.mubr.bf16.gmra.mrb[72].mxu0 %v11604_v17 }
  0xf3   : > { %9463 = vmatprep.mubr.msk.bf16.mxu1 %vm1140_vm0, %v11605_v18  ;;  %9435 = vmatprep.mubr.msk.bf16.mxu0 %vm1140_vm0, %v11605_v18  ;;  %v11661_v18 = vld [vmem:[%s12472_s27 + $0x1b0] ss:$8 sps:$4 sm:$0xff]  }
  0xfa   : > { %1761 = vmatmul.mubr.bf16.gmra.mrb[76].mxu1 %v11607_v19  ;;  %1448 = vmatmul.mubr.bf16.gmra.mrb[76].mxu0 %v11607_v19  ;;  %v11692_v19 = vld [vmem:[%s16985_s4 + $0x300] ss:$16 sps:$4 sm:$0xff]  }
  0xfb   : > { %9464 = vmatprep.mubr.msk.bf16.mxu1 %vm1140_vm0, %v11608_v20  ;;  %9436 = vmatprep.mubr.msk.bf16.mxu0 %vm1140_vm0, %v11608_v20 }
  0xfc   : > { %3948 = vmatpush1.bf16.msra.mxu0 %v11692_v19 }
 0x102   : > { %1771 = vmatmul.mubr.bf16.gmra.mrb[80].mxu1 %v11610_v25  ;;  %1458 = vmatmul.mubr.bf16.gmra.mrb[80].mxu0 %v11610_v25 }
 0x103   : > { %9465 = vmatprep.mubr.msk.bf16.mxu1 %vm1140_vm0, %v11611_v26  ;;  %9437 = vmatprep.mubr.msk.bf16.mxu0 %vm1140_vm0, %v11611_v26  ;;  %v12796_v26 = vrot.slane %v12737_v1, %v12732_v0 }
 0x10a   : > { %1781 = vmatmul.mubr.bf16.gmra.mrb[84].mxu1 %v11613_v27  ;;  %1468 = vmatmul.mubr.bf16.gmra.mrb[84].mxu0 %v11613_v27 }
 0x10b   : > { %9466 = vmatprep.mubr.msk.bf16.mxu1 %vm1140_vm0, %v11614_v28  ;;  %9438 = vmatprep.mubr.msk.bf16.mxu0 %vm1140_vm0, %v11614_v28 }
 0x112   : > { %1791 = vmatmul.mubr.bf16.gmra.mrb[88].mxu1 %v11616_v33  ;;  %1478 = vmatmul.mubr.bf16.gmra.mrb[88].mxu0 %v11616_v33  ;;  %v11700_v33 = vld [vmem:[%s16985_s4 + $0x324] ss:$16 sps:$4 sm:$0xff]  }
 0x113   : > { %9467 = vmatprep.mubr.msk.bf16.mxu1 %vm1140_vm0, %v11617_v34  ;;  %9439 = vmatprep.mubr.msk.bf16.mxu0 %vm1140_vm0, %v11617_v34  ;;  %v11703_v34 = vld [vmem:[%s16985_s4 + $0x32c] ss:$16 sps:$4 sm:$0xff]  }
 0x114   : > { %3949 = vmatprep.subr.bf16.mxu0 %v11700_v33  ;;  %4122 = vmatprep.subr.bf16.mxu1 %v11703_v34  ;;  %v11710_v34 = vld [vmem:[%s16985_s4 + $0x360] ss:$16 sps:$4 sm:$0xff]  }
 0x115   : > { %3950 = vmatpush1.bf16.msra.mxu0 %v11698_v37 }
 0x116   : > { %3951 = vmatprep.subr.bf16.mxu0 %v11706_v48 }
 0x119   : > { %3952 = vmatpush1.bf16.msra.mxu0 %v11704_v53 }
 0x11a   : > { %1801 = vmatmul.mubr.bf16.gmra.mrb[92].mxu1 %v11619_v35  ;;  %1488 = vmatmul.mubr.bf16.gmra.mrb[92].mxu0 %v11619_v35 }
 0x11b   : > { %9468 = vmatprep.mubr.msk.bf16.mxu1 %vm1140_vm0, %v11620_v36  ;;  %9440 = vmatprep.mubr.msk.bf16.mxu0 %vm1140_vm0, %v11620_v36 }
 0x122   : > { %1811 = vmatmul.mubr.bf16.gmra.mrb[96].mxu1 %v11622_v41  ;;  %1498 = vmatmul.mubr.bf16.gmra.mrb[96].mxu0 %v11622_v41 }
 0x123   : > { %9469 = vmatprep.mubr.msk.bf16.mxu1 %vm1140_vm0, %v11623_v42  ;;  %9441 = vmatprep.mubr.msk.bf16.mxu0 %vm1140_vm0, %v11623_v42  ;;  %v11701_v42 = vld [vmem:[%s16985_s4 + $0x328] ss:$16 sps:$4 sm:$0xff]  }
 0x124   : > { %4123 = vmatpush1.bf16.msra.mxu1 %v11701_v42  ;;  %v11715_v42 = vld [vmem:[%s16985_s4 + $0x36c] ss:$16 sps:$4 sm:$0xff]  }
 0x12a   : > { %1821 = vmatmul.mubr.bf16.gmra.mrb[100].mxu1 %v11625_v46  ;;  %1508 = vmatmul.mubr.bf16.gmra.mrb[100].mxu0 %v11625_v46 }
 0x12b   : > { %9470 = vmatprep.mubr.msk.bf16.mxu1 %vm1140_vm0, %v11650_v49  ;;  %9442 = vmatprep.mubr.msk.bf16.mxu0 %vm1140_vm0, %v11650_v49 }
 0x132   : > { %1831 = vmatmul.mubr.bf16.gmra.mrb[104].mxu1 %v11652_v59  ;;  %1518 = vmatmul.mubr.bf16.gmra.mrb[104].mxu0 %v11652_v59  ;;  %v11709_v59 = vld [vmem:[%s16985_s4 + $0x34c] ss:$16 sps:$4 sm:$0xff]  }
 0x133   : > { %9471 = vmatprep.mubr.msk.bf16.mxu1 %vm1140_vm0, %v11659_v63  ;;  %9443 = vmatprep.mubr.msk.bf16.mxu0 %vm1140_vm0, %v11659_v63 }
 0x134   : > { %4124 = vmatprep.subr.bf16.mxu1 %v11709_v59 }
 0x135   : > { %v1572_v10 = vpop.f32.mrb[0].mxu1  ;;  %v12769_v11 = vpop.f32.mrb[0].mxu0 }
 0x136   : > { %v1875_v15 = vmul.f32 %v12747_v4, %v1572_v10  ;;  %v1574_v16 = vpop.f32.mrb[1].mxu1  ;;  %v1261_v17 = vpop.f32.mrb[1].mxu0  ;;  %v11707_v10 = vld [vmem:[%s16985_s4 + $0x348] ss:$16 sps:$4 sm:$0xff]  }
 0x137   : > { %v1876_v20 = vmul.f32 %v12757_v7, %v1574_v16  ;;  %v1576_v21 = vpop.f32.mrb[2].mxu1  ;;  %v12787_v22 = vpop.f32.mrb[2].mxu0  ;;  %v1874_v25 = vmul.f32 %v12767_v9, %v1261_v17  ;;  %4125 = vmatpush1.bf16.msra.mxu1 %v11707_v10 }
 0x138   : > { %v2121_v24 = vadd.f32 %v12763_v8, %v1875_v15  ;;  %v1879_v27 = vmul.f32 %v12747_v4, %v1576_v21  ;;  %v1578_v28 = vpop.f32.mrb[3].mxu1  ;;  %v1265_v29 = vpop.f32.mrb[3].mxu0  ;;  %4126 = vmatprep.subr.bf16.mxu1 %v11715_v42 }
 0x139   : > { %v2122_v30 = vadd.f32 %v12773_v12, %v1876_v20  ;;  %v1880_v31 = vmul.f32 %v12757_v7, %v1578_v28  ;;  %v1878_v32 = vmul.f32 %v12767_v9, %v1265_v29  ;;  %v12814_v40 = vadd.f32 %v12796_v26, %v1874_v25 }
 0x13a   : > { %v2345_v35 = vmax.f32 %v2121_v24, 0.0  ;;  %v2125_v36 = vadd.f32 %v12763_v8, %v1879_v27  ;;  %1841 = vmatmul.mubr.bf16.gmra.mrb[108].mxu1 %v11661_v18  ;;  %1528 = vmatmul.mubr.bf16.gmra.mrb[108].mxu0 %v11661_v18 }
 0x13b   : > { %v2346_v38 = vmax.f32 %v2122_v30, 0.0  ;;  %v2126_v39 = vadd.f32 %v12773_v12, %v1880_v31  ;;  %v12820_v44 = vadd.f32 %v12796_v26, %v1878_v32  ;;  %v17006_v60 = vmax.f32 %v12814_v40, 0.0 }
 0x13c   : > { %v2349_v41 = vmax.f32 %v2125_v36, 0.0 }
 0x13d   : > { %v2350_v43 = vmax.f32 %v2126_v39, 0.0  ;;  %v1582_v45 = vpop.f32.mrb[4].mxu1  ;;  %v12822_v46 = vpop.f32.mrb[4].mxu0  ;;  %v10858_v47 = vpack.i.bf16 %v2346_v38, %v2345_v35  ;;  %v17005_v13 = vmax.f32 %v12820_v44, 0.0  ;;  %v11712_v35 = vld [vmem:[%s16985_s4 + $0x364] ss:$16 sps:$4 sm:$0xff]  }
 0x13e   : > { %v1883_v49 = vmul.f32 %v12747_v4, %v1582_v45  ;;  %v1584_v50 = vpop.f32.mrb[5].mxu1  ;;  %v1271_v51 = vpop.f32.mrb[5].mxu0  ;;  %3953 = vmatprep.subr.bf16.mxu0 %v11712_v35 }
 0x13f   : > { %v1884_v54 = vmul.f32 %v12757_v7, %v1584_v50  ;;  %10859 = vrot.lane.b32.xlu0 %v10858_v47, %s12174_s29  ;;  %v1586_v55 = vpop.f32.mrb[6].mxu1  ;;  %v12833_v56 = vpop.f32.mrb[6].mxu0  ;;  %v10863_v57 = vpack.i.bf16 %v2350_v43, %v2349_v41  ;;  %v1882_v2 = vmul.f32 %v12767_v9, %v1271_v51  ;;  %v10868_v30 = vpack.i.bf16 %v17005_v13, %v17006_v60  ;;  %v11713_v41 = vld [vmem:[%s16985_s4 + $0x368] ss:$16 sps:$4 sm:$0xff]  }
 0x140   : > { %v2129_v63 = vadd.f32 %v12763_v8, %v1883_v49  ;;  %v1887_v3 = vmul.f32 %v12747_v4, %v1586_v55  ;;  %v1588_v5 = vpop.f32.mrb[7].mxu1  ;;  %v1275_v6 = vpop.f32.mrb[7].mxu0  ;;  %3954 = vmatpush1.bf16.msra.mxu0 %v11710_v34  ;;  %4127 = vmatpush1.bf16.msra.mxu1 %v11713_v41 }
 0x141   : > { %v2130_v14 = vadd.f32 %v12773_v12, %v1884_v54  ;;  %v1888_v15 = vmul.f32 %v12757_v7, %v1588_v5  ;;  %v1886_v16 = vmul.f32 %v12767_v9, %v1275_v6  ;;  %v12853_v21 = vadd.f32 %v12796_v26, %v1882_v2 }
 0x142   : > { %v2353_v17 = vmax.f32 %v2129_v63, 0.0  ;;  %v2133_v18 = vadd.f32 %v12763_v8, %v1887_v3 }
 0x143   : > { %v2354_v19 = vmax.f32 %v2130_v14, 0.0  ;;  %v2134_v20 = vadd.f32 %v12773_v12, %v1888_v15  ;;  %10864 = vrot.lane.b32.xlu0 %v10863_v57, %s12174_s29  ;;  %v12856_v25 = vadd.f32 %v12796_v26, %v1886_v16  ;;  %v17004_v43 = vmax.f32 %v12853_v21, 0.0 }
 0x144   : > { %v2357_v23 = vmax.f32 %v2133_v18, 0.0  ;;  %v16991_v18 = vmov 0  }
 0x145   : > { %v2358_v24 = vmax.f32 %v2134_v20, 0.0  ;;  %v1592_v27 = vpop.f32.mrb[8].mxu1  ;;  %v12858_v28 = vpop.f32.mrb[8].mxu0  ;;  %v10873_v29 = vpack.i.bf16 %v2354_v19, %v2353_v17  ;;  %v17003_v51 = vmax.f32 %v12856_v25, 0.0  ;;  %3959 = vmatprep.mubr.bf16.mxu0 %v16991_v18  ;;  %4132 = vmatprep.mubr.bf16.mxu1 %v16991_v18 }
 0x146   : > { %v1891_v31 = vmul.f32 %v12747_v4, %v1592_v27  ;;  %v1594_v32 = vpop.f32.mrb[9].mxu1  ;;  %v1281_v33 = vpop.f32.mrb[9].mxu0  ;;  %3960 = vmatmul.mubr.bf16.vlgmr.msra.gmra.mrb[112].mxu0 %v16991_v18  ;;  %4133 = vmatmul.mubr.bf16.vlgmr.msra.gmra.mrb[112].mxu1 %v16991_v18 }
 0x147   : > { %v1892_v36 = vmul.f32 %v12757_v7, %v1594_v32  ;;  %10874 = vrot.lane.b32.xlu1 %v10873_v29, %s12174_s29  ;;  %v1596_v37 = vpop.f32.mrb[10].mxu1  ;;  %10869 = vrot.lane.b32.xlu0 %v10868_v30, %s12174_s29  ;;  %v12874_v38 = vpop.f32.mrb[10].mxu0  ;;  %v10878_v39 = vpack.i.bf16 %v2358_v24, %v2357_v23  ;;  %v1890_v48 = vmul.f32 %v12767_v9, %v1281_v33 }
 0x148   : > { %v2137_v45 = vadd.f32 %v12763_v8, %v1891_v31  ;;  %v1895_v47 = vmul.f32 %v12747_v4, %v1596_v37  ;;  %v1598_v49 = vpop.f32.mrb[11].mxu1  ;;  %v1285_v50 = vpop.f32.mrb[11].mxu0  ;;  %v10883_v17 = vpack.i.bf16 %v17003_v51, %v17004_v43 }
 0x149   : > { %v2138_v53 = vadd.f32 %v12773_v12, %v1892_v36  ;;  %v1896_v54 = vmul.f32 %v12757_v7, %v1598_v49  ;;  %v1894_v55 = vmul.f32 %v12767_v9, %v1285_v50  ;;  %v12894_v5 = vadd.f32 %v12796_v26, %v1890_v48 }
 0x14a   : > { %v2361_v57 = vmax.f32 %v2137_v45, 0.0  ;;  %v2141_v59 = vadd.f32 %v12763_v8, %v1895_v47 }
 0x14b   : > { %v2362_v63 = vmax.f32 %v2138_v53, 0.0  ;;  %v2142_v2 = vadd.f32 %v12773_v12, %v1896_v54  ;;  %10879 = vrot.lane.b32.xlu1 %v10878_v39, %s12174_s29  ;;  %v12897_v6 = vadd.f32 %v12796_v26, %v1894_v55  ;;  %v17000_v32 = vmax.f32 %v12894_v5, 0.0 }
 0x14c   : > { %v2365_v3 = vmax.f32 %v2141_v59, 0.0 }
 0x14d   : > { %v2366_v10 = vmax.f32 %v2142_v2, 0.0  ;;  %v1602_v14 = vpop.f32.mrb[12].mxu1  ;;  %v12899_v15 = vpop.f32.mrb[12].mxu0  ;;  %v10888_v16 = vpack.i.bf16 %v2362_v63, %v2361_v57  ;;  %v16998_v33 = vmax.f32 %v12897_v6, 0.0 }
 0x14e   : > { %v1899_v19 = vmul.f32 %v12747_v4, %v1602_v14  ;;  %v1604_v20 = vpop.f32.mrb[13].mxu1  ;;  %v1291_v23 = vpop.f32.mrb[13].mxu0 }
 0x14f   : > { %v1900_v24 = vmul.f32 %v12757_v7, %v1604_v20  ;;  %v1606_v27 = vpop.f32.mrb[14].mxu1  ;;  %10889 = vrot.lane.b32.xlu0 %v10888_v16, %s12174_s29  ;;  %10884 = vrot.lane.b32.xlu1 %v10883_v17, %s12174_s29  ;;  %v1898_v29 = vmul.f32 %v12767_v9, %v1291_v23  ;;  %v12914_v30 = vpop.f32.mrb[14].mxu0  ;;  %v10893_v31 = vpack.i.bf16 %v2366_v10, %v2365_v3 }
 0x150   : > { %v2145_v34 = vadd.f32 %v12763_v8, %v1899_v19  ;;  %v1903_v35 = vmul.f32 %v12747_v4, %v1606_v27  ;;  %v1608_v36 = vpop.f32.mrb[15].mxu1  ;;  %v1295_v37 = vpop.f32.mrb[15].mxu0  ;;  %v10898_v55 = vpack.i.bf16 %v16998_v33, %v17000_v32 }
 0x151   : > { %v2146_v39 = vadd.f32 %v12773_v12, %v1900_v24  ;;  %v1904_v41 = vmul.f32 %v12757_v7, %v1608_v36  ;;  %v1902_v42 = vmul.f32 %v12767_v9, %v1295_v37  ;;  %v12925_v48 = vadd.f32 %v12796_v26, %v1898_v29 }
 0x152   : > { %v2369_v45 = vmax.f32 %v2145_v34, 0.0  ;;  %v2149_v47 = vadd.f32 %v12763_v8, %v1903_v35 }
 0x153   : > { %v2370_v49 = vmax.f32 %v2146_v39, 0.0  ;;  %v2150_v50 = vadd.f32 %v12773_v12, %v1904_v41  ;;  %v12929_v53 = vadd.f32 %v12796_v26, %v1902_v42  ;;  %10894 = vrot.lane.b32.xlu1 %v10893_v31, %s12174_s29  ;;  %v16999_v3 = vmax.f32 %v12925_v48, 0.0  ;;  %10899 = vrot.lane.b32.xlu0 %v10898_v55, %s12174_s29 }
 0x154   : > { %v2373_v54 = vmax.f32 %v2149_v47, 0.0 }
 0x155   : > { %v2374_v57 = vmax.f32 %v2150_v50, 0.0  ;;  %v1612_v59 = vpop.f32.mrb[16].mxu1  ;;  %v12936_v63 = vpop.f32.mrb[16].mxu0  ;;  %v10903_v2 = vpack.i.bf16 %v2370_v49, %v2369_v45  ;;  %v16995_v10 = vmax.f32 %v12929_v53, 0.0 }
 0x156   : > { %v1907_v14 = vmul.f32 %v12747_v4, %v1612_v59  ;;  %v1614_v16 = vpop.f32.mrb[17].mxu1  ;;  %v1301_v17 = vpop.f32.mrb[17].mxu0 }
 0x157   : > { %v1908_v19 = vmul.f32 %v12757_v7, %v1614_v16  ;;  %v1616_v20 = vpop.f32.mrb[18].mxu1  ;;  %v1906_v23 = vmul.f32 %v12767_v9, %v1301_v17  ;;  %v12944_v24 = vpop.f32.mrb[18].mxu0  ;;  %v10908_v27 = vpack.i.bf16 %v2374_v57, %v2373_v54  ;;  %10904 = vrot.lane.b32.xlu0 %v10903_v2, %s12174_s29  ;;  %v10913_v47 = vpack.i.bf16 %v16995_v10, %v16999_v3 }
 0x158   : > { %v2153_v29 = vadd.f32 %v12763_v8, %v1907_v14  ;;  %v1911_v31 = vmul.f32 %v12747_v4, %v1616_v20  ;;  %v1618_v34 = vpop.f32.mrb[19].mxu1  ;;  %v1305_v35 = vpop.f32.mrb[19].mxu0 }
 0x159   : > { %v2154_v36 = vadd.f32 %v12773_v12, %v1908_v19  ;;  %v12950_v37 = vadd.f32 %v12796_v26, %v1906_v23  ;;  %v1912_v39 = vmul.f32 %v12757_v7, %v1618_v34  ;;  %10909 = vrot.lane.b32.xlu1 %v10908_v27, %s12174_s29  ;;  %v1910_v41 = vmul.f32 %v12767_v9, %v1305_v35 }
 0x15a   : > { %v2377_v42 = vmax.f32 %v2153_v29, 0.0  ;;  %v2157_v45 = vadd.f32 %v12763_v8, %v1911_v31 }
 0x15b   : > { %17147 = vst [vmem:[#allocation6_spill] sm:$0xff] %v12950_v37  ;;  %v2378_v49 = vmax.f32 %v2154_v36, 0.0  ;;  %v16994_v50 = vmax.f32 %v12950_v37, 0.0  ;;  %v2158_v54 = vadd.f32 %v12773_v12, %v1912_v39  ;;  %v12964_v55 = vadd.f32 %v12796_v26, %v1910_v41 }
 0x15c   : > { %v2381_v57 = vmax.f32 %v2157_v45, 0.0 }
 0x15d   : > { %17148 = vst [vmem:[#allocation7_spill] sm:$0xff] %v12964_v55  ;;  %v2382_v59 = vmax.f32 %v2158_v54, 0.0  ;;  %v16993_v14 = vmax.f32 %v12964_v55, 0.0  ;;  %v1622_v16 = vpop.f32.mrb[20].mxu1  ;;  %10914 = vrot.lane.b32.xlu1 %v10913_v47, %s12174_s29  ;;  %v12968_v2 = vpop.f32.mrb[20].mxu0  ;;  %v10918_v17 = vpack.i.bf16 %v2378_v49, %v2377_v42 }
 0x15e   : > { %v1915_v19 = vmul.f32 %v12747_v4, %v1622_v16  ;;  %v1624_v20 = vpop.f32.mrb[21].mxu1  ;;  %v1311_v23 = vpop.f32.mrb[21].mxu0 }
 0x15f   : > { %v1916_v27 = vmul.f32 %v12757_v7, %v1624_v20  ;;  %v1626_v29 = vpop.f32.mrb[22].mxu1  ;;  %10919 = vrot.lane.b32.xlu0 %v10918_v17, %s12174_s29  ;;  %v1914_v31 = vmul.f32 %v12767_v9, %v1311_v23  ;;  %v12974_v34 = vpop.f32.mrb[22].mxu0  ;;  %v10923_v35 = vpack.i.bf16 %v2382_v59, %v2381_v57  ;;  %v10928_v36 = vpack.i.bf16 %v16993_v14, %v16994_v50 }
 0x160   : > { %v2161_v39 = vadd.f32 %v12763_v8, %v1915_v19  ;;  %v1919_v41 = vmul.f32 %v12747_v4, %v1626_v29  ;;  %v1628_v42 = vpop.f32.mrb[23].mxu1  ;;  %v1315_v45 = vpop.f32.mrb[23].mxu0 }
 0x161   : > { %v2162_v47 = vadd.f32 %v12773_v12, %v1916_v27  ;;  %v1920_v49 = vmul.f32 %v12757_v7, %v1628_v42  ;;  %10924 = vrot.lane.b32.xlu1 %v10923_v35, %s12174_s29  ;;  %v1918_v54 = vmul.f32 %v12767_v9, %v1315_v45  ;;  %v12988_v16 = vadd.f32 %v12796_v26, %v1914_v31 }
 0x162   : > { %v2385_v57 = vmax.f32 %v2161_v39, 0.0  ;;  %v2165_v59 = vadd.f32 %v12763_v8, %v1919_v41 }
 0x163   : > { %17149 = vst [vmem:[#allocation8_spill] sm:$0xff] %v12988_v16  ;;  %v2386_v17 = vmax.f32 %v2162_v47, 0.0  ;;  %v2166_v19 = vadd.f32 %v12773_v12, %v1920_v49  ;;  %v12992_v20 = vadd.f32 %v12796_v26, %v1918_v54  ;;  %10929 = vrot.lane.b32.xlu0 %v10928_v36, %s12174_s29  ;;  %v16997_v39 = vmax.f32 %v12988_v16, 0.0 }
 0x164   : > { %v2389_v23 = vmax.f32 %v2165_v59, 0.0 }
 0x165   : > { %17150 = vst [vmem:[#allocation9_spill] sm:$0xff] %v12992_v20  ;;  %v2390_v27 = vmax.f32 %v2166_v19, 0.0  ;;  %v1632_v29 = vpop.f32.mrb[24].mxu1  ;;  %v12995_v35 = vpop.f32.mrb[24].mxu0  ;;  %v10933_v42 = vpack.i.bf16 %v2386_v17, %v2385_v57  ;;  %v16996_v41 = vmax.f32 %v12992_v20, 0.0 }
 0x166   : > { %v1923_v31 = vmul.f32 %v12747_v4, %v1632_v29  ;;  %v1634_v45 = vpop.f32.mrb[25].mxu1  ;;  %v1321_v47 = vpop.f32.mrb[25].mxu0 }
 0x167   : > { %v1924_v49 = vmul.f32 %v12757_v7, %v1634_v45  ;;  %v1636_v54 = vpop.f32.mrb[26].mxu1  ;;  %10934 = vrot.lane.b32.xlu0 %v10933_v42, %s12174_s29  ;;  %v1922_v36 = vmul.f32 %v12767_v9, %v1321_v47  ;;  %v13003_v59 = vpop.f32.mrb[26].mxu0  ;;  %v10938_v19 = vpack.i.bf16 %v2390_v27, %v2389_v23  ;;  %v10943_v27 = vpack.i.bf16 %v16996_v41, %v16997_v39 }
 0x168   : > { %v2169_v57 = vadd.f32 %v12763_v8, %v1923_v31  ;;  %v1927_v17 = vmul.f32 %v12747_v4, %v1636_v54  ;;  %v1638_v18 = vpop.f32.mrb[27].mxu1  ;;  %v1325_v14 = vpop.f32.mrb[27].mxu0 }
 0x169   : > { %v2170_v29 = vadd.f32 %v12773_v12, %v1924_v49  ;;  %v13009_v50 = vadd.f32 %v12796_v26, %v1922_v36  ;;  %v1928_v45 = vmul.f32 %v12757_v7, %v1638_v18  ;;  %10939 = vrot.lane.b32.xlu1 %v10938_v19, %s12174_s29  ;;  %v1926_v42 = vmul.f32 %v12767_v9, %v1325_v14 }
 0x16a   : > { %v2393_v47 = vmax.f32 %v2169_v57, 0.0  ;;  %v2173_v23 = vadd.f32 %v12763_v8, %v1927_v17 }
 0x16b   : > { %17151 = vst [vmem:[#allocation10_spill] sm:$0xff] %v13009_v50  ;;  %v2394_v31 = vmax.f32 %v2170_v29, 0.0  ;;  %v17002_v49 = vmax.f32 %v13009_v50, 0.0  ;;  %v2174_v54 = vadd.f32 %v12773_v12, %v1928_v45  ;;  %v13022_v36 = vadd.f32 %v12796_v26, %v1926_v42 }
 0x16c   : > { %v2397_v18 = vmax.f32 %v2173_v23, 0.0 }
 0x16d   : > { %17152 = vst [vmem:[#allocation11_spill] sm:$0xff] %v13022_v36  ;;  %v2398_v19 = vmax.f32 %v2174_v54, 0.0  ;;  %v17001_v14 = vmax.f32 %v13022_v36, 0.0  ;;  %v1642_v57 = vpop.f32.mrb[28].mxu1  ;;  %10944 = vrot.lane.b32.xlu1 %v10943_v27, %s12174_s29  ;;  %v13026_v17 = vpop.f32.mrb[28].mxu0  ;;  %v10948_v10 = vpack.i.bf16 %v2394_v31, %v2393_v47 }
 0x16e   : > { %v1931_v41 = vmul.f32 %v12747_v4, %v1642_v57  ;;  %v1644_v29 = vpop.f32.mrb[29].mxu1  ;;  %v1331_v39 = vpop.f32.mrb[29].mxu0 }
 0x16f   : > { %v1932_v33 = vmul.f32 %v12757_v7, %v1644_v29  ;;  %v1646_v45 = vpop.f32.mrb[30].mxu1  ;;  %10949 = vrot.lane.b32.xlu0 %v10948_v10, %s12174_s29  ;;  %v1930_v42 = vmul.f32 %v12767_v9, %v1331_v39  ;;  %v13032_v23 = vpop.f32.mrb[30].mxu0  ;;  %v10953_v54 = vpack.i.bf16 %v2398_v19, %v2397_v18  ;;  %v10958_v27 = vpack.i.bf16 %v17001_v14, %v17002_v49 }
 0x170   : > { %v2177_v47 = vadd.f32 %v12763_v8, %v1931_v41  ;;  %v1935_v31 = vmul.f32 %v12747_v4, %v1646_v45  ;;  %v1648_v57 = vpop.f32.mrb[31].mxu1  ;;  %v1335_v3 = vpop.f32.mrb[31].mxu0 }
 0x171   : > { %v2178_v29 = vadd.f32 %v12773_v12, %v1932_v33  ;;  %v1936_v10 = vmul.f32 %v12757_v7, %v1648_v57  ;;  %10954 = vrot.lane.b32.xlu1 %v10953_v54, %s12174_s29  ;;  %v1934_v39 = vmul.f32 %v12767_v9, %v1335_v3  ;;  %v13046_v32 = vadd.f32 %v12796_v26, %v1930_v42 }
 0x172   : > { %v2401_v18 = vmax.f32 %v2177_v47, 0.0  ;;  %v2181_v19 = vadd.f32 %v12763_v8, %v1935_v31 }
 0x173   : > { %17153 = vst [vmem:[#allocation12_spill] sm:$0xff] %v13046_v32  ;;  %v2402_v14 = vmax.f32 %v2178_v29, 0.0  ;;  %v2182_v41 = vadd.f32 %v12773_v12, %v1936_v10  ;;  %v13050_v45 = vadd.f32 %v12796_v26, %v1934_v39  ;;  %10959 = vrot.lane.b32.xlu0 %v10958_v27, %s12174_s29  ;;  %v17010_v47 = vmax.f32 %v13046_v32, 0.0 }
 0x174   : > { %v2405_v33 = vmax.f32 %v2181_v19, 0.0 }
 0x175   : > { %17154 = vst [vmem:[#allocation13_spill] sm:$0xff] %v13050_v45  ;;  %v2406_v57 = vmax.f32 %v2182_v41, 0.0  ;;  %v1652_v49 = vpop.f32.mrb[32].mxu1  ;;  %v13053_v54 = vpop.f32.mrb[32].mxu0  ;;  %v10963_v3 = vpack.i.bf16 %v2402_v14, %v2401_v18  ;;  %v17009_v31 = vmax.f32 %v13050_v45, 0.0 }
 0x176   : > { %v1939_v42 = vmul.f32 %v12747_v4, %v1652_v49  ;;  %v1654_v29 = vpop.f32.mrb[33].mxu1  ;;  %v1341_v51 = vpop.f32.mrb[33].mxu0 }
 0x177   : > { %v1940_v10 = vmul.f32 %v12757_v7, %v1654_v29  ;;  %v1656_v39 = vpop.f32.mrb[34].mxu1  ;;  %10964 = vrot.lane.b32.xlu0 %v10963_v3, %s12174_s29  ;;  %v1938_v27 = vmul.f32 %v12767_v9, %v1341_v51  ;;  %v13061_v19 = vpop.f32.mrb[34].mxu0  ;;  %v10968_v41 = vpack.i.bf16 %v2406_v57, %v2405_v33  ;;  %v10973_v57 = vpack.i.bf16 %v17009_v31, %v17010_v47 }
 0x178   : > { %v2185_v14 = vadd.f32 %v12763_v8, %v1939_v42  ;;  %v1943_v18 = vmul.f32 %v12747_v4, %v1656_v39  ;;  %v1658_v43 = vpop.f32.mrb[35].mxu1  ;;  %v1345_v13 = vpop.f32.mrb[35].mxu0 }
 0x179   : > { %v2186_v49 = vadd.f32 %v12773_v12, %v1940_v10  ;;  %v13067_v60 = vadd.f32 %v12796_v26, %v1938_v27  ;;  %v1944_v29 = vmul.f32 %v12757_v7, %v1658_v43  ;;  %10969 = vrot.lane.b32.xlu1 %v10968_v41, %s12174_s29  ;;  %v1942_v51 = vmul.f32 %v12767_v9, %v1345_v13 }
 0x17a   : > { %v2409_v3 = vmax.f32 %v2185_v14, 0.0  ;;  %v2189_v33 = vadd.f32 %v12763_v8, %v1943_v18 }
 0x17b   : > { %17155 = vst [vmem:[#allocation14_spill] sm:$0xff] %v13067_v60  ;;  %v2410_v42 = vmax.f32 %v2186_v49, 0.0  ;;  %v2190_v39 = vadd.f32 %v12773_v12, %v1944_v29  ;;  %v13080_v27 = vadd.f32 %v12796_v26, %v1942_v51  ;;  %v17157_v13 = vmax.f32 %v13067_v60, 0.0 }
 0x17c   : > { %v2413_v43 = vmax.f32 %v2189_v33, 0.0 }
 0x17d   : > { %17156 = vst [vmem:[#allocation15_spill] sm:$0xff] %v13080_v27  ;;  %v2414_v41 = vmax.f32 %v2190_v39, 0.0  ;;  %v1662_v14 = vpop.f32.mrb[36].mxu1  ;;  %10974 = vrot.lane.b32.xlu1 %v10973_v57, %s12174_s29  ;;  %v13084_v18 = vpop.f32.mrb[36].mxu0  ;;  %v10978_v0 = vpack.i.bf16 %v2410_v42, %v2409_v3  ;;  %v17158_v57 = vmax.f32 %v13080_v27, 0.0 }
 0x17e   : > { %v1947_v31 = vmul.f32 %v12747_v4, %v1662_v14  ;;  %v1664_v49 = vpop.f32.mrb[37].mxu1  ;;  %v1351_v47 = vpop.f32.mrb[37].mxu0 }
 0x17f   : > { %v1948_v10 = vmul.f32 %v12757_v7, %v1664_v49  ;;  %v1666_v29 = vpop.f32.mrb[38].mxu1  ;;  %10979 = vrot.lane.b32.xlu0 %v10978_v0, %s12174_s29  ;;  %v1946_v51 = vmul.f32 %v12767_v9, %v1351_v47  ;;  %v13090_v33 = vpop.f32.mrb[38].mxu0  ;;  %v10983_v39 = vpack.i.bf16 %v2414_v41, %v2413_v43  ;;  %v10988_v62 = vpack.i.bf16 %v17158_v57, %v17157_v13 }
 0x180   : > { %v2193_v3 = vadd.f32 %v12763_v8, %v1947_v31  ;;  %v1951_v42 = vmul.f32 %v12747_v4, %v1666_v29  ;;  %v1668_v14 = vpop.f32.mrb[39].mxu1  ;;  %v1355_v58 = vpop.f32.mrb[39].mxu0 }
 0x181   : > { %v2194_v49 = vadd.f32 %v12773_v12, %v1948_v10  ;;  %v1952_v0 = vmul.f32 %v12757_v7, %v1668_v14  ;;  %10984 = vrot.lane.b32.xlu1 %v10983_v39, %s12174_s29  ;;  %v1950_v47 = vmul.f32 %v12767_v9, %v1355_v58  ;;  %v13104_v27 = vadd.f32 %v12796_v26, %v1946_v51 }
 0x182   : > { %v2417_v43 = vmax.f32 %v2193_v3, 0.0  ;;  %v2197_v41 = vadd.f32 %v12763_v8, %v1951_v42 }
 0x183   : > { %17159 = vst [vmem:[#allocation16_spill] sm:$0xff] %v13104_v27  ;;  %v2418_v13 = vmax.f32 %v2194_v49, 0.0  ;;  %v2198_v31 = vadd.f32 %v12773_v12, %v1952_v0  ;;  %v13108_v29 = vadd.f32 %v12796_v26, %v1950_v47  ;;  %10989 = vrot.lane.b32.xlu0 %v10988_v62, %s12174_s29 }
 0x184   : > { %v2421_v10 = vmax.f32 %v2197_v41, 0.0 }
 0x185   : > { %17160 = vst [vmem:[#allocation17_spill] sm:$0xff] %v13108_v29  ;;  %v2422_v57 = vmax.f32 %v2198_v31, 0.0  ;;  %v1672_v14 = vpop.f32.mrb[40].mxu1  ;;  %v13111_v39 = vpop.f32.mrb[40].mxu0  ;;  %v10993_v58 = vpack.i.bf16 %v2418_v13, %v2417_v43 }
 0x186   : > { %v1955_v51 = vmul.f32 %v12747_v4, %v1672_v14  ;;  %v1674_v49 = vpop.f32.mrb[41].mxu1  ;;  %v1361_v60 = vpop.f32.mrb[41].mxu0 }
 0x187   : > { %v1956_v0 = vmul.f32 %v12757_v7, %v1674_v49  ;;  %v1676_v47 = vpop.f32.mrb[42].mxu1  ;;  %10994 = vrot.lane.b32.xlu0 %v10993_v58, %s12174_s29  ;;  %v1954_v62 = vmul.f32 %v12767_v9, %v1361_v60  ;;  %v13119_v41 = vpop.f32.mrb[42].mxu0  ;;  %v10998_v31 = vpack.i.bf16 %v2422_v57, %v2421_v10  ;;  %v13131_v58 = vsub.s32 0, %v12696_v52 }
 0x188   : > { %v2201_v43 = vadd.f32 %v12763_v8, %v1955_v51  ;;  %v1959_v13 = vmul.f32 %v12747_v4, %v1676_v47  ;;  %v1678_v3 = vpop.f32.mrb[43].mxu1  ;;  %v1365_v42 = vpop.f32.mrb[43].mxu0  ;;  %v17163_v51 = vmax.f32 %v13104_v27, 0.0  ;;  %v17164_v47 = vmax.f32 %v13108_v29, 0.0 }
 0x189   : > { %v2202_v14 = vadd.f32 %v12773_v12, %v1956_v0  ;;  %v13125_v45 = vadd.f32 %v12796_v26, %v1954_v62  ;;  %v1960_v49 = vmul.f32 %v12757_v7, %v1678_v3  ;;  %10999 = vrot.lane.b32.xlu1 %v10998_v31, %s12174_s29  ;;  %v1958_v60 = vmul.f32 %v12767_v9, %v1365_v42 }
 0x18a   : > { %17162 = vst [vmem:[#allocation19_spill] sm:$0xff] %v13131_v58  ;;  %v2425_v10 = vmax.f32 %v2201_v43, 0.0  ;;  %v2205_v57 = vadd.f32 %v12763_v8, %v1959_v13  ;;  %v11003_v0 = vpack.i.bf16 %v17164_v47, %v17163_v51 }
 0x18b   : > { %17161 = vst [vmem:[#allocation18_spill] sm:$0xff] %v13125_v45  ;;  %v2426_v36 = vmax.f32 %v2202_v14, 0.0  ;;  %v17023_v62 = vmax.f32 %v13125_v45, 0.0  ;;  %v2206_v3 = vadd.f32 %v12773_v12, %v1960_v49  ;;  %v13141_v31 = vadd.f32 %v12796_v26, %v1958_v60 }
 0x18c   : > { %v2429_v42 = vmax.f32 %v2205_v57, 0.0  ;;  %v13149_v14 = vrot.slane %v12725_v61, %v13131_v58 }
 0x18d   : > { %17165 = vst [vmem:[#allocation20_spill] sm:$0xff] %v13141_v31  ;;  %v2430_v32 = vmax.f32 %v2206_v3, 0.0  ;;  %v1682_v43 = vpop.f32.mrb[44].mxu1  ;;  %11004 = vrot.lane.b32.xlu1 %v11003_v0, %s12174_s29  ;;  %v13145_v13 = vpop.f32.mrb[44].mxu0  ;;  %v11008_v27 = vpack.i.bf16 %v2426_v36, %v2425_v10  ;;  %v17166_v36 = vmax.f32 %v13141_v31, 0.0 }
 0x18e   : > { %v1963_v51 = vmul.f32 %v12747_v4, %v1682_v43  ;;  %v1684_v49 = vpop.f32.mrb[45].mxu1  ;;  %v1371_v47 = vpop.f32.mrb[45].mxu0 }
 0x18f   : > { %v1964_v60 = vmul.f32 %v12757_v7, %v1684_v49  ;;  %v1686_v57 = vpop.f32.mrb[46].mxu1  ;;  %11009 = vrot.lane.b32.xlu0 %v11008_v27, %s12174_s29  ;;  %v1962_v3 = vmul.f32 %v12767_v9, %v1371_v47  ;;  %v13155_v52 = vpop.f32.mrb[46].mxu0  ;;  %v11013_v0 = vpack.i.bf16 %v2430_v32, %v2429_v42  ;;  %v11018_v61 = vpack.i.bf16 %v17166_v36, %v17023_v62 }
 0x190   : > { %v2209_v10 = vadd.f32 %v12763_v8, %v1963_v51  ;;  %v1967_v43 = vmul.f32 %v12747_v4, %v1686_v57  ;;  %v1688_v29 = vpop.f32.mrb[47].mxu1  ;;  %v1375_v50 = vpop.f32.mrb[47].mxu0  ;;  %v13169_v32 = vrot.slane %v12737_v1, %v13131_v58  ;;  %v1873_v57 = vmul.f32 %v13149_v14, %v12769_v11 }
 0x191   : > { %v2210_v49 = vadd.f32 %v12773_v12, %v1964_v60  ;;  %v1968_v27 = vmul.f32 %v12757_v7, %v1688_v29  ;;  %11014 = vrot.lane.b32.xlu1 %v11013_v0, %s12174_s29  ;;  %v1966_v47 = vmul.f32 %v12767_v9, %v1375_v50  ;;  %v13173_v51 = vadd.f32 %v12796_v26, %v1962_v3 }
 0x192   : > { %v2433_v42 = vmax.f32 %v2209_v10, 0.0  ;;  %v2213_v36 = vadd.f32 %v12763_v8, %v1967_v43 }
 0x193   : > { %17167 = vst [vmem:[#allocation21_spill] sm:$0xff] %v13173_v51  ;;  %v2434_v60 = vmax.f32 %v2210_v49, 0.0  ;;  %v2214_v29 = vadd.f32 %v12773_v12, %v1968_v27  ;;  %v13179_v0 = vadd.f32 %v12796_v26, %v1966_v47  ;;  %11019 = vrot.lane.b32.xlu0 %v11018_v61, %s12174_s29  ;;  %v13188_v27 = vadd.f32 %v13169_v32, %v1873_v57 }
 0x194   : > { %v2437_v50 = vmax.f32 %v2213_v36, 0.0 }
 0x195   : > { %17168 = vst [vmem:[#allocation22_spill] sm:$0xff] %v13179_v0  ;;  %v2438_v1 = vmax.f32 %v2214_v29, 0.0  ;;  %v1692_v62 = vpop.f32.mrb[48].mxu1  ;;  %v13182_v10 = vpop.f32.mrb[48].mxu0  ;;  %v11023_v43 = vpack.i.bf16 %v2434_v60, %v2433_v42  ;;  %v1877_v60 = vmul.f32 %v13149_v14, %v12787_v22 }
 0x196   : > { %17169 = vst [vmem:[#allocation23_spill] sm:$0xff] %v13182_v10  ;;  %v1971_v11 = vmul.f32 %v12747_v4, %v1692_v62  ;;  %v1694_v49 = vpop.f32.mrb[49].mxu1  ;;  %v1381_v31 = vpop.f32.mrb[49].mxu0  ;;  %v1881_v62 = vmul.f32 %v13149_v14, %v12822_v46  ;;  %v1885_v46 = vmul.f32 %v13149_v14, %v12833_v56  ;;  %v1893_v56 = vmul.f32 %v13149_v14, %v12874_v38  ;;  %v11731_v10 = vld [vmem:[%s16985_s4 + $0x40] ss:$16 sps:$4 sm:$0xff]  }
 0x197   : > { %v1972_v47 = vmul.f32 %v12757_v7, %v1694_v49  ;;  %v1696_v61 = vpop.f32.mrb[50].mxu1  ;;  %11024 = vrot.lane.b32.xlu0 %v11023_v43, %s12174_s29  ;;  %v1970_v36 = vmul.f32 %v12767_v9, %v1381_v31  ;;  %v13193_v29 = vpop.f32.mrb[50].mxu0  ;;  %v11028_v42 = vpack.i.bf16 %v2438_v1, %v2437_v50 }
 0x198   : > { %17170 = vst [vmem:[#allocation24_spill] sm:$0xff] %v13193_v29  ;;  %v2217_v58 = vadd.f32 %v12763_v8, %v1971_v11  ;;  %v1975_v57 = vmul.f32 %v12747_v4, %v1696_v61  ;;  %v1698_v3 = vpop.f32.mrb[51].mxu1  ;;  %v1385_v49 = vpop.f32.mrb[51].mxu0  ;;  %v17172_v11 = vmax.f32 %v13173_v51, 0.0  ;;  %v17173_v61 = vmax.f32 %v13179_v0, 0.0 }
 0x199   : > { %v2218_v45 = vadd.f32 %v12773_v12, %v1972_v47  ;;  %v13203_v43 = vadd.f32 %v12796_v26, %v1970_v36  ;;  %v1976_v31 = vmul.f32 %v12757_v7, %v1698_v3  ;;  %11029 = vrot.lane.b32.xlu1 %v11028_v42, %s12174_s29  ;;  %v1974_v22 = vmul.f32 %v12767_v9, %v1385_v49 }
 0x19a   : > { %v2441_v50 = vmax.f32 %v2217_v58, 0.0  ;;  %v2221_v1 = vadd.f32 %v12763_v8, %v1975_v57  ;;  %v11033_v47 = vpack.i.bf16 %v17173_v61, %v17172_v11  ;;  %v1889_v49 = vmul.f32 %v13149_v14, %v12858_v28 }
 0x19b   : > { %17171 = vst [vmem:[#allocation25_spill] sm:$0xff] %v13203_v43  ;;  %v2442_v20 = vmax.f32 %v2218_v45, 0.0  ;;  %v2222_v3 = vadd.f32 %v12773_v12, %v1976_v31  ;;  %v13218_v42 = vadd.f32 %v12796_v26, %v1974_v22  ;;  %v13230_v22 = vadd.f32 %v13169_v32, %v1877_v60 }
 0x19c   : > { %v2445_v58 = vmax.f32 %v2221_v1, 0.0  ;;  %v13233_v28 = vadd.f32 %v13169_v32, %v1881_v62  ;;  %v13236_v38 = vadd.f32 %v13169_v32, %v1885_v46  ;;  %v17177_v62 = vmax.f32 %v13203_v43, 0.0 }
 0x19d   : > { %17174 = vst [vmem:[#allocation26_spill] sm:$0xff] %v13218_v42  ;;  %v2446_v51 = vmax.f32 %v2222_v3, 0.0  ;;  %v1702_v45 = vpop.f32.mrb[52].mxu1  ;;  %11034 = vrot.lane.b32.xlu1 %v11033_v47, %s12174_s29  ;;  %v13227_v61 = vpop.f32.mrb[52].mxu0  ;;  %v11038_v31 = vpack.i.bf16 %v2442_v20, %v2441_v50  ;;  %v17178_v47 = vmax.f32 %v13218_v42, 0.0  ;;  %v13249_v0 = vadd.f32 %v13169_v32, %v1889_v49 }
 0x19e   : > { %17175 = vst [vmem:[#allocation27_spill] sm:$0xff] %v13227_v61  ;;  %v1979_v1 = vmul.f32 %v12747_v4, %v1702_v45  ;;  %v1704_v3 = vpop.f32.mrb[53].mxu1  ;;  %v1391_v57 = vpop.f32.mrb[53].mxu0  ;;  %v13252_v45 = vadd.f32 %v13169_v32, %v1893_v56  ;;  %v1901_v56 = vmul.f32 %v13149_v14, %v12914_v30 }
 0x19f   : > { %v1980_v11 = vmul.f32 %v12757_v7, %v1704_v3  ;;  %v1706_v36 = vpop.f32.mrb[54].mxu1  ;;  %11039 = vrot.lane.b32.xlu0 %v11038_v31, %s12174_s29  ;;  %v1978_v20 = vmul.f32 %v12767_v9, %v1391_v57  ;;  %v13242_v50 = vpop.f32.mrb[54].mxu0  ;;  %v11043_v60 = vpack.i.bf16 %v2446_v51, %v2445_v58  ;;  %v11048_v46 = vpack.i.bf16 %v17178_v47, %v17177_v62 }
 0x1a0   : > { %17176 = vst [vmem:[#allocation28_spill] sm:$0xff] %v13242_v50  ;;  %v2225_v3 = vadd.f32 %v12763_v8, %v1979_v1  ;;  %v1983_v31 = vmul.f32 %v12747_v4, %v1706_v36  ;;  %v1708_v55 = vpop.f32.mrb[55].mxu1  ;;  %v1395_v57 = vpop.f32.mrb[55].mxu0  ;;  %v1897_v51 = vmul.f32 %v13149_v14, %v12899_v15  ;;  %v13284_v43 = vadd.f32 %v13169_v32, %v1901_v56 }
 0x1a1   : > { %v2226_v58 = vadd.f32 %v12773_v12, %v1980_v11  ;;  %v1984_v42 = vmul.f32 %v12757_v7, %v1708_v55  ;;  %11044 = vrot.lane.b32.xlu1 %v11043_v60, %s12174_s29  ;;  %v1982_v49 = vmul.f32 %v12767_v9, %v1395_v57  ;;  %v13266_v36 = vadd.f32 %v12796_v26, %v1978_v20 }
 0x1a2   : > { %v2449_v62 = vmax.f32 %v2225_v3, 0.0  ;;  %v2229_v1 = vadd.f32 %v12763_v8, %v1983_v31  ;;  %v13279_v57 = vadd.f32 %v13169_v32, %v1897_v51  ;;  %v1905_v51 = vmul.f32 %v13149_v14, %v12936_v63 }
 0x1a3   : > { %17179 = vst [vmem:[#allocation29_spill] sm:$0xff] %v13266_v36  ;;  %v2450_v15 = vmax.f32 %v2226_v58, 0.0  ;;  %v2230_v11 = vadd.f32 %v12773_v12, %v1984_v42  ;;  %v13271_v55 = vadd.f32 %v12796_v26, %v1982_v49  ;;  %11049 = vrot.lane.b32.xlu0 %v11048_v46, %s12174_s29  ;;  %v1909_v60 = vmul.f32 %v13149_v14, %v12944_v24 }
 0x1a4   : > { %v2453_v31 = vmax.f32 %v2229_v1, 0.0 }
 0x1a5   : > { %17180 = vst [vmem:[#allocation30_spill] sm:$0xff] %v13271_v55  ;;  %v2454_v58 = vmax.f32 %v2230_v11, 0.0  ;;  %v1712_v47 = vpop.f32.mrb[56].mxu1  ;;  %v13281_v42 = vpop.f32.mrb[56].mxu0  ;;  %v11053_v49 = vpack.i.bf16 %v2450_v15, %v2449_v62 }
 0x1a6   : > { %17181 = vst [vmem:[#allocation31_spill] sm:$0xff] %v13281_v42  ;;  %v1987_v3 = vmul.f32 %v12747_v4, %v1712_v47  ;;  %v1714_v1 = vpop.f32.mrb[57].mxu1  ;;  %v1401_v30 = vpop.f32.mrb[57].mxu0  ;;  %v1913_v47 = vmul.f32 %v13149_v14, %v12968_v2 }
 0x1a7   : > { %v1988_v11 = vmul.f32 %v12757_v7, %v1714_v1  ;;  %v1716_v20 = vpop.f32.mrb[58].mxu1  ;;  %11054 = vrot.lane.b32.xlu0 %v11053_v49, %s12174_s29  ;;  %v1986_v62 = vmul.f32 %v12767_v9, %v1401_v30  ;;  %v13294_v56 = vpop.f32.mrb[58].mxu0  ;;  %v11058_v15 = vpack.i.bf16 %v2454_v58, %v2453_v31  ;;  %v17185_v58 = vmax.f32 %v13271_v55, 0.0 }
 0x1a8   : > { %17182 = vst [vmem:[#allocation32_spill] sm:$0xff] %v13294_v56  ;;  %v2233_v46 = vadd.f32 %v12763_v8, %v1987_v3  ;;  %v1991_v63 = vmul.f32 %v12747_v4, %v1716_v20  ;;  %v1718_v42 = vpop.f32.mrb[59].mxu1  ;;  %v1405_v1 = vpop.f32.mrb[59].mxu0  ;;  %v17184_v20 = vmax.f32 %v13266_v36, 0.0  ;;  %v13328_v31 = vadd.f32 %v13169_v32, %v1913_v47 }
 0x1a9   : > { %v2234_v16 = vadd.f32 %v12773_v12, %v1988_v11  ;;  %v13304_v49 = vadd.f32 %v12796_v26, %v1986_v62  ;;  %v1992_v30 = vmul.f32 %v12757_v7, %v1718_v42  ;;  %11059 = vrot.lane.b32.xlu1 %v11058_v15, %s12174_s29  ;;  %v1990_v24 = vmul.f32 %v12767_v9, %v1405_v1 }
 0x1aa   : > { %v2457_v2 = vmax.f32 %v2233_v46, 0.0  ;;  %v2237_v3 = vadd.f32 %v12763_v8, %v1991_v63  ;;  %v11063_v56 = vpack.i.bf16 %v17185_v58, %v17184_v20  ;;  %v13322_v1 = vadd.f32 %v13169_v32, %v1905_v51  ;;  %17189 = vst [vmem:[#allocation37_spill] sm:$0xff] %v13328_v31 }
 0x1ab   : > { %17183 = vst [vmem:[#allocation33_spill] sm:$0xff] %v13304_v49  ;;  %v2458_v11 = vmax.f32 %v2234_v16, 0.0  ;;  %v2238_v37 = vadd.f32 %v12773_v12, %v1992_v30  ;;  %v13318_v42 = vadd.f32 %v12796_v26, %v1990_v24  ;;  %v13325_v46 = vadd.f32 %v13169_v32, %v1909_v60 }
 0x1ac   : > { %17187 = vst [vmem:[#allocation35_spill] sm:$0xff] %v13322_v1  ;;  %v2461_v63 = vmax.f32 %v2237_v3, 0.0  ;;  %v1917_v51 = vmul.f32 %v13149_v14, %v12974_v34  ;;  %v1921_v60 = vmul.f32 %v13149_v14, %v12995_v35  ;;  %v1925_v3 = vmul.f32 %v13149_v14, %v13003_v59  ;;  %v11724_v1 = vld [vmem:[%s16985_s4 + $0x2c] ss:$16 sps:$4 sm:$0xff]  }
 0x1ad   : > { %17186 = vst [vmem:[#allocation34_spill] sm:$0xff] %v13318_v42  ;;  %17188 = vst [vmem:[#allocation36_spill] sm:$0xff] %v13325_v46  ;;  %v2462_v16 = vmax.f32 %v2238_v37, 0.0  ;;  %v1722_v58 = vpop.f32.mrb[60].mxu1  ;;  %11064 = vrot.lane.b32.xlu1 %v11063_v56, %s12174_s29  ;;  %v13332_v30 = vpop.f32.mrb[60].mxu0  ;;  %v11068_v24 = vpack.i.bf16 %v2458_v11, %v2457_v2  ;;  %v1929_v20 = vmul.f32 %v13149_v14, %v13026_v17  ;;  %v17192_v35 = vmax.f32 %v13304_v49, 0.0 }
 0x1ae   : > { %17190 = vst [vmem:[#allocation38_spill] sm:$0xff] %v13332_v30  ;;  %v1995_v47 = vmul.f32 %v12747_v4, %v1722_v58  ;;  %v1724_v37 = vpop.f32.mrb[61].mxu1  ;;  %v1411_v15 = vpop.f32.mrb[61].mxu0  ;;  %v17193_v11 = vmax.f32 %v13318_v42, 0.0  ;;  %v1933_v55 = vmul.f32 %v13149_v14, %v13032_v23  ;;  %v13364_v23 = vadd.f32 %v13169_v32, %v1917_v51 }
 0x1af   : > { %v1996_v56 = vmul.f32 %v12757_v7, %v1724_v37  ;;  %v1726_v62 = vpop.f32.mrb[62].mxu1  ;;  %11069 = vrot.lane.b32.xlu0 %v11068_v24, %s12174_s29  ;;  %v13345_v2 = vpop.f32.mrb[62].mxu0  ;;  %v11073_v34 = vpack.i.bf16 %v2462_v16, %v2461_v63  ;;  %v13371_v58 = vadd.f32 %v13169_v32, %v1925_v3  ;;  %v1994_v3 = vmul.f32 %v12767_v9, %v1411_v15  ;;  %v11716_v15 = vld [vmem:[%s16985_s4 + $0x8] ss:$16 sps:$4 sm:$0xff]  }
 0x1b0   : > { %17191 = vst [vmem:[#allocation39_spill] sm:$0xff] %v13345_v2  ;;  %v11078_v59 = vpack.i.bf16 %v17193_v11, %v17192_v35  ;;  %v2241_v17 = vadd.f32 %v12763_v8, %v1995_v47  ;;  %v1999_v37 = vmul.f32 %v12747_v4, %v1726_v62  ;;  %v1728_v36 = vpop.f32.mrb[63].mxu1  ;;  %v1415_v30 = vpop.f32.mrb[63].mxu0  ;;  %17194 = vst [vmem:[#allocation40_spill] sm:$0xff] %v13364_v23 }
 0x1b1   : > { %v2242_v16 = vadd.f32 %v12773_v12, %v1996_v56  ;;  %v2000_v42 = vmul.f32 %v12757_v7, %v1728_v36  ;;  %v13360_v35 = vpop.permute.xlu0 %10859  ;;  %11074 = vrot.lane.b32.xlu1 %v11073_v34, %s12174_s29  ;;  %v13367_v47 = vadd.f32 %v13169_v32, %v1921_v60  ;;  %17196 = vst [vmem:[#allocation42_spill] sm:$0xff] %v13371_v58 }
 0x1b2   : > { %v2465_v62 = vmax.f32 %v2241_v17, 0.0  ;;  %v2245_v11 = vadd.f32 %v12763_v8, %v1999_v37  ;;  %v13374_v56 = vadd.f32 %v13169_v32, %v1929_v20  ;;  %v13379_v51 = vadd.f32 %v13169_v32, %v1933_v55 }
 0x1b3   : > { %17195 = vst [vmem:[#allocation41_spill] sm:$0xff] %v13367_v47  ;;  %v2466_v36 = vmax.f32 %v2242_v16, 0.0  ;;  %v2246_v63 = vadd.f32 %v12773_v12, %v2000_v42  ;;  %11079 = vrot.lane.b32.xlu0 %v11078_v59, %s12174_s29  ;;  %v1937_v60 = vmul.f32 %v13149_v14, %v13053_v54  ;;  %v1941_v34 = vmul.f32 %v13149_v14, %v13061_v19 }
 0x1b4   : > { %17197 = vst [vmem:[#allocation43_spill] sm:$0xff] %v13374_v56  ;;  %17198 = vst [vmem:[#allocation44_spill] sm:$0xff] %v13379_v51  ;;  %v2469_v17 = vmax.f32 %v2245_v11, 0.0  ;;  %v1998_v20 = vmul.f32 %v12767_v9, %v1415_v30  ;;  %v10862_v59 = vunpack.i.h.bf16 %v13360_v35 }
 0x1b5   : > { %v2470_v37 = vmax.f32 %v2246_v63, 0.0  ;;  %v13387_v16 = vpop.permute.xlu0 %10864  ;;  %v1732_v42 = vpop.f32.mrb[64].mxu1  ;;  %v11083_v24 = vpack.i.bf16 %v2466_v36, %v2465_v62  ;;  %v13401_v55 = vadd.f32 %v13169_v32, %v1937_v60  ;;  %v13414_v63 = vadd.f32 %v12796_v26, %v1994_v3 }
 0x1b6   : > { %v10867_v49 = vunpack.i.h.bf16 %v13387_v16  ;;  %v13393_v2 = vpop.f32.mrb[64].mxu0  ;;  %v1734_v19 = vpop.f32.mrb[65].mxu1  ;;  %v2003_v30 = vmul.f32 %v12747_v4, %v1732_v42  ;;  %v11718_v42 = vld [vmem:[%s16985_s4 + $0xc] ss:$16 sps:$4 sm:$0xff]   ;;  %v13417_v60 = vadd.f32 %v12796_v26, %v1998_v20  ;;  %v17205_v3 = vunpack.i.l.bf16 %v13360_v35 }
 0x1b7   : > { %17199 = vst [vmem:[#allocation45_spill] sm:$0xff] %v13393_v2  ;;  %v2004_v11 = vmul.f32 %v12757_v7, %v1734_v19  ;;  %v1736_v62 = vpop.f32.mrb[66].mxu1  ;;  %11084 = vrot.lane.b32.xlu0 %v11083_v24, %s12174_s29  ;;  %v1421_v36 = vpop.f32.mrb[65].mxu0  ;;  %17200 = vst [vmem:[#allocation46_spill] sm:$0xff] %v13401_v55  ;;  %v11088_v2 = vpack.i.bf16 %v2470_v37, %v2469_v17  ;;  %v11719_v17 = vld [vmem:[%s16985_s4] ss:$16 sps:$4 sm:$0xff]   ;;  %v13429_v24 = vadd.f32 %v13169_v32, %v1941_v34 }
 0x1b8   : > { %v13403_v31 = vpop.f32.mrb[66].mxu0  ;;  %v1738_v54 = vpop.f32.mrb[67].mxu1  ;;  %17202 = vst [vmem:[#allocation48_spill] sm:$0xff] %v13414_v63  ;;  %17203 = vst [vmem:[#allocation49_spill] sm:$0xff] %v13417_v60  ;;  %v11721_v37 = vld [vmem:[%s16985_s4 + $0x4] ss:$16 sps:$4 sm:$0xff]   ;;  %v3072_v20 = vsel %vm1140_vm0, %v17205_v3, %v10862_v59  ;;  %v17206_v56 = vunpack.i.l.bf16 %v13387_v16  ;;  %v13442_v19 = vadd.f32 %v12763_v8, %v2003_v30  ;;  %v2007_v51 = vmul.f32 %v12747_v4, %v1736_v62 }
 0x1b9   : > { %17201 = vst [vmem:[#allocation47_spill] sm:$0xff] %v13403_v31  ;;  %v13419_v31 = vpop.permute.xlu1 %10874  ;;  %17204 = vst [vmem:[#allocation50_spill] sm:$0xff] %v13429_v24  ;;  %11089 = vrot.lane.b32.xlu1 %v11088_v2, %s12174_s29  ;;  %v1425_v58 = vpop.f32.mrb[67].mxu0  ;;  %v2250_v34 = vadd.f32 %v12773_v12, %v2004_v11  ;;  %4726 = vmatprep.subr.bf16.mxu1 %v11718_v42  ;;  %v1945_v2 = vmul.f32 %v13149_v14, %v13084_v18  ;;  %v11722_v30 = vld [vmem:[%s16985_s4 + $0x28] ss:$16 sps:$4 sm:$0xff]  }
 0x1ba   : > { %v3074_v47 = vsel %vm1140_vm0, %v17206_v56, %v10867_v49  ;;  %v10877_v59 = vunpack.i.h.bf16 %v13419_v31  ;;  %4553 = vmatprep.subr.bf16.mxu0 %v11721_v37  ;;  %v2002_v56 = vmul.f32 %v12767_v9, %v1421_v36  ;;  %v2008_v3 = vmul.f32 %v12757_v7, %v1738_v54  ;;  %v13452_v23 = vpop.permute.xlu0 %10869  ;;  %4727 = vmatpush1.bf16.msra.mxu1 %v11716_v15 }
 0x1bb   : > { %4554 = vmatpush1.bf16.msra.mxu0 %v11719_v17  ;;  %v2006_v18 = vmul.f32 %v12767_v9, %v1425_v58  ;;  %4728 = vmatprep.subr.bf16.mxu1 %v11724_v1  ;;  %v17207_v37 = vmax.f32 %v12814_v40, 0.0  ;;  %v17208_v17 = vmax.f32 %v12820_v44, 0.0  ;;  %v2473_v42 = vmax.f32 %v13442_v19, 0.0 }
 0x1bc   : > { %v2474_v58 = vmax.f32 %v2250_v34, 0.0  ;;  %v13473_v50 = vadd.f32 %v12763_v8, %v2007_v51  ;;  %v17210_v1 = vunpack.i.l.bf16 %v13419_v31  ;;  %v13515_v61 = vadd.f32 %v13169_v32, %v1945_v2  ;;  %v11733_v2 = vld [vmem:[%s16985_s4 + $0x44] ss:$16 sps:$4 sm:$0xff]  }
 0x1bd   : > { %v13461_v36 = vpop.permute.xlu1 %10879  ;;  %v1742_v54 = vpop.f32.mrb[68].mxu1  ;;  %v3296_v15 = vmax.f32 %v17207_v37, %v3072_v20  ;;  %v3298_v49 = vmax.f32 %v17208_v17, %v3074_v47  ;;  %v13481_v47 = vadd.f32 %v12796_v26, %v2002_v56  ;;  %v13484_v37 = vadd.f32 %v12773_v12, %v2008_v3  ;;  %v11727_v56 = vld [vmem:[%s16985_s4 + $0x24] ss:$16 sps:$4 sm:$0xff]  }
 0x1be   : > { %v10882_v55 = vunpack.i.h.bf16 %v13461_v36  ;;  %v17049_v11 = vunpack.i.l.bf16 %v13461_v36  ;;  %v13469_v46 = vpop.f32.mrb[68].mxu0  ;;  %v1744_v62 = vpop.f32.mrb[69].mxu1  ;;  %v3076_v40 = vsel %vm1140_vm0, %v17210_v1, %v10877_v59  ;;  %v17212_v17 = vmax.f32 %v12853_v21, 0.0  ;;  %4729 = vmatpush1.bf16.msra.mxu1 %v11722_v30  ;;  %v11725_v59 = vld [vmem:[%s16985_s4 + $0x20] ss:$16 sps:$4 sm:$0xff]   ;;  %17218 = vst [vmem:[#allocation55_spill] sm:$0xff] %v13515_v61  ;;  %4555 = vmatprep.subr.bf16.mxu0 %v11727_v56 }
 0x1bf   : > { %17209 = vst [vmem:[#allocation51_spill] sm:$0xff] %v13469_v46  ;;  %v1746_v20 = vpop.f32.mrb[70].mxu1  ;;  %v13478_v44 = vpop.f32.mrb[69].mxu0  ;;  %17211 = vst [vmem:[#allocation52_spill] sm:$0xff] %v13481_v47  ;;  %v10872_v3 = vunpack.i.h.bf16 %v13452_v23  ;;  %v13501_v21 = vadd.f32 %v12796_v26, %v2006_v18  ;;  %v17215_v1 = vmax.f32 %v12856_v25, 0.0  ;;  %v17217_v30 = vmax.f32 %v13417_v60, 0.0  ;;  %4556 = vmatpush1.bf16.msra.mxu0 %v11725_v59 }
 0x1c0   : > { %v3300_v19 = vmax.f32 %v17212_v17, %v3076_v40  ;;  %v3078_v51 = vsel %vm1140_vm0, %v17049_v11, %v10882_v55  ;;  %v13491_v34 = vpop.f32.mrb[70].mxu0  ;;  %v1748_v46 = vpop.f32.mrb[71].mxu1  ;;  %v17216_v40 = vmax.f32 %v13414_v63, 0.0  ;;  %v1949_v18 = vmul.f32 %v13149_v14, %v13090_v33  ;;  %4557 = vmatprep.subr.bf16.mxu0 %v11733_v2 }
 0x1c1   : > { %17213 = vst [vmem:[#allocation53_spill] sm:$0xff] %v13491_v34  ;;  %17214 = vst [vmem:[#allocation54_spill] sm:$0xff] %v13501_v21  ;;  %v3302_v55 = vmax.f32 %v17215_v1, %v3078_v51  ;;  %v13509_v11 = vpop.permute.xlu1 %10884  ;;  %v11730_v34 = vld [vmem:[%s16985_s4 + $0x4c] ss:$16 sps:$4 sm:$0xff]   ;;  %v1953_v25 = vmul.f32 %v13149_v14, %v13111_v39  ;;  %v10871_v51 = vunpack.i.l.bf16 %v13452_v23  ;;  %v13522_v1 = vpop.permute.xlu0 %10889  ;;  %v2011_v33 = vmul.f32 %v12747_v4, %v1742_v54 }
 0x1c2   : > { %v11093_v17 = vpack.i.bf16 %v17217_v30, %v17216_v40  ;;  %v1435_v40 = vpop.f32.mrb[71].mxu0  ;;  %v11728_v30 = vld [vmem:[%s16985_s4 + $0x48] ss:$16 sps:$4 sm:$0xff]   ;;  %v3408_v60 = vmax.f32 %v3296_v15, %v3300_v19  ;;  %v11098_v39 = vpack.i.bf16 %v2474_v58, %v2473_v42  ;;  %v2477_v23 = vmax.f32 %v13473_v50, 0.0  ;;  %4730 = vmatprep.subr.bf16.mxu1 %v11730_v34 }
 0x1c3   : > { %v3410_v63 = vmax.f32 %v3298_v49, %v3302_v55  ;;  %v2478_v29 = vmax.f32 %v13484_v37, 0.0  ;;  %v2012_v56 = vmul.f32 %v12757_v7, %v1744_v62  ;;  %v11736_v49 = vld [vmem:[%s16985_s4 + $0x6c] ss:$16 sps:$4 sm:$0xff]   ;;  %v17054_v54 = vmax.f32 %v13481_v47, 0.0  ;;  %4731 = vmatpush1.bf16.msra.mxu1 %v11728_v30  ;;  %4558 = vmatpush1.bf16.msra.mxu0 %v11731_v10 }
 0x1c4   : > { %11094 = vrot.lane.b32.xlu1 %v11093_v17, %s12174_s29  ;;  %v17219_v15 = vunpack.i.l.bf16 %v13387_v16  ;;  %11099 = vrot.lane.b32.xlu0 %v11098_v39, %s12174_s29  ;;  %v17221_v59 = vunpack.i.l.bf16 %v13360_v35  ;;  %v2015_v16 = vmul.f32 %v12747_v4, %v1746_v20  ;;  %v13563_v34 = vadd.f32 %v13169_v32, %v1949_v18  ;;  %v11734_v20 = vld [vmem:[%s16985_s4 + $0x68] ss:$16 sps:$4 sm:$0xff]  }
 0x1c5   : > { %v13546_v58 = vpack.c.bf16 %v3410_v63, %v3408_v60  ;;  %v1752_v62 = vpop.f32.mrb[72].mxu1  ;;  %v13549_v37 = vpop.permute.xlu1 %10894  ;;  %v13566_v39 = vadd.f32 %v13169_v32, %v1953_v25  ;;  %v2257_v35 = vadd.f32 %v12763_v8, %v2011_v33  ;;  %v2258_v18 = vadd.f32 %v12773_v12, %v2012_v56  ;;  %4732 = vmatprep.subr.bf16.mxu1 %v11736_v49 }
 0x1c6   : > { %v3073_v42 = vsel %vm1140_vm0, %v10872_v3, %v17219_v15  ;;  %v3071_v55 = vsel %vm1140_vm0, %v10871_v51, %v17221_v59  ;;  %v2016_v3 = vmul.f32 %v12757_v7, %v1748_v46  ;;  %v13557_v17 = vpop.f32.mrb[72].mxu0  ;;  %v13559_v63 = vpop.f32.mrb[73].mxu1  ;;  %17223 = vst [vmem:[#allocation58_spill] sm:$0xff] %v13563_v34  ;;  %v10887_v25 = vunpack.i.h.bf16 %v13509_v11 }
 0x1c7   : > { %17220 = vst [vmem:[#allocation56_spill] sm:$0xff] %v13546_v58  ;;  %17222 = vst [vmem:[#allocation57_spill] sm:$0xff] %v13557_v17  ;;  %v13569_v51 = vpop.f32.mrb[74].mxu1  ;;  %9584 = vmatprep.mubr.msk.bf16.mxu0 %vm3884_vm1, %v13546_v58  ;;  %9597 = vmatprep.mubr.msk.bf16.mxu1 %vm3884_vm1, %v13546_v58  ;;  %v13575_v46 = vpop.f32.mrb[73].mxu0  ;;  %v10886_v30 = vunpack.i.l.bf16 %v13509_v11  ;;  %v11103_v2 = vpack.i.bf16 %v2478_v29, %v2477_v23  ;;  %v17226_v59 = vmax.f32 %v13230_v22, 0.0  ;;  %v17227_v19 = vmax.f32 %v13188_v27, 0.0 }
 0x1c8   : > { %17224 = vst [vmem:[#allocation59_spill] sm:$0xff] %v13566_v39  ;;  %v13583_v33 = vpop.permute.xlu0 %10899  ;;  %v13585_v15 = vpop.f32.mrb[74].mxu0  ;;  %v2010_v56 = vmul.f32 %v12767_v9, %v13478_v44  ;;  %v17228_v11 = vmax.f32 %v13501_v21, 0.0  ;;  %v2261_v10 = vadd.f32 %v12763_v8, %v2015_v16  ;;  %v2262_v49 = vadd.f32 %v12773_v12, %v2016_v3  ;;  %4733 = vmatpush1.bf16.msra.mxu1 %v11734_v20  ;;  %v17275_v39 = vld [vmem:[#allocation8_spill] sm:$0xff] }
 0x1c9   : > { %17225 = vst [vmem:[#allocation60_spill] sm:$0xff] %v13585_v15  ;;  %v3297_v60 = vmax.f32 %v17226_v59, %v3073_v42  ;;  %v3295_v50 = vmax.f32 %v17227_v19, %v3071_v55  ;;  %v1758_v23 = vpop.f32.mrb[75].mxu1  ;;  %v13597_v58 = vpop.f32.mrb[75].mxu0  ;;  %v17229_v22 = vunpack.i.l.bf16 %v13461_v36  ;;  %v17230_v42 = vunpack.i.l.bf16 %v13419_v31  ;;  %11104 = vrot.lane.b32.xlu1 %v11103_v2, %s12174_s29 }
 0x1ca   : > { %v11108_v29 = vpack.i.bf16 %v17228_v11, %v17054_v54  ;;  %v17231_v55 = vmax.f32 %v13236_v38, 0.0  ;;  %v17232_v11 = vmax.f32 %v13233_v28, 0.0  ;;  %v2014_v3 = vmul.f32 %v12767_v9, %v1435_v40 }
 0x1cb   : > { %v3077_v27 = vsel %vm1140_vm0, %v10887_v25, %v17229_v22  ;;  %v3075_v44 = vsel %vm1140_vm0, %v10886_v30, %v17230_v42  ;;  %v13615_v36 = vpop.permute.xlu1 %10909  ;;  %v1957_v31 = vmul.f32 %v13149_v14, %v13119_v41  ;;  %v2481_v25 = vmax.f32 %v2257_v35, 0.0 }
 0x1cc   : > { %v3301_v59 = vmax.f32 %v17231_v55, %v3077_v27  ;;  %v3299_v16 = vmax.f32 %v17232_v11, %v3075_v44  ;;  %11109 = vrot.lane.b32.xlu0 %v11108_v29, %s12174_s29  ;;  %v2482_v30 = vmax.f32 %v2258_v18, 0.0  ;;  %v2019_v2 = vmul.f32 %v12747_v4, %v1752_v62  ;;  %v13620_v22 = vpop.permute.xlu0 %10904 }
 0x1cd   : > { %v1961_v28 = vmul.f32 %v13149_v14, %v13145_v13  ;;  %v13625_v29 = vpop.f32.mrb[76].mxu1  ;;  %v13627_v42 = vpop.f32.mrb[76].mxu0  ;;  %v2485_v20 = vmax.f32 %v2261_v10, 0.0  ;;  %v13630_v41 = vadd.f32 %v12796_v26, %v2010_v56  ;;  %v10892_v35 = vunpack.i.h.bf16 %v13522_v1 }
 0x1ce   : > { %v3409_v40 = vmax.f32 %v3297_v60, %v3301_v59  ;;  %v3407_v27 = vmax.f32 %v3295_v50, %v3299_v16  ;;  %17233 = vst [vmem:[#allocation61_spill] sm:$0xff] %v13627_v42  ;;  %v10891_v62 = vunpack.i.l.bf16 %v13522_v1  ;;  %v13634_v18 = vpop.f32.mrb[77].mxu1  ;;  %v13636_v44 = vpop.f32.mrb[77].mxu0  ;;  %v2486_v55 = vmax.f32 %v2262_v49, 0.0  ;;  %v11737_v1 = vld [vmem:[%s16985_s4 + $0x60] ss:$16 sps:$4 sm:$0xff]  }
 0x1cf   : > { %17234 = vst [vmem:[#allocation62_spill] sm:$0xff] %v13630_v41  ;;  %v13641_v50 = vadd.f32 %v12796_v26, %v2014_v3  ;;  %v10897_v60 = vunpack.i.h.bf16 %v13549_v37  ;;  %v13644_v10 = vpop.f32.mrb[78].mxu1  ;;  %v13646_v56 = vpop.permute.xlu1 %10914  ;;  %v11739_v59 = vld [vmem:[%s16985_s4 + $0x64] ss:$16 sps:$4 sm:$0xff]   ;;  %v13655_v49 = vadd.f32 %v12763_v8, %v2019_v2  ;;  %v10896_v11 = vunpack.i.l.bf16 %v13549_v37 }
 0x1d0   : > { %v13638_v13 = vpack.c.bf16 %v3409_v40, %v3407_v27  ;;  %v2020_v16 = vmul.f32 %v12757_v7, %v13559_v63  ;;  %v11113_v3 = vpack.i.bf16 %v2482_v30, %v2481_v25  ;;  %v13660_v40 = vpop.f32.mrb[78].mxu0  ;;  %v13662_v27 = vpop.f32.mrb[79].mxu1  ;;  %v10902_v54 = vunpack.i.h.bf16 %v13583_v33  ;;  %4559 = vmatprep.subr.bf16.mxu0 %v11739_v59 }
 0x1d1   : > { %17236 = vst [vmem:[#allocation64_spill] sm:$0xff] %v13641_v50  ;;  %17237 = vst [vmem:[#allocation65_spill] sm:$0xff] %v13660_v40  ;;  %v2023_v38 = vmul.f32 %v12747_v4, %v13569_v51  ;;  %v2024_v19 = vmul.f32 %v12757_v7, %v1758_v23  ;;  %v10907_v2 = vunpack.i.h.bf16 %v13620_v22  ;;  %v13671_v37 = vpop.permute.xlu0 %10919  ;;  %v13673_v63 = vpop.f32.mrb[79].mxu0  ;;  %v13676_v25 = vadd.f32 %v13169_v32, %v1957_v31  ;;  %v11740_v31 = vld [vmem:[%s16985_s4 + $0x88] ss:$16 sps:$4 sm:$0xff]  }
 0x1d2   : > { %17235 = vst [vmem:[#allocation63_spill] sm:$0xff] %v13638_v13  ;;  %3970 = vmatmul.mubr.bf16.gmra.mrb[116].mxu0 %v13638_v13  ;;  %4143 = vmatmul.mubr.bf16.gmra.mrb[116].mxu1 %v13638_v13  ;;  %v13679_v30 = vadd.f32 %v13169_v32, %v1961_v28  ;;  %v2266_v51 = vadd.f32 %v12773_v12, %v2020_v16  ;;  %v17057_v23 = vunpack.i.l.bf16 %v13620_v22  ;;  %v10901_v42 = vunpack.i.l.bf16 %v13583_v33  ;;  %v11742_v28 = vld [vmem:[%s16985_s4 + $0x8c] ss:$16 sps:$4 sm:$0xff]  }
 0x1d3   : > { %17238 = vst [vmem:[#allocation66_spill] sm:$0xff] %v13676_v25  ;;  %11114 = vrot.lane.b32.xlu0 %v11113_v3, %s12174_s29  ;;  %v11118_v15 = vpack.i.bf16 %v2486_v55, %v2485_v20  ;;  %4560 = vmatpush1.bf16.msra.mxu0 %v11737_v1  ;;  %v3080_v16 = vsel %vm1140_vm0, %v10891_v62, %v10892_v35  ;;  %v13700_v20 = vpop.permute.xlu1 %10924  ;;  %v2489_v55 = vmax.f32 %v13655_v49, 0.0  ;;  %v10912_v49 = vunpack.i.h.bf16 %v13615_v36 }
 0x1d4   : > { %17239 = vst [vmem:[#allocation67_spill] sm:$0xff] %v13679_v30  ;;  %v3082_v59 = vsel %vm1140_vm0, %v10896_v11, %v10897_v60  ;;  %v2018_v3 = vmul.f32 %v12767_v9, %v13575_v46  ;;  %v3084_v33 = vsel %vm1140_vm0, %v17057_v23, %v10907_v2  ;;  %v3081_v1 = vsel %vm1140_vm0, %v10902_v54, %v10896_v11 }
 0x1d5   : > { %v13705_v13 = vadd.f32 %v12763_v8, %v2023_v38  ;;  %v13708_v35 = vadd.f32 %v12773_v12, %v2024_v19  ;;  %11119 = vrot.lane.b32.xlu1 %v11118_v15, %s12174_s29  ;;  %v13711_v60 = vpop.f32.mrb[80].mxu1  ;;  %v13713_v46 = vpop.permute.xlu0 %10929  ;;  %4734 = vmatprep.subr.bf16.mxu1 %v11742_v28  ;;  %v2490_v2 = vmax.f32 %v2266_v51, 0.0  ;;  %v2022_v23 = vmul.f32 %v12767_v9, %v13597_v58 }
 0x1d6   : > { %v10911_v54 = vunpack.i.l.bf16 %v13615_v36  ;;  %v13719_v38 = vpop.f32.mrb[80].mxu0  ;;  %v13721_v11 = vpop.f32.mrb[81].mxu1  ;;  %4735 = vmatpush1.bf16.msra.mxu1 %v11740_v31  ;;  %v17241_v15 = vmax.f32 %v12894_v5, 0.0  ;;  %v3079_v40 = vsel %vm1140_vm0, %v10901_v42, %v10891_v62  ;;  %v17242_v28 = vmax.f32 %v12925_v48, 0.0  ;;  %v11743_v31 = vld [vmem:[%s16985_s4 + $0x80] ss:$16 sps:$4 sm:$0xff]  }
 0x1d7   : > { %17240 = vst [vmem:[#allocation68_spill] sm:$0xff] %v13719_v38  ;;  %v17243_v17 = vmax.f32 %v13630_v41, 0.0  ;;  %v17244_v58 = vmax.f32 %v13641_v50, 0.0  ;;  %v13732_v47 = vpop.f32.mrb[82].mxu1  ;;  %v13734_v36 = vpop.f32.mrb[81].mxu0  ;;  %v17245_v48 = vmax.f32 %v12897_v6, 0.0 }
 0x1d8   : > { %v3304_v19 = vmax.f32 %v17241_v15, %v3080_v16  ;;  %v3308_v51 = vmax.f32 %v17242_v28, %v3084_v33  ;;  %v11745_v5 = vld [vmem:[%s16985_s4 + $0x84] ss:$16 sps:$4 sm:$0xff]   ;;  %v17246_v62 = vmax.f32 %v13252_v45, 0.0  ;;  %v3086_v33 = vsel %vm1140_vm0, %v10911_v54, %v10912_v49  ;;  %v13750_v15 = vpop.f32.mrb[82].mxu0  ;;  %v13752_v28 = vpop.f32.mrb[83].mxu1 }
 0x1d9   : > { %v11123_v21 = vpack.i.bf16 %v17244_v58, %v17243_v17  ;;  %v3306_v42 = vmax.f32 %v17245_v48, %v3082_v59  ;;  %v13747_v17 = vadd.f32 %v12796_v26, %v2018_v3  ;;  %17248 = vst [vmem:[#allocation70_spill] sm:$0xff] %v13750_v15  ;;  %v2493_v58 = vmax.f32 %v13705_v13, 0.0  ;;  %v13760_v59 = vpop.f32.mrb[83].mxu0  ;;  %4561 = vmatprep.subr.bf16.mxu0 %v11745_v5 }
 0x1da   : > { %v3305_v16 = vmax.f32 %v17246_v62, %v3081_v1  ;;  %v2494_v38 = vmax.f32 %v13708_v35, 0.0  ;;  %v17249_v50 = vmax.f32 %v12929_v53, 0.0  ;;  %v10917_v45 = vunpack.i.h.bf16 %v13646_v56  ;;  %4562 = vmatpush1.bf16.msra.mxu0 %v11743_v31  ;;  %v11746_v53 = vld [vmem:[%s16985_s4 + $0xa8] ss:$16 sps:$4 sm:$0xff]  }
 0x1db   : > { %17247 = vst [vmem:[#allocation69_spill] sm:$0xff] %v13747_v17  ;;  %11124 = vrot.lane.b32.xlu1 %v11123_v21, %s12174_s29  ;;  %v13763_v3 = vadd.f32 %v12796_v26, %v2022_v23  ;;  %v2027_v1 = vmul.f32 %v12747_v4, %v13625_v29  ;;  %v10916_v13 = vunpack.i.l.bf16 %v13646_v56  ;;  %v11128_v49 = vpack.i.bf16 %v2490_v2, %v2489_v55  ;;  %v11748_v21 = vld [vmem:[%s16985_s4 + $0xac] ss:$16 sps:$4 sm:$0xff]   ;;  %v13777_v29 = vpop.permute.xlu1 %10939 }
 0x1dc   : > { %v3310_v6 = vmax.f32 %v17249_v50, %v3086_v33  ;;  %v3412_v50 = vmax.f32 %v3304_v19, %v3308_v51  ;;  %v2028_v23 = vmul.f32 %v12757_v7, %v13634_v18  ;;  %v3085_v5 = vsel %vm1140_vm0, %v10917_v45, %v10911_v54  ;;  %v13788_v51 = vpop.permute.xlu0 %10934  ;;  %4736 = vmatprep.subr.bf16.mxu1 %v11748_v21 }
 0x1dd   : > { %17250 = vst [vmem:[#allocation71_spill] sm:$0xff] %v13763_v3  ;;  %v2031_v55 = vmul.f32 %v12747_v4, %v13644_v10  ;;  %v17251_v2 = vmax.f32 %v13284_v43, 0.0  ;;  %v17252_v48 = vunpack.i.l.bf16 %v13620_v22  ;;  %11129 = vrot.lane.b32.xlu0 %v11128_v49, %s12174_s29  ;;  %v17253_v18 = vmax.f32 %v13249_v0, 0.0  ;;  %v13798_v33 = vpop.f32.mrb[84].mxu1  ;;  %v13800_v22 = vpop.f32.mrb[84].mxu0  ;;  %4737 = vmatpush1.bf16.msra.mxu1 %v11746_v53 }
 0x1de   : > { %v3414_v35 = vmax.f32 %v3306_v42, %v3310_v6  ;;  %v17255_v62 = vmax.f32 %v13279_v57, 0.0  ;;  %v2032_v43 = vmul.f32 %v12757_v7, %v13662_v27  ;;  %17256 = vst [vmem:[#allocation73_spill] sm:$0xff] %v13800_v22  ;;  %v17062_v6 = vmax.f32 %v13747_v17, 0.0  ;;  %v13807_v49 = vpop.f32.mrb[85].mxu0 }
 0x1df   : > { %v3309_v31 = vmax.f32 %v17251_v2, %v3085_v5  ;;  %v3083_v19 = vsel %vm1140_vm0, %v10916_v13, %v17252_v48  ;;  %v3303_v54 = vmax.f32 %v17253_v18, %v3079_v40  ;;  %v17061_v45 = vmax.f32 %v13763_v3, 0.0  ;;  %v13805_v13 = vpop.f32.mrb[85].mxu1  ;;  %v17261_v18 = vld [vmem:[#allocation27_spill] sm:$0xff] }
 0x1e0   : > { %v13792_v42 = vpack.c.bf16 %v3414_v35, %v3412_v50  ;;  %v3307_v10 = vmax.f32 %v17255_v62, %v3083_v19  ;;  %v2273_v0 = vadd.f32 %v12763_v8, %v2027_v1  ;;  %v2274_v57 = vadd.f32 %v12773_v12, %v2028_v23  ;;  %v13814_v53 = vpop.f32.mrb[86].mxu1  ;;  %v13816_v35 = vpop.permute.xlu1 %10944  ;;  %v17262_v62 = vld [vmem:[#allocation28_spill] sm:$0xff] }
 0x1e1   : > { %v3413_v40 = vmax.f32 %v3305_v16, %v3309_v31  ;;  %v2026_v27 = vmul.f32 %v12767_v9, %v13636_v44  ;;  %v11133_v50 = vpack.i.bf16 %v2494_v38, %v2493_v58  ;;  %v1965_v1 = vmul.f32 %v13149_v14, %v13155_v52  ;;  %v13826_v44 = vpop.f32.mrb[86].mxu0  ;;  %v13828_v38 = vpop.f32.mrb[87].mxu1  ;;  %v17258_v58 = vld [vmem:[#allocation23_spill] sm:$0xff]  ;;  %v17259_v31 = vld [vmem:[#allocation24_spill] sm:$0xff] }
 0x1e2   : > { %17254 = vst [vmem:[#allocation72_spill] sm:$0xff] %v13792_v42  ;;  %v3411_v21 = vmax.f32 %v3303_v54, %v3307_v10  ;;  %9585 = vmatprep.mubr.msk.bf16.mxu0 %vm3884_vm1, %v13792_v42  ;;  %v2277_v5 = vadd.f32 %v12763_v8, %v2031_v55  ;;  %v2030_v23 = vmul.f32 %v12767_v9, %v13673_v63  ;;  %17257 = vst [vmem:[#allocation74_spill] sm:$0xff] %v13826_v44  ;;  %v13838_v63 = vpop.permute.xlu0 %10949  ;;  %v13840_v55 = vpop.f32.mrb[87].mxu0 }
 0x1e3   : > { %9598 = vmatprep.mubr.msk.bf16.mxu1 %vm3884_vm1, %v13792_v42  ;;  %v1969_v2 = vmul.f32 %v13149_v14, %v17258_v58  ;;  %v1973_v48 = vmul.f32 %v13149_v14, %v17259_v31  ;;  %v2278_v52 = vadd.f32 %v12773_v12, %v2032_v43  ;;  %11134 = vrot.lane.b32.xlu1 %v11133_v50, %s12174_s29  ;;  %v2497_v58 = vmax.f32 %v2273_v0, 0.0 }
 0x1e4   : > { %v13834_v19 = vpack.c.bf16 %v3413_v40, %v3411_v21  ;;  %v1977_v54 = vmul.f32 %v13149_v14, %v17261_v18  ;;  %v1981_v10 = vmul.f32 %v13149_v14, %v17262_v62  ;;  %v11138_v40 = vpack.i.bf16 %v17061_v45, %v17062_v6  ;;  %v13865_v62 = vpop.permute.xlu1 %10954 }
 0x1e5   : > { %v2498_v21 = vmax.f32 %v2274_v57, 0.0  ;;  %v13851_v43 = vadd.f32 %v12796_v26, %v2026_v27  ;;  %v10922_v50 = vunpack.i.h.bf16 %v13671_v37  ;;  %v2501_v18 = vmax.f32 %v2277_v5, 0.0  ;;  %v13876_v16 = vpop.f32.mrb[88].mxu1  ;;  %v13892_v56 = vpop.f32.mrb[88].mxu0 }
 0x1e6   : > { %17260 = vst [vmem:[#allocation23_spill] sm:$0xff] %v13834_v19  ;;  %3980 = vmatmul.mubr.bf16.gmra.mrb[120].mxu0 %v13834_v19  ;;  %4153 = vmatmul.mubr.bf16.gmra.mrb[120].mxu1 %v13834_v19  ;;  %v13858_v0 = vadd.f32 %v12796_v26, %v2030_v23  ;;  %v2035_v57 = vmul.f32 %v12747_v4, %v13711_v60  ;;  %v2502_v23 = vmax.f32 %v2278_v52, 0.0  ;;  %v11749_v60 = vld [vmem:[%s16985_s4 + $0xa0] ss:$16 sps:$4 sm:$0xff]   ;;  %v10932_v52 = vunpack.i.h.bf16 %v13713_v46  ;;  %v13894_v31 = vpop.f32.mrb[89].mxu1  ;;  %v13905_v3 = vpop.f32.mrb[89].mxu0 }
 0x1e7   : > { %17263 = vst [vmem:[#allocation24_spill] sm:$0xff] %v13851_v43  ;;  %11139 = vrot.lane.b32.xlu0 %v11138_v40, %s12174_s29  ;;  %v2036_v27 = vmul.f32 %v12757_v7, %v13721_v11  ;;  %v13868_v45 = vadd.f32 %v13169_v32, %v1965_v1  ;;  %v13871_v6 = vadd.f32 %v13169_v32, %v1969_v2  ;;  %v13878_v40 = vpop.permute.xlu0 %10959  ;;  %v11751_v11 = vld [vmem:[%s16985_s4 + $0xa4] ss:$16 sps:$4 sm:$0xff]   ;;  %v10927_v2 = vunpack.i.h.bf16 %v13700_v20  ;;  %v13903_v15 = vpop.f32.mrb[90].mxu1 }
 0x1e8   : > { %17264 = vst [vmem:[#allocation27_spill] sm:$0xff] %v13858_v0  ;;  %v13874_v5 = vadd.f32 %v13169_v32, %v1973_v48  ;;  %v13887_v1 = vadd.f32 %v13169_v32, %v1977_v54  ;;  %v10926_v48 = vunpack.i.l.bf16 %v13700_v20  ;;  %17269 = vst [vmem:[#allocation78_spill] sm:$0xff] %v13892_v56  ;;  %v13897_v19 = vadd.f32 %v13169_v32, %v1981_v10  ;;  %v13911_v41 = vpop.f32.mrb[90].mxu0  ;;  %v13913_v42 = vpop.f32.mrb[91].mxu1 }
 0x1e9   : > { %17265 = vst [vmem:[#allocation28_spill] sm:$0xff] %v13868_v45  ;;  %17266 = vst [vmem:[#allocation75_spill] sm:$0xff] %v13871_v6  ;;  %v17271_v44 = vunpack.i.l.bf16 %v13671_v37  ;;  %v11143_v22 = vpack.i.bf16 %v2498_v21, %v2497_v58  ;;  %4563 = vmatprep.subr.bf16.mxu0 %v11751_v11  ;;  %v2281_v56 = vadd.f32 %v12763_v8, %v2035_v57  ;;  %v10937_v10 = vunpack.i.h.bf16 %v13788_v51  ;;  %v13921_v57 = vpop.f32.mrb[91].mxu0 }
 0x1ea   : > { %17267 = vst [vmem:[#allocation76_spill] sm:$0xff] %v13874_v5  ;;  %17268 = vst [vmem:[#allocation77_spill] sm:$0xff] %v13887_v1  ;;  %v2282_v17 = vadd.f32 %v12773_v12, %v2036_v27  ;;  %4564 = vmatpush1.bf16.msra.mxu0 %v11749_v60  ;;  %v2040_v58 = vmul.f32 %v12757_v7, %v13752_v28  ;;  %v10936_v21 = vunpack.i.l.bf16 %v13788_v51  ;;  %v11752_v27 = vld [vmem:[%s16985_s4 + $0xc8] ss:$16 sps:$4 sm:$0xff]   ;;  %v11754_v60 = vld [vmem:[%s16985_s4 + $0xcc] ss:$16 sps:$4 sm:$0xff]   ;;  %v10931_v11 = vunpack.i.l.bf16 %v13713_v46 }
 0x1eb   : > { %17270 = vst [vmem:[#allocation79_spill] sm:$0xff] %v13897_v19  ;;  %v3088_v54 = vsel %vm1140_vm0, %v17271_v44, %v10922_v50  ;;  %17272 = vst [vmem:[#allocation80_spill] sm:$0xff] %v13911_v41  ;;  %v2039_v44 = vmul.f32 %v12747_v4, %v13732_v47  ;;  %11144 = vrot.lane.b32.xlu0 %v11143_v22, %s12174_s29  ;;  %v11148_v50 = vpack.i.bf16 %v2502_v23, %v2501_v18  ;;  %v13940_v41 = vpop.permute.xlu1 %10969  ;;  %v13946_v61 = vpop.permute.xlu0 %10964 }
 0x1ec   : > { %v3090_v47 = vsel %vm1140_vm0, %v10926_v48, %v10927_v2  ;;  %v3089_v22 = vsel %vm1140_vm0, %v10932_v52, %v10926_v48  ;;  %v10942_v28 = vunpack.i.h.bf16 %v13777_v29  ;;  %v2034_v51 = vmul.f32 %v12767_v9, %v13734_v36  ;;  %4738 = vmatprep.subr.bf16.mxu1 %v11754_v60  ;;  %v17273_v2 = vld [vmem:[#allocation6_spill] sm:$0xff] }
 0x1ed   : > { %v3092_v18 = vsel %vm1140_vm0, %v10936_v21, %v10937_v10  ;;  %11149 = vrot.lane.b32.xlu1 %v11148_v50, %s12174_s29  ;;  %v2038_v23 = vmul.f32 %v12767_v9, %v13760_v59  ;;  %v10941_v20 = vunpack.i.l.bf16 %v13777_v29  ;;  %v17274_v48 = vmax.f32 %v17273_v2, 0.0  ;;  %4739 = vmatpush1.bf16.msra.mxu1 %v11752_v27  ;;  %v17282_v27 = vld [vmem:[#allocation36_spill] sm:$0xff] }
 0x1ee   : > { %v2505_v52 = vmax.f32 %v2281_v56, 0.0  ;;  %v2506_v30 = vmax.f32 %v2282_v17, 0.0  ;;  %v17276_v25 = vmax.f32 %v17275_v39, 0.0  ;;  %v2285_v10 = vadd.f32 %v12763_v8, %v2039_v44  ;;  %v13957_v17 = vpop.f32.mrb[92].mxu0  ;;  %v11755_v39 = vld [vmem:[%s16985_s4 + $0xc0] ss:$16 sps:$4 sm:$0xff]  }
 0x1ef   : > { %v3312_v46 = vmax.f32 %v17274_v48, %v3088_v54  ;;  %v2286_v59 = vadd.f32 %v12773_v12, %v2040_v58  ;;  %v3094_v29 = vsel %vm1140_vm0, %v10941_v20, %v10942_v28  ;;  %v17277_v50 = vmax.f32 %v13851_v43, 0.0  ;;  %v13955_v54 = vpop.f32.mrb[92].mxu1  ;;  %17279 = vst [vmem:[#allocation6_spill] sm:$0xff] %v13957_v17  ;;  %v17280_v56 = vld [vmem:[#allocation7_spill] sm:$0xff]  ;;  %v13976_v34 = vpop.f32.mrb[93].mxu0 }
 0x1f0   : > { %v3316_v36 = vmax.f32 %v17276_v25, %v3092_v18  ;;  %v17278_v60 = vmax.f32 %v13858_v0, 0.0  ;;  %v11757_v25 = vld [vmem:[%s16985_s4 + $0xc4] ss:$16 sps:$4 sm:$0xff]   ;;  %v17281_v44 = vmax.f32 %v17280_v56, 0.0  ;;  %v17283_v28 = vmax.f32 %v17282_v27, 0.0  ;;  %v13974_v43 = vpop.f32.mrb[93].mxu1 }
 0x1f1   : > { %v17284_v48 = vunpack.i.l.bf16 %v13671_v37  ;;  %v13979_v24 = vadd.f32 %v12796_v26, %v2034_v51  ;;  %v13982_v56 = vadd.f32 %v12796_v26, %v2038_v23  ;;  %v10947_v37 = vunpack.i.h.bf16 %v13816_v35  ;;  %4565 = vmatprep.subr.bf16.mxu0 %v11757_v25  ;;  %v13993_v27 = vpop.f32.mrb[94].mxu0 }
 0x1f2   : > { %v11153_v2 = vpack.i.bf16 %v17278_v60, %v17277_v50  ;;  %v3314_v58 = vmax.f32 %v17281_v44, %v3090_v47  ;;  %v3313_v18 = vmax.f32 %v17283_v28, %v3089_v22  ;;  %v17285_v60 = vld [vmem:[#allocation9_spill] sm:$0xff]  ;;  %v2043_v47 = vmul.f32 %v12747_v4, %v13798_v33  ;;  %v13988_v22 = vpop.f32.mrb[94].mxu1  ;;  %17289 = vst [vmem:[#allocation36_spill] sm:$0xff] %v13993_v27  ;;  %v11758_v33 = vld [vmem:[%s16985_s4 + $0xe8] ss:$16 sps:$4 sm:$0xff]  }
 0x1f3   : > { %v3087_v50 = vsel %vm1140_vm0, %v10931_v11, %v17284_v48  ;;  %v17286_v17 = vmax.f32 %v17285_v60, 0.0  ;;  %17287 = vst [vmem:[#allocation8_spill] sm:$0xff] %v13979_v24  ;;  %17288 = vst [vmem:[#allocation7_spill] sm:$0xff] %v13982_v56  ;;  %v13990_v11 = vpop.permute.xlu1 %10974  ;;  %v10946_v51 = vunpack.i.l.bf16 %v13816_v35  ;;  %v11158_v44 = vpack.i.bf16 %v2506_v30, %v2505_v52  ;;  %v13995_v23 = vpop.f32.mrb[95].mxu1  ;;  %4566 = vmatpush1.bf16.msra.mxu0 %v11755_v39 }
 0x1f4   : > { %11154 = vrot.lane.b32.xlu1 %v11153_v2, %s12174_s29  ;;  %v11760_v2 = vld [vmem:[%s16985_s4 + $0xec] ss:$16 sps:$4 sm:$0xff]   ;;  %v2509_v28 = vmax.f32 %v2285_v10, 0.0  ;;  %v2510_v25 = vmax.f32 %v2286_v59, 0.0  ;;  %v3093_v30 = vsel %vm1140_vm0, %v10947_v37, %v10941_v20  ;;  %v14006_v35 = vpop.f32.mrb[95].mxu0  ;;  %v17293_v10 = vld [vmem:[#allocation35_spill] sm:$0xff]  ;;  %v2047_v20 = vmul.f32 %v12747_v4, %v13814_v53 }
 0x1f5   : > { %v3318_v0 = vmax.f32 %v17286_v17, %v3094_v29  ;;  %v3416_v29 = vmax.f32 %v3312_v46, %v3316_v36  ;;  %v17291_v36 = vld [vmem:[#allocation40_spill] sm:$0xff]  ;;  %v3091_v48 = vsel %vm1140_vm0, %v10946_v51, %v10936_v21  ;;  %11159 = vrot.lane.b32.xlu0 %v11158_v44, %s12174_s29  ;;  %4740 = vmatprep.subr.bf16.mxu1 %v11760_v2  ;;  %v17294_v59 = vmax.f32 %v17293_v10, 0.0  ;;  %v17295_v37 = vld [vmem:[#allocation37_spill] sm:$0xff] }
 0x1f6   : > { %v17292_v39 = vmax.f32 %v17291_v36, 0.0  ;;  %v17296_v46 = vmax.f32 %v17295_v37, 0.0  ;;  %4741 = vmatpush1.bf16.msra.mxu1 %v11758_v33  ;;  %v2048_v51 = vmul.f32 %v12757_v7, %v13828_v38  ;;  %v2042_v33 = vmul.f32 %v12767_v9, %v13807_v49 }
 0x1f7   : > { %v3418_v17 = vmax.f32 %v3314_v58, %v3318_v0  ;;  %v2044_v0 = vmul.f32 %v12757_v7, %v13805_v13  ;;  %v3311_v60 = vmax.f32 %v17294_v59, %v3087_v50  ;;  %v17079_v13 = vmax.f32 %v13979_v24, 0.0  ;;  %v14030_v50 = vpop.permute.xlu0 %10979 }
 0x1f8   : > { %v3317_v58 = vmax.f32 %v17292_v39, %v3093_v30  ;;  %v2289_v30 = vadd.f32 %v12763_v8, %v2043_v47  ;;  %v11163_v2 = vpack.i.bf16 %v2510_v25, %v2509_v28  ;;  %v14035_v47 = vpop.permute.xlu1 %10984  ;;  %v2294_v28 = vadd.f32 %v12773_v12, %v2048_v51 }
 0x1f9   : > { %v14009_v52 = vpack.c.bf16 %v3418_v17, %v3416_v29  ;;  %v3315_v29 = vmax.f32 %v17296_v46, %v3091_v48  ;;  %v17078_v17 = vmax.f32 %v13982_v56, 0.0  ;;  %v2290_v53 = vadd.f32 %v12773_v12, %v2044_v0 }
 0x1fa   : > { %v3417_v21 = vmax.f32 %v3313_v18, %v3317_v58  ;;  %v14037_v18 = vpop.f32.mrb[96].mxu1  ;;  %v14043_v58 = vpop.f32.mrb[96].mxu0  ;;  %v2293_v48 = vadd.f32 %v12763_v8, %v2047_v20  ;;  %11164 = vrot.lane.b32.xlu1 %v11163_v2, %s12174_s29  ;;  %v2046_v25 = vmul.f32 %v12767_v9, %v13840_v55  ;;  %v2513_v20 = vmax.f32 %v2289_v30, 0.0 }
 0x1fb   : > { %17290 = vst [vmem:[#allocation9_spill] sm:$0xff] %v14009_v52  ;;  %9586 = vmatprep.mubr.msk.bf16.mxu0 %vm3884_vm1, %v14009_v52  ;;  %9599 = vmatprep.mubr.msk.bf16.mxu1 %vm3884_vm1, %v14009_v52  ;;  %v3415_v44 = vmax.f32 %v3311_v60, %v3315_v29  ;;  %17297 = vst [vmem:[#allocation40_spill] sm:$0xff] %v14043_v58  ;;  %v14045_v0 = vpop.f32.mrb[97].mxu1  ;;  %v14056_v59 = vpop.f32.mrb[97].mxu0  ;;  %v17299_v60 = vld [vmem:[#allocation31_spill] sm:$0xff]  ;;  %v17300_v29 = vld [vmem:[#allocation32_spill] sm:$0xff]  ;;  %v14071_v2 = vadd.f32 %v12796_v26, %v2042_v33  ;;  %v10952_v39 = vunpack.i.h.bf16 %v13838_v63 }
 0x1fc   : > { %v14054_v10 = vpop.f32.mrb[98].mxu1  ;;  %v1985_v37 = vmul.f32 %v13149_v14, %v17299_v60  ;;  %v1989_v36 = vmul.f32 %v13149_v14, %v17300_v29  ;;  %v14066_v51 = vpop.f32.mrb[98].mxu0  ;;  %v2514_v55 = vmax.f32 %v2290_v53, 0.0  ;;  %v10957_v29 = vunpack.i.h.bf16 %v13865_v62 }
 0x1fd   : > { %v14048_v49 = vpack.c.bf16 %v3417_v21, %v3415_v44  ;;  %v11168_v21 = vpack.i.bf16 %v17078_v17, %v17079_v13  ;;  %17301 = vst [vmem:[#allocation37_spill] sm:$0xff] %v14066_v51  ;;  %v14068_v44 = vpop.f32.mrb[99].mxu1  ;;  %17302 = vst [vmem:[#allocation31_spill] sm:$0xff] %v14071_v2  ;;  %v14077_v30 = vpop.f32.mrb[99].mxu0  ;;  %v10956_v17 = vunpack.i.l.bf16 %v13865_v62  ;;  %v2051_v53 = vmul.f32 %v12747_v4, %v13876_v16  ;;  %v11763_v62 = vld [vmem:[%s16985_s4 + $0xe4] ss:$16 sps:$4 sm:$0xff]  }
 0x1fe   : > { %v2052_v33 = vmul.f32 %v12757_v7, %v13894_v31  ;;  %v2517_v13 = vmax.f32 %v2293_v48, 0.0  ;;  %v2518_v38 = vmax.f32 %v2294_v28, 0.0  ;;  %v14087_v46 = vadd.f32 %v12796_v26, %v2046_v25  ;;  %v14089_v60 = vpop.permute.xlu0 %10989  ;;  %v14106_v25 = vpop.permute.xlu1 %10999  ;;  %4567 = vmatprep.subr.bf16.mxu0 %v11763_v62 }
 0x1ff   : > { %17298 = vst [vmem:[#allocation35_spill] sm:$0xff] %v14048_v49  ;;  %3990 = vmatmul.mubr.bf16.gmra.mrb[124].mxu0 %v14048_v49  ;;  %4163 = vmatmul.mubr.bf16.gmra.mrb[124].mxu1 %v14048_v49  ;;  %v11761_v49 = vld [vmem:[%s16985_s4 + $0xe0] ss:$16 sps:$4 sm:$0xff]   ;;  %v14098_v16 = vadd.f32 %v13169_v32, %v1985_v37  ;;  %v14101_v31 = vadd.f32 %v13169_v32, %v1989_v36  ;;  %v10962_v48 = vunpack.i.h.bf16 %v13878_v40  ;;  %v17305_v58 = vunpack.i.l.bf16 %v13838_v63  ;;  %v14116_v36 = vpop.f32.mrb[100].mxu1  ;;  %v14118_v56 = vpop.f32.mrb[100].mxu0 }
 0x200   : > { %11169 = vrot.lane.b32.xlu0 %v11168_v21, %s12174_s29  ;;  %17303 = vst [vmem:[#allocation32_spill] sm:$0xff] %v14087_v46  ;;  %v2055_v28 = vmul.f32 %v12747_v4, %v13903_v15  ;;  %v17304_v21 = vld [vmem:[#allocation39_spill] sm:$0xff]  ;;  %v11173_v27 = vpack.i.bf16 %v2514_v55, %v2513_v20  ;;  %v3098_v15 = vsel %vm1140_vm0, %v10956_v17, %v10957_v29  ;;  %v14124_v19 = vpop.f32.mrb[101].mxu1  ;;  %v14126_v51 = vpop.f32.mrb[101].mxu0  ;;  %v10966_v20 = vunpack.i.l.bf16 %v13946_v61 }
 0x201   : > { %v14110_v52 = vmul.f32 %v13149_v14, %v17304_v21  ;;  %v3096_v37 = vsel %vm1140_vm0, %v17305_v58, %v10952_v39  ;;  %17306 = vst [vmem:[#allocation39_spill] sm:$0xff] %v14118_v56  ;;  %v2297_v24 = vadd.f32 %v12763_v8, %v2051_v53  ;;  %v2298_v1 = vadd.f32 %v12773_v12, %v2052_v33  ;;  %v14133_v29 = vpop.f32.mrb[102].mxu1  ;;  %v11764_v53 = vld [vmem:[%s16985_s4 + $0x108] ss:$16 sps:$4 sm:$0xff]  }
 0x202   : > { %v10967_v21 = vunpack.i.h.bf16 %v13946_v61  ;;  %17307 = vst [vmem:[#allocation81_spill] sm:$0xff] %v14124_v19  ;;  %17308 = vst [vmem:[#allocation82_spill] sm:$0xff] %v14126_v51  ;;  %4568 = vmatpush1.bf16.msra.mxu0 %v11761_v49  ;;  %v2056_v58 = vmul.f32 %v12757_v7, %v13913_v42  ;;  %v11178_v55 = vpack.i.bf16 %v2518_v38, %v2517_v13  ;;  %v11766_v49 = vld [vmem:[%s16985_s4 + $0x10c] ss:$16 sps:$4 sm:$0xff]   ;;  %v10972_v61 = vunpack.i.h.bf16 %v13940_v41  ;;  %v14147_v42 = vpop.f32.mrb[102].mxu0  ;;  %v14149_v13 = vpop.f32.mrb[103].mxu1 }
 0x203   : > { %17309 = vst [vmem:[#allocation83_spill] sm:$0xff] %v14133_v29  ;;  %v3097_v33 = vsel %vm1140_vm0, %v10962_v48, %v10956_v17  ;;  %v14144_v62 = vadd.f32 %v12763_v8, %v2055_v28  ;;  %17310 = vst [vmem:[#allocation84_spill] sm:$0xff] %v14147_v42  ;;  %v2050_v38 = vmul.f32 %v12767_v9, %v13905_v3  ;;  %v14158_v48 = vpop.permute.xlu0 %10994  ;;  %v14160_v28 = vpop.f32.mrb[103].mxu0  ;;  %4742 = vmatprep.subr.bf16.mxu1 %v11766_v49  ;;  %v17313_v42 = vld [vmem:[#allocation10_spill] sm:$0xff]  ;;  %v17315_v3 = vld [vmem:[#allocation12_spill] sm:$0xff] }
 0x204   : > { %11174 = vrot.lane.b32.xlu0 %v11173_v27, %s12174_s29  ;;  %v10961_v27 = vunpack.i.l.bf16 %v13878_v40  ;;  %17311 = vst [vmem:[#allocation85_spill] sm:$0xff] %v14149_v13  ;;  %v3100_v39 = vsel %vm1140_vm0, %v10966_v20, %v10967_v21  ;;  %11179 = vrot.lane.b32.xlu1 %v11178_v55, %s12174_s29  ;;  %v2054_v17 = vmul.f32 %v12767_v9, %v13921_v57  ;;  %v10971_v40 = vunpack.i.l.bf16 %v13940_v41  ;;  %v17317_v55 = vld [vmem:[#allocation11_spill] sm:$0xff] }
 0x205   : > { %17312 = vst [vmem:[#allocation86_spill] sm:$0xff] %v14160_v28  ;;  %v17314_v56 = vmax.f32 %v17313_v42, 0.0  ;;  %v2521_v5 = vmax.f32 %v2297_v24, 0.0  ;;  %v2522_v45 = vmax.f32 %v2298_v1, 0.0  ;;  %v17316_v13 = vmax.f32 %v17315_v3, 0.0  ;;  %4743 = vmatpush1.bf16.msra.mxu1 %v11764_v53  ;;  %v17324_v53 = vld [vmem:[#allocation13_spill] sm:$0xff]  ;;  %v14188_v42 = vpop.permute.xlu1 %11004 }
 0x206   : > { %v17318_v51 = vmax.f32 %v17317_v55, 0.0  ;;  %v2302_v57 = vadd.f32 %v12773_v12, %v2056_v58  ;;  %v3102_v41 = vsel %vm1140_vm0, %v10971_v40, %v10972_v61  ;;  %v17319_v19 = vmax.f32 %v14071_v2, 0.0  ;;  %v11767_v24 = vld [vmem:[%s16985_s4 + $0x100] ss:$16 sps:$4 sm:$0xff]   ;;  %v11769_v1 = vld [vmem:[%s16985_s4 + $0x104] ss:$16 sps:$4 sm:$0xff]  }
 0x207   : > { %v3320_v6 = vmax.f32 %v17314_v56, %v3096_v37  ;;  %v3324_v21 = vmax.f32 %v17316_v13, %v3100_v39  ;;  %v17320_v49 = vmax.f32 %v14087_v46, 0.0  ;;  %v17321_v56 = vld [vmem:[#allocation42_spill] sm:$0xff]  ;;  %v2525_v58 = vmax.f32 %v14144_v62, 0.0  ;;  %v14202_v62 = vpop.f32.mrb[104].mxu1  ;;  %4569 = vmatprep.subr.bf16.mxu0 %v11769_v1  ;;  %v17330_v1 = vld [vmem:[#allocation44_spill] sm:$0xff] }
 0x208   : > { %v3322_v29 = vmax.f32 %v17318_v51, %v3098_v15  ;;  %v17322_v37 = vmax.f32 %v17321_v56, 0.0  ;;  %v17323_v15 = vunpack.i.l.bf16 %v13838_v63  ;;  %v17325_v61 = vmax.f32 %v17324_v53, 0.0  ;;  %v14205_v56 = vpop.f32.mrb[105].mxu1  ;;  %4570 = vmatpush1.bf16.msra.mxu0 %v11767_v24 }
 0x209   : > { %v11183_v28 = vpack.i.bf16 %v17320_v49, %v17319_v19  ;;  %v14191_v13 = vadd.f32 %v12796_v26, %v2050_v38  ;;  %v14194_v3 = vadd.f32 %v12796_v26, %v2054_v17  ;;  %v10977_v63 = vunpack.i.h.bf16 %v13990_v11  ;;  %v14207_v17 = vpop.f32.mrb[104].mxu0 }
 0x20a   : > { %v3321_v51 = vmax.f32 %v17322_v37, %v3097_v33  ;;  %v3095_v39 = vsel %vm1140_vm0, %v10961_v27, %v17323_v15  ;;  %v3326_v19 = vmax.f32 %v17325_v61, %v3102_v41  ;;  %v2059_v33 = vmul.f32 %v12747_v4, %v13955_v54  ;;  %v14200_v27 = vpop.permute.xlu0 %11009  ;;  %17328 = vst [vmem:[#allocation11_spill] sm:$0xff] %v14207_v17  ;;  %v11770_v54 = vld [vmem:[%s16985_s4 + $0x128] ss:$16 sps:$4 sm:$0xff]   ;;  %v17333_v61 = vld [vmem:[#allocation41_spill] sm:$0xff] }
 0x20b   : > { %17326 = vst [vmem:[#allocation10_spill] sm:$0xff] %v14191_v13  ;;  %17327 = vst [vmem:[#allocation12_spill] sm:$0xff] %v14194_v3  ;;  %11184 = vrot.lane.b32.xlu1 %v11183_v28, %s12174_s29  ;;  %v3420_v55 = vmax.f32 %v3320_v6, %v3324_v21  ;;  %v10976_v38 = vunpack.i.l.bf16 %v13990_v11  ;;  %v11188_v49 = vpack.i.bf16 %v2522_v45, %v2521_v5  ;;  %v11772_v28 = vld [vmem:[%s16985_s4 + $0x12c] ss:$16 sps:$4 sm:$0xff]   ;;  %v2526_v37 = vmax.f32 %v2302_v57, 0.0  ;;  %v14220_v11 = vpop.f32.mrb[106].mxu1 }
 0x20c   : > { %v3422_v41 = vmax.f32 %v3322_v29, %v3326_v19  ;;  %v2060_v6 = vmul.f32 %v12757_v7, %v13974_v43  ;;  %v2063_v45 = vmul.f32 %v12747_v4, %v13988_v22  ;;  %v3101_v5 = vsel %vm1140_vm0, %v10977_v63, %v10971_v40  ;;  %v14222_v29 = vpop.f32.mrb[105].mxu0  ;;  %v14231_v43 = vpop.f32.mrb[107].mxu1  ;;  %4744 = vmatprep.subr.bf16.mxu1 %v11772_v28 }
 0x20d   : > { %v17331_v15 = vmax.f32 %v17330_v1, 0.0  ;;  %v3099_v57 = vsel %vm1140_vm0, %v10976_v38, %v10966_v20  ;;  %11189 = vrot.lane.b32.xlu0 %v11188_v49, %s12174_s29  ;;  %v14233_v22 = vpop.f32.mrb[106].mxu0  ;;  %v14237_v40 = vadd.f32 %v13169_v32, %v14110_v52  ;;  %v17334_v19 = vmax.f32 %v17333_v61, 0.0  ;;  %4745 = vmatpush1.bf16.msra.mxu1 %v11770_v54  ;;  %v14257_v61 = vpop.permute.xlu1 %11014 }
 0x20e   : > { %v14225_v24 = vpack.c.bf16 %v3422_v41, %v3420_v55  ;;  %17332 = vst [vmem:[#allocation13_spill] sm:$0xff] %v14233_v22  ;;  %v17092_v55 = vmax.f32 %v14191_v13, 0.0  ;;  %v17335_v41 = vld [vmem:[#allocation43_spill] sm:$0xff]  ;;  %v14244_v20 = vpop.f32.mrb[107].mxu0  ;;  %v17091_v38 = vmax.f32 %v14194_v3, 0.0  ;;  %v2305_v49 = vadd.f32 %v12763_v8, %v2059_v33  ;;  %v17345_v22 = vld [vmem:[#allocation14_spill] sm:$0xff] }
 0x20f   : > { %v3325_v53 = vmax.f32 %v17331_v15, %v3101_v5  ;;  %v3319_v63 = vmax.f32 %v17334_v19, %v3095_v39  ;;  %v17336_v5 = vmax.f32 %v17335_v41, 0.0  ;;  %v2064_v52 = vmul.f32 %v12757_v7, %v13995_v23  ;;  %v14264_v19 = vpop.permute.xlu0 %11019 }
 0x210   : > { %17329 = vst [vmem:[#allocation42_spill] sm:$0xff] %v14225_v24  ;;  %9587 = vmatprep.mubr.msk.bf16.mxu0 %vm3884_vm1, %v14225_v24  ;;  %9600 = vmatprep.mubr.msk.bf16.mxu1 %vm3884_vm1, %v14225_v24  ;;  %v2306_v39 = vadd.f32 %v12773_v12, %v2060_v6  ;;  %v2058_v54 = vmul.f32 %v12767_v9, %v13976_v34  ;;  %v10982_v33 = vunpack.i.h.bf16 %v14030_v50  ;;  %v10981_v23 = vunpack.i.l.bf16 %v14030_v50 }
 0x211   : > { %v3323_v1 = vmax.f32 %v17336_v5, %v3099_v57  ;;  %v3421_v28 = vmax.f32 %v3321_v51, %v3325_v53  ;;  %v11193_v57 = vpack.i.bf16 %v2526_v37, %v2525_v58  ;;  %v2309_v51 = vadd.f32 %v12763_v8, %v2063_v45  ;;  %v14273_v37 = vpop.f32.mrb[108].mxu1  ;;  %v14275_v45 = vpop.f32.mrb[108].mxu0 }
 0x212   : > { %v2062_v53 = vmul.f32 %v12767_v9, %v14006_v35  ;;  %v2310_v58 = vadd.f32 %v12773_v12, %v2064_v52  ;;  %17339 = vst [vmem:[#allocation41_spill] sm:$0xff] %v14275_v45  ;;  %v10987_v35 = vunpack.i.h.bf16 %v14035_v47  ;;  %v10986_v5 = vunpack.i.l.bf16 %v14035_v47  ;;  %v14286_v52 = vpop.f32.mrb[109].mxu0  ;;  %v14296_v47 = vpop.permute.xlu1 %11029  ;;  %v17347_v45 = vld [vmem:[#allocation15_spill] sm:$0xff] }
 0x213   : > { %v3419_v15 = vmax.f32 %v3319_v63, %v3323_v1  ;;  %v17337_v63 = vld [vmem:[#allocation38_spill] sm:$0xff]  ;;  %11194 = vrot.lane.b32.xlu1 %v11193_v57, %s12174_s29  ;;  %v11198_v1 = vpack.i.bf16 %v17091_v38, %v17092_v55  ;;  %17340 = vst [vmem:[#allocation43_spill] sm:$0xff] %v14286_v52  ;;  %v2530_v57 = vmax.f32 %v2306_v39, 0.0  ;;  %v2533_v38 = vmax.f32 %v2309_v51, 0.0 }
 0x214   : > { %v1993_v41 = vmul.f32 %v13149_v14, %v17337_v63  ;;  %v14289_v63 = vadd.f32 %v12796_v26, %v2058_v54  ;;  %v14292_v21 = vadd.f32 %v12796_v26, %v2062_v53  ;;  %v3104_v55 = vsel %vm1140_vm0, %v10981_v23, %v10982_v33  ;;  %v14308_v53 = vpop.f32.mrb[110].mxu0  ;;  %v11773_v33 = vld [vmem:[%s16985_s4 + $0x120] ss:$16 sps:$4 sm:$0xff]  }
 0x215   : > { %v14269_v34 = vpack.c.bf16 %v3421_v28, %v3419_v15  ;;  %v14284_v28 = vpop.f32.mrb[109].mxu1  ;;  %v2529_v15 = vmax.f32 %v2305_v49, 0.0  ;;  %11199 = vrot.lane.b32.xlu0 %v11198_v1, %s12174_s29  ;;  %v2067_v49 = vmul.f32 %v12747_v4, %v14037_v18  ;;  %v2068_v39 = vmul.f32 %v12757_v7, %v14045_v0  ;;  %17342 = vst [vmem:[#allocation87_spill] sm:$0xff] %v14308_v53  ;;  %v14314_v24 = vpop.f32.mrb[111].mxu0  ;;  %v11775_v18 = vld [vmem:[%s16985_s4 + $0x124] ss:$16 sps:$4 sm:$0xff]  }
 0x216   : > { %17341 = vst [vmem:[#allocation38_spill] sm:$0xff] %v14292_v21  ;;  %v14298_v50 = vpop.f32.mrb[110].mxu1  ;;  %v14311_v6 = vadd.f32 %v13169_v32, %v1993_v41  ;;  %v10992_v51 = vunpack.i.h.bf16 %v14089_v60  ;;  %17343 = vst [vmem:[#allocation88_spill] sm:$0xff] %v14314_v24  ;;  %v17344_v0 = vld [vmem:[#allocation45_spill] sm:$0xff]  ;;  %v3106_v41 = vsel %vm1140_vm0, %v10986_v5, %v10987_v35  ;;  %v2071_v53 = vmul.f32 %v12747_v4, %v14054_v10  ;;  %v14341_v10 = vpop.permute.xlu0 %11024 }
 0x217   : > { %17338 = vst [vmem:[#allocation44_spill] sm:$0xff] %v14269_v34  ;;  %4000 = vmatmul.mubr.bf16.gmra.mrb[128].mxu0 %v14269_v34  ;;  %4173 = vmatmul.mubr.bf16.gmra.mrb[128].mxu1 %v14269_v34  ;;  %v14306_v54 = vpop.f32.mrb[111].mxu1  ;;  %v2534_v34 = vmax.f32 %v2310_v58, 0.0  ;;  %v14324_v1 = vmul.f32 %v13149_v14, %v17344_v0  ;;  %v10991_v58 = vunpack.i.l.bf16 %v14089_v60  ;;  %v17346_v17 = vmax.f32 %v17345_v22, 0.0 }
 0x218   : > { %v11203_v46 = vpack.i.bf16 %v2530_v57, %v2529_v15  ;;  %4571 = vmatprep.subr.bf16.mxu0 %v11775_v18  ;;  %v2313_v0 = vadd.f32 %v12763_v8, %v2067_v49  ;;  %v2314_v2 = vadd.f32 %v12773_v12, %v2068_v39  ;;  %v2072_v60 = vmul.f32 %v12757_v7, %v14068_v44  ;;  %v11776_v49 = vld [vmem:[%s16985_s4 + $0x148] ss:$16 sps:$4 sm:$0xff]   ;;  %v11778_v44 = vld [vmem:[%s16985_s4 + $0x14c] ss:$16 sps:$4 sm:$0xff]  }
 0x219   : > { %v14333_v3 = vmax.f32 %v17346_v17, %v3104_v55  ;;  %v10997_v35 = vunpack.i.h.bf16 %v14158_v48  ;;  %4572 = vmatpush1.bf16.msra.mxu0 %v11773_v33  ;;  %v17348_v22 = vmax.f32 %v17347_v45, 0.0  ;;  %v3105_v55 = vsel %vm1140_vm0, %v10992_v51, %v10986_v5  ;;  %4746 = vmatprep.subr.bf16.mxu1 %v11778_v44  ;;  %v17349_v33 = vld [vmem:[#allocation50_spill] sm:$0xff] }
 0x21a   : > { %11204 = vrot.lane.b32.xlu0 %v11203_v46, %s12174_s29  ;;  %v10996_v15 = vunpack.i.l.bf16 %v14158_v48  ;;  %v11208_v57 = vpack.i.bf16 %v2534_v34, %v2533_v38  ;;  %v3103_v39 = vsel %vm1140_vm0, %v10991_v58, %v10981_v23  ;;  %v14356_v45 = vadd.f32 %v12763_v8, %v2071_v53  ;;  %v14361_v48 = vpop.permute.xlu1 %11034  ;;  %v17351_v58 = vld [vmem:[#allocation16_spill] sm:$0xff]  ;;  %4747 = vmatpush1.bf16.msra.mxu1 %v11776_v49  ;;  %v11781_v49 = vld [vmem:[%s16985_s4 + $0x144] ss:$16 sps:$4 sm:$0xff]  }
 0x21b   : > { %v3330_v17 = vmax.f32 %v17348_v22, %v3106_v41  ;;  %v2066_v5 = vmul.f32 %v12767_v9, %v14056_v59  ;;  %v11002_v46 = vunpack.i.h.bf16 %v14106_v25  ;;  %v14364_v38 = vadd.f32 %v12773_v12, %v2072_v60  ;;  %v14375_v60 = vpop.permute.xlu0 %11039  ;;  %4573 = vmatprep.subr.bf16.mxu0 %v11781_v49 }
 0x21c   : > { %v3108_v34 = vsel %vm1140_vm0, %v10996_v15, %v10997_v35  ;;  %11209 = vrot.lane.b32.xlu1 %v11208_v57, %s12174_s29  ;;  %v2070_v23 = vmul.f32 %v12767_v9, %v14077_v30  ;;  %v11001_v53 = vunpack.i.l.bf16 %v14106_v25  ;;  %v2537_v51 = vmax.f32 %v2313_v0, 0.0  ;;  %v17353_v35 = vld [vmem:[#allocation46_spill] sm:$0xff] }
 0x21d   : > { %v17350_v59 = vmax.f32 %v17349_v33, 0.0  ;;  %v2538_v41 = vmax.f32 %v2314_v2, 0.0  ;;  %v17352_v22 = vmax.f32 %v17351_v58, 0.0  ;;  %v17354_v24 = vmax.f32 %v17353_v35, 0.0  ;;  %v11779_v2 = vld [vmem:[%s16985_s4 + $0x140] ss:$16 sps:$4 sm:$0xff]  }
 0x21e   : > { %v3110_v52 = vsel %vm1140_vm0, %v11001_v53, %v11002_v46  ;;  %v2075_v30 = vmul.f32 %v12747_v4, %v14116_v36  ;;  %v17355_v25 = vmax.f32 %v14289_v63, 0.0  ;;  %v17356_v0 = vmax.f32 %v14292_v21, 0.0  ;;  %v17359_v33 = vld [vmem:[#allocation81_spill] sm:$0xff]  ;;  %v11784_v58 = vld [vmem:[%s16985_s4 + $0x16c] ss:$16 sps:$4 sm:$0xff]   ;;  %4574 = vmatpush1.bf16.msra.mxu0 %v11779_v2  ;;  %v17365_v2 = vld [vmem:[#allocation55_spill] sm:$0xff] }
 0x21f   : > { %v3329_v18 = vmax.f32 %v17350_v59, %v3105_v55  ;;  %v3332_v13 = vmax.f32 %v17352_v22, %v3108_v34  ;;  %v3327_v57 = vmax.f32 %v17354_v24, %v3103_v39  ;;  %v11782_v24 = vld [vmem:[%s16985_s4 + $0x168] ss:$16 sps:$4 sm:$0xff]   ;;  %v2541_v44 = vmax.f32 %v14356_v45, 0.0  ;;  %v17357_v39 = vld [vmem:[#allocation17_spill] sm:$0xff]  ;;  %v17360_v45 = vld [vmem:[#allocation83_spill] sm:$0xff]  ;;  %4748 = vmatprep.subr.bf16.mxu1 %v11784_v58 }
 0x220   : > { %v11213_v55 = vpack.i.bf16 %v17356_v0, %v17355_v25  ;;  %v14397_v36 = vadd.f32 %v12796_v26, %v2066_v5  ;;  %v17358_v46 = vmax.f32 %v17357_v39, 0.0  ;;  %v2076_v59 = vmul.f32 %v12757_v7, %v17359_v33  ;;  %v14416_v33 = vpop.permute.xlu1 %11044  ;;  %4749 = vmatpush1.bf16.msra.mxu1 %v11782_v24 }
 0x221   : > { %v2542_v22 = vmax.f32 %v14364_v38, 0.0  ;;  %v14408_v35 = vadd.f32 %v12796_v26, %v2070_v23  ;;  %v2079_v5 = vmul.f32 %v12747_v4, %v17360_v45  ;;  %v11007_v25 = vunpack.i.h.bf16 %v14188_v42  ;;  %v17361_v45 = vld [vmem:[#allocation82_spill] sm:$0xff] }
 0x222   : > { %v3334_v34 = vmax.f32 %v17358_v46, %v3110_v52  ;;  %11214 = vrot.lane.b32.xlu1 %v11213_v55, %s12174_s29  ;;  %v3424_v52 = vmax.f32 %v14333_v3, %v3332_v13  ;;  %v11006_v39 = vunpack.i.l.bf16 %v14188_v42  ;;  %v11218_v46 = vpack.i.bf16 %v2538_v41, %v2537_v51  ;;  %v17363_v42 = vld [vmem:[#allocation58_spill] sm:$0xff]  ;;  %v14430_v41 = vpop.permute.xlu0 %11049 }
 0x223   : > { %v2321_v38 = vadd.f32 %v12763_v8, %v2075_v30  ;;  %v2322_v23 = vadd.f32 %v12773_v12, %v2076_v59  ;;  %v3109_v55 = vsel %vm1140_vm0, %v11007_v25, %v11001_v53  ;;  %v2074_v21 = vmul.f32 %v12767_v9, %v17361_v45 }
 0x224   : > { %v3426_v0 = vmax.f32 %v3330_v17, %v3334_v34  ;;  %v2325_v13 = vadd.f32 %v12763_v8, %v2079_v5  ;;  %v17364_v3 = vmax.f32 %v17363_v42, 0.0  ;;  %v3107_v51 = vsel %vm1140_vm0, %v11006_v39, %v10996_v15  ;;  %11219 = vrot.lane.b32.xlu0 %v11218_v46, %s12174_s29  ;;  %v17367_v5 = vld [vmem:[#allocation85_spill] sm:$0xff]  ;;  %v17368_v42 = vld [vmem:[#allocation86_spill] sm:$0xff] }
 0x225   : > { %v17366_v34 = vmax.f32 %v17365_v2, 0.0  ;;  %v14437_v59 = vadd.f32 %v12796_v26, %v2074_v21  ;;  %v2080_v25 = vmul.f32 %v12757_v7, %v17367_v5  ;;  %v11012_v15 = vunpack.i.h.bf16 %v14200_v27 }
 0x226   : > { %v14423_v49 = vpack.c.bf16 %v3426_v0, %v3424_v52  ;;  %v3333_v17 = vmax.f32 %v17364_v3, %v3109_v55  ;;  %v11011_v52 = vunpack.i.l.bf16 %v14200_v27  ;;  %v14447_v0 = vpop.permute.xlu1 %11059  ;;  %v2545_v39 = vmax.f32 %v2321_v38, 0.0 }
 0x227   : > { %v3331_v24 = vmax.f32 %v17366_v34, %v3107_v51  ;;  %v2546_v46 = vmax.f32 %v2322_v23, 0.0  ;;  %v11223_v55 = vpack.i.bf16 %v2542_v22, %v2541_v44  ;;  %v2326_v45 = vadd.f32 %v12773_v12, %v2080_v25  ;;  %v14467_v34 = vpop.permute.xlu0 %11054  ;;  %v17375_v51 = vld [vmem:[#allocation66_spill] sm:$0xff] }
 0x228   : > { %17362 = vst [vmem:[#allocation45_spill] sm:$0xff] %v14423_v49  ;;  %v3425_v58 = vmax.f32 %v3329_v18, %v3333_v17  ;;  %9588 = vmatprep.mubr.msk.bf16.mxu0 %vm3884_vm1, %v14423_v49  ;;  %9601 = vmatprep.mubr.msk.bf16.mxu1 %vm3884_vm1, %v14423_v49  ;;  %v2549_v18 = vmax.f32 %v2325_v13, 0.0  ;;  %v2078_v3 = vmul.f32 %v12767_v9, %v17368_v42  ;;  %v11017_v27 = vunpack.i.h.bf16 %v14257_v61  ;;  %v17388_v49 = vld [vmem:[#allocation67_spill] sm:$0xff] }
 0x229   : > { %v3423_v21 = vmax.f32 %v3327_v57, %v3331_v24  ;;  %v3112_v2 = vsel %vm1140_vm0, %v11011_v52, %v11012_v15  ;;  %11224 = vrot.lane.b32.xlu1 %v11223_v55, %s12174_s29  ;;  %v11016_v38 = vunpack.i.l.bf16 %v14257_v61  ;;  %v11787_v57 = vld [vmem:[%s16985_s4 + $0x164] ss:$16 sps:$4 sm:$0xff]   ;;  %v2550_v44 = vmax.f32 %v2326_v45, 0.0  ;;  %v11785_v24 = vld [vmem:[%s16985_s4 + $0x160] ss:$16 sps:$4 sm:$0xff]   ;;  %v17371_v15 = vld [vmem:[#allocation18_spill] sm:$0xff] }
 0x22a   : > { %v14463_v22 = vadd.f32 %v12796_v26, %v2078_v3  ;;  %v11022_v23 = vunpack.i.h.bf16 %v14264_v19  ;;  %v11021_v13 = vunpack.i.l.bf16 %v14264_v19  ;;  %v11027_v5 = vunpack.i.h.bf16 %v14341_v10  ;;  %v14484_v3 = vpop.permute.xlu1 %11064  ;;  %4575 = vmatprep.subr.bf16.mxu0 %v11787_v57  ;;  %v17377_v57 = vld [vmem:[#allocation59_spill] sm:$0xff] }
 0x22b   : > { %v14453_v17 = vpack.c.bf16 %v3425_v58, %v3423_v21  ;;  %v3114_v61 = vsel %vm1140_vm0, %v11016_v38, %v11017_v27  ;;  %v11228_v58 = vpack.i.bf16 %v2546_v46, %v2545_v39  ;;  %v11026_v25 = vunpack.i.l.bf16 %v14341_v10  ;;  %v17373_v39 = vld [vmem:[#allocation20_spill] sm:$0xff]  ;;  %4576 = vmatpush1.bf16.msra.mxu0 %v11785_v24 }
 0x22c   : > { %17370 = vst [vmem:[#allocation15_spill] sm:$0xff] %v14463_v22  ;;  %v17372_v21 = vmax.f32 %v17371_v15, 0.0  ;;  %v17104_v55 = vmax.f32 %v14463_v22, 0.0  ;;  %v3113_v45 = vsel %vm1140_vm0, %v11022_v23, %v11016_v38  ;;  %v3111_v42 = vsel %vm1140_vm0, %v11021_v13, %v11011_v52  ;;  %v11788_v38 = vld [vmem:[%s16985_s4 + $0x188] ss:$16 sps:$4 sm:$0xff]  }
 0x22d   : > { %17369 = vst [vmem:[#allocation14_spill] sm:$0xff] %v14453_v17  ;;  %4010 = vmatmul.mubr.bf16.gmra.mrb[132].mxu0 %v14453_v17  ;;  %4183 = vmatmul.mubr.bf16.gmra.mrb[132].mxu1 %v14453_v17  ;;  %v17374_v46 = vmax.f32 %v17373_v39, 0.0  ;;  %v17376_v53 = vmax.f32 %v17375_v51, 0.0  ;;  %v3116_v10 = vsel %vm1140_vm0, %v11026_v25, %v11027_v5  ;;  %v11790_v52 = vld [vmem:[%s16985_s4 + $0x18c] ss:$16 sps:$4 sm:$0xff]   ;;  %v17378_v23 = vmax.f32 %v17377_v57, 0.0  ;;  %v14504_v5 = vpop.permute.xlu0 %11069 }
 0x22e   : > { %v14479_v19 = vmax.f32 %v17372_v21, %v3112_v2  ;;  %11229 = vrot.lane.b32.xlu0 %v11228_v58, %s12174_s29  ;;  %v11238_v2 = vpack.i.bf16 %v2550_v44, %v2549_v18  ;;  %v11031_v58 = vunpack.i.l.bf16 %v14296_v47  ;;  %v11791_v18 = vld [vmem:[%s16985_s4 + $0x180] ss:$16 sps:$4 sm:$0xff]   ;;  %v11793_v44 = vld [vmem:[%s16985_s4 + $0x184] ss:$16 sps:$4 sm:$0xff]   ;;  %v11796_v21 = vld [vmem:[%s16985_s4 + $0x1ac] ss:$16 sps:$4 sm:$0xff]   ;;  %v11037_v24 = vunpack.i.h.bf16 %v14361_v48  ;;  %4750 = vmatprep.subr.bf16.mxu1 %v11790_v52 }
 0x22f   : > { %v3338_v27 = vmax.f32 %v17374_v46, %v3114_v61  ;;  %v3337_v30 = vmax.f32 %v17376_v53, %v3113_v45  ;;  %v3335_v13 = vmax.f32 %v17378_v23, %v3111_v42  ;;  %v17379_v61 = vld [vmem:[#allocation21_spill] sm:$0xff]  ;;  %v11032_v53 = vunpack.i.h.bf16 %v14296_v47  ;;  %4751 = vmatpush1.bf16.msra.mxu1 %v11788_v38  ;;  %4577 = vmatprep.subr.bf16.mxu0 %v11793_v44  ;;  %v17384_v52 = vld [vmem:[#allocation22_spill] sm:$0xff]  ;;  %v17386_v38 = vld [vmem:[#allocation28_spill] sm:$0xff] }
 0x230   : > { %v17380_v15 = vmax.f32 %v17379_v61, 0.0  ;;  %11239 = vrot.lane.b32.xlu1 %v11238_v2, %s12174_s29  ;;  %v17381_v45 = vmax.f32 %v14397_v36, 0.0  ;;  %v17382_v47 = vmax.f32 %v14408_v35, 0.0  ;;  %v11036_v39 = vunpack.i.l.bf16 %v14361_v48  ;;  %v11794_v48 = vld [vmem:[%s16985_s4 + $0x1a8] ss:$16 sps:$4 sm:$0xff]   ;;  %4752 = vmatprep.subr.bf16.mxu1 %v11796_v21 }
 0x231   : > { %v11042_v46 = vunpack.i.h.bf16 %v14375_v60  ;;  %v3118_v57 = vsel %vm1140_vm0, %v11031_v58, %v11032_v53  ;;  %v17383_v2 = vmax.f32 %v14437_v59, 0.0  ;;  %v11041_v61 = vunpack.i.l.bf16 %v14375_v60  ;;  %v11802_v60 = vld [vmem:[%s16985_s4 + $0x38c] ss:$16 sps:$4 sm:$0xff]   ;;  %4578 = vmatpush1.bf16.msra.mxu0 %v11791_v18 }
 0x232   : > { %v3340_v51 = vmax.f32 %v17380_v15, %v3116_v10  ;;  %v11233_v42 = vpack.i.bf16 %v17382_v47, %v17381_v45  ;;  %v11799_v10 = vld [vmem:[%s16985_s4 + $0x1a4] ss:$16 sps:$4 sm:$0xff]   ;;  %v11047_v15 = vunpack.i.h.bf16 %v14416_v33  ;;  %v17385_v45 = vmax.f32 %v17384_v52, 0.0 }
 0x233   : > { %v11243_v23 = vpack.i.bf16 %v17104_v55, %v17383_v2  ;;  %v3117_v53 = vsel %vm1140_vm0, %v11037_v24, %v11031_v58  ;;  %v3115_v17 = vsel %vm1140_vm0, %v11036_v39, %v11026_v25  ;;  %v11046_v2 = vunpack.i.l.bf16 %v14416_v33  ;;  %v14551_v58 = vpop.permute.xlu1 %11074  ;;  %v11797_v33 = vld [vmem:[%s16985_s4 + $0x1a0] ss:$16 sps:$4 sm:$0xff]   ;;  %4579 = vmatprep.subr.bf16.mxu0 %v11799_v10  ;;  %4753 = vmatpush1.bf16.msra.mxu1 %v11794_v48 }
 0x234   : > { %v3342_v47 = vmax.f32 %v17385_v45, %v3118_v57  ;;  %11234 = vrot.lane.b32.xlu0 %v11233_v42, %s12174_s29  ;;  %v17387_v44 = vmax.f32 %v17386_v38, 0.0  ;;  %v17389_v22 = vmax.f32 %v17388_v49, 0.0  ;;  %v3120_v57 = vsel %vm1140_vm0, %v11041_v61, %v11042_v46  ;;  %v17390_v39 = vld [vmem:[#allocation25_spill] sm:$0xff]  ;;  %5412 = vmatprep.subr.bf16.mxu1 %v11802_v60 }
 0x235   : > { %v11052_v42 = vunpack.i.h.bf16 %v14430_v41  ;;  %v3428_v25 = vmax.f32 %v14479_v19, %v3340_v51  ;;  %11244 = vrot.lane.b32.xlu1 %v11243_v23, %s12174_s29  ;;  %v3122_v24 = vsel %vm1140_vm0, %v11046_v2, %v11047_v15  ;;  %v11051_v49 = vunpack.i.l.bf16 %v14430_v41  ;;  %v17392_v19 = vld [vmem:[#allocation26_spill] sm:$0xff]  ;;  %4580 = vmatpush1.bf16.msra.mxu0 %v11797_v33 }
 0x236   : > { %v3341_v55 = vmax.f32 %v17387_v44, %v3117_v53  ;;  %v3339_v52 = vmax.f32 %v17389_v22, %v3115_v17  ;;  %v3430_v21 = vmax.f32 %v3338_v27, %v3342_v47  ;;  %v17391_v46 = vmax.f32 %v17390_v39, 0.0  ;;  %v14563_v53 = vpop.permute.xlu0 %11079  ;;  %v17400_v39 = vld [vmem:[#allocation30_spill] sm:$0xff] }
 0x237   : > { %v3121_v18 = vsel %vm1140_vm0, %v11052_v42, %v11046_v2  ;;  %v17393_v27 = vmax.f32 %v17392_v19, 0.0  ;;  %v3119_v23 = vsel %vm1140_vm0, %v11051_v49, %v11041_v61  ;;  %v11057_v41 = vunpack.i.h.bf16 %v14467_v34  ;;  %v11090_v48 = vpop.permute.xlu1 %11089  ;;  %v17396_v61 = vld [vmem:[#allocation75_spill] sm:$0xff] }
 0x238   : > { %v3429_v17 = vmax.f32 %v3337_v30, %v3341_v55  ;;  %v3427_v22 = vmax.f32 %v3335_v13, %v3339_v52  ;;  %v3344_v45 = vmax.f32 %v17391_v46, %v3120_v57  ;;  %v14565_v38 = vpack.c.bf16 %v3430_v21, %v3428_v25  ;;  %v17394_v55 = vld [vmem:[#allocation76_spill] sm:$0xff]  ;;  %v17398_v21 = vld [vmem:[#allocation29_spill] sm:$0xff]  ;;  %v17402_v19 = vld [vmem:[#allocation79_spill] sm:$0xff] }
 0x239   : > { %v3346_v51 = vmax.f32 %v17393_v27, %v3122_v24  ;;  %v17395_v13 = vmax.f32 %v17394_v55, 0.0  ;;  %v11056_v15 = vunpack.i.l.bf16 %v14467_v34  ;;  %v11062_v47 = vunpack.i.h.bf16 %v14447_v0 }
 0x23a   : > { %v14571_v30 = vpack.c.bf16 %v3429_v17, %v3427_v22  ;;  %9589 = vmatprep.mubr.msk.bf16.mxu0 %vm3884_vm1, %v14565_v38  ;;  %9602 = vmatprep.mubr.msk.bf16.mxu1 %vm3884_vm1, %v14565_v38  ;;  %v17397_v2 = vmax.f32 %v17396_v61, 0.0  ;;  %v11061_v44 = vunpack.i.l.bf16 %v14447_v0  ;;  %v11067_v52 = vunpack.i.h.bf16 %v14484_v3  ;;  %v11805_v0 = vld [vmem:[%s16985_s4 + $0x384] ss:$16 sps:$4 sm:$0xff]   ;;  %v11085_v61 = vpop.permute.xlu0 %11084 }
 0x23b   : > { %v3345_v10 = vmax.f32 %v17395_v13, %v3121_v18  ;;  %v11066_v57 = vunpack.i.l.bf16 %v14484_v3  ;;  %v3124_v34 = vsel %vm1140_vm0, %v11056_v15, %v11057_v41  ;;  %v11072_v42 = vunpack.i.h.bf16 %v14504_v5  ;;  %5239 = vmatprep.subr.bf16.mxu0 %v11805_v0 }
 0x23c   : > { %v3343_v60 = vmax.f32 %v17397_v2, %v3119_v23  ;;  %4020 = vmatmul.mubr.bf16.gmra.mrb[136].mxu0 %v14571_v30  ;;  %4193 = vmatmul.mubr.bf16.gmra.mrb[136].mxu1 %v14571_v30  ;;  %v11071_v33 = vunpack.i.l.bf16 %v14504_v5  ;;  %v11077_v25 = vunpack.i.h.bf16 %v14551_v58  ;;  %v17399_v24 = vmax.f32 %v17398_v21, 0.0  ;;  %v17404_v23 = vld [vmem:[#allocation77_spill] sm:$0xff]  ;;  %v17406_v2 = vld [vmem:[#allocation47_spill] sm:$0xff] }
 0x23d   : > { %v3126_v3 = vsel %vm1140_vm0, %v11061_v44, %v11062_v47  ;;  %v3125_v17 = vsel %vm1140_vm0, %v11067_v52, %v11061_v44  ;;  %v3123_v22 = vsel %vm1140_vm0, %v11066_v57, %v11056_v15  ;;  %v17401_v46 = vmax.f32 %v17400_v39, 0.0  ;;  %v17408_v15 = vld [vmem:[#allocation53_spill] sm:$0xff] }
 0x23e   : > { %v3348_v49 = vmax.f32 %v17399_v24, %v3124_v34  ;;  %v17403_v5 = vmax.f32 %v17402_v19, 0.0  ;;  %v17405_v41 = vmax.f32 %v17404_v23, 0.0  ;;  %v11076_v13 = vunpack.i.l.bf16 %v14551_v58  ;;  %v17407_v34 = vld [vmem:[#allocation51_spill] sm:$0xff] }
 0x23f   : > { %v3350_v18 = vmax.f32 %v17401_v46, %v3126_v3  ;;  %v2005_v47 = vmul.f32 %v13149_v14, %v17406_v2  ;;  %v2009_v44 = vmul.f32 %v13149_v14, %v17407_v34  ;;  %v2013_v52 = vmul.f32 %v13149_v14, %v17408_v15  ;;  %v14621_v2 = vpop.permute.xlu0 %11099  ;;  %v17413_v34 = vld [vmem:[#allocation34_spill] sm:$0xff] }
 0x240   : > { %v3349_v27 = vmax.f32 %v17403_v5, %v3125_v17  ;;  %v3347_v55 = vmax.f32 %v17405_v41, %v3123_v22  ;;  %v11082_v57 = vunpack.i.h.bf16 %v14563_v53  ;;  %v3432_v21 = vmax.f32 %v3344_v45, %v3348_v49  ;;  %v11095_v22 = vpop.permute.xlu1 %11094 }
 0x241   : > { %v3434_v24 = vmax.f32 %v3346_v51, %v3350_v18  ;;  %v3128_v58 = vsel %vm1140_vm0, %v11071_v33, %v11072_v42  ;;  %v11081_v0 = vunpack.i.l.bf16 %v14563_v53  ;;  %v11087_v39 = vunpack.i.h.bf16 %v11085_v61  ;;  %v17409_v42 = vld [vmem:[#allocation33_spill] sm:$0xff]  ;;  %v17411_v18 = vld [vmem:[#allocation48_spill] sm:$0xff] }
 0x242   : > { %v3433_v3 = vmax.f32 %v3345_v10, %v3349_v27  ;;  %v3431_v17 = vmax.f32 %v3343_v60, %v3347_v55  ;;  %v11086_v46 = vunpack.i.l.bf16 %v11085_v61  ;;  %v3130_v23 = vsel %vm1140_vm0, %v11076_v13, %v11077_v25 }
 0x243   : > { %v14616_v19 = vpack.c.bf16 %v3434_v24, %v3432_v21  ;;  %v11092_v41 = vunpack.i.h.bf16 %v11090_v48  ;;  %v3129_v45 = vsel %vm1140_vm0, %v11082_v57, %v11076_v13  ;;  %v11091_v10 = vunpack.i.l.bf16 %v11090_v48 }
 0x244   : > { %v14618_v5 = vpack.c.bf16 %v3433_v3, %v3431_v17  ;;  %v3132_v51 = vsel %vm1140_vm0, %v11086_v46, %v11087_v39  ;;  %v11097_v60 = vunpack.i.h.bf16 %v11095_v22  ;;  %v17410_v49 = vmax.f32 %v17409_v42, 0.0  ;;  %v17416_v3 = vld [vmem:[#allocation49_spill] sm:$0xff]  ;;  %v11105_v39 = vpop.permute.xlu1 %11104 }
 0x245   : > { %9590 = vmatprep.mubr.msk.bf16.mxu0 %vm3884_vm1, %v14616_v19  ;;  %9603 = vmatprep.mubr.msk.bf16.mxu1 %vm3884_vm1, %v14616_v19  ;;  %v3127_v25 = vsel %vm1140_vm0, %v11081_v0, %v11071_v33  ;;  %v17412_v27 = vmax.f32 %v17411_v18, 0.0  ;;  %v11096_v61 = vunpack.i.l.bf16 %v11095_v22  ;;  %v2463_v13 = vmax.f32 %v14311_v6, 0.0  ;;  %v11110_v18 = vpop.permute.xlu0 %11109 }
 0x246   : > { %v3352_v53 = vmax.f32 %v17410_v49, %v3128_v58  ;;  %v17414_v48 = vmax.f32 %v17413_v34, 0.0  ;;  %4030 = vmatmul.mubr.bf16.gmra.mrb[140].mxu0 %v14618_v5  ;;  %4203 = vmatmul.mubr.bf16.gmra.mrb[140].mxu1 %v14618_v5  ;;  %v3134_v57 = vsel %vm1140_vm0, %v11091_v10, %v11092_v41  ;;  %v3133_v21 = vsel %vm1140_vm0, %v11097_v60, %v11091_v10 }
 0x247   : > { %v3356_v55 = vmax.f32 %v17412_v27, %v3132_v51  ;;  %v17415_v24 = vmax.f32 %v14101_v31, 0.0  ;;  %v17417_v17 = vmax.f32 %v17416_v3, 0.0  ;;  %v17418_v22 = vmax.f32 %v14237_v40, 0.0 }
 0x248   : > { %v3354_v15 = vmax.f32 %v17414_v48, %v3130_v23  ;;  %v3131_v0 = vsel %vm1140_vm0, %v11096_v61, %v11086_v46  ;;  %v2247_v23 = vadd.f32 %v13169_v32, %v14324_v1  ;;  %v2251_v51 = vadd.f32 %v13169_v32, %v2005_v47 }
 0x249   : > { %v3353_v33 = vmax.f32 %v17415_v24, %v3129_v45  ;;  %v3358_v58 = vmax.f32 %v17417_v17, %v3134_v57  ;;  %v3357_v6 = vmax.f32 %v17418_v22, %v3133_v21  ;;  %v17419_v41 = vmax.f32 %v14098_v16, 0.0  ;;  %v11115_v57 = vpop.permute.xlu0 %11114  ;;  %v17420_v17 = vld [vmem:[#allocation52_spill] sm:$0xff] }
 0x24a   : > { %v3355_v60 = vmax.f32 %v2463_v13, %v3131_v0  ;;  %v3436_v31 = vmax.f32 %v3352_v53, %v3356_v55  ;;  %v11102_v49 = vunpack.i.h.bf16 %v14621_v2  ;;  %v11101_v27 = vunpack.i.l.bf16 %v14621_v2 }
 0x24b   : > { %v3351_v10 = vmax.f32 %v17419_v41, %v3127_v25  ;;  %v3438_v45 = vmax.f32 %v3354_v15, %v3358_v58  ;;  %v3437_v42 = vmax.f32 %v3353_v33, %v3357_v6  ;;  %v11107_v46 = vunpack.i.h.bf16 %v11105_v39  ;;  %v17422_v6 = vld [vmem:[#allocation54_spill] sm:$0xff] }
 0x24c   : > { %v11106_v61 = vunpack.i.l.bf16 %v11105_v39  ;;  %v14656_v34 = vadd.f32 %v13169_v32, %v2009_v44  ;;  %v14659_v1 = vadd.f32 %v13169_v32, %v2013_v52  ;;  %v2083_v47 = vmul.f32 %v12747_v4, %v14202_v62 }
 0x24d   : > { %v3435_v40 = vmax.f32 %v3351_v10, %v3355_v60  ;;  %v14661_v16 = vpack.c.bf16 %v3438_v45, %v3436_v31  ;;  %v11112_v25 = vunpack.i.h.bf16 %v11110_v18  ;;  %v11111_v2 = vunpack.i.l.bf16 %v11110_v18  ;;  %v11120_v10 = vpop.permute.xlu1 %11119 }
 0x24e   : > { %v2084_v44 = vmul.f32 %v12757_v7, %v14205_v56  ;;  %v2471_v52 = vmax.f32 %v2247_v23, 0.0  ;;  %v3136_v55 = vsel %vm1140_vm0, %v11101_v27, %v11102_v49  ;;  %v3138_v13 = vsel %vm1140_vm0, %v11106_v61, %v11107_v46 }
 0x24f   : > { %v14665_v53 = vpack.c.bf16 %v3437_v42, %v3435_v40  ;;  %9591 = vmatprep.mubr.msk.bf16.mxu0 %vm3884_vm1, %v14661_v16  ;;  %9604 = vmatprep.mubr.msk.bf16.mxu1 %vm3884_vm1, %v14661_v16  ;;  %v2475_v62 = vmax.f32 %v2251_v51, 0.0  ;;  %v2479_v48 = vmax.f32 %v14656_v34, 0.0  ;;  %v2483_v15 = vmax.f32 %v14659_v1, 0.0 }
 0x250   : > { %v2329_v21 = vadd.f32 %v12763_v8, %v2083_v47  ;;  %v3137_v24 = vsel %vm1140_vm0, %v11112_v25, %v11106_v61  ;;  %v11117_v56 = vunpack.i.h.bf16 %v11115_v57  ;;  %v11116_v33 = vunpack.i.l.bf16 %v11115_v57  ;;  %v17426_v25 = vld [vmem:[#allocation64_spill] sm:$0xff] }
 0x251   : > { %4040 = vmatmul.mubr.bf16.gmra.mrb[144].mxu0 %v14665_v53  ;;  %4213 = vmatmul.mubr.bf16.gmra.mrb[144].mxu1 %v14665_v53  ;;  %v2087_v3 = vmul.f32 %v12747_v4, %v14220_v11  ;;  %v17421_v58 = vmax.f32 %v17420_v17, 0.0  ;;  %v17423_v0 = vmax.f32 %v17422_v6, 0.0  ;;  %v3135_v23 = vsel %vm1140_vm0, %v11111_v2, %v11101_v27  ;;  %v17424_v27 = vld [vmem:[#allocation62_spill] sm:$0xff] }
 0x252   : > { %v2330_v51 = vadd.f32 %v12773_v12, %v2084_v44  ;;  %v3140_v41 = vsel %vm1140_vm0, %v11116_v33, %v11117_v56  ;;  %v2088_v60 = vmul.f32 %v12757_v7, %v14231_v43  ;;  %v2091_v31 = vmul.f32 %v12747_v4, %v14273_v37 }
 0x253   : > { %v3360_v22 = vmax.f32 %v17421_v58, %v3136_v55  ;;  %v3362_v39 = vmax.f32 %v17423_v0, %v3138_v13  ;;  %v2092_v11 = vmul.f32 %v12757_v7, %v14284_v28  ;;  %v3361_v45 = vmax.f32 %v2475_v62, %v3137_v24  ;;  %v17428_v58 = vld [vmem:[#allocation43_spill] sm:$0xff] }
 0x254   : > { %v11122_v42 = vunpack.i.h.bf16 %v11120_v10  ;;  %v11121_v49 = vunpack.i.l.bf16 %v11120_v10  ;;  %v2553_v18 = vmax.f32 %v2329_v21, 0.0  ;;  %v3359_v40 = vmax.f32 %v2471_v52, %v3135_v23  ;;  %v11125_v52 = vpop.permute.xlu1 %11124 }
 0x255   : > { %v17425_v46 = vmax.f32 %v17424_v27, 0.0  ;;  %v2333_v34 = vadd.f32 %v12763_v8, %v2087_v3  ;;  %v2095_v1 = vmul.f32 %v12747_v4, %v14298_v50  ;;  %v2554_v47 = vmax.f32 %v2330_v51, 0.0 }
 0x256   : > { %v3142_v43 = vsel %vm1140_vm0, %v11121_v49, %v11122_v42  ;;  %v2082_v37 = vmul.f32 %v12767_v9, %v14222_v29  ;;  %v2096_v28 = vmul.f32 %v12757_v7, %v14306_v54  ;;  %v17427_v2 = vmax.f32 %v17426_v25, 0.0 }
 0x257   : > { %v3364_v61 = vmax.f32 %v17425_v46, %v3140_v41  ;;  %v2334_v55 = vadd.f32 %v12773_v12, %v2088_v60  ;;  %v2337_v13 = vadd.f32 %v12763_v8, %v2091_v31  ;;  %v2338_v62 = vadd.f32 %v12773_v12, %v2092_v11 }
 0x258   : > { %v3366_v44 = vmax.f32 %v17427_v2, %v3142_v43  ;;  %v11127_v4 = vunpack.i.h.bf16 %v11125_v52  ;;  %v11126_v50 = vunpack.i.l.bf16 %v11125_v52  ;;  %v2341_v57 = vadd.f32 %v12763_v8, %v2095_v1  ;;  %v17430_v1 = vld [vmem:[#allocation57_spill] sm:$0xff] }
 0x259   : > { %v2086_v29 = vmul.f32 %v12767_v9, %v14244_v20  ;;  %v3440_v21 = vmax.f32 %v3360_v22, %v3364_v61  ;;  %v2557_v7 = vmax.f32 %v2333_v34, 0.0  ;;  %v2342_v54 = vadd.f32 %v12773_v12, %v2096_v28  ;;  %v14724_v22 = vpop.permute.xlu0 %11129  ;;  %v11135_v61 = vpop.permute.xlu1 %11134 }
 0x25a   : > { %v3442_v24 = vmax.f32 %v3362_v39, %v3366_v44  ;;  %v3141_v56 = vsel %vm1140_vm0, %v11127_v4, %v11121_v49  ;;  %v3139_v3 = vsel %vm1140_vm0, %v11126_v50, %v11116_v33  ;;  %v14718_v17 = vadd.f32 %v12796_v26, %v2082_v37  ;;  %v17433_v4 = vld [vmem:[#allocation65_spill] sm:$0xff] }
 0x25b   : > { %v2090_v6 = vmul.f32 %v12767_v9, %v17428_v58  ;;  %v3365_v8 = vmax.f32 %v2483_v15, %v3141_v56  ;;  %v3363_v23 = vmax.f32 %v2479_v48, %v3139_v3  ;;  %v2558_v20 = vmax.f32 %v2334_v55, 0.0  ;;  %v17429_v15 = vld [vmem:[#allocation88_spill] sm:$0xff] }
 0x25c   : > { %v14722_v0 = vpack.c.bf16 %v3442_v24, %v3440_v21  ;;  %v2561_v39 = vmax.f32 %v2337_v13, 0.0  ;;  %v2562_v51 = vmax.f32 %v2338_v62, 0.0  ;;  %v2565_v12 = vmax.f32 %v2341_v57, 0.0  ;;  %v17432_v13 = vld [vmem:[#allocation61_spill] sm:$0xff] }
 0x25d   : > { %v14727_v41 = vadd.f32 %v12796_v26, %v2086_v29  ;;  %v3441_v33 = vmax.f32 %v3361_v45, %v3365_v8  ;;  %v3439_v10 = vmax.f32 %v3359_v40, %v3363_v23  ;;  %v2566_v60 = vmax.f32 %v2342_v54, 0.0 }
 0x25e   : > { %9592 = vmatprep.mubr.msk.bf16.mxu0 %vm3884_vm1, %v14722_v0  ;;  %9605 = vmatprep.mubr.msk.bf16.mxu1 %vm3884_vm1, %v14722_v0  ;;  %v2094_v48 = vmul.f32 %v12767_v9, %v17429_v15  ;;  %v14736_v31 = vadd.f32 %v12796_v26, %v2090_v6  ;;  %v11248_v11 = vpack.i.bf16 %v2554_v47, %v2553_v18  ;;  %v2552_v40 = vmax.f32 %v14718_v17, 0.0  ;;  %v11140_v18 = vpop.permute.xlu0 %11139  ;;  %v17431_v47 = vld [vmem:[#allocation60_spill] sm:$0xff]  ;;  %v17436_v15 = vld [vmem:[#allocation69_spill] sm:$0xff] }
 0x25f   : > { %v14738_v42 = vpack.c.bf16 %v3441_v33, %v3439_v10  ;;  %v11253_v45 = vpack.i.bf16 %v2558_v20, %v2557_v7  ;;  %v2556_v27 = vmax.f32 %v14727_v41, 0.0  ;;  %v11258_v46 = vpack.i.bf16 %v2562_v51, %v2561_v39  ;;  %v11150_v58 = vpop.permute.xlu1 %11149  ;;  %v17434_v51 = vld [vmem:[#allocation24_spill] sm:$0xff] }
 0x260   : > { %v14741_v49 = vadd.f32 %v12796_v26, %v2094_v48  ;;  %11249 = vrot.lane.b32.xlu0 %v11248_v11, %s12174_s29  ;;  %v11268_v9 = vpack.i.bf16 %v2566_v60, %v2565_v12  ;;  %v2560_v34 = vmax.f32 %v14736_v31, 0.0  ;;  %v2017_v43 = vmul.f32 %v13149_v14, %v17430_v1  ;;  %v11968_v31 = vld [vmem:[%s16985_s4 + $0x708] ss:$16 sps:$4 sm:$0xff]  }
 0x261   : > { %4050 = vmatmul.mubr.bf16.gmra.mrb[148].mxu0 %v14738_v42  ;;  %4223 = vmatmul.mubr.bf16.gmra.mrb[148].mxu1 %v14738_v42  ;;  %v2021_v37 = vmul.f32 %v13149_v14, %v17431_v47  ;;  %v11263_v28 = vpack.i.bf16 %v2556_v27, %v2552_v40  ;;  %v11132_v25 = vunpack.i.h.bf16 %v14724_v22  ;;  %v11131_v2 = vunpack.i.l.bf16 %v14724_v22 }
 0x262   : > { %v2564_v26 = vmax.f32 %v14741_v49, 0.0  ;;  %11254 = vrot.lane.b32.xlu1 %v11253_v45, %s12174_s29  ;;  %v11137_v44 = vunpack.i.h.bf16 %v11135_v61  ;;  %v11136_v52 = vunpack.i.l.bf16 %v11135_v61  ;;  %v2025_v62 = vmul.f32 %v13149_v14, %v17432_v13  ;;  %v11145_v57 = vpop.permute.xlu0 %11144  ;;  %v17438_v45 = vld [vmem:[#allocation71_spill] sm:$0xff] }
 0x263   : > { %v2029_v50 = vmul.f32 %v13149_v14, %v17433_v4  ;;  %v2263_v29 = vadd.f32 %v13169_v32, %v2017_v43  ;;  %v11147_v21 = vunpack.i.h.bf16 %v11145_v57  ;;  %v11146_v24 = vunpack.i.l.bf16 %v11145_v57  ;;  %v11971_v49 = vld [vmem:[%s16985_s4 + $0x700] ss:$16 sps:$4 sm:$0xff]  }
 0x264   : > { %11259 = vrot.lane.b32.xlu0 %v11258_v46, %s12174_s29  ;;  %v11273_v55 = vpack.i.bf16 %v2564_v26, %v2560_v34  ;;  %v2267_v7 = vadd.f32 %v13169_v32, %v2021_v37  ;;  %v3144_v54 = vsel %vm1140_vm0, %v11131_v2, %v11132_v25  ;;  %v3146_v56 = vsel %vm1140_vm0, %v11136_v52, %v11137_v44 }
 0x265   : > { %v11142_v3 = vunpack.i.h.bf16 %v11140_v18  ;;  %v11141_v6 = vunpack.i.l.bf16 %v11140_v18  ;;  %v3148_v8 = vsel %vm1140_vm0, %v11146_v24, %v11147_v21  ;;  %v11152_v23 = vunpack.i.h.bf16 %v11150_v58  ;;  %v17440_v18 = vld [vmem:[#allocation27_spill] sm:$0xff] }
 0x266   : > { %11269 = vrot.lane.b32.xlu1 %v11268_v9, %s12174_s29  ;;  %v11151_v20 = vunpack.i.l.bf16 %v11150_v58  ;;  %v2271_v22 = vadd.f32 %v13169_v32, %v2025_v62  ;;  %v2275_v39 = vadd.f32 %v13169_v32, %v2029_v50  ;;  %v17435_v12 = vmax.f32 %v17434_v51, 0.0  ;;  %v11155_v47 = vpop.permute.xlu1 %11154 }
 0x267   : > { %v2487_v10 = vmax.f32 %v2263_v29, 0.0  ;;  %v17437_v48 = vmax.f32 %v17436_v15, 0.0  ;;  %v17439_v46 = vmax.f32 %v17438_v45, 0.0  ;;  %v3145_v61 = vsel %vm1140_vm0, %v11142_v3, %v11136_v52  ;;  %v11160_v3 = vpop.permute.xlu0 %11159  ;;  %v17445_v15 = vld [vmem:[#allocation74_spill] sm:$0xff] }
 0x268   : > { %11264 = vrot.lane.b32.xlu0 %v11263_v28, %s12174_s29  ;;  %v3372_v33 = vmax.f32 %v17435_v12, %v3148_v8  ;;  %v3150_v60 = vsel %vm1140_vm0, %v11151_v20, %v11152_v23  ;;  %v17441_v1 = vmax.f32 %v17440_v18, 0.0  ;;  %v2491_v37 = vmax.f32 %v2267_v7, 0.0  ;;  %v17442_v8 = vld [vmem:[#allocation68_spill] sm:$0xff] }
 0x269   : > { %v3368_v11 = vmax.f32 %v17437_v48, %v3144_v54  ;;  %v3370_v9 = vmax.f32 %v17439_v46, %v3146_v56  ;;  %v3143_v28 = vsel %vm1140_vm0, %v11141_v6, %v11131_v2  ;;  %v11157_v25 = vunpack.i.h.bf16 %v11155_v47 }
 0x26a   : > { %11274 = vrot.lane.b32.xlu1 %v11273_v55, %s12174_s29  ;;  %v3374_v43 = vmax.f32 %v17441_v1, %v3150_v60  ;;  %v11156_v44 = vunpack.i.l.bf16 %v11155_v47  ;;  %v2495_v55 = vmax.f32 %v2271_v22, 0.0  ;;  %v2499_v13 = vmax.f32 %v2275_v39, 0.0 }
 0x26b   : > { %v3444_v62 = vmax.f32 %v3368_v11, %v3372_v33  ;;  %v3369_v50 = vmax.f32 %v2491_v37, %v3145_v61  ;;  %v3149_v57 = vsel %vm1140_vm0, %v11157_v25, %v11151_v20  ;;  %v3367_v21 = vmax.f32 %v2487_v10, %v3143_v28  ;;  %v17443_v20 = vld [vmem:[#allocation70_spill] sm:$0xff]  ;;  %v17444_v10 = vld [vmem:[#allocation73_spill] sm:$0xff] }
 0x26c   : > { %v3446_v4 = vmax.f32 %v3370_v9, %v3374_v43  ;;  %v3147_v29 = vsel %vm1140_vm0, %v11156_v44, %v11146_v24  ;;  %v3373_v54 = vmax.f32 %v2499_v13, %v3149_v57  ;;  %v11165_v24 = vpop.permute.xlu1 %11164  ;;  %v2033_v23 = vmul.f32 %v13149_v14, %v17442_v8 }
 0x26d   : > { %v3371_v56 = vmax.f32 %v2495_v55, %v3147_v29  ;;  %v2037_v22 = vmul.f32 %v13149_v14, %v17443_v20  ;;  %v11162_v39 = vunpack.i.h.bf16 %v11160_v3  ;;  %v11161_v51 = vunpack.i.l.bf16 %v11160_v3  ;;  %v17450_v3 = vld [vmem:[#allocation7_spill] sm:$0xff] }
 0x26e   : > { %v14793_v52 = vpack.c.bf16 %v3446_v4, %v3444_v62  ;;  %v3445_v7 = vmax.f32 %v3369_v50, %v3373_v54  ;;  %v11167_v12 = vunpack.i.h.bf16 %v11165_v24  ;;  %v11166_v33 = vunpack.i.l.bf16 %v11165_v24  ;;  %v17446_v62 = vld [vmem:[#allocation31_spill] sm:$0xff] }
 0x26f   : > { %v3443_v58 = vmax.f32 %v3367_v21, %v3371_v56  ;;  %v2041_v60 = vmul.f32 %v13149_v14, %v17444_v10  ;;  %v2045_v48 = vmul.f32 %v13149_v14, %v17445_v15  ;;  %v2279_v45 = vadd.f32 %v13169_v32, %v2033_v23  ;;  %v17448_v21 = vld [vmem:[#allocation8_spill] sm:$0xff] }
 0x270   : > { %9593 = vmatprep.mubr.msk.bf16.mxu0 %vm3884_vm1, %v14793_v52  ;;  %9606 = vmatprep.mubr.msk.bf16.mxu1 %vm3884_vm1, %v14793_v52  ;;  %v2283_v61 = vadd.f32 %v13169_v32, %v2037_v22  ;;  %v3152_v18 = vsel %vm1140_vm0, %v11161_v51, %v11162_v39  ;;  %v3154_v1 = vsel %vm1140_vm0, %v11166_v33, %v11167_v12  ;;  %v17447_v4 = vmax.f32 %v17446_v62, 0.0 }
 0x271   : > { %v14799_v2 = vpack.c.bf16 %v3445_v7, %v3443_v58  ;;  %v2287_v55 = vadd.f32 %v13169_v32, %v2041_v60  ;;  %v2291_v13 = vadd.f32 %v13169_v32, %v2045_v48  ;;  %v2503_v57 = vmax.f32 %v2279_v45, 0.0 }
 0x272   : > { %v11170_v6 = vpop.permute.xlu0 %11169  ;;  %v17449_v54 = vmax.f32 %v17448_v21, 0.0  ;;  %v17451_v7 = vmax.f32 %v17450_v3, 0.0  ;;  %v2507_v22 = vmax.f32 %v2283_v61, 0.0  ;;  %v17456_v21 = vld [vmem:[#allocation6_spill] sm:$0xff] }
 0x273   : > { %4060 = vmatmul.mubr.bf16.gmra.mrb[152].mxu0 %v14799_v2  ;;  %4233 = vmatmul.mubr.bf16.gmra.mrb[152].mxu1 %v14799_v2  ;;  %v11172_v43 = vunpack.i.h.bf16 %v11170_v6  ;;  %v11171_v37 = vunpack.i.l.bf16 %v11170_v6  ;;  %v17452_v6 = vld [vmem:[#allocation32_spill] sm:$0xff]  ;;  %v2511_v60 = vmax.f32 %v2287_v55, 0.0  ;;  %v2515_v15 = vmax.f32 %v2291_v13, 0.0 }
 0x274   : > { %v3376_v56 = vmax.f32 %v17449_v54, %v3152_v18  ;;  %v3378_v58 = vmax.f32 %v17451_v7, %v3154_v1  ;;  %v17453_v8 = vmax.f32 %v17452_v6, 0.0  ;;  %v17455_v13 = vld [vmem:[#allocation80_spill] sm:$0xff]  ;;  %v2057_v54 = vmul.f32 %v13149_v14, %v17456_v21 }
 0x275   : > { %v3153_v24 = vsel %vm1140_vm0, %v11172_v43, %v11166_v33  ;;  %v3151_v39 = vsel %vm1140_vm0, %v11171_v37, %v11161_v51  ;;  %v2053_v62 = vmul.f32 %v13149_v14, %v17455_v13 }
 0x276   : > { %v11175_v11 = vpop.permute.xlu0 %11174  ;;  %v11180_v47 = vpop.permute.xlu1 %11179  ;;  %v3377_v45 = vmax.f32 %v2507_v22, %v3153_v24  ;;  %v3375_v1 = vmax.f32 %v2503_v57, %v3151_v39 }
 0x277   : > { %v11177_v46 = vunpack.i.h.bf16 %v11175_v11  ;;  %v11176_v9 = vunpack.i.l.bf16 %v11175_v11  ;;  %v11182_v25 = vunpack.i.h.bf16 %v11180_v47  ;;  %v11181_v44 = vunpack.i.l.bf16 %v11180_v47 }
 0x279   : > { %v3156_v28 = vsel %vm1140_vm0, %v11176_v9, %v11177_v46  ;;  %v3158_v29 = vsel %vm1140_vm0, %v11181_v44, %v11182_v25 }
 0x27a   : > { %v3380_v50 = vmax.f32 %v17447_v4, %v3156_v28  ;;  %v3382_v23 = vmax.f32 %v17453_v8, %v3158_v29  ;;  %v2299_v8 = vadd.f32 %v13169_v32, %v2053_v62 }
 0x27c   : > { %v3448_v48 = vmax.f32 %v3376_v56, %v3380_v50  ;;  %v3450_v11 = vmax.f32 %v3378_v58, %v3382_v23  ;;  %v17457_v56 = vld [vmem:[#allocation36_spill] sm:$0xff] }
 0x27d   : > { %v11185_v20 = vpop.permute.xlu1 %11184  ;;  %v2061_v3 = vmul.f32 %v13149_v14, %v17457_v56 }
 0x27e   : > { %v11187_v12 = vunpack.i.h.bf16 %v11185_v20  ;;  %v11186_v10 = vunpack.i.l.bf16 %v11185_v20  ;;  %v14831_v33 = vpack.c.bf16 %v3450_v11, %v3448_v48  ;;  %v2303_v48 = vadd.f32 %v13169_v32, %v2057_v54 }
 0x27f   : > { %v11190_v28 = vpop.permute.xlu0 %11189  ;;  %v2307_v11 = vadd.f32 %v13169_v32, %v2061_v3 }
 0x280   : > { %v3157_v46 = vsel %vm1140_vm0, %v11187_v12, %v11181_v44  ;;  %v3155_v18 = vsel %vm1140_vm0, %v11186_v10, %v11176_v9  ;;  %9594 = vmatprep.mubr.msk.bf16.mxu0 %vm3884_vm1, %v14831_v33  ;;  %9607 = vmatprep.mubr.msk.bf16.mxu1 %vm3884_vm1, %v14831_v33  ;;  %v17454_v44 = vld [vmem:[#allocation78_spill] sm:$0xff]  ;;  %v11192_v4 = vunpack.i.h.bf16 %v11190_v28  ;;  %v11191_v50 = vunpack.i.l.bf16 %v11190_v28 }
 0x281   : > { %v3381_v43 = vmax.f32 %v2515_v15, %v3157_v46  ;;  %v3379_v47 = vmax.f32 %v2511_v60, %v3155_v18  ;;  %v2049_v55 = vmul.f32 %v13149_v14, %v17454_v44  ;;  %v17463_v44 = vld [vmem:[#allocation38_spill] sm:$0xff]  ;;  %v2527_v54 = vmax.f32 %v2303_v48, 0.0  ;;  %v17466_v48 = vld [vmem:[#allocation37_spill] sm:$0xff] }
 0x282   : > { %v3160_v23 = vsel %vm1140_vm0, %v11191_v50, %v11192_v4  ;;  %v2523_v4 = vmax.f32 %v2299_v8, 0.0  ;;  %v2531_v56 = vmax.f32 %v2307_v11, 0.0  ;;  %v2069_v11 = vmul.f32 %v13149_v14, %v17466_v48 }
 0x283   : > { %v3449_v61 = vmax.f32 %v3377_v45, %v3381_v43  ;;  %v3447_v25 = vmax.f32 %v3375_v1, %v3379_v47  ;;  %v2295_v58 = vadd.f32 %v13169_v32, %v2049_v55  ;;  %v17458_v45 = vmax.f32 %v14289_v63, 0.0  ;;  %v17459_v43 = vld [vmem:[#allocation10_spill] sm:$0xff] }
 0x284   : > { %v17460_v47 = vmax.f32 %v17459_v43, 0.0  ;;  %v17464_v55 = vmax.f32 %v17463_v44, 0.0  ;;  %v17467_v43 = vld [vmem:[#allocation39_spill] sm:$0xff] }
 0x285   : > { %v14837_v51 = vpack.c.bf16 %v3449_v61, %v3447_v25  ;;  %v11195_v9 = vpop.permute.xlu1 %11194  ;;  %v2519_v18 = vmax.f32 %v2295_v58, 0.0  ;;  %v17461_v61 = vld [vmem:[#allocation12_spill] sm:$0xff] }
 0x286   : > { %v11197_v57 = vunpack.i.h.bf16 %v11195_v9  ;;  %v11196_v29 = vunpack.i.l.bf16 %v11195_v9  ;;  %v3384_v28 = vmax.f32 %v17460_v47, %v3160_v23  ;;  %v17462_v25 = vmax.f32 %v17461_v61, 0.0 }
 0x287   : > { %4070 = vmatmul.mubr.bf16.gmra.mrb[156].mxu0 %v14837_v51  ;;  %4243 = vmatmul.mubr.bf16.gmra.mrb[156].mxu1 %v14837_v51  ;;  %v11200_v37 = vpop.permute.xlu0 %11199  ;;  %v2073_v47 = vmul.f32 %v13149_v14, %v17467_v43 }
 0x288   : > { %v3162_v20 = vsel %vm1140_vm0, %v11196_v29, %v11197_v57  ;;  %v11202_v22 = vunpack.i.h.bf16 %v11200_v37  ;;  %v11201_v12 = vunpack.i.l.bf16 %v11200_v37 }
 0x289   : > { %v3386_v9 = vmax.f32 %v17462_v25, %v3162_v20 }
 0x28a   : > { %v3161_v37 = vsel %vm1140_vm0, %v11202_v22, %v11196_v29  ;;  %v3159_v57 = vsel %vm1140_vm0, %v11201_v12, %v11191_v50 }
 0x28b   : > { %v3385_v58 = vmax.f32 %v2523_v4, %v3161_v37  ;;  %v3383_v20 = vmax.f32 %v2519_v18, %v3159_v57 }
 0x28c   : > { %v11205_v7 = vpop.permute.xlu0 %11204 }
 0x28d   : > { %v11207_v24 = vunpack.i.h.bf16 %v11205_v7  ;;  %v11206_v6 = vunpack.i.l.bf16 %v11205_v7 }
 0x28e   : > { %v11210_v39 = vpop.permute.xlu1 %11209 }
 0x28f   : > { %v3164_v10 = vsel %vm1140_vm0, %v11206_v6, %v11207_v24  ;;  %v11212_v60 = vunpack.i.h.bf16 %v11210_v39  ;;  %v11211_v15 = vunpack.i.l.bf16 %v11210_v39 }
 0x290   : > { %v3388_v46 = vmax.f32 %v17458_v45, %v3164_v10 }
 0x291   : > { %v3166_v1 = vsel %vm1140_vm0, %v11211_v15, %v11212_v60 }
 0x292   : > { %v3390_v13 = vmax.f32 %v17464_v55, %v3166_v1  ;;  %v3452_v3 = vmax.f32 %v3384_v28, %v3388_v46  ;;  %v17468_v28 = vld [vmem:[#allocation84_spill] sm:$0xff]  ;;  %v2315_v55 = vadd.f32 %v13169_v32, %v2069_v11 }
 0x293   : > { %v2077_v61 = vmul.f32 %v13149_v14, %v17468_v28 }
 0x294   : > { %v11215_v62 = vpop.permute.xlu1 %11214  ;;  %v3454_v7 = vmax.f32 %v3386_v9, %v3390_v13 }
 0x295   : > { %v11217_v63 = vunpack.i.h.bf16 %v11215_v62  ;;  %v11216_v21 = vunpack.i.l.bf16 %v11215_v62 }
 0x296   : > { %v14869_v29 = vpack.c.bf16 %v3454_v7, %v3452_v3  ;;  %v11220_v50 = vpop.permute.xlu0 %11219  ;;  %v17469_v3 = vmax.f32 %v14437_v59, 0.0 }
 0x297   : > { %v3165_v24 = vsel %vm1140_vm0, %v11217_v63, %v11211_v15  ;;  %v3163_v23 = vsel %vm1140_vm0, %v11216_v21, %v11206_v6  ;;  %v17465_v15 = vld [vmem:[#allocation40_spill] sm:$0xff]  ;;  %v11222_v45 = vunpack.i.h.bf16 %v11220_v50  ;;  %v11221_v46 = vunpack.i.l.bf16 %v11220_v50 }
 0x298   : > { %v3389_v22 = vmax.f32 %v2531_v56, %v3165_v24  ;;  %v3387_v39 = vmax.f32 %v2527_v54, %v3163_v23  ;;  %9595 = vmatprep.mubr.msk.bf16.mxu0 %vm3884_vm1, %v14869_v29  ;;  %9608 = vmatprep.mubr.msk.bf16.mxu1 %vm3884_vm1, %v14869_v29  ;;  %v2065_v6 = vmul.f32 %v13149_v14, %v17465_v15  ;;  %v17471_v50 = vmax.f32 %v14408_v35, 0.0  ;;  %v17472_v15 = vld [vmem:[#allocation15_spill] sm:$0xff] }
 0x299   : > { %v3168_v13 = vsel %vm1140_vm0, %v11221_v46, %v11222_v45  ;;  %v2319_v54 = vadd.f32 %v13169_v32, %v2073_v47  ;;  %v2323_v56 = vadd.f32 %v13169_v32, %v2077_v61 }
 0x29a   : > { %v3453_v10 = vmax.f32 %v3385_v58, %v3389_v22  ;;  %v3451_v8 = vmax.f32 %v3383_v20, %v3387_v39  ;;  %v2311_v9 = vadd.f32 %v13169_v32, %v2065_v6  ;;  %v2539_v39 = vmax.f32 %v2315_v55, 0.0 }
 0x29b   : > { %v11225_v60 = vpop.permute.xlu1 %11224  ;;  %v17473_v6 = vmax.f32 %v17472_v15, 0.0  ;;  %v2543_v47 = vmax.f32 %v2319_v54, 0.0  ;;  %v2547_v28 = vmax.f32 %v2323_v56, 0.0  ;;  %v11811_v54 = vld [vmem:[%s16985_s4 + $0x3a4] ss:$16 sps:$4 sm:$0xff]  }
 0x29c   : > { %v14875_v12 = vpack.c.bf16 %v3453_v10, %v3451_v8  ;;  %v11227_v18 = vunpack.i.h.bf16 %v11225_v60  ;;  %v11226_v1 = vunpack.i.l.bf16 %v11225_v60  ;;  %v2535_v24 = vmax.f32 %v2311_v9, 0.0  ;;  %v11806_v56 = vld [vmem:[%s16985_s4 + $0x3a8] ss:$16 sps:$4 sm:$0xff]  }
 0x29d   : > { %v17470_v10 = vmax.f32 %v14397_v36, 0.0  ;;  %v11824_v15 = vld [vmem:[%s16985_s4 + $0x408] ss:$16 sps:$4 sm:$0xff]  }
 0x29e   : > { %4080 = vmatmul.mubr.bf16.gmra.mrb[160].mxu0 %v14875_v12  ;;  %4253 = vmatmul.mubr.bf16.gmra.mrb[160].mxu1 %v14875_v12  ;;  %v3170_v4 = vsel %vm1140_vm0, %v11226_v1, %v11227_v18 }
 0x29f   : > { %v3392_v8 = vmax.f32 %v17470_v10, %v3168_v13  ;;  %v3394_v60 = vmax.f32 %v17471_v50, %v3170_v4  ;;  %v11818_v10 = vld [vmem:[%s16985_s4 + $0x3e8] ss:$16 sps:$4 sm:$0xff]   ;;  %v11826_v50 = vld [vmem:[%s16985_s4 + $0x40c] ss:$16 sps:$4 sm:$0xff]  }
 0x2a0   : > { %v11230_v25 = vpop.permute.xlu0 %11229 }
 0x2a1   : > { %v11232_v37 = vunpack.i.h.bf16 %v11230_v25  ;;  %v11231_v44 = vunpack.i.l.bf16 %v11230_v25 }
 0x2a2   : > { %v11240_v62 = vpop.permute.xlu1 %11239 }
 0x2a3   : > { %v3172_v57 = vsel %vm1140_vm0, %v11231_v44, %v11232_v37  ;;  %v11242_v63 = vunpack.i.h.bf16 %v11240_v62  ;;  %v11241_v21 = vunpack.i.l.bf16 %v11240_v62 }
 0x2a4   : > { %v3396_v7 = vmax.f32 %v17469_v3, %v3172_v57  ;;  %v11800_v57 = vld [vmem:[%s16985_s4 + $0x388] ss:$16 sps:$4 sm:$0xff]   ;;  %v11809_v3 = vld [vmem:[%s16985_s4 + $0x3a0] ss:$16 sps:$4 sm:$0xff]  }
 0x2a5   : > { %v3174_v23 = vsel %vm1140_vm0, %v11241_v21, %v11242_v63  ;;  %v11803_v63 = vld [vmem:[%s16985_s4 + $0x380] ss:$16 sps:$4 sm:$0xff]  }
 0x2a6   : > { %v11235_v58 = vpop.permute.xlu0 %11234  ;;  %v3398_v48 = vmax.f32 %v17473_v6, %v3174_v23  ;;  %v3456_v61 = vmax.f32 %v3392_v8, %v3396_v7  ;;  %v11814_v7 = vld [vmem:[%s16985_s4 + $0x3cc] ss:$16 sps:$4 sm:$0xff]   ;;  %v11815_v23 = vld [vmem:[%s16985_s4 + $0x3c0] ss:$16 sps:$4 sm:$0xff]  }
 0x2a7   : > { %v11237_v20 = vunpack.i.h.bf16 %v11235_v58  ;;  %v11236_v22 = vunpack.i.l.bf16 %v11235_v58  ;;  %v11245_v11 = vpop.permute.xlu1 %11244  ;;  %v11817_v58 = vld [vmem:[%s16985_s4 + $0x3c4] ss:$16 sps:$4 sm:$0xff]   ;;  %v11821_v8 = vld [vmem:[%s16985_s4 + $0x3e0] ss:$16 sps:$4 sm:$0xff]  }
 0x2a8   : > { %v11247_v18 = vunpack.i.h.bf16 %v11245_v11  ;;  %v11246_v43 = vunpack.i.l.bf16 %v11245_v11  ;;  %v3458_v25 = vmax.f32 %v3394_v60, %v3398_v48  ;;  %v11829_v60 = vld [vmem:[%s16985_s4 + $0x404] ss:$16 sps:$4 sm:$0xff]   ;;  %v11827_v6 = vld [vmem:[%s16985_s4 + $0x400] ss:$16 sps:$4 sm:$0xff]   ;;  %v11832_v48 = vld [vmem:[%s16985_s4 + $0x42c] ss:$16 sps:$4 sm:$0xff]  }
 0x2a9   : > { %v3169_v59 = vsel %vm1140_vm0, %v11237_v20, %v11226_v1  ;;  %v3167_v45 = vsel %vm1140_vm0, %v11236_v22, %v11221_v46  ;;  %v11820_v20 = vld [vmem:[%s16985_s4 + $0x3ec] ss:$16 sps:$4 sm:$0xff]   ;;  %v11823_v22 = vld [vmem:[%s16985_s4 + $0x3e4] ss:$16 sps:$4 sm:$0xff]  }
 0x2aa   : > { %v3393_v9 = vmax.f32 %v2539_v39, %v3169_v59  ;;  %v3173_v36 = vsel %vm1140_vm0, %v11247_v18, %v11241_v21  ;;  %v3171_v35 = vsel %vm1140_vm0, %v11246_v43, %v11231_v44  ;;  %v14907_v37 = vpack.c.bf16 %v3458_v25, %v3456_v61  ;;  %v11808_v21 = vld [vmem:[%s16985_s4 + $0x3ac] ss:$16 sps:$4 sm:$0xff]   ;;  %v11835_v11 = vld [vmem:[%s16985_s4 + $0x424] ss:$16 sps:$4 sm:$0xff]   ;;  %v11830_v18 = vld [vmem:[%s16985_s4 + $0x428] ss:$16 sps:$4 sm:$0xff]  }
 0x2ab   : > { %v3391_v55 = vmax.f32 %v2535_v24, %v3167_v45  ;;  %v3397_v13 = vmax.f32 %v2547_v28, %v3173_v36  ;;  %v3395_v62 = vmax.f32 %v2543_v47, %v3171_v35  ;;  %v17474_v44 = vmov 0   ;;  %v11812_v24 = vld [vmem:[%s16985_s4 + $0x3c8] ss:$16 sps:$4 sm:$0xff]   ;;  %v17476_v59 = vld [vmem:[#allocation63_spill] sm:$0xff]  ;;  %v11838_v47 = vld [vmem:[%s16985_s4 + $0x44c] ss:$16 sps:$4 sm:$0xff]  }
 0x2ac   : > { %9596 = vmatprep.mubr.msk.bf16.mxu0 %vm3884_vm1, %v14907_v37  ;;  %9609 = vmatprep.mubr.msk.bf16.mxu1 %vm3884_vm1, %v14907_v37  ;;  %v17475_v39 = vld [vmem:[#allocation56_spill] sm:$0xff]  ;;  %v11833_v43 = vld [vmem:[%s16985_s4 + $0x420] ss:$16 sps:$4 sm:$0xff]   ;;  %v11841_v28 = vld [vmem:[%s16985_s4 + $0x444] ss:$16 sps:$4 sm:$0xff]  }
 0x2ad   : > { %v3457_v4 = vmax.f32 %v3393_v9, %v3397_v13  ;;  %v3455_v1 = vmax.f32 %v3391_v55, %v3395_v62  ;;  %v17477_v45 = vld [vmem:[#allocation72_spill] sm:$0xff]  ;;  %v17478_v61 = vld [vmem:[#allocation11_spill] sm:$0xff]  ;;  %v17479_v9 = vld [vmem:[#allocation13_spill] sm:$0xff] }
 0x2ae   : > { %v2081_v25 = vmul.f32 %v13149_v14, %v17478_v61  ;;  %v2085_v36 = vmul.f32 %v13149_v14, %v17479_v9  ;;  %v11836_v55 = vld [vmem:[%s16985_s4 + $0x448] ss:$16 sps:$4 sm:$0xff]   ;;  %v11839_v13 = vld [vmem:[%s16985_s4 + $0x440] ss:$16 sps:$4 sm:$0xff]  }
 0x2af   : > { %v14913_v46 = vpack.c.bf16 %v3457_v4, %v3455_v1  ;;  %v17480_v62 = vld [vmem:[#allocation41_spill] sm:$0xff]  ;;  %v17481_v1 = vld [vmem:[#allocation87_spill] sm:$0xff] }
 0x2b0   : > { %v2089_v4 = vmul.f32 %v13149_v14, %v17480_v62  ;;  %v17484_v62 = vld [vmem:[#allocation35_spill] sm:$0xff] }
 0x2b1   : > { %4090 = vmatmul.mubr.bf16.gmra.mrb[164].mxu0 %v14913_v46  ;;  %4263 = vmatmul.mubr.bf16.gmra.mrb[164].mxu1 %v14913_v46 }
 0x2b2   : > { %4585 = vmatprep.mubr.bf16.mxu0 %v17474_v44  ;;  %4758 = vmatprep.mubr.bf16.mxu1 %v17474_v44 }
 0x2b9   : > { %4586 = vmatmul.mubr.bf16.vlgmr.msra.gmra.mrb[112].mxu0 %v17474_v44  ;;  %4759 = vmatmul.mubr.bf16.vlgmr.msra.gmra.mrb[112].mxu1 %v17474_v44 }
 0x2ba   : > { %5413 = vmatpush1.bf16.msra.mxu1 %v11800_v57  ;;  %5240 = vmatpush1.bf16.msra.mxu0 %v11803_v63  ;;  %v2093_v57 = vmul.f32 %v13149_v14, %v17481_v1  ;;  %v11844_v63 = vld [vmem:[%s16985_s4 + $0x46c] ss:$16 sps:$4 sm:$0xff]   ;;  %v2331_v14 = vadd.f32 %v13169_v32, %v2085_v36 }
 0x2bb   : > { %4595 = vmatprep.mubr.bf16.mxu0 %v17474_v44  ;;  %4768 = vmatprep.mubr.bf16.mxu1 %v17474_v44  ;;  %v11856_v36 = vld [vmem:[%s16985_s4 + $0x4ac] ss:$16 sps:$4 sm:$0xff]  }
 0x2bc   : > { %5414 = vmatprep.subr.bf16.mxu1 %v11808_v21  ;;  %5241 = vmatprep.subr.bf16.mxu0 %v11811_v54  ;;  %v11847_v21 = vld [vmem:[%s16985_s4 + $0x464] ss:$16 sps:$4 sm:$0xff]  }
 0x2be   : > { %5415 = vmatpush1.bf16.msra.mxu1 %v11806_v56  ;;  %5242 = vmatpush1.bf16.msra.mxu0 %v11809_v3  ;;  %v17482_v56 = vld [vmem:[#allocation23_spill] sm:$0xff]  ;;  %v2327_v3 = vadd.f32 %v13169_v32, %v2081_v25 }
 0x2bf   : > { %5416 = vmatprep.subr.bf16.mxu1 %v11814_v7  ;;  %5243 = vmatprep.subr.bf16.mxu0 %v11817_v58  ;;  %v17483_v7 = vld [vmem:[#allocation9_spill] sm:$0xff] }
 0x2c1   : > { %4596 = vmatmul.mubr.bf16.gmra.mrb[116].mxu0 %v17474_v44  ;;  %4769 = vmatmul.mubr.bf16.gmra.mrb[116].mxu1 %v17474_v44 }
 0x2c2   : > { %9666 = vmatprep.mubr.msk.bf16.mxu0 %vm3884_vm1, %v17475_v39  ;;  %9678 = vmatprep.mubr.msk.bf16.mxu1 %vm3884_vm1, %v17475_v39 }
 0x2c3   : > { %5417 = vmatpush1.bf16.msra.mxu1 %v11812_v24  ;;  %5244 = vmatpush1.bf16.msra.mxu0 %v11815_v23  ;;  %v11842_v24 = vld [vmem:[%s16985_s4 + $0x468] ss:$16 sps:$4 sm:$0xff]   ;;  %v11845_v23 = vld [vmem:[%s16985_s4 + $0x460] ss:$16 sps:$4 sm:$0xff]  }
 0x2c4   : > { %5418 = vmatprep.subr.bf16.mxu1 %v11820_v20  ;;  %5245 = vmatprep.subr.bf16.mxu0 %v11823_v22  ;;  %v2335_v20 = vadd.f32 %v13169_v32, %v2089_v4  ;;  %v2339_v22 = vadd.f32 %v13169_v32, %v2093_v57  ;;  %v11848_v32 = vld [vmem:[%s16985_s4 + $0x488] ss:$16 sps:$4 sm:$0xff]  }
 0x2c6   : > { %v2559_v25 = vmax.f32 %v2335_v20, 0.0  ;;  %v2563_v9 = vmax.f32 %v2339_v22, 0.0 }
 0x2c7   : > { %5419 = vmatpush1.bf16.msra.mxu1 %v11818_v10  ;;  %5246 = vmatpush1.bf16.msra.mxu0 %v11821_v8  ;;  %v11850_v10 = vld [vmem:[%s16985_s4 + $0x48c] ss:$16 sps:$4 sm:$0xff]   ;;  %v11853_v8 = vld [vmem:[%s16985_s4 + $0x484] ss:$16 sps:$4 sm:$0xff]  }
 0x2c8   : > { %5420 = vmatprep.subr.bf16.mxu1 %v11826_v50  ;;  %5247 = vmatprep.subr.bf16.mxu0 %v11829_v60 }
 0x2c9   : > { %4606 = vmatmul.mubr.bf16.gmra.mrb[120].mxu0 %v17476_v59  ;;  %4779 = vmatmul.mubr.bf16.gmra.mrb[120].mxu1 %v17476_v59 }
 0x2ca   : > { %9667 = vmatprep.mubr.msk.bf16.mxu0 %vm3884_vm1, %v17477_v45  ;;  %9679 = vmatprep.mubr.msk.bf16.mxu1 %vm3884_vm1, %v17477_v45 }
 0x2cb   : > { %5421 = vmatpush1.bf16.msra.mxu1 %v11824_v15  ;;  %5248 = vmatpush1.bf16.msra.mxu0 %v11827_v6  ;;  %v2551_v6 = vmax.f32 %v2327_v3, 0.0 }
 0x2cc   : > { %5422 = vmatprep.subr.bf16.mxu1 %v11832_v48  ;;  %5249 = vmatprep.subr.bf16.mxu0 %v11835_v11  ;;  %v2555_v48 = vmax.f32 %v2331_v14, 0.0 }
 0x2cf   : > { %5423 = vmatpush1.bf16.msra.mxu1 %v11830_v18  ;;  %5250 = vmatpush1.bf16.msra.mxu0 %v11833_v43  ;;  %v11851_v18 = vld [vmem:[%s16985_s4 + $0x480] ss:$16 sps:$4 sm:$0xff]  }
 0x2d0   : > { %5424 = vmatprep.subr.bf16.mxu1 %v11838_v47  ;;  %5251 = vmatprep.subr.bf16.mxu0 %v11841_v28 }
 0x2d1   : > { %4616 = vmatmul.mubr.bf16.gmra.mrb[124].mxu0 %v17482_v56  ;;  %4789 = vmatmul.mubr.bf16.gmra.mrb[124].mxu1 %v17482_v56 }
 0x2d2   : > { %v15011_v35 = vpop.permute.xlu0 %11249  ;;  %9668 = vmatprep.mubr.msk.bf16.mxu0 %vm3884_vm1, %v17483_v7  ;;  %9680 = vmatprep.mubr.msk.bf16.mxu1 %vm3884_vm1, %v17483_v7 }
 0x2d3   : > { %5425 = vmatpush1.bf16.msra.mxu1 %v11836_v55  ;;  %5252 = vmatpush1.bf16.msra.mxu0 %v11839_v13  ;;  %v11251_v60 = vunpack.i.l.bf16 %v15011_v35  ;;  %v11859_v55 = vld [vmem:[%s16985_s4 + $0x4a4] ss:$16 sps:$4 sm:$0xff]  }
 0x2d4   : > { %v15029_v54 = vpop.permute.xlu1 %11254  ;;  %5426 = vmatprep.subr.bf16.mxu1 %v11844_v63  ;;  %5253 = vmatprep.subr.bf16.mxu0 %v11847_v21  ;;  %v17485_v21 = vld [vmem:[#allocation42_spill] sm:$0xff] }
 0x2d5   : > { %v11256_v15 = vunpack.i.l.bf16 %v15029_v54 }
 0x2d6   : > { %v15039_v58 = vpop.permute.xlu0 %11259 }
 0x2d7   : > { %5427 = vmatpush1.bf16.msra.mxu1 %v11842_v24  ;;  %5254 = vmatpush1.bf16.msra.mxu0 %v11845_v23  ;;  %v11261_v43 = vunpack.i.l.bf16 %v15039_v58  ;;  %v11854_v24 = vld [vmem:[%s16985_s4 + $0x4a8] ss:$16 sps:$4 sm:$0xff]   ;;  %v11857_v23 = vld [vmem:[%s16985_s4 + $0x4a0] ss:$16 sps:$4 sm:$0xff]  }
 0x2d8   : > { %v15055_v50 = vpop.permute.xlu1 %11269  ;;  %5428 = vmatprep.subr.bf16.mxu1 %v11850_v10  ;;  %5255 = vmatprep.subr.bf16.mxu0 %v11853_v8 }
 0x2d9   : > { %v11271_v47 = vunpack.i.l.bf16 %v15055_v50  ;;  %4626 = vmatmul.mubr.bf16.gmra.mrb[128].mxu0 %v17484_v62  ;;  %4799 = vmatmul.mubr.bf16.gmra.mrb[128].mxu1 %v17484_v62 }
 0x2da   : > { %v11265_v11 = vpop.permute.xlu0 %11264  ;;  %9669 = vmatprep.mubr.msk.bf16.mxu0 %vm3884_vm1, %v17485_v21  ;;  %9681 = vmatprep.mubr.msk.bf16.mxu1 %vm3884_vm1, %v17485_v21 }
 0x2db   : > { %v11267_v28 = vunpack.i.h.bf16 %v11265_v11  ;;  %v11266_v61 = vunpack.i.l.bf16 %v11265_v11  ;;  %5429 = vmatpush1.bf16.msra.mxu1 %v11848_v32  ;;  %5256 = vmatpush1.bf16.msra.mxu0 %v11851_v18  ;;  %v11860_v18 = vld [vmem:[%s16985_s4 + $0x4c8] ss:$16 sps:$4 sm:$0xff]  }
 0x2dc   : > { %v11275_v13 = vpop.permute.xlu1 %11274  ;;  %5430 = vmatprep.subr.bf16.mxu1 %v11856_v36  ;;  %5257 = vmatprep.subr.bf16.mxu0 %v11859_v55  ;;  %v17486_v36 = vld [vmem:[#allocation44_spill] sm:$0xff]  ;;  %v17487_v55 = vld [vmem:[#allocation45_spill] sm:$0xff] }
 0x2dd   : > { %v3177_v4 = vsel %vm1140_vm0, %v11267_v28, %v11256_v15  ;;  %v3175_v1 = vsel %vm1140_vm0, %v11266_v61, %v11251_v60  ;;  %v11277_v57 = vunpack.i.h.bf16 %v11275_v13  ;;  %v11276_v63 = vunpack.i.l.bf16 %v11275_v13  ;;  %v11863_v28 = vld [vmem:[%s16985_s4 + $0x4c0] ss:$16 sps:$4 sm:$0xff]   ;;  %v11866_v13 = vld [vmem:[%s16985_s4 + $0x4e8] ss:$16 sps:$4 sm:$0xff]  }
 0x2de   : > { %v3401_v3 = vmax.f32 %v2555_v48, %v3177_v4  ;;  %v3399_v14 = vmax.f32 %v2551_v6, %v3175_v1  ;;  %v11862_v6 = vld [vmem:[%s16985_s4 + $0x4cc] ss:$16 sps:$4 sm:$0xff]   ;;  %v11865_v48 = vld [vmem:[%s16985_s4 + $0x4c4] ss:$16 sps:$4 sm:$0xff]   ;;  %v11869_v4 = vld [vmem:[%s16985_s4 + $0x4e0] ss:$16 sps:$4 sm:$0xff]  }
 0x2df   : > { %v3181_v20 = vsel %vm1140_vm0, %v11277_v57, %v11271_v47  ;;  %v3179_v22 = vsel %vm1140_vm0, %v11276_v63, %v11261_v43  ;;  %5431 = vmatpush1.bf16.msra.mxu1 %v11854_v24  ;;  %5258 = vmatpush1.bf16.msra.mxu0 %v11857_v23  ;;  %v11874_v1 = vld [vmem:[%s16985_s4 + $0x50c] ss:$16 sps:$4 sm:$0xff]   ;;  %v11877_v57 = vld [vmem:[%s16985_s4 + $0x504] ss:$16 sps:$4 sm:$0xff]   ;;  %v11872_v63 = vld [vmem:[%s16985_s4 + $0x508] ss:$16 sps:$4 sm:$0xff]  }
 0x2e0   : > { %v3405_v10 = vmax.f32 %v2563_v9, %v3181_v20  ;;  %v3403_v8 = vmax.f32 %v2559_v25, %v3179_v22  ;;  %5432 = vmatprep.subr.bf16.mxu1 %v11862_v6  ;;  %5259 = vmatprep.subr.bf16.mxu0 %v11865_v48  ;;  %v11868_v25 = vld [vmem:[%s16985_s4 + $0x4ec] ss:$16 sps:$4 sm:$0xff]   ;;  %v11871_v9 = vld [vmem:[%s16985_s4 + $0x4e4] ss:$16 sps:$4 sm:$0xff]   ;;  %v11878_v20 = vld [vmem:[%s16985_s4 + $0x528] ss:$16 sps:$4 sm:$0xff]  }
 0x2e1   : > { %4636 = vmatmul.mubr.bf16.gmra.mrb[132].mxu0 %v17486_v36  ;;  %4809 = vmatmul.mubr.bf16.gmra.mrb[132].mxu1 %v17486_v36  ;;  %v11883_v24 = vld [vmem:[%s16985_s4 + $0x524] ss:$16 sps:$4 sm:$0xff]   ;;  %v17488_v23 = vld [vmem:[#allocation14_spill] sm:$0xff]  ;;  %v11881_v22 = vld [vmem:[%s16985_s4 + $0x520] ss:$16 sps:$4 sm:$0xff]  }
 0x2e2   : > { %v3461_v11 = vmax.f32 %v3401_v3, %v3405_v10  ;;  %v3459_v32 = vmax.f32 %v3399_v14, %v3403_v8  ;;  %9670 = vmatprep.mubr.msk.bf16.mxu0 %vm3884_vm1, %v17487_v55  ;;  %9682 = vmatprep.mubr.msk.bf16.mxu1 %vm3884_vm1, %v17487_v55  ;;  %v11875_v3 = vld [vmem:[%s16985_s4 + $0x500] ss:$16 sps:$4 sm:$0xff]   ;;  %v11880_v14 = vld [vmem:[%s16985_s4 + $0x52c] ss:$16 sps:$4 sm:$0xff]   ;;  %v11889_v8 = vld [vmem:[%s16985_s4 + $0x544] ss:$16 sps:$4 sm:$0xff]  }
 0x2e3   : > { %5433 = vmatpush1.bf16.msra.mxu1 %v11860_v18  ;;  %5260 = vmatpush1.bf16.msra.mxu0 %v11863_v28  ;;  %v11886_v10 = vld [vmem:[%s16985_s4 + $0x54c] ss:$16 sps:$4 sm:$0xff]   ;;  %v11884_v6 = vld [vmem:[%s16985_s4 + $0x548] ss:$16 sps:$4 sm:$0xff]   ;;  %v11887_v48 = vld [vmem:[%s16985_s4 + $0x540] ss:$16 sps:$4 sm:$0xff]  }
 0x2e4   : > { %v15109_v61 = vpack.c.bf16 %v3461_v11, %v3459_v32  ;;  %5434 = vmatprep.subr.bf16.mxu1 %v11868_v25  ;;  %5261 = vmatprep.subr.bf16.mxu0 %v11871_v9  ;;  %v11892_v11 = vld [vmem:[%s16985_s4 + $0x56c] ss:$16 sps:$4 sm:$0xff]   ;;  %v11895_v32 = vld [vmem:[%s16985_s4 + $0x564] ss:$16 sps:$4 sm:$0xff]   ;;  %v11893_v18 = vld [vmem:[%s16985_s4 + $0x560] ss:$16 sps:$4 sm:$0xff]  }
 0x2e5   : > { %v11901_v28 = vld [vmem:[%s16985_s4 + $0x584] ss:$16 sps:$4 sm:$0xff]   ;;  %v11896_v25 = vld [vmem:[%s16985_s4 + $0x588] ss:$16 sps:$4 sm:$0xff]   ;;  %v11899_v9 = vld [vmem:[%s16985_s4 + $0x580] ss:$16 sps:$4 sm:$0xff]  }
 0x2e7   : > { %5435 = vmatpush1.bf16.msra.mxu1 %v11866_v13  ;;  %5262 = vmatpush1.bf16.msra.mxu0 %v11869_v4  ;;  %v11904_v13 = vld [vmem:[%s16985_s4 + $0x5ac] ss:$16 sps:$4 sm:$0xff]   ;;  %v11907_v4 = vld [vmem:[%s16985_s4 + $0x5a4] ss:$16 sps:$4 sm:$0xff]  }
 0x2e8   : > { %5436 = vmatprep.subr.bf16.mxu1 %v11874_v1  ;;  %5263 = vmatprep.subr.bf16.mxu0 %v11877_v57  ;;  %v11902_v1 = vld [vmem:[%s16985_s4 + $0x5a8] ss:$16 sps:$4 sm:$0xff]   ;;  %v11905_v57 = vld [vmem:[%s16985_s4 + $0x5a0] ss:$16 sps:$4 sm:$0xff]  }
 0x2e9   : > { %4646 = vmatmul.mubr.bf16.gmra.mrb[136].mxu0 %v17488_v23  ;;  %4819 = vmatmul.mubr.bf16.gmra.mrb[136].mxu1 %v17488_v23 }
 0x2ea   : > { %9671 = vmatprep.mubr.msk.bf16.mxu0 %vm3884_vm1, %v14565_v38  ;;  %9683 = vmatprep.mubr.msk.bf16.mxu1 %vm3884_vm1, %v14565_v38 }
 0x2eb   : > { %5437 = vmatpush1.bf16.msra.mxu1 %v11872_v63  ;;  %5264 = vmatpush1.bf16.msra.mxu0 %v11875_v3  ;;  %v11910_v63 = vld [vmem:[%s16985_s4 + $0x5cc] ss:$16 sps:$4 sm:$0xff]   ;;  %v11913_v3 = vld [vmem:[%s16985_s4 + $0x5c4] ss:$16 sps:$4 sm:$0xff]  }
 0x2ec   : > { %5438 = vmatprep.subr.bf16.mxu1 %v11880_v14  ;;  %5265 = vmatprep.subr.bf16.mxu0 %v11883_v24  ;;  %v11908_v14 = vld [vmem:[%s16985_s4 + $0x5c8] ss:$16 sps:$4 sm:$0xff]   ;;  %v11911_v24 = vld [vmem:[%s16985_s4 + $0x5c0] ss:$16 sps:$4 sm:$0xff]  }
 0x2ef   : > { %5439 = vmatpush1.bf16.msra.mxu1 %v11878_v20  ;;  %5266 = vmatpush1.bf16.msra.mxu0 %v11881_v22  ;;  %v11916_v20 = vld [vmem:[%s16985_s4 + $0x5ec] ss:$16 sps:$4 sm:$0xff]   ;;  %v11919_v22 = vld [vmem:[%s16985_s4 + $0x5e4] ss:$16 sps:$4 sm:$0xff]  }
 0x2f0   : > { %6207 = vmatprep.subr.bf16.mxu1 %v11886_v10  ;;  %6034 = vmatprep.subr.bf16.mxu0 %v11889_v8  ;;  %v11914_v10 = vld [vmem:[%s16985_s4 + $0x5e8] ss:$16 sps:$4 sm:$0xff]   ;;  %v11917_v8 = vld [vmem:[%s16985_s4 + $0x5e0] ss:$16 sps:$4 sm:$0xff]  }
 0x2f1   : > { %4656 = vmatmul.mubr.bf16.gmra.mrb[140].mxu0 %v14571_v30  ;;  %4829 = vmatmul.mubr.bf16.gmra.mrb[140].mxu1 %v14571_v30 }
 0x2f2   : > { %9672 = vmatprep.mubr.msk.bf16.mxu0 %vm3884_vm1, %v14616_v19  ;;  %9684 = vmatprep.mubr.msk.bf16.mxu1 %vm3884_vm1, %v14616_v19 }
 0x2f9   : > { %4666 = vmatmul.mubr.bf16.gmra.mrb[144].mxu0 %v14618_v5  ;;  %4839 = vmatmul.mubr.bf16.gmra.mrb[144].mxu1 %v14618_v5 }
 0x2fa   : > { %9673 = vmatprep.mubr.msk.bf16.mxu0 %vm3884_vm1, %v14661_v16  ;;  %9685 = vmatprep.mubr.msk.bf16.mxu1 %vm3884_vm1, %v14661_v16 }
 0x301   : > { %4676 = vmatmul.mubr.bf16.gmra.mrb[148].mxu0 %v14665_v53  ;;  %4849 = vmatmul.mubr.bf16.gmra.mrb[148].mxu1 %v14665_v53 }
 0x302   : > { %9674 = vmatprep.mubr.msk.bf16.mxu0 %vm3884_vm1, %v14722_v0  ;;  %9686 = vmatprep.mubr.msk.bf16.mxu1 %vm3884_vm1, %v14722_v0 }
 0x309   : > { %4686 = vmatmul.mubr.bf16.gmra.mrb[152].mxu0 %v14738_v42  ;;  %4859 = vmatmul.mubr.bf16.gmra.mrb[152].mxu1 %v14738_v42 }
 0x30a   : > { %9675 = vmatprep.mubr.msk.bf16.mxu0 %vm3884_vm1, %v14793_v52  ;;  %9687 = vmatprep.mubr.msk.bf16.mxu1 %vm3884_vm1, %v14793_v52 }
 0x311   : > { %4696 = vmatmul.mubr.bf16.gmra.mrb[156].mxu0 %v14799_v2  ;;  %4869 = vmatmul.mubr.bf16.gmra.mrb[156].mxu1 %v14799_v2 }
 0x312   : > { %9676 = vmatprep.mubr.msk.bf16.mxu0 %vm3884_vm1, %v14831_v33  ;;  %9688 = vmatprep.mubr.msk.bf16.mxu1 %vm3884_vm1, %v14831_v33 }
 0x319   : > { %4706 = vmatmul.mubr.bf16.gmra.mrb[160].mxu0 %v14837_v51  ;;  %4879 = vmatmul.mubr.bf16.gmra.mrb[160].mxu1 %v14837_v51 }
 0x31a   : > { %9677 = vmatprep.mubr.msk.bf16.mxu0 %vm3884_vm1, %v14869_v29  ;;  %9689 = vmatprep.mubr.msk.bf16.mxu1 %vm3884_vm1, %v14869_v29 }
 0x321   : > { %4716 = vmatmul.mubr.bf16.gmra.mrb[164].mxu0 %v14875_v12  ;;  %4889 = vmatmul.mubr.bf16.gmra.mrb[164].mxu1 %v14875_v12 }
 0x322   : > { %9802 = vmatprep.mubr.msk.bf16.mxu0 %vm3884_vm1, %v17475_v39  ;;  %9816 = vmatprep.mubr.msk.bf16.mxu1 %vm3884_vm1, %v17475_v39  ;;  %v11890_v39 = vld [vmem:[%s16985_s4 + $0x568] ss:$16 sps:$4 sm:$0xff]  }
 0x329   : > { %5272 = vmatmul.mubr.bf16.vlgmr.msra.gmra.mrb[112].mxu0 %v17476_v59  ;;  %5445 = vmatmul.mubr.bf16.vlgmr.msra.gmra.mrb[112].mxu1 %v17476_v59  ;;  %v11898_v59 = vld [vmem:[%s16985_s4 + $0x58c] ss:$16 sps:$4 sm:$0xff]  }
 0x32a   : > { %6208 = vmatpush1.bf16.msra.mxu1 %v11884_v6  ;;  %9803 = vmatprep.mubr.msk.bf16.mxu0 %vm3884_vm1, %v17477_v45  ;;  %v11922_v6 = vld [vmem:[%s16985_s4 + $0x60c] ss:$16 sps:$4 sm:$0xff]  }
 0x32b   : > { %9817 = vmatprep.mubr.msk.bf16.mxu1 %vm3884_vm1, %v17477_v45  ;;  %6035 = vmatpush1.bf16.msra.mxu0 %v11887_v48  ;;  %v11925_v48 = vld [vmem:[%s16985_s4 + $0x604] ss:$16 sps:$4 sm:$0xff]  }
 0x32c   : > { %6209 = vmatprep.subr.bf16.mxu1 %v11892_v11  ;;  %6036 = vmatprep.subr.bf16.mxu0 %v11895_v32  ;;  %v11920_v11 = vld [vmem:[%s16985_s4 + $0x608] ss:$16 sps:$4 sm:$0xff]   ;;  %v11923_v32 = vld [vmem:[%s16985_s4 + $0x600] ss:$16 sps:$4 sm:$0xff]  }
 0x32e   : > { %6210 = vmatpush1.bf16.msra.mxu1 %v11890_v39  ;;  %v11928_v39 = vld [vmem:[%s16985_s4 + $0x62c] ss:$16 sps:$4 sm:$0xff]  }
 0x32f   : > { %6037 = vmatpush1.bf16.msra.mxu0 %v11893_v18  ;;  %6211 = vmatprep.subr.bf16.mxu1 %v11898_v59  ;;  %v11931_v18 = vld [vmem:[%s16985_s4 + $0x624] ss:$16 sps:$4 sm:$0xff]   ;;  %v11926_v59 = vld [vmem:[%s16985_s4 + $0x628] ss:$16 sps:$4 sm:$0xff]  }
 0x330   : > { %6038 = vmatprep.subr.bf16.mxu0 %v11901_v28  ;;  %v11929_v28 = vld [vmem:[%s16985_s4 + $0x620] ss:$16 sps:$4 sm:$0xff]  }
 0x331   : > { %5282 = vmatmul.mubr.bf16.gmra.mrb[116].mxu0 %v17482_v56  ;;  %5455 = vmatmul.mubr.bf16.gmra.mrb[116].mxu1 %v17482_v56 }
 0x332   : > { %9804 = vmatprep.mubr.msk.bf16.mxu0 %vm3884_vm1, %v17483_v7  ;;  %9818 = vmatprep.mubr.msk.bf16.mxu1 %vm3884_vm1, %v17483_v7 }
 0x333   : > { %6212 = vmatpush1.bf16.msra.mxu1 %v11896_v25  ;;  %6039 = vmatpush1.bf16.msra.mxu0 %v11899_v9  ;;  %v11934_v25 = vld [vmem:[%s16985_s4 + $0x64c] ss:$16 sps:$4 sm:$0xff]   ;;  %v11937_v9 = vld [vmem:[%s16985_s4 + $0x644] ss:$16 sps:$4 sm:$0xff]  }
 0x334   : > { %6213 = vmatprep.subr.bf16.mxu1 %v11904_v13  ;;  %6040 = vmatprep.subr.bf16.mxu0 %v11907_v4  ;;  %v11932_v13 = vld [vmem:[%s16985_s4 + $0x648] ss:$16 sps:$4 sm:$0xff]   ;;  %v11935_v4 = vld [vmem:[%s16985_s4 + $0x640] ss:$16 sps:$4 sm:$0xff]  }
 0x337   : > { %6214 = vmatpush1.bf16.msra.mxu1 %v11902_v1  ;;  %6041 = vmatpush1.bf16.msra.mxu0 %v11905_v57  ;;  %v11940_v1 = vld [vmem:[%s16985_s4 + $0x66c] ss:$16 sps:$4 sm:$0xff]   ;;  %v11943_v57 = vld [vmem:[%s16985_s4 + $0x664] ss:$16 sps:$4 sm:$0xff]  }
 0x338   : > { %6215 = vmatprep.subr.bf16.mxu1 %v11910_v63  ;;  %6042 = vmatprep.subr.bf16.mxu0 %v11913_v3  ;;  %v11938_v63 = vld [vmem:[%s16985_s4 + $0x668] ss:$16 sps:$4 sm:$0xff]   ;;  %v11941_v3 = vld [vmem:[%s16985_s4 + $0x660] ss:$16 sps:$4 sm:$0xff]  }
 0x339   : > { %5292 = vmatmul.mubr.bf16.gmra.mrb[120].mxu0 %v17484_v62  ;;  %5465 = vmatmul.mubr.bf16.gmra.mrb[120].mxu1 %v17484_v62 }
 0x33a   : > { %9805 = vmatprep.mubr.msk.bf16.mxu0 %vm3884_vm1, %v17485_v21  ;;  %9819 = vmatprep.mubr.msk.bf16.mxu1 %vm3884_vm1, %v17485_v21 }
 0x33b   : > { %6216 = vmatpush1.bf16.msra.mxu1 %v11908_v14  ;;  %6043 = vmatpush1.bf16.msra.mxu0 %v11911_v24  ;;  %v11946_v14 = vld [vmem:[%s16985_s4 + $0x68c] ss:$16 sps:$4 sm:$0xff]   ;;  %v11949_v24 = vld [vmem:[%s16985_s4 + $0x684] ss:$16 sps:$4 sm:$0xff]  }
 0x33c   : > { %6217 = vmatprep.subr.bf16.mxu1 %v11916_v20  ;;  %6044 = vmatprep.subr.bf16.mxu0 %v11919_v22  ;;  %v11944_v20 = vld [vmem:[%s16985_s4 + $0x688] ss:$16 sps:$4 sm:$0xff]   ;;  %v11947_v22 = vld [vmem:[%s16985_s4 + $0x680] ss:$16 sps:$4 sm:$0xff]  }
 0x33f   : > { %6218 = vmatpush1.bf16.msra.mxu1 %v11914_v10  ;;  %6045 = vmatpush1.bf16.msra.mxu0 %v11917_v8  ;;  %v11952_v10 = vld [vmem:[%s16985_s4 + $0x6ac] ss:$16 sps:$4 sm:$0xff]   ;;  %v11955_v8 = vld [vmem:[%s16985_s4 + $0x6a4] ss:$16 sps:$4 sm:$0xff]  }
 0x340   : > { %6219 = vmatprep.subr.bf16.mxu1 %v11922_v6  ;;  %6046 = vmatprep.subr.bf16.mxu0 %v11925_v48  ;;  %v11950_v6 = vld [vmem:[%s16985_s4 + $0x6a8] ss:$16 sps:$4 sm:$0xff]   ;;  %v11953_v48 = vld [vmem:[%s16985_s4 + $0x6a0] ss:$16 sps:$4 sm:$0xff]  }
 0x341   : > { %5302 = vmatmul.mubr.bf16.gmra.mrb[124].mxu0 %v17486_v36  ;;  %5475 = vmatmul.mubr.bf16.gmra.mrb[124].mxu1 %v17486_v36 }
 0x342   : > { %9806 = vmatprep.mubr.msk.bf16.mxu0 %vm3884_vm1, %v17487_v55  ;;  %9820 = vmatprep.mubr.msk.bf16.mxu1 %vm3884_vm1, %v17487_v55 }
 0x343   : > { %6220 = vmatpush1.bf16.msra.mxu1 %v11920_v11  ;;  %6047 = vmatpush1.bf16.msra.mxu0 %v11923_v32  ;;  %v11958_v11 = vld [vmem:[%s16985_s4 + $0x6cc] ss:$16 sps:$4 sm:$0xff]   ;;  %v11961_v32 = vld [vmem:[%s16985_s4 + $0x6c4] ss:$16 sps:$4 sm:$0xff]  }
 0x344   : > { %6221 = vmatprep.subr.bf16.mxu1 %v11928_v39  ;;  %6048 = vmatprep.subr.bf16.mxu0 %v11931_v18  ;;  %v11956_v39 = vld [vmem:[%s16985_s4 + $0x6c8] ss:$16 sps:$4 sm:$0xff]   ;;  %v11959_v18 = vld [vmem:[%s16985_s4 + $0x6c0] ss:$16 sps:$4 sm:$0xff]  }
 0x347   : > { %6222 = vmatpush1.bf16.msra.mxu1 %v11926_v59  ;;  %6049 = vmatpush1.bf16.msra.mxu0 %v11929_v28  ;;  %v11964_v59 = vld [vmem:[%s16985_s4 + $0x6ec] ss:$16 sps:$4 sm:$0xff]   ;;  %v11967_v28 = vld [vmem:[%s16985_s4 + $0x6e4] ss:$16 sps:$4 sm:$0xff]  }
 0x348   : > { %6223 = vmatprep.subr.bf16.mxu1 %v11934_v25  ;;  %6050 = vmatprep.subr.bf16.mxu0 %v11937_v9  ;;  %v11962_v25 = vld [vmem:[%s16985_s4 + $0x6e8] ss:$16 sps:$4 sm:$0xff]   ;;  %v11965_v9 = vld [vmem:[%s16985_s4 + $0x6e0] ss:$16 sps:$4 sm:$0xff]  }
 0x349   : > { %5312 = vmatmul.mubr.bf16.gmra.mrb[128].mxu0 %v17488_v23  ;;  %5485 = vmatmul.mubr.bf16.gmra.mrb[128].mxu1 %v17488_v23 }
 0x34a   : > { %9807 = vmatprep.mubr.msk.bf16.mxu0 %vm3884_vm1, %v14565_v38  ;;  %9821 = vmatprep.mubr.msk.bf16.mxu1 %vm3884_vm1, %v14565_v38 }
 0x34b   : > { %6224 = vmatpush1.bf16.msra.mxu1 %v11932_v13  ;;  %6051 = vmatpush1.bf16.msra.mxu0 %v11935_v4  ;;  %v11970_v13 = vld [vmem:[%s16985_s4 + $0x70c] ss:$16 sps:$4 sm:$0xff]   ;;  %v11973_v4 = vld [vmem:[%s16985_s4 + $0x704] ss:$16 sps:$4 sm:$0xff]  }
 0x34c   : > { %6225 = vmatprep.subr.bf16.mxu1 %v11940_v1  ;;  %6052 = vmatprep.subr.bf16.mxu0 %v11943_v57  ;;  %v11252_v1 = vunpack.i.h.bf16 %v15011_v35  ;;  %v11257_v57 = vunpack.i.h.bf16 %v15029_v54 }
 0x34f   : > { %6226 = vmatpush1.bf16.msra.mxu1 %v11938_v63  ;;  %6053 = vmatpush1.bf16.msra.mxu0 %v11941_v3  ;;  %v11262_v63 = vunpack.i.h.bf16 %v15039_v58  ;;  %v11272_v3 = vunpack.i.h.bf16 %v15055_v50  ;;  %v11985_v58 = vld [vmem:[%s16985_s4 + $0x744] ss:$16 sps:$4 sm:$0xff]   ;;  %v11980_v50 = vld [vmem:[%s16985_s4 + $0x748] ss:$16 sps:$4 sm:$0xff]  }
 0x350   : > { %6227 = vmatprep.subr.bf16.mxu1 %v11946_v14  ;;  %6054 = vmatprep.subr.bf16.mxu0 %v11949_v24  ;;  %v3176_v14 = vsel %vm1140_vm0, %v11251_v60, %v11252_v1  ;;  %v3178_v24 = vsel %vm1140_vm0, %v11256_v15, %v11257_v57  ;;  %v11983_v15 = vld [vmem:[%s16985_s4 + $0x740] ss:$16 sps:$4 sm:$0xff]   ;;  %v12012_v57 = vld [vmem:[%s16985_s4 + $0x7ec] ss:$16 sps:$4 sm:$0xff]  }
 0x351   : > { %5322 = vmatmul.mubr.bf16.gmra.mrb[132].mxu0 %v14571_v30  ;;  %5495 = vmatmul.mubr.bf16.gmra.mrb[132].mxu1 %v14571_v30  ;;  %v3402_v35 = vmax.f32 %v2556_v27, %v3178_v24  ;;  %v11976_v27 = vld [vmem:[%s16985_s4 + $0x72c] ss:$16 sps:$4 sm:$0xff]   ;;  %v12007_v1 = vld [vmem:[%s16985_s4 + $0x7c0] ss:$16 sps:$4 sm:$0xff]  }
 0x352   : > { %9808 = vmatprep.mubr.msk.bf16.mxu0 %vm3884_vm1, %v14616_v19  ;;  %9822 = vmatprep.mubr.msk.bf16.mxu1 %vm3884_vm1, %v14616_v19  ;;  %v12018_v24 = vld [vmem:[%s16985_s4 + $0x80c] ss:$16 sps:$4 sm:$0xff]  }
 0x353   : > { %6228 = vmatpush1.bf16.msra.mxu1 %v11944_v20  ;;  %6055 = vmatpush1.bf16.msra.mxu0 %v11947_v22  ;;  %v3180_v20 = vsel %vm1140_vm0, %v11261_v43, %v11262_v63  ;;  %v3182_v22 = vsel %vm1140_vm0, %v11271_v47, %v11272_v3  ;;  %v11988_v43 = vld [vmem:[%s16985_s4 + $0x76c] ss:$16 sps:$4 sm:$0xff]   ;;  %v11991_v47 = vld [vmem:[%s16985_s4 + $0x764] ss:$16 sps:$4 sm:$0xff]   ;;  %v12010_v3 = vld [vmem:[%s16985_s4 + $0x7e8] ss:$16 sps:$4 sm:$0xff]  }
 0x354   : > { %6229 = vmatprep.subr.bf16.mxu1 %v11952_v10  ;;  %6056 = vmatprep.subr.bf16.mxu0 %v11955_v8  ;;  %v3400_v10 = vmax.f32 %v2552_v40, %v3176_v14  ;;  %v3404_v60 = vmax.f32 %v2560_v34, %v3180_v20  ;;  %v3406_v54 = vmax.f32 %v2564_v26, %v3182_v22  ;;  %v11979_v34 = vld [vmem:[%s16985_s4 + $0x724] ss:$16 sps:$4 sm:$0xff]   ;;  %v11974_v26 = vld [vmem:[%s16985_s4 + $0x728] ss:$16 sps:$4 sm:$0xff]   ;;  %v12013_v14 = vld [vmem:[%s16985_s4 + $0x7e0] ss:$16 sps:$4 sm:$0xff]  }
 0x355   : > { %v11986_v8 = vld [vmem:[%s16985_s4 + $0x768] ss:$16 sps:$4 sm:$0xff]   ;;  %v12015_v63 = vld [vmem:[%s16985_s4 + $0x7e4] ss:$16 sps:$4 sm:$0xff]  }
 0x356   : > { %v3460_v17 = vmax.f32 %v3400_v10, %v3404_v60  ;;  %v3462_v40 = vmax.f32 %v3402_v35, %v3406_v54  ;;  %v12021_v20 = vld [vmem:[%s16985_s4 + $0x804] ss:$16 sps:$4 sm:$0xff]   ;;  %v12016_v22 = vld [vmem:[%s16985_s4 + $0x808] ss:$16 sps:$4 sm:$0xff]   ;;  %v12019_v10 = vld [vmem:[%s16985_s4 + $0x800] ss:$16 sps:$4 sm:$0xff]  }
 0x357   : > { %6230 = vmatpush1.bf16.msra.mxu1 %v11950_v6  ;;  %6057 = vmatpush1.bf16.msra.mxu0 %v11953_v48  ;;  %v11989_v6 = vld [vmem:[%s16985_s4 + $0x760] ss:$16 sps:$4 sm:$0xff]   ;;  %v11994_v48 = vld [vmem:[%s16985_s4 + $0x78c] ss:$16 sps:$4 sm:$0xff]   ;;  %v12027_v60 = vld [vmem:[%s16985_s4 + $0x824] ss:$16 sps:$4 sm:$0xff]  }
 0x358   : > { %6231 = vmatprep.subr.bf16.mxu1 %v11958_v11  ;;  %6058 = vmatprep.subr.bf16.mxu0 %v11961_v32  ;;  %v15471_v41 = vpack.c.bf16 %v3462_v40, %v3460_v17  ;;  %v11997_v11 = vld [vmem:[%s16985_s4 + $0x784] ss:$16 sps:$4 sm:$0xff]   ;;  %v11992_v32 = vld [vmem:[%s16985_s4 + $0x788] ss:$16 sps:$4 sm:$0xff]   ;;  %v12024_v35 = vld [vmem:[%s16985_s4 + $0x82c] ss:$16 sps:$4 sm:$0xff]  }
 0x359   : > { %5332 = vmatmul.mubr.bf16.gmra.mrb[136].mxu0 %v14618_v5  ;;  %5505 = vmatmul.mubr.bf16.gmra.mrb[136].mxu1 %v14618_v5  ;;  %v12022_v54 = vld [vmem:[%s16985_s4 + $0x828] ss:$16 sps:$4 sm:$0xff]   ;;  %v12025_v17 = vld [vmem:[%s16985_s4 + $0x820] ss:$16 sps:$4 sm:$0xff]   ;;  %v12030_v40 = vld [vmem:[%s16985_s4 + $0x84c] ss:$16 sps:$4 sm:$0xff]  }
 0x35a   : > { %9809 = vmatprep.mubr.msk.bf16.mxu0 %vm3884_vm1, %v14661_v16  ;;  %9823 = vmatprep.mubr.msk.bf16.mxu1 %vm3884_vm1, %v14661_v16 }
 0x35b   : > { %6232 = vmatpush1.bf16.msra.mxu1 %v11956_v39  ;;  %6059 = vmatpush1.bf16.msra.mxu0 %v11959_v18  ;;  %v11995_v39 = vld [vmem:[%s16985_s4 + $0x780] ss:$16 sps:$4 sm:$0xff]   ;;  %v12000_v18 = vld [vmem:[%s16985_s4 + $0x7ac] ss:$16 sps:$4 sm:$0xff]  }
 0x35c   : > { %6233 = vmatprep.subr.bf16.mxu1 %v11964_v59  ;;  %6060 = vmatprep.subr.bf16.mxu0 %v11967_v28  ;;  %v12003_v59 = vld [vmem:[%s16985_s4 + $0x7a4] ss:$16 sps:$4 sm:$0xff]   ;;  %v11998_v28 = vld [vmem:[%s16985_s4 + $0x7a8] ss:$16 sps:$4 sm:$0xff]  }
 0x35f   : > { %6234 = vmatpush1.bf16.msra.mxu1 %v11962_v25  ;;  %6061 = vmatpush1.bf16.msra.mxu0 %v11965_v9  ;;  %v12001_v25 = vld [vmem:[%s16985_s4 + $0x7a0] ss:$16 sps:$4 sm:$0xff]   ;;  %v12006_v9 = vld [vmem:[%s16985_s4 + $0x7cc] ss:$16 sps:$4 sm:$0xff]  }
 0x360   : > { %7002 = vmatprep.subr.bf16.mxu1 %v11970_v13  ;;  %6829 = vmatprep.subr.bf16.mxu0 %v11973_v4  ;;  %v12009_v13 = vld [vmem:[%s16985_s4 + $0x7c4] ss:$16 sps:$4 sm:$0xff]   ;;  %v12004_v4 = vld [vmem:[%s16985_s4 + $0x7c8] ss:$16 sps:$4 sm:$0xff]  }
 0x361   : > { %5342 = vmatmul.mubr.bf16.gmra.mrb[140].mxu0 %v14665_v53  ;;  %5515 = vmatmul.mubr.bf16.gmra.mrb[140].mxu1 %v14665_v53 }
 0x362   : > { %9810 = vmatprep.mubr.msk.bf16.mxu0 %vm3884_vm1, %v14722_v0  ;;  %9824 = vmatprep.mubr.msk.bf16.mxu1 %vm3884_vm1, %v14722_v0 }
 0x369   : > { %5352 = vmatmul.mubr.bf16.gmra.mrb[144].mxu0 %v14738_v42  ;;  %5525 = vmatmul.mubr.bf16.gmra.mrb[144].mxu1 %v14738_v42 }
 0x36a   : > { %9811 = vmatprep.mubr.msk.bf16.mxu0 %vm3884_vm1, %v14793_v52  ;;  %9825 = vmatprep.mubr.msk.bf16.mxu1 %vm3884_vm1, %v14793_v52 }
 0x371   : > { %5362 = vmatmul.mubr.bf16.gmra.mrb[148].mxu0 %v14799_v2  ;;  %5535 = vmatmul.mubr.bf16.gmra.mrb[148].mxu1 %v14799_v2 }
 0x372   : > { %9812 = vmatprep.mubr.msk.bf16.mxu0 %vm3884_vm1, %v14831_v33  ;;  %9826 = vmatprep.mubr.msk.bf16.mxu1 %vm3884_vm1, %v14831_v33 }
 0x379   : > { %5372 = vmatmul.mubr.bf16.gmra.mrb[152].mxu0 %v14837_v51  ;;  %5545 = vmatmul.mubr.bf16.gmra.mrb[152].mxu1 %v14837_v51 }
 0x37a   : > { %9813 = vmatprep.mubr.msk.bf16.mxu0 %vm3884_vm1, %v14869_v29  ;;  %9827 = vmatprep.mubr.msk.bf16.mxu1 %vm3884_vm1, %v14869_v29 }
 0x381   : > { %5382 = vmatmul.mubr.bf16.gmra.mrb[156].mxu0 %v14875_v12  ;;  %5555 = vmatmul.mubr.bf16.gmra.mrb[156].mxu1 %v14875_v12 }
 0x382   : > { %9814 = vmatprep.mubr.msk.bf16.mxu0 %vm3884_vm1, %v14907_v37  ;;  %9828 = vmatprep.mubr.msk.bf16.mxu1 %vm3884_vm1, %v14907_v37 }
 0x389   : > { %5392 = vmatmul.mubr.bf16.gmra.mrb[160].mxu0 %v14913_v46  ;;  %5565 = vmatmul.mubr.bf16.gmra.mrb[160].mxu1 %v14913_v46 }
 0x38a   : > { %9815 = vmatprep.mubr.msk.bf16.mxu0 %vm3884_vm1, %v15471_v41  ;;  %9829 = vmatprep.mubr.msk.bf16.mxu1 %vm3884_vm1, %v15471_v41 }
 0x391   : > { %5402 = vmatmul.mubr.bf16.gmra.mrb[164].mxu0 %v15109_v61  ;;  %5575 = vmatmul.mubr.bf16.gmra.mrb[164].mxu1 %v15109_v61 }
 0x392   : > { %9942 = vmatprep.mubr.msk.bf16.mxu0 %vm3884_vm1, %v17477_v45  ;;  %9955 = vmatprep.mubr.msk.bf16.mxu1 %vm3884_vm1, %v17477_v45  ;;  %v11977_v45 = vld [vmem:[%s16985_s4 + $0x720] ss:$16 sps:$4 sm:$0xff]  }
 0x399   : > { %6067 = vmatmul.mubr.bf16.vlgmr.msra.gmra.mrb[112].mxu0 %v17482_v56  ;;  %6240 = vmatmul.mubr.bf16.vlgmr.msra.gmra.mrb[112].mxu1 %v17482_v56  ;;  %v11982_v56 = vld [vmem:[%s16985_s4 + $0x74c] ss:$16 sps:$4 sm:$0xff]  }
 0x39a   : > { %7003 = vmatpush1.bf16.msra.mxu1 %v11968_v31  ;;  %9943 = vmatprep.mubr.msk.bf16.mxu0 %vm3884_vm1, %v17483_v7  ;;  %v12033_v31 = vld [vmem:[%s16985_s4 + $0x844] ss:$16 sps:$4 sm:$0xff]  }
 0x39b   : > { %9956 = vmatprep.mubr.msk.bf16.mxu1 %vm3884_vm1, %v17483_v7  ;;  %6830 = vmatpush1.bf16.msra.mxu0 %v11971_v49  ;;  %v12028_v49 = vld [vmem:[%s16985_s4 + $0x848] ss:$16 sps:$4 sm:$0xff]  }
 0x39c   : > { %7004 = vmatprep.subr.bf16.mxu1 %v11976_v27  ;;  %6831 = vmatprep.subr.bf16.mxu0 %v11979_v34  ;;  %v12031_v27 = vld [vmem:[%s16985_s4 + $0x840] ss:$16 sps:$4 sm:$0xff]   ;;  %v12036_v34 = vld [vmem:[%s16985_s4 + $0x86c] ss:$16 sps:$4 sm:$0xff]  }
 0x39e   : > { %7005 = vmatpush1.bf16.msra.mxu1 %v11974_v26  ;;  %v12039_v26 = vld [vmem:[%s16985_s4 + $0x864] ss:$16 sps:$4 sm:$0xff]  }
 0x39f   : > { %6832 = vmatpush1.bf16.msra.mxu0 %v11977_v45  ;;  %7006 = vmatprep.subr.bf16.mxu1 %v11982_v56  ;;  %v12034_v45 = vld [vmem:[%s16985_s4 + $0x868] ss:$16 sps:$4 sm:$0xff]   ;;  %v12037_v56 = vld [vmem:[%s16985_s4 + $0x860] ss:$16 sps:$4 sm:$0xff]  }
 0x3a0   : > { %6833 = vmatprep.subr.bf16.mxu0 %v11985_v58  ;;  %v12042_v58 = vld [vmem:[%s16985_s4 + $0x88c] ss:$16 sps:$4 sm:$0xff]  }
 0x3a1   : > { %6077 = vmatmul.mubr.bf16.gmra.mrb[116].mxu0 %v17484_v62  ;;  %6250 = vmatmul.mubr.bf16.gmra.mrb[116].mxu1 %v17484_v62 }
 0x3a2   : > { %9944 = vmatprep.mubr.msk.bf16.mxu0 %vm3884_vm1, %v17485_v21  ;;  %9957 = vmatprep.mubr.msk.bf16.mxu1 %vm3884_vm1, %v17485_v21 }
 0x3a3   : > { %7007 = vmatpush1.bf16.msra.mxu1 %v11980_v50  ;;  %6834 = vmatpush1.bf16.msra.mxu0 %v11983_v15  ;;  %v12045_v50 = vld [vmem:[%s16985_s4 + $0x884] ss:$16 sps:$4 sm:$0xff]   ;;  %v12040_v15 = vld [vmem:[%s16985_s4 + $0x888] ss:$16 sps:$4 sm:$0xff]  }
 0x3a4   : > { %7008 = vmatprep.subr.bf16.mxu1 %v11988_v43  ;;  %6835 = vmatprep.subr.bf16.mxu0 %v11991_v47  ;;  %v12043_v43 = vld [vmem:[%s16985_s4 + $0x880] ss:$16 sps:$4 sm:$0xff]   ;;  %v12048_v47 = vld [vmem:[%s16985_s4 + $0x8ac] ss:$16 sps:$4 sm:$0xff]  }
 0x3a7   : > { %7009 = vmatpush1.bf16.msra.mxu1 %v11986_v8  ;;  %6836 = vmatpush1.bf16.msra.mxu0 %v11989_v6  ;;  %v12051_v8 = vld [vmem:[%s16985_s4 + $0x8a4] ss:$16 sps:$4 sm:$0xff]   ;;  %v12046_v6 = vld [vmem:[%s16985_s4 + $0x8a8] ss:$16 sps:$4 sm:$0xff]  }
 0x3a8   : > { %7010 = vmatprep.subr.bf16.mxu1 %v11994_v48  ;;  %6837 = vmatprep.subr.bf16.mxu0 %v11997_v11  ;;  %v12049_v48 = vld [vmem:[%s16985_s4 + $0x8a0] ss:$16 sps:$4 sm:$0xff]  }
 0x3a9   : > { %6087 = vmatmul.mubr.bf16.gmra.mrb[120].mxu0 %v17486_v36  ;;  %6260 = vmatmul.mubr.bf16.gmra.mrb[120].mxu1 %v17486_v36 }
 0x3aa   : > { %9945 = vmatprep.mubr.msk.bf16.mxu0 %vm3884_vm1, %v17487_v55  ;;  %9958 = vmatprep.mubr.msk.bf16.mxu1 %vm3884_vm1, %v17487_v55 }
 0x3ab   : > { %7011 = vmatpush1.bf16.msra.mxu1 %v11992_v32  ;;  %6838 = vmatpush1.bf16.msra.mxu0 %v11995_v39 }
 0x3ac   : > { %7012 = vmatprep.subr.bf16.mxu1 %v12000_v18  ;;  %6839 = vmatprep.subr.bf16.mxu0 %v12003_v59 }
 0x3af   : > { %7013 = vmatpush1.bf16.msra.mxu1 %v11998_v28  ;;  %6840 = vmatpush1.bf16.msra.mxu0 %v12001_v25 }
 0x3b0   : > { %7014 = vmatprep.subr.bf16.mxu1 %v12006_v9  ;;  %6841 = vmatprep.subr.bf16.mxu0 %v12009_v13  ;;  %v12068_v13 = vld [vmem:[%s16988_s7 + $0x28] sm:$0xff]  }
 0x3b1   : > { %6097 = vmatmul.mubr.bf16.gmra.mrb[124].mxu0 %v17488_v23  ;;  %6270 = vmatmul.mubr.bf16.gmra.mrb[124].mxu1 %v17488_v23 }
 0x3b2   : > { %9946 = vmatprep.mubr.msk.bf16.mxu0 %vm3884_vm1, %v14565_v38  ;;  %9959 = vmatprep.mubr.msk.bf16.mxu1 %vm3884_vm1, %v14565_v38 }
 0x3b3   : > { %7015 = vmatpush1.bf16.msra.mxu1 %v12004_v4  ;;  %6842 = vmatpush1.bf16.msra.mxu0 %v12007_v1 }
 0x3b4   : > { %7016 = vmatprep.subr.bf16.mxu1 %v12012_v57  ;;  %6843 = vmatprep.subr.bf16.mxu0 %v12015_v63 }
 0x3b7   : > { %7017 = vmatpush1.bf16.msra.mxu1 %v12010_v3  ;;  %6844 = vmatpush1.bf16.msra.mxu0 %v12013_v14 }
 0x3b8   : > { %7018 = vmatprep.subr.bf16.mxu1 %v12018_v24  ;;  %6845 = vmatprep.subr.bf16.mxu0 %v12021_v20 }
 0x3b9   : > { %6107 = vmatmul.mubr.bf16.gmra.mrb[128].mxu0 %v14571_v30  ;;  %6280 = vmatmul.mubr.bf16.gmra.mrb[128].mxu1 %v14571_v30 }
 0x3ba   : > { %9947 = vmatprep.mubr.msk.bf16.mxu0 %vm3884_vm1, %v14616_v19  ;;  %9960 = vmatprep.mubr.msk.bf16.mxu1 %vm3884_vm1, %v14616_v19 }
 0x3bb   : > { %7019 = vmatpush1.bf16.msra.mxu1 %v12016_v22  ;;  %6846 = vmatpush1.bf16.msra.mxu0 %v12019_v10 }
 0x3bc   : > { %7020 = vmatprep.subr.bf16.mxu1 %v12024_v35  ;;  %6847 = vmatprep.subr.bf16.mxu0 %v12027_v60 }
 0x3bf   : > { %7021 = vmatpush1.bf16.msra.mxu1 %v12022_v54  ;;  %6848 = vmatpush1.bf16.msra.mxu0 %v12025_v17 }
 0x3c0   : > { %7022 = vmatprep.subr.bf16.mxu1 %v12030_v40  ;;  %6849 = vmatprep.subr.bf16.mxu0 %v12033_v31 }
 0x3c1   : > { %6117 = vmatmul.mubr.bf16.gmra.mrb[132].mxu0 %v14618_v5  ;;  %6290 = vmatmul.mubr.bf16.gmra.mrb[132].mxu1 %v14618_v5 }
 0x3c2   : > { %9948 = vmatprep.mubr.msk.bf16.mxu0 %vm3884_vm1, %v14661_v16  ;;  %9961 = vmatprep.mubr.msk.bf16.mxu1 %vm3884_vm1, %v14661_v16 }
 0x3c3   : > { %7023 = vmatpush1.bf16.msra.mxu1 %v12028_v49  ;;  %6850 = vmatpush1.bf16.msra.mxu0 %v12031_v27 }
 0x3c4   : > { %7024 = vmatprep.subr.bf16.mxu1 %v12036_v34  ;;  %6851 = vmatprep.subr.bf16.mxu0 %v12039_v26 }
 0x3c7   : > { %7025 = vmatpush1.bf16.msra.mxu1 %v12034_v45  ;;  %6852 = vmatpush1.bf16.msra.mxu0 %v12037_v56 }
 0x3c8   : > { %7026 = vmatprep.subr.bf16.mxu1 %v12042_v58  ;;  %6853 = vmatprep.subr.bf16.mxu0 %v12045_v50 }
 0x3c9   : > { %6127 = vmatmul.mubr.bf16.gmra.mrb[136].mxu0 %v14665_v53  ;;  %6300 = vmatmul.mubr.bf16.gmra.mrb[136].mxu1 %v14665_v53 }
 0x3ca   : > { %9949 = vmatprep.mubr.msk.bf16.mxu0 %vm3884_vm1, %v14722_v0  ;;  %9962 = vmatprep.mubr.msk.bf16.mxu1 %vm3884_vm1, %v14722_v0 }
 0x3cb   : > { %7027 = vmatpush1.bf16.msra.mxu1 %v12040_v15  ;;  %6854 = vmatpush1.bf16.msra.mxu0 %v12043_v43 }
 0x3cc   : > { %7028 = vmatprep.subr.bf16.mxu1 %v12048_v47  ;;  %6855 = vmatprep.subr.bf16.mxu0 %v12051_v8 }
 0x3cf   : > { %7029 = vmatpush1.bf16.msra.mxu1 %v12046_v6  ;;  %6856 = vmatpush1.bf16.msra.mxu0 %v12049_v48 }
 0x3d0   : > { %8273 = vmatprep.subr.bf16.mxu0 %v17474_v44  ;;  %8401 = vmatprep.subr.bf16.mxu1 %v17474_v44 }
 0x3d1   : > { %6137 = vmatmul.mubr.bf16.gmra.mrb[140].mxu0 %v14738_v42  ;;  %6310 = vmatmul.mubr.bf16.gmra.mrb[140].mxu1 %v14738_v42 }
 0x3d2   : > { %9950 = vmatprep.mubr.msk.bf16.mxu0 %vm3884_vm1, %v14793_v52  ;;  %9963 = vmatprep.mubr.msk.bf16.mxu1 %vm3884_vm1, %v14793_v52 }
 0x3d9   : > { %6147 = vmatmul.mubr.bf16.gmra.mrb[144].mxu0 %v14799_v2  ;;  %6320 = vmatmul.mubr.bf16.gmra.mrb[144].mxu1 %v14799_v2 }
 0x3da   : > { %9951 = vmatprep.mubr.msk.bf16.mxu0 %vm3884_vm1, %v14831_v33  ;;  %9964 = vmatprep.mubr.msk.bf16.mxu1 %vm3884_vm1, %v14831_v33 }
 0x3e1   : > { %6157 = vmatmul.mubr.bf16.gmra.mrb[148].mxu0 %v14837_v51  ;;  %6330 = vmatmul.mubr.bf16.gmra.mrb[148].mxu1 %v14837_v51 }
 0x3e2   : > { %9952 = vmatprep.mubr.msk.bf16.mxu0 %vm3884_vm1, %v14869_v29  ;;  %9965 = vmatprep.mubr.msk.bf16.mxu1 %vm3884_vm1, %v14869_v29 }
 0x3e9   : > { %6167 = vmatmul.mubr.bf16.gmra.mrb[152].mxu0 %v14875_v12  ;;  %6340 = vmatmul.mubr.bf16.gmra.mrb[152].mxu1 %v14875_v12 }
 0x3ea   : > { %9953 = vmatprep.mubr.msk.bf16.mxu0 %vm3884_vm1, %v14907_v37  ;;  %9966 = vmatprep.mubr.msk.bf16.mxu1 %vm3884_vm1, %v14907_v37 }
 0x3f1   : > { %6177 = vmatmul.mubr.bf16.gmra.mrb[156].mxu0 %v14913_v46  ;;  %6350 = vmatmul.mubr.bf16.gmra.mrb[156].mxu1 %v14913_v46 }
 0x3f2   : > { %9954 = vmatprep.mubr.msk.bf16.mxu0 %vm3884_vm1, %v15471_v41  ;;  %9967 = vmatprep.mubr.msk.bf16.mxu1 %vm3884_vm1, %v15471_v41 }
 0x3f9   : > { %6187 = vmatmul.mubr.bf16.gmra.mrb[160].mxu0 %v15109_v61  ;;  %6360 = vmatmul.mubr.bf16.gmra.mrb[160].mxu1 %v15109_v61 }
 0x3fa   : > { %6196 = vmatprep.mubr.bf16.mxu0 %v17474_v44  ;;  %6369 = vmatprep.mubr.bf16.mxu1 %v17474_v44 }
 0x401   : > { %6197 = vmatmul.mubr.bf16.gmra.mrb[164].mxu0 %v17474_v44  ;;  %6370 = vmatmul.mubr.bf16.gmra.mrb[164].mxu1 %v17474_v44 }
 0x402   : > { %10080 = vmatprep.mubr.msk.bf16.mxu0 %vm3884_vm1, %v17483_v7  ;;  %10092 = vmatprep.mubr.msk.bf16.mxu1 %vm3884_vm1, %v17483_v7  ;;  %v12066_v7 = vld [vmem:[%s16988_s7 + $0xc0] sm:$0xff]  }
 0x409   : > { %6862 = vmatmul.mubr.bf16.vlgmr.msra.gmra.mrb[112].mxu0 %v17484_v62  ;;  %7035 = vmatmul.mubr.bf16.vlgmr.msra.gmra.mrb[112].mxu1 %v17484_v62  ;;  %v17489_v62 = vld [vmem:[#allocation3_spill] sm:$0xff] }
 0x40a   : > { %10081 = vmatprep.mubr.msk.bf16.mxu0 %vm3884_vm1, %v17485_v21  ;;  %10093 = vmatprep.mubr.msk.bf16.mxu1 %vm3884_vm1, %v17485_v21 }
 0x411   : > { %6872 = vmatmul.mubr.bf16.gmra.mrb[116].mxu0 %v17486_v36  ;;  %7045 = vmatmul.mubr.bf16.gmra.mrb[116].mxu1 %v17486_v36 }
 0x412   : > { %10082 = vmatprep.mubr.msk.bf16.mxu0 %vm3884_vm1, %v17487_v55  ;;  %10094 = vmatprep.mubr.msk.bf16.mxu1 %vm3884_vm1, %v17487_v55  ;;  %v12067_v55 = vld [vmem:[%s16988_s7 + $0x20] sm:$0xff]  }
 0x419   : > { %6882 = vmatmul.mubr.bf16.gmra.mrb[120].mxu0 %v17488_v23  ;;  %7055 = vmatmul.mubr.bf16.gmra.mrb[120].mxu1 %v17488_v23 }
 0x41a   : > { %10083 = vmatprep.mubr.msk.bf16.mxu0 %vm3884_vm1, %v14565_v38  ;;  %10095 = vmatprep.mubr.msk.bf16.mxu1 %vm3884_vm1, %v14565_v38  ;;  %v12052_v38 = vld [vmem:[%s16988_s7 + $0x70] sm:$0xff]  }
 0x41b   : > { %8274 = vmatpush1.bf16.msra.mxu0 %v12052_v38 }
 0x41c   : > { %8275 = vmatprep.subr.bf16.mxu0 %v17474_v44 }
 0x421   : > { %6892 = vmatmul.mubr.bf16.gmra.mrb[124].mxu0 %v14571_v30  ;;  %7065 = vmatmul.mubr.bf16.gmra.mrb[124].mxu1 %v14571_v30  ;;  %v12053_v30 = vld [vmem:[%s16988_s7 + $0x78] sm:$0xff]  }
 0x422   : > { %10084 = vmatprep.mubr.msk.bf16.mxu0 %vm3884_vm1, %v14616_v19  ;;  %10096 = vmatprep.mubr.msk.bf16.mxu1 %vm3884_vm1, %v14616_v19  ;;  %v12054_v19 = vld [vmem:[%s16988_s7 + $0x80] sm:$0xff]  }
 0x423   : > { %8276 = vmatpush1.bf16.msra.mxu0 %v12053_v30 }
 0x424   : > { %8277 = vmatprep.subr.bf16.mxu0 %v17474_v44 }
 0x427   : > { %8278 = vmatpush1.bf16.msra.mxu0 %v12054_v19 }
 0x428   : > { %8279 = vmatprep.subr.bf16.mxu0 %v17474_v44 }
 0x429   : > { %6902 = vmatmul.mubr.bf16.gmra.mrb[128].mxu0 %v14618_v5  ;;  %7075 = vmatmul.mubr.bf16.gmra.mrb[128].mxu1 %v14618_v5  ;;  %v12055_v5 = vld [vmem:[%s16988_s7 + $0x88] sm:$0xff]  }
 0x42a   : > { %10085 = vmatprep.mubr.msk.bf16.mxu0 %vm3884_vm1, %v14661_v16  ;;  %10097 = vmatprep.mubr.msk.bf16.mxu1 %vm3884_vm1, %v14661_v16  ;;  %v12056_v16 = vld [vmem:[%s16988_s7 + $0x90] sm:$0xff]  }
 0x42b   : > { %8280 = vmatpush1.bf16.msra.mxu0 %v12055_v5 }
 0x42c   : > { %8281 = vmatprep.subr.bf16.mxu0 %v17474_v44 }
 0x42f   : > { %8282 = vmatpush1.bf16.msra.mxu0 %v12056_v16 }
 0x430   : > { %8283 = vmatprep.subr.bf16.mxu0 %v17474_v44 }
 0x431   : > { %6912 = vmatmul.mubr.bf16.gmra.mrb[132].mxu0 %v14665_v53  ;;  %7085 = vmatmul.mubr.bf16.gmra.mrb[132].mxu1 %v14665_v53  ;;  %v12057_v53 = vld [vmem:[%s16988_s7 + $0x98] sm:$0xff]  }
 0x432   : > { %10086 = vmatprep.mubr.msk.bf16.mxu0 %vm3884_vm1, %v14722_v0  ;;  %10098 = vmatprep.mubr.msk.bf16.mxu1 %vm3884_vm1, %v14722_v0  ;;  %v12058_v0 = vld [vmem:[%s16988_s7 + $0xa0] sm:$0xff]  }
 0x433   : > { %8284 = vmatpush1.bf16.msra.mxu0 %v12057_v53 }
 0x434   : > { %8285 = vmatprep.subr.bf16.mxu0 %v17474_v44 }
 0x437   : > { %8286 = vmatpush1.bf16.msra.mxu0 %v12058_v0 }
 0x438   : > { %8287 = vmatprep.subr.bf16.mxu0 %v17474_v44 }
 0x439   : > { %6922 = vmatmul.mubr.bf16.gmra.mrb[136].mxu0 %v14738_v42  ;;  %7095 = vmatmul.mubr.bf16.gmra.mrb[136].mxu1 %v14738_v42  ;;  %v12059_v42 = vld [vmem:[%s16988_s7] sm:$0xff]  }
 0x43a   : > { %10087 = vmatprep.mubr.msk.bf16.mxu0 %vm3884_vm1, %v14793_v52  ;;  %10099 = vmatprep.mubr.msk.bf16.mxu1 %vm3884_vm1, %v14793_v52  ;;  %v12060_v52 = vld [vmem:[%s16988_s7 + $0xa8] sm:$0xff]  }
 0x43b   : > { %8402 = vmatpush1.bf16.msra.mxu1 %v12059_v42  ;;  %8288 = vmatpush1.bf16.msra.mxu0 %v12060_v52  ;;  %v12069_v42 = vld [vmem:[%s16988_s7 + $0xc8] sm:$0xff]  }
 0x43c   : > { %8403 = vmatprep.subr.bf16.mxu1 %v17474_v44  ;;  %8289 = vmatprep.subr.bf16.mxu0 %v17474_v44 }
 0x441   : > { %6932 = vmatmul.mubr.bf16.gmra.mrb[140].mxu0 %v14799_v2  ;;  %7105 = vmatmul.mubr.bf16.gmra.mrb[140].mxu1 %v14799_v2  ;;  %v12061_v2 = vld [vmem:[%s16988_s7 + $0x8] sm:$0xff]  }
 0x442   : > { %10088 = vmatprep.mubr.msk.bf16.mxu0 %vm3884_vm1, %v14831_v33  ;;  %10100 = vmatprep.mubr.msk.bf16.mxu1 %vm3884_vm1, %v14831_v33  ;;  %v12062_v33 = vld [vmem:[%s16988_s7 + $0xb0] sm:$0xff]  }
 0x443   : > { %8404 = vmatpush1.bf16.msra.mxu1 %v12061_v2  ;;  %8290 = vmatpush1.bf16.msra.mxu0 %v12062_v33 }
 0x444   : > { %8405 = vmatprep.subr.bf16.mxu1 %v17474_v44  ;;  %8291 = vmatprep.subr.bf16.mxu0 %v17474_v44 }
 0x449   : > { %6942 = vmatmul.mubr.bf16.gmra.mrb[144].mxu0 %v14837_v51  ;;  %7115 = vmatmul.mubr.bf16.gmra.mrb[144].mxu1 %v14837_v51  ;;  %v12063_v51 = vld [vmem:[%s16988_s7 + $0x10] sm:$0xff]  }
 0x44a   : > { %10089 = vmatprep.mubr.msk.bf16.mxu0 %vm3884_vm1, %v14869_v29  ;;  %10101 = vmatprep.mubr.msk.bf16.mxu1 %vm3884_vm1, %v14869_v29  ;;  %v12064_v29 = vld [vmem:[%s16988_s7 + $0xb8] sm:$0xff]  }
 0x44b   : > { %8406 = vmatpush1.bf16.msra.mxu1 %v12063_v51  ;;  %8292 = vmatpush1.bf16.msra.mxu0 %v12064_v29 }
 0x44c   : > { %8407 = vmatprep.subr.bf16.mxu1 %v17474_v44  ;;  %8293 = vmatprep.subr.bf16.mxu0 %v17474_v44 }
 0x44f   : > { %8294 = vmatpush1.bf16.msra.mxu0 %v12066_v7 }
 0x450   : > { %8295 = vmatprep.subr.bf16.mxu0 %v17474_v44 }
 0x451   : > { %6952 = vmatmul.mubr.bf16.gmra.mrb[148].mxu0 %v14875_v12  ;;  %7125 = vmatmul.mubr.bf16.gmra.mrb[148].mxu1 %v14875_v12  ;;  %v15860_v12 = vld [vmem:[%s16986_s5] sm:$0xf] }
 0x452   : > { %10090 = vmatprep.mubr.msk.bf16.mxu0 %vm3884_vm1, %v14907_v37  ;;  %10102 = vmatprep.mubr.msk.bf16.mxu1 %vm3884_vm1, %v14907_v37  ;;  %v12065_v37 = vld [vmem:[%s16988_s7 + $0x18] sm:$0xff]   ;;  %v15876_v21 = vrot.slane %v15860_v12, %v17489_v62 }
 0x453   : > { %8408 = vmatpush1.bf16.msra.mxu1 %v12065_v37  ;;  %8296 = vmatpush1.bf16.msra.mxu0 %v12069_v42 }
 0x454   : > { %8409 = vmatprep.subr.bf16.mxu1 %v17474_v44  ;;  %8297 = vmatprep.subr.bf16.mxu0 %v17474_v44 }
 0x457   : > { %8410 = vmatpush1.bf16.msra.mxu1 %v12067_v55 }
 0x458   : > { %8411 = vmatprep.subr.bf16.mxu1 %v17474_v44 }
 0x459   : > { %6962 = vmatmul.mubr.bf16.gmra.mrb[152].mxu0 %v14913_v46  ;;  %7135 = vmatmul.mubr.bf16.gmra.mrb[152].mxu1 %v14913_v46  ;;  %v15869_v46 = vld [vmem:[%s16987_s6] sm:$0xf] }
 0x45a   : > { %10091 = vmatprep.mubr.msk.bf16.mxu0 %vm3884_vm1, %v15471_v41  ;;  %10103 = vmatprep.mubr.msk.bf16.mxu1 %vm3884_vm1, %v15471_v41  ;;  %v15888_v23 = vrot.slane %v15869_v46, %v17489_v62  ;;  %v12070_v62 = vld [vmem:[%s16988_s7 + $0x30] sm:$0xff]  }
 0x45b   : > { %8412 = vmatpush1.bf16.msra.mxu1 %v12068_v13  ;;  %v17491_v13 = vld [vmem:[#allocation5_spill] sm:$0xff] }
 0x45c   : > { %8413 = vmatprep.subr.bf16.mxu1 %v17474_v44 }
 0x45f   : > { %8414 = vmatpush1.bf16.msra.mxu1 %v12070_v62 }
 0x460   : > { %8415 = vmatprep.subr.bf16.mxu1 %v17474_v44 }
 0x461   : > { %6972 = vmatmul.mubr.bf16.gmra.mrb[156].mxu0 %v15109_v61  ;;  %7145 = vmatmul.mubr.bf16.gmra.mrb[156].mxu1 %v15109_v61  ;;  %v17490_v61 = vld [vmem:[#allocation4_spill] sm:$0xff] }
 0x462   : > { %6981 = vmatprep.mubr.bf16.mxu0 %v17474_v44  ;;  %7154 = vmatprep.mubr.bf16.mxu1 %v17474_v44  ;;  %v15881_v36 = vrot.slane %v15860_v12, %v17490_v61  ;;  %v15895_v32 = vrot.slane %v15869_v46, %v17490_v61 }
 0x469   : > { %6982 = vmatmul.mubr.bf16.gmra.mrb[160].mxu0 %v17474_v44  ;;  %7155 = vmatmul.mubr.bf16.gmra.mrb[160].mxu1 %v17474_v44 }
 0x46a   : > { %6991 = vmatprep.mubr.bf16.mxu0 %v17474_v44  ;;  %7164 = vmatprep.mubr.bf16.mxu1 %v17474_v44 }
 0x471   : > { %6992 = vmatmul.mubr.bf16.gmra.mrb[164].mxu0 %v17474_v44  ;;  %7165 = vmatmul.mubr.bf16.gmra.mrb[164].mxu1 %v17474_v44 }
 0x4dc   : > { %v15891_v41 = vpop.f32.mrb[112].mxu0  ;;  %v7036_v11 = vpop.f32.mrb[112].mxu1 }
 0x4dd   : > { %v7311_v39 = vmul.f32 %v15876_v21, %v7036_v11  ;;  %v15898_v18 = vpop.f32.mrb[113].mxu0  ;;  %v7038_v59 = vpop.f32.mrb[113].mxu1 }
 0x4de   : > { %v7312_v28 = vmul.f32 %v15881_v36, %v7038_v59  ;;  %v15902_v25 = vpop.f32.mrb[114].mxu0  ;;  %v7040_v9 = vpop.f32.mrb[114].mxu1 }
 0x4df   : > { %v7445_v4 = vadd.f32 %v15888_v23, %v7311_v39  ;;  %v7315_v1 = vmul.f32 %v15876_v21, %v7040_v9  ;;  %v15909_v57 = vpop.f32.mrb[115].mxu0  ;;  %v7042_v63 = vpop.f32.mrb[115].mxu1  ;;  %v12071_v9 = vld [vmem:[%s16988_s7 + $0x38] sm:$0xff]  }
 0x4e0   : > { %v7446_v3 = vadd.f32 %v15895_v32, %v7312_v28  ;;  %v7316_v14 = vmul.f32 %v15881_v36, %v7042_v63  ;;  %8416 = vmatpush1.bf16.msra.mxu1 %v12071_v9 }
 0x4e1   : > { %v7557_v24 = vmax.f32 %v7445_v4, 0.0  ;;  %v7449_v20 = vadd.f32 %v15888_v23, %v7315_v1  ;;  %v15963_v4 = vrot.slane %v15860_v12, %v17491_v13  ;;  %8417 = vmatprep.subr.bf16.mxu1 %v17474_v44 }
 0x4e2   : > { %v7558_v22 = vmax.f32 %v7446_v3, 0.0  ;;  %v7450_v10 = vadd.f32 %v15895_v32, %v7316_v14 }
 0x4e3   : > { %v7561_v35 = vmax.f32 %v7449_v20, 0.0 }
 0x4e4   : > { %v7562_v60 = vmax.f32 %v7450_v10, 0.0  ;;  %v15917_v54 = vpop.f32.mrb[116].mxu0  ;;  %v7046_v17 = vpop.f32.mrb[116].mxu1  ;;  %v15919_v40 = vpack.i.bf16 %v7558_v22, %v7557_v24 }
 0x4e5   : > { %v7319_v31 = vmul.f32 %v15876_v21, %v7046_v17  ;;  %v15922_v49 = vpop.f32.mrb[117].mxu0  ;;  %v7048_v27 = vpop.f32.mrb[117].mxu1  ;;  %v15973_v17 = vrot.slane %v15869_v46, %v17491_v13 }
 0x4e6   : > { %v7320_v34 = vmul.f32 %v15881_v36, %v7048_v27  ;;  %v15925_v26 = vpop.f32.mrb[118].mxu0  ;;  %v7050_v45 = vpop.f32.mrb[118].mxu1  ;;  %v15927_v56 = vpack.i.bf16 %v7562_v60, %v7561_v35 }
 0x4e7   : > { %v7453_v58 = vadd.f32 %v15888_v23, %v7319_v31  ;;  %v7323_v50 = vmul.f32 %v15876_v21, %v7050_v45  ;;  %v15931_v15 = vpop.f32.mrb[119].mxu0  ;;  %v7052_v43 = vpop.f32.mrb[119].mxu1 }
 0x4e8   : > { %v7454_v47 = vadd.f32 %v15895_v32, %v7320_v34  ;;  %v7324_v8 = vmul.f32 %v15881_v36, %v7052_v43 }
 0x4e9   : > { %v7565_v6 = vmax.f32 %v7453_v58, 0.0  ;;  %v7457_v48 = vadd.f32 %v15888_v23, %v7323_v50 }
 0x4ea   : > { %v7566_v38 = vmax.f32 %v7454_v47, 0.0  ;;  %v7458_v30 = vadd.f32 %v15895_v32, %v7324_v8  ;;  %v12072_v8 = vld [vmem:[%s16988_s7 + $0xd0] sm:$0xff]  }
 0x4eb   : > { %v7569_v19 = vmax.f32 %v7457_v48, 0.0  ;;  %8298 = vmatpush1.bf16.msra.mxu0 %v12072_v8 }
 0x4ec   : > { %v7570_v5 = vmax.f32 %v7458_v30, 0.0  ;;  %v15937_v16 = vpop.f32.mrb[120].mxu0  ;;  %v7056_v53 = vpop.f32.mrb[120].mxu1  ;;  %v15939_v0 = vpack.i.bf16 %v7566_v38, %v7565_v6  ;;  %8299 = vmatprep.subr.bf16.mxu0 %v17474_v44 }
 0x4ed   : > { %v7327_v52 = vmul.f32 %v15876_v21, %v7056_v53  ;;  %v6885_v2 = vpop.f32.mrb[121].mxu0  ;;  %v7058_v33 = vpop.f32.mrb[121].mxu1 }
 0x4ee   : > { %v7328_v51 = vmul.f32 %v15881_v36, %v7058_v33  ;;  %v15946_v29 = vpop.f32.mrb[122].mxu0  ;;  %v7060_v37 = vpop.f32.mrb[122].mxu1  ;;  %v15948_v7 = vpack.i.bf16 %v7570_v5, %v7569_v19  ;;  %v7326_v45 = vmul.f32 %v15963_v4, %v6885_v2  ;;  %v12073_v2 = vld [vmem:[%s16988_s7 + $0x40] sm:$0xff]  }
 0x4ef   : > { %v7461_v61 = vadd.f32 %v15888_v23, %v7327_v52  ;;  %v7331_v55 = vmul.f32 %v15876_v21, %v7060_v37  ;;  %v6889_v11 = vpop.f32.mrb[123].mxu0  ;;  %v7062_v39 = vpop.f32.mrb[123].mxu1  ;;  %8418 = vmatpush1.bf16.msra.mxu1 %v12073_v2 }
 0x4f0   : > { %v7462_v59 = vadd.f32 %v15895_v32, %v7328_v51  ;;  %v7332_v28 = vmul.f32 %v15881_v36, %v7062_v39  ;;  %v7330_v20 = vmul.f32 %v15963_v4, %v6889_v11  ;;  %v16000_v37 = vadd.f32 %v15973_v17, %v7326_v45  ;;  %8419 = vmatprep.subr.bf16.mxu1 %v17474_v44 }
 0x4f1   : > { %v7573_v1 = vmax.f32 %v7461_v61, 0.0  ;;  %v7465_v63 = vadd.f32 %v15888_v23, %v7331_v55  ;;  %v7314_v45 = vmul.f32 %v15963_v4, %v15909_v57 }
 0x4f2   : > { %v7574_v3 = vmax.f32 %v7462_v59, 0.0  ;;  %v7466_v14 = vadd.f32 %v15895_v32, %v7332_v28  ;;  %v15986_v6 = vadd.f32 %v15973_v17, %v7330_v20 }
 0x4f3   : > { %v7577_v24 = vmax.f32 %v7465_v63, 0.0 }
 0x4f4   : > { %v7578_v22 = vmax.f32 %v7466_v14, 0.0  ;;  %v15969_v10 = vpop.f32.mrb[124].mxu0  ;;  %v7066_v35 = vpop.f32.mrb[124].mxu1  ;;  %v11278_v60 = vpack.i.bf16 %v7574_v3, %v7573_v1  ;;  %v17117_v39 = vmax.f32 %v15986_v6, 0.0 }
 0x4f5   : > { %v7335_v31 = vmul.f32 %v15876_v21, %v7066_v35  ;;  %v6895_v27 = vpop.f32.mrb[125].mxu0  ;;  %v7068_v34 = vpop.f32.mrb[125].mxu1 }
 0x4f6   : > { %v7336_v58 = vmul.f32 %v15881_v36, %v7068_v34  ;;  %11279 = vrot.lane.b32.xlu0 %v11278_v60, %s12174_s29  ;;  %v15980_v50 = vpop.f32.mrb[126].mxu0  ;;  %v7070_v43 = vpop.f32.mrb[126].mxu1  ;;  %v11283_v47 = vpack.i.bf16 %v7578_v22, %v7577_v24  ;;  %v7334_v5 = vmul.f32 %v15963_v4, %v6895_v27  ;;  %v17118_v24 = vmax.f32 %v16000_v37, 0.0  ;;  %v12074_v27 = vld [vmem:[%s16988_s7 + $0xd8] sm:$0xff]   ;;  %v12075_v34 = vld [vmem:[%s16988_s7 + $0x48] sm:$0xff]  }
 0x4f7   : > { %v7469_v48 = vadd.f32 %v15888_v23, %v7335_v31  ;;  %v7339_v38 = vmul.f32 %v15876_v21, %v7070_v43  ;;  %v6899_v30 = vpop.f32.mrb[127].mxu0  ;;  %v7072_v19 = vpop.f32.mrb[127].mxu1  ;;  %8300 = vmatpush1.bf16.msra.mxu0 %v12074_v27  ;;  %8420 = vmatpush1.bf16.msra.mxu1 %v12075_v34 }
 0x4f8   : > { %v7470_v53 = vadd.f32 %v15895_v32, %v7336_v58  ;;  %v7338_v42 = vmul.f32 %v15963_v4, %v6899_v30  ;;  %v7340_v52 = vmul.f32 %v15881_v36, %v7072_v19  ;;  %11284 = vrot.lane.b32.xlu1 %v11283_v47, %s12174_s29  ;;  %v16010_v59 = vadd.f32 %v15973_v17, %v7334_v5 }
 0x4f9   : > { %v7581_v33 = vmax.f32 %v7469_v48, 0.0  ;;  %v7473_v51 = vadd.f32 %v15888_v23, %v7339_v38  ;;  %v11293_v57 = vpack.i.bf16 %v17117_v39, %v17118_v24  ;;  %v7310_v19 = vmul.f32 %v15963_v4, %v15898_v18  ;;  %8421 = vmatprep.subr.bf16.mxu1 %v17474_v44  ;;  %8558 = vmatprep.subr.bf16.mxu0 %v17474_v44 }
 0x4fa   : > { %v7582_v62 = vmax.f32 %v7470_v53, 0.0  ;;  %v16003_v61 = vadd.f32 %v15973_v17, %v7338_v42  ;;  %v7474_v55 = vadd.f32 %v15895_v32, %v7340_v52  ;;  %v17121_v48 = vmax.f32 %v16010_v59, 0.0  ;;  %v12076_v42 = vld [vmem:[%s16988_s7 + $0x50] sm:$0xff]  }
 0x4fb   : > { %v7585_v11 = vmax.f32 %v7473_v51, 0.0  ;;  %v7322_v52 = vmul.f32 %v15963_v4, %v15931_v15  ;;  %v16059_v51 = vadd.f32 %v15973_v17, %v7314_v45  ;;  %v7318_v15 = vmul.f32 %v15963_v4, %v15922_v49  ;;  %8422 = vmatpush1.bf16.msra.mxu1 %v12076_v42  ;;  %v12077_v49 = vld [vmem:[%s16988_s7 + $0x58] sm:$0xff]  }
 0x4fc   : > { %v7586_v28 = vmax.f32 %v7474_v55, 0.0  ;;  %v16012_v9 = vpop.f32.mrb[128].mxu0  ;;  %v7076_v13 = vpop.f32.mrb[128].mxu1  ;;  %v11288_v1 = vpack.i.bf16 %v7582_v62, %v7581_v33  ;;  %v17114_v20 = vmax.f32 %v16003_v61, 0.0  ;;  %8423 = vmatprep.subr.bf16.mxu1 %v17474_v44 }
 0x4fd   : > { %v7343_v63 = vmul.f32 %v15876_v21, %v7076_v13  ;;  %v16015_v3 = vpop.f32.mrb[129].mxu0  ;;  %v7078_v14 = vpop.f32.mrb[129].mxu1 }
 0x4fe   : > { %v7344_v22 = vmul.f32 %v15881_v36, %v7078_v14  ;;  %11289 = vrot.lane.b32.xlu0 %v11288_v1, %s12174_s29  ;;  %v16021_v35 = vpop.f32.mrb[130].mxu0  ;;  %v7080_v60 = vpop.f32.mrb[130].mxu1  ;;  %v11298_v31 = vpack.i.bf16 %v7586_v28, %v7585_v11  ;;  %v11303_v18 = vpack.i.bf16 %v17114_v20, %v17121_v48  ;;  %v16070_v1 = vadd.f32 %v15973_v17, %v7310_v19 }
 0x4ff   : > { %v7477_v58 = vadd.f32 %v15888_v23, %v7343_v63  ;;  %v7347_v43 = vmul.f32 %v15876_v21, %v7080_v60  ;;  %v16033_v47 = vpop.f32.mrb[131].mxu0  ;;  %v7082_v8 = vpop.f32.mrb[131].mxu1  ;;  %v16077_v60 = vadd.f32 %v15973_v17, %v7322_v52  ;;  %8424 = vmatpush1.bf16.msra.mxu1 %v12077_v49 }
 0x500   : > { %v7478_v38 = vadd.f32 %v15895_v32, %v7344_v22  ;;  %v7348_v30 = vmul.f32 %v15881_v36, %v7082_v8  ;;  %11299 = vrot.lane.b32.xlu1 %v11298_v31, %s12174_s29  ;;  %8425 = vmatprep.subr.bf16.mxu1 %v17474_v44 }
 0x501   : > { %v7589_v5 = vmax.f32 %v7477_v58, 0.0  ;;  %v7481_v53 = vadd.f32 %v15888_v23, %v7347_v43  ;;  %v17109_v58 = vmax.f32 %v16059_v51, 0.0  ;;  %v17108_v52 = vmax.f32 %v16077_v60, 0.0 }
 0x502   : > { %v7590_v2 = vmax.f32 %v7478_v38, 0.0  ;;  %v7482_v33 = vadd.f32 %v15895_v32, %v7348_v30  ;;  %11294 = vrot.lane.b32.xlu0 %v11293_v57, %s12174_s29  ;;  %v16091_v57 = vadd.f32 %v15973_v17, %v7318_v15 }
 0x503   : > { %v7593_v62 = vmax.f32 %v7481_v53, 0.0 }
 0x504   : > { %v7594_v55 = vmax.f32 %v7482_v33, 0.0  ;;  %v7086_v11 = vpop.f32.mrb[132].mxu1  ;;  %11304 = vrot.lane.b32.xlu1 %v11303_v18, %s12174_s29  ;;  %v16065_v28 = vpop.f32.mrb[132].mxu0  ;;  %v16067_v13 = vpack.i.bf16 %v7590_v2, %v7589_v5  ;;  %v17110_v5 = vmax.f32 %v16070_v1, 0.0  ;;  %v17111_v15 = vmax.f32 %v16091_v57, 0.0 }
 0x505   : > { %v7351_v63 = vmul.f32 %v15876_v21, %v7086_v11  ;;  %v6915_v14 = vpop.f32.mrb[133].mxu0  ;;  %v7088_v22 = vpop.f32.mrb[133].mxu1 }
 0x506   : > { %v7352_v31 = vmul.f32 %v15881_v36, %v7088_v22  ;;  %v7090_v27 = vpop.f32.mrb[134].mxu1  ;;  %11309 = vrot.lane.b32.xlu0 %v15919_v40, %s12174_s29  ;;  %v16082_v34 = vpop.f32.mrb[134].mxu0  ;;  %v16084_v45 = vpack.i.bf16 %v7594_v55, %v7593_v62  ;;  %v11328_v62 = vpack.i.bf16 %v17109_v58, %v17110_v5  ;;  %v7346_v55 = vmul.f32 %v15963_v4, %v16033_v47 }
 0x507   : > { %v7485_v43 = vadd.f32 %v15888_v23, %v7351_v63  ;;  %v7355_v8 = vmul.f32 %v15876_v21, %v7090_v27  ;;  %v6919_v38 = vpop.f32.mrb[135].mxu0  ;;  %v7092_v30 = vpop.f32.mrb[135].mxu1  ;;  %v7342_v47 = vmul.f32 %v15963_v4, %v16015_v3 }
 0x508   : > { %v7486_v19 = vadd.f32 %v15895_v32, %v7352_v31  ;;  %v7356_v40 = vmul.f32 %v15881_v36, %v7092_v30  ;;  %11314 = vrot.lane.b32.xlu1 %v15927_v56, %s12174_s29  ;;  %v12079_v56 = vld [vmem:[%s16988_s7 + $0x60] sm:$0xff]   ;;  %v7354_v49 = vmul.f32 %v15963_v4, %v6919_v38  ;;  %v11333_v38 = vpack.i.bf16 %v17108_v52, %v17111_v15 }
 0x509   : > { %v7597_v53 = vmax.f32 %v7485_v43, 0.0  ;;  %v7489_v42 = vadd.f32 %v15888_v23, %v7355_v8  ;;  %8426 = vmatpush1.bf16.msra.mxu1 %v12079_v56  ;;  %v12081_v8 = vld [vmem:[%s16988_s7 + $0x68] sm:$0xff]   ;;  %v16138_v56 = vadd.f32 %v15973_v17, %v7346_v55 }
 0x50a   : > { %v7598_v2 = vmax.f32 %v7486_v19, 0.0  ;;  %v7490_v33 = vadd.f32 %v15895_v32, %v7356_v40  ;;  %11319 = vrot.lane.b32.xlu0 %v15939_v0, %s12174_s29  ;;  %8427 = vmatprep.subr.bf16.mxu1 %v17474_v44 }
 0x50b   : > { %v7601_v18 = vmax.f32 %v7489_v42, 0.0 }
 0x50c   : > { %v11348_v11 = vpack.i.bf16 %v7598_v2, %v7597_v53  ;;  %v7602_v63 = vmax.f32 %v7490_v33, 0.0  ;;  %v7096_v0 = vpop.f32.mrb[136].mxu1  ;;  %11324 = vrot.lane.b32.xlu1 %v15948_v7, %s12174_s29  ;;  %v16116_v22 = vpop.f32.mrb[136].mxu0  ;;  %v7350_v53 = vmul.f32 %v15963_v4, %v6915_v14 }
 0x50d   : > { %v7359_v31 = vmul.f32 %v15876_v21, %v7096_v0  ;;  %v6925_v27 = vpop.f32.mrb[137].mxu0  ;;  %v7098_v43 = vpop.f32.mrb[137].mxu1  ;;  %8428 = vmatpush1.bf16.msra.mxu1 %v12081_v8 }
 0x50e   : > { %v11358_v30 = vpack.i.bf16 %v7602_v63, %v7601_v18  ;;  %v7360_v19 = vmul.f32 %v15881_v36, %v7098_v43  ;;  %v7100_v7 = vpop.f32.mrb[138].mxu1  ;;  %11329 = vrot.lane.b32.xlu0 %v11328_v62, %s12174_s29  ;;  %v16127_v40 = vpop.f32.mrb[138].mxu0  ;;  %v16144_v63 = vadd.f32 %v15973_v17, %v7354_v49  ;;  %8717 = vmatprep.subr.bf16.mxu1 %v17474_v44 }
 0x50f   : > { %v7493_v42 = vadd.f32 %v15888_v23, %v7359_v31  ;;  %v7363_v2 = vmul.f32 %v15876_v21, %v7100_v7  ;;  %v6929_v3 = vpop.f32.mrb[139].mxu0  ;;  %v7102_v33 = vpop.f32.mrb[139].mxu1  ;;  %v16148_v31 = vadd.f32 %v15973_v17, %v7342_v47  ;;  %v17112_v7 = vmax.f32 %v16138_v56, 0.0 }
 0x510   : > { %v7494_v18 = vadd.f32 %v15895_v32, %v7360_v19  ;;  %v7364_v62 = vmul.f32 %v15881_v36, %v7102_v33  ;;  %11334 = vrot.lane.b32.xlu1 %v11333_v38, %s12174_s29  ;;  %v16155_v19 = vadd.f32 %v15973_v17, %v7350_v53  ;;  %v7362_v8 = vmul.f32 %v15963_v4, %v6929_v3 }
 0x511   : > { %v7605_v14 = vmax.f32 %v7493_v42, 0.0  ;;  %v7497_v0 = vadd.f32 %v15888_v23, %v7363_v2 }
 0x512   : > { %v7606_v43 = vmax.f32 %v7494_v18, 0.0  ;;  %v7498_v55 = vadd.f32 %v15895_v32, %v7364_v62  ;;  %11339 = vrot.lane.b32.xlu0 %v16067_v13, %s12174_s29  ;;  %v17115_v13 = vmax.f32 %v16144_v63, 0.0  ;;  %v17113_v62 = vmax.f32 %v16148_v31, 0.0 }
 0x513   : > { %v7609_v49 = vmax.f32 %v7497_v0, 0.0  ;;  %v7358_v0 = vmul.f32 %v15963_v4, %v6925_v27 }
 0x514   : > { %v11368_v38 = vpack.i.bf16 %v7606_v43, %v7605_v14  ;;  %v7610_v42 = vmax.f32 %v7498_v55, 0.0  ;;  %v7106_v47 = vpop.f32.mrb[140].mxu1  ;;  %11344 = vrot.lane.b32.xlu1 %v16084_v45, %s12174_s29  ;;  %v16161_v2 = vpop.f32.mrb[140].mxu0  ;;  %v17116_v45 = vmax.f32 %v16155_v19, 0.0  ;;  %v11353_v27 = vpack.i.bf16 %v17112_v7, %v17113_v62 }
 0x515   : > { %v7367_v33 = vmul.f32 %v15876_v21, %v7106_v47  ;;  %v6935_v18 = vpop.f32.mrb[141].mxu0  ;;  %v7108_v53 = vpop.f32.mrb[141].mxu1  ;;  %v16190_v15 = vadd.f32 %v15973_v17, %v7358_v0 }
 0x516   : > { %v11373_v14 = vpack.i.bf16 %v7610_v42, %v7609_v49  ;;  %v7368_v3 = vmul.f32 %v15881_v36, %v7108_v53  ;;  %v7110_v43 = vpop.f32.mrb[142].mxu1  ;;  %11349 = vrot.lane.b32.xlu0 %v11348_v11, %s12174_s29  ;;  %v16169_v55 = vpop.f32.mrb[142].mxu0  ;;  %v16179_v49 = vadd.f32 %v15973_v17, %v7362_v8  ;;  %v7366_v62 = vmul.f32 %v15963_v4, %v6935_v18 }
 0x517   : > { %v7501_v52 = vadd.f32 %v15888_v23, %v7367_v33  ;;  %v7371_v47 = vmul.f32 %v15876_v21, %v7110_v43  ;;  %v6939_v58 = vpop.f32.mrb[143].mxu0  ;;  %v7112_v5 = vpop.f32.mrb[143].mxu1  ;;  %v11363_v33 = vpack.i.bf16 %v17115_v13, %v17116_v45 }
 0x518   : > { %v7502_v11 = vadd.f32 %v15895_v32, %v7368_v3  ;;  %v7372_v42 = vmul.f32 %v15881_v36, %v7112_v5  ;;  %11359 = vrot.lane.b32.xlu1 %v11358_v30, %s12174_s29  ;;  %v7370_v8 = vmul.f32 %v15963_v4, %v6939_v58  ;;  %v17120_v30 = vmax.f32 %v16179_v49, 0.0 }
 0x519   : > { %v7613_v53 = vmax.f32 %v7501_v52, 0.0  ;;  %v7505_v43 = vadd.f32 %v15888_v23, %v7371_v47 }
 0x51a   : > { %v7614_v7 = vmax.f32 %v7502_v11, 0.0  ;;  %v7506_v3 = vadd.f32 %v15895_v32, %v7372_v42  ;;  %11354 = vrot.lane.b32.xlu0 %v11353_v27, %s12174_s29  ;;  %v17119_v42 = vmax.f32 %v16190_v15, 0.0  ;;  %v16203_v27 = vadd.f32 %v15973_v17, %v7370_v8 }
 0x51b   : > { %v7617_v5 = vmax.f32 %v7505_v43, 0.0 }
 0x51c   : > { %v11383_v20 = vpack.i.bf16 %v7614_v7, %v7613_v53  ;;  %v7618_v13 = vmax.f32 %v7506_v3, 0.0  ;;  %v7116_v52 = vpop.f32.mrb[144].mxu1  ;;  %11364 = vrot.lane.b32.xlu1 %v11363_v33, %s12174_s29  ;;  %v16198_v47 = vpop.f32.mrb[144].mxu0  ;;  %v11378_v8 = vpack.i.bf16 %v17120_v30, %v17119_v42 }
 0x51d   : > { %17492 = vst [vmem:[#allocation50_spill] sm:$0xff] %v16198_v47  ;;  %v7375_v0 = vmul.f32 %v15876_v21, %v7116_v52  ;;  %v6945_v11 = vpop.f32.mrb[145].mxu0  ;;  %v7118_v58 = vpop.f32.mrb[145].mxu1 }
 0x51e   : > { %v11388_v43 = vpack.i.bf16 %v7618_v13, %v7617_v5  ;;  %v7376_v45 = vmul.f32 %v15881_v36, %v7118_v58  ;;  %v7120_v18 = vpop.f32.mrb[146].mxu1  ;;  %11369 = vrot.lane.b32.xlu0 %v11368_v38, %s12174_s29  ;;  %v16207_v7 = vpop.f32.mrb[146].mxu0  ;;  %v16216_v13 = vadd.f32 %v15973_v17, %v7366_v62 }
 0x51f   : > { %v7509_v33 = vadd.f32 %v15888_v23, %v7375_v0  ;;  %v7379_v53 = vmul.f32 %v15876_v21, %v7120_v18  ;;  %v6949_v3 = vpop.f32.mrb[147].mxu0  ;;  %v7122_v52 = vpop.f32.mrb[147].mxu1  ;;  %v17123_v18 = vmax.f32 %v16203_v27, 0.0 }
 0x520   : > { %v7510_v5 = vadd.f32 %v15895_v32, %v7376_v45  ;;  %v7380_v38 = vmul.f32 %v15881_v36, %v7122_v52  ;;  %11374 = vrot.lane.b32.xlu1 %v11373_v14, %s12174_s29  ;;  %v7378_v62 = vmul.f32 %v15963_v4, %v6949_v3  ;;  %v17122_v30 = vmax.f32 %v16216_v13, 0.0 }
 0x521   : > { %v7621_v58 = vmax.f32 %v7509_v33, 0.0  ;;  %v7513_v0 = vadd.f32 %v15888_v23, %v7379_v53  ;;  %v7374_v33 = vmul.f32 %v15963_v4, %v6945_v11 }
 0x522   : > { %v7622_v39 = vmax.f32 %v7510_v5, 0.0  ;;  %v7514_v24 = vadd.f32 %v15895_v32, %v7380_v38  ;;  %11379 = vrot.lane.b32.xlu0 %v11378_v8, %s12174_s29  ;;  %v11393_v3 = vpack.i.bf16 %v17123_v18, %v17122_v30 }
 0x523   : > { %v7625_v42 = vmax.f32 %v7513_v0, 0.0 }
 0x524   : > { %v11398_v45 = vpack.i.bf16 %v7622_v39, %v7621_v58  ;;  %v7626_v48 = vmax.f32 %v7514_v24, 0.0  ;;  %v7126_v52 = vpop.f32.mrb[148].mxu1  ;;  %11389 = vrot.lane.b32.xlu1 %v11388_v43, %s12174_s29  ;;  %v16228_v14 = vpop.f32.mrb[148].mxu0  ;;  %v16241_v58 = vadd.f32 %v15973_v17, %v7378_v62 }
 0x525   : > { %17493 = vst [vmem:[#allocation16_spill] sm:$0xff] %v16228_v14  ;;  %v7383_v53 = vmul.f32 %v15876_v21, %v7126_v52  ;;  %v6955_v5 = vpop.f32.mrb[149].mxu0  ;;  %v7128_v38 = vpop.f32.mrb[149].mxu1 }
 0x526   : > { %v11403_v8 = vpack.i.bf16 %v7626_v48, %v7625_v42  ;;  %v7384_v39 = vmul.f32 %v15881_v36, %v7128_v38  ;;  %v7130_v24 = vpop.f32.mrb[150].mxu1  ;;  %11384 = vrot.lane.b32.xlu0 %v11383_v20, %s12174_s29  ;;  %v16238_v43 = vpop.f32.mrb[150].mxu0  ;;  %17495 = vst [vmem:[#allocation17_spill] sm:$0xff] %v16241_v58  ;;  %v7382_v47 = vmul.f32 %v15963_v4, %v6955_v5 }
 0x527   : > { %17494 = vst [vmem:[#allocation46_spill] sm:$0xff] %v16238_v43  ;;  %v7517_v11 = vadd.f32 %v15888_v23, %v7383_v53  ;;  %v7387_v0 = vmul.f32 %v15876_v21, %v7130_v24  ;;  %v6959_v52 = vpop.f32.mrb[151].mxu0  ;;  %v7132_v14 = vpop.f32.mrb[151].mxu1  ;;  %v16251_v20 = vadd.f32 %v15973_v17, %v7374_v33 }
 0x528   : > { %v7518_v48 = vadd.f32 %v15895_v32, %v7384_v39  ;;  %v7386_v42 = vmul.f32 %v15963_v4, %v6959_v52  ;;  %v7388_v38 = vmul.f32 %v15881_v36, %v7132_v14  ;;  %11394 = vrot.lane.b32.xlu1 %v11393_v3, %s12174_s29  ;;  %v16261_v14 = vadd.f32 %v15973_v17, %v7382_v47 }
 0x529   : > { %17496 = vst [vmem:[#allocation81_spill] sm:$0xff] %v16251_v20  ;;  %v7629_v62 = vmax.f32 %v7517_v11, 0.0  ;;  %v7521_v53 = vadd.f32 %v15888_v23, %v7387_v0  ;;  %v17126_v0 = vmax.f32 %v16251_v20, 0.0 }
 0x52a   : > { %v7630_v30 = vmax.f32 %v7518_v48, 0.0  ;;  %v16255_v24 = vadd.f32 %v15973_v17, %v7386_v42  ;;  %v7522_v5 = vadd.f32 %v15895_v32, %v7388_v38  ;;  %11399 = vrot.lane.b32.xlu0 %v11398_v45, %s12174_s29  ;;  %17498 = vst [vmem:[#allocation82_spill] sm:$0xff] %v16261_v14 }
 0x52b   : > { %v7633_v52 = vmax.f32 %v7521_v53, 0.0 }
 0x52c   : > { %17497 = vst [vmem:[#allocation83_spill] sm:$0xff] %v16255_v24  ;;  %v11408_v3 = vpack.i.bf16 %v7630_v30, %v7629_v62  ;;  %v7634_v33 = vmax.f32 %v7522_v5, 0.0  ;;  %v7136_v18 = vpop.f32.mrb[152].mxu1  ;;  %11404 = vrot.lane.b32.xlu1 %v11403_v8, %s12174_s29  ;;  %v16264_v11 = vpop.f32.mrb[152].mxu0  ;;  %v17501_v8 = vmax.f32 %v16241_v58, 0.0 }
 0x52d   : > { %17499 = vst [vmem:[#allocation58_spill] sm:$0xff] %v16264_v11  ;;  %v7391_v48 = vmul.f32 %v15876_v21, %v7136_v18  ;;  %v6965_v42 = vpop.f32.mrb[153].mxu0  ;;  %v7138_v38 = vpop.f32.mrb[153].mxu1 }
 0x52e   : > { %v11418_v39 = vpack.i.bf16 %v7634_v33, %v7633_v52  ;;  %v7390_v53 = vmul.f32 %v15963_v4, %v6965_v42  ;;  %v7392_v47 = vmul.f32 %v15881_v36, %v7138_v38  ;;  %v7140_v30 = vpop.f32.mrb[154].mxu1  ;;  %11409 = vrot.lane.b32.xlu0 %v11408_v3, %s12174_s29  ;;  %v16272_v62 = vpop.f32.mrb[154].mxu0  ;;  %v11413_v5 = vpack.i.bf16 %v17501_v8, %v17126_v0 }
 0x52f   : > { %17500 = vst [vmem:[#allocation55_spill] sm:$0xff] %v16272_v62  ;;  %v7525_v18 = vadd.f32 %v15888_v23, %v7391_v48  ;;  %v7395_v11 = vmul.f32 %v15876_v21, %v7140_v30  ;;  %v6969_v45 = vpop.f32.mrb[155].mxu0  ;;  %v7142_v52 = vpop.f32.mrb[155].mxu1  ;;  %v17127_v33 = vmax.f32 %v16261_v14, 0.0  ;;  %v17503_v30 = vmax.f32 %v16255_v24, 0.0 }
 0x530   : > { %v7526_v42 = vadd.f32 %v15895_v32, %v7392_v47  ;;  %v7394_v38 = vmul.f32 %v15963_v4, %v6969_v45  ;;  %v7396_v3 = vmul.f32 %v15881_v36, %v7142_v52  ;;  %11419 = vrot.lane.b32.xlu1 %v11418_v39, %s12174_s29  ;;  %v16286_v58 = vadd.f32 %v15973_v17, %v7390_v53 }
 0x531   : > { %v7637_v20 = vmax.f32 %v7525_v18, 0.0  ;;  %v7529_v48 = vadd.f32 %v15888_v23, %v7395_v11  ;;  %v11423_v8 = vpack.i.bf16 %v17503_v30, %v17127_v33 }
 0x532   : > { %17502 = vst [vmem:[#allocation85_spill] sm:$0xff] %v16286_v58  ;;  %v7638_v0 = vmax.f32 %v7526_v42, 0.0  ;;  %v16294_v47 = vadd.f32 %v15973_v17, %v7394_v38  ;;  %v7530_v45 = vadd.f32 %v15895_v32, %v7396_v3  ;;  %11414 = vrot.lane.b32.xlu0 %v11413_v5, %s12174_s29  ;;  %v17131_v30 = vmax.f32 %v16286_v58, 0.0 }
 0x533   : > { %v7641_v39 = vmax.f32 %v7529_v48, 0.0 }
 0x534   : > { %17504 = vst [vmem:[#allocation86_spill] sm:$0xff] %v16294_v47  ;;  %v11428_v18 = vpack.i.bf16 %v7638_v0, %v7637_v20  ;;  %v17132_v53 = vmax.f32 %v16294_v47, 0.0  ;;  %v7642_v52 = vmax.f32 %v7530_v45, 0.0  ;;  %v7146_v62 = vpop.f32.mrb[156].mxu1  ;;  %11424 = vrot.lane.b32.xlu1 %v11423_v8, %s12174_s29  ;;  %v16300_v11 = vpop.f32.mrb[156].mxu0 }
 0x535   : > { %17505 = vst [vmem:[#allocation18_spill] sm:$0xff] %v16300_v11  ;;  %v7399_v42 = vmul.f32 %v15876_v21, %v7146_v62  ;;  %v6975_v38 = vpop.f32.mrb[157].mxu0  ;;  %v7148_v33 = vpop.f32.mrb[157].mxu1 }
 0x536   : > { %v11433_v14 = vpack.i.bf16 %v7642_v52, %v7641_v39  ;;  %v7400_v3 = vmul.f32 %v15881_v36, %v7148_v33  ;;  %v7150_v5 = vpop.f32.mrb[158].mxu1  ;;  %11429 = vrot.lane.b32.xlu0 %v11428_v18, %s12174_s29  ;;  %v16306_v20 = vpop.f32.mrb[158].mxu0  ;;  %v11438_v0 = vpack.i.bf16 %v17132_v53, %v17131_v30  ;;  %v7398_v39 = vmul.f32 %v15963_v4, %v6975_v38 }
 0x537   : > { %17506 = vst [vmem:[#allocation20_spill] sm:$0xff] %v16306_v20  ;;  %v7533_v48 = vadd.f32 %v15888_v23, %v7399_v42  ;;  %v7403_v8 = vmul.f32 %v15876_v21, %v7150_v5  ;;  %v6979_v62 = vpop.f32.mrb[159].mxu0  ;;  %v7152_v45 = vpop.f32.mrb[159].mxu1 }
 0x538   : > { %v7534_v33 = vadd.f32 %v15895_v32, %v7400_v3  ;;  %v7402_v52 = vmul.f32 %v15963_v4, %v6979_v62  ;;  %v7404_v18 = vmul.f32 %v15881_v36, %v7152_v45  ;;  %11434 = vrot.lane.b32.xlu1 %v11433_v14, %s12174_s29  ;;  %v16326_v3 = vadd.f32 %v15973_v17, %v7398_v39 }
 0x539   : > { %v7645_v58 = vmax.f32 %v7533_v48, 0.0  ;;  %v7537_v47 = vadd.f32 %v15888_v23, %v7403_v8 }
 0x53a   : > { %v7646_v30 = vmax.f32 %v7534_v33, 0.0  ;;  %v16321_v42 = vadd.f32 %v15973_v17, %v7402_v52  ;;  %v7538_v5 = vadd.f32 %v15895_v32, %v7404_v18  ;;  %11439 = vrot.lane.b32.xlu0 %v11438_v0, %s12174_s29  ;;  %17507 = vst [vmem:[#allocation66_spill] sm:$0xff] %v16326_v3 }
 0x53b   : > { %v7649_v38 = vmax.f32 %v7537_v47, 0.0 }
 0x53c   : > { %v11443_v62 = vpack.i.bf16 %v7646_v30, %v7645_v58  ;;  %v7650_v53 = vmax.f32 %v7538_v5, 0.0  ;;  %v16328_v45 = vpop.f32.mrb[160].mxu0  ;;  %v7156_v14 = vpop.f32.mrb[160].mxu1  ;;  %v17139_v5 = vmax.f32 %v16326_v3, 0.0 }
 0x53d   : > { %17508 = vst [vmem:[#allocation59_spill] sm:$0xff] %v16328_v45  ;;  %v7407_v48 = vmul.f32 %v15876_v21, %v7156_v14  ;;  %v6985_v8 = vpop.f32.mrb[161].mxu0  ;;  %v7158_v33 = vpop.f32.mrb[161].mxu1 }
 0x53e   : > { %v11448_v24 = vpack.i.bf16 %v7650_v53, %v7649_v38  ;;  %v7408_v18 = vmul.f32 %v15881_v36, %v7158_v33  ;;  %v7160_v20 = vpop.f32.mrb[162].mxu1  ;;  %11444 = vrot.lane.b32.xlu0 %v11443_v62, %s12174_s29  ;;  %v16334_v47 = vpop.f32.mrb[162].mxu0  ;;  %v17510_v62 = vmax.f32 %v16321_v42, 0.0  ;;  %v7406_v3 = vmul.f32 %v15963_v4, %v6985_v8 }
 0x53f   : > { %17509 = vst [vmem:[#allocation21_spill] sm:$0xff] %v16334_v47  ;;  %v7541_v58 = vadd.f32 %v15888_v23, %v7407_v48  ;;  %v7411_v30 = vmul.f32 %v15876_v21, %v7160_v20  ;;  %v6989_v0 = vpop.f32.mrb[163].mxu0  ;;  %v7162_v39 = vpop.f32.mrb[163].mxu1 }
 0x540   : > { %v7542_v14 = vadd.f32 %v15895_v32, %v7408_v18  ;;  %v7412_v52 = vmul.f32 %v15881_v36, %v7162_v39  ;;  %11449 = vrot.lane.b32.xlu1 %v11448_v24, %s12174_s29  ;;  %v11453_v48 = vpack.i.bf16 %v17510_v62, %v17139_v5  ;;  %v7410_v47 = vmul.f32 %v15963_v4, %v6989_v0 }
 0x541   : > { %v7653_v53 = vmax.f32 %v7541_v58, 0.0  ;;  %v7545_v38 = vadd.f32 %v15888_v23, %v7411_v30 }
 0x542   : > { %v7654_v33 = vmax.f32 %v7542_v14, 0.0  ;;  %v7546_v20 = vadd.f32 %v15895_v32, %v7412_v52 }
 0x543   : > { %v7657_v45 = vmax.f32 %v7545_v38, 0.0 }
 0x544   : > { %v11458_v11 = vpack.i.bf16 %v7654_v33, %v7653_v53  ;;  %v7658_v18 = vmax.f32 %v7546_v20, 0.0  ;;  %v7166_v43 = vpop.f32.mrb[164].mxu1  ;;  %11454 = vrot.lane.b32.xlu1 %v11453_v48, %s12174_s29  ;;  %v16350_v24 = vpop.f32.mrb[164].mxu0  ;;  %v16359_v53 = vadd.f32 %v15973_v17, %v7410_v47 }
 0x545   : > { %v7415_v58 = vmul.f32 %v15876_v21, %v7166_v43  ;;  %v6995_v30 = vpop.f32.mrb[165].mxu0  ;;  %v7168_v39 = vpop.f32.mrb[165].mxu1 }
 0x546   : > { %v11463_v62 = vpack.i.bf16 %v7658_v18, %v7657_v45  ;;  %v7416_v14 = vmul.f32 %v15881_v36, %v7168_v39  ;;  %v7170_v52 = vpop.f32.mrb[166].mxu1  ;;  %11459 = vrot.lane.b32.xlu0 %v11458_v11, %s12174_s29  ;;  %v16356_v0 = vpop.f32.mrb[166].mxu0  ;;  %17511 = vst [vmem:[#allocation22_spill] sm:$0xff] %v16359_v53  ;;  %v7414_v20 = vmul.f32 %v15963_v4, %v6995_v30 }
 0x547   : > { %v7549_v38 = vadd.f32 %v15888_v23, %v7415_v58  ;;  %v7419_v48 = vmul.f32 %v15876_v21, %v7170_v52  ;;  %v6999_v43 = vpop.f32.mrb[167].mxu0  ;;  %v7172_v33 = vpop.f32.mrb[167].mxu1  ;;  %v16370_v39 = vadd.f32 %v15973_v17, %v7406_v3 }
 0x548   : > { %v7550_v45 = vadd.f32 %v15895_v32, %v7416_v14  ;;  %v7418_v8 = vmul.f32 %v15963_v4, %v6999_v43  ;;  %v7420_v18 = vmul.f32 %v15881_v36, %v7172_v33  ;;  %11464 = vrot.lane.b32.xlu1 %v11463_v62, %s12174_s29  ;;  %v17137_v14 = vmax.f32 %v16359_v53, 0.0  ;;  %v17515_v43 = vld [vmem:[#allocation19_spill] sm:$0xff] }
 0x549   : > { %v7661_v11 = vmax.f32 %v7549_v38, 0.0  ;;  %v7553_v47 = vadd.f32 %v15888_v23, %v7419_v48  ;;  %17512 = vst [vmem:[#allocation28_spill] sm:$0xff] %v16370_v39  ;;  %v16378_v4 = vadd.f32 %v15973_v17, %v7414_v20  ;;  %v17135_v38 = vmax.f32 %v16370_v39, 0.0 }
 0x54a   : > { %v7662_v58 = vmax.f32 %v7550_v45, 0.0  ;;  %v16373_v21 = vadd.f32 %v15973_v17, %v7418_v8  ;;  %v7554_v30 = vadd.f32 %v15895_v32, %v7420_v18  ;;  %v16397_v33 = vrot.slane %v15860_v12, %v17515_v43 }
 0x54b   : > { %v7665_v52 = vmax.f32 %v7553_v47, 0.0  ;;  %17514 = vst [vmem:[#allocation25_spill] sm:$0xff] %v16378_v4  ;;  %v11478_v32 = vpack.i.bf16 %v17137_v14, %v17135_v38  ;;  %v17136_v48 = vmax.f32 %v16378_v4, 0.0 }
 0x54c   : > { %17513 = vst [vmem:[#allocation67_spill] sm:$0xff] %v16373_v21  ;;  %v11468_v36 = vpack.i.bf16 %v7662_v58, %v7661_v11  ;;  %v7666_v62 = vmax.f32 %v7554_v30, 0.0  ;;  %v17138_v23 = vmax.f32 %v16373_v21, 0.0  ;;  %v7325_v45 = vmul.f32 %v16397_v33, %v15937_v16 }
 0x54d   : > { %v7309_v18 = vmul.f32 %v16397_v33, %v15891_v41  ;;  %v16405_v11 = vrot.slane %v15869_v46, %v17515_v43  ;;  %v7329_v47 = vmul.f32 %v16397_v33, %v15946_v29  ;;  %v7313_v58 = vmul.f32 %v16397_v33, %v15902_v25 }
 0x54e   : > { %v11473_v3 = vpack.i.bf16 %v7666_v62, %v7665_v52  ;;  %11469 = vrot.lane.b32.xlu0 %v11468_v36, %s12174_s29  ;;  %v11483_v17 = vpack.i.bf16 %v17138_v23, %v17136_v48  ;;  %v7333_v12 = vmul.f32 %v16397_v33, %v15969_v10  ;;  %v7337_v41 = vmul.f32 %v16397_v33, %v15980_v50 }
 0x54f   : > { %v7459_v62 = vadd.f32 %v16405_v11, %v7325_v45  ;;  %v7463_v29 = vadd.f32 %v16405_v11, %v7329_v47  ;;  %v7317_v10 = vmul.f32 %v16397_v33, %v15917_v54  ;;  %v7321_v47 = vmul.f32 %v16397_v33, %v15925_v26 }
 0x550   : > { %11474 = vrot.lane.b32.xlu1 %v11473_v3, %s12174_s29  ;;  %v16417_v3 = vadd.f32 %v16405_v11, %v7309_v18  ;;  %v7467_v43 = vadd.f32 %v16405_v11, %v7333_v12  ;;  %v17516_v48 = vmax.f32 %v16010_v59, 0.0  ;;  %v17519_v26 = vmax.f32 %v16003_v61, 0.0 }
 0x551   : > { %v7575_v12 = vmax.f32 %v7463_v29, 0.0 }
 0x552   : > { %11479 = vrot.lane.b32.xlu0 %v11478_v32, %s12174_s29 }
 0x554   : > { %11484 = vrot.lane.b32.xlu1 %v11483_v17, %s12174_s29  ;;  %v16421_v17 = vadd.f32 %v16405_v11, %v7313_v58  ;;  %v7471_v58 = vadd.f32 %v16405_v11, %v7337_v41 }
 0x568   : > { %v11280_v20 = vpop.permute.xlu0 %11279 }
 0x569   : > { %v11282_v30 = vunpack.i.h.bf16 %v11280_v20  ;;  %v11281_v52 = vunpack.i.l.bf16 %v11280_v20 }
 0x56a   : > { %v11285_v8 = vpop.permute.xlu1 %11284 }
 0x56b   : > { %v11287_v16 = vunpack.i.h.bf16 %v11285_v8  ;;  %v11286_v36 = vunpack.i.l.bf16 %v11285_v8  ;;  %v7928_v20 = vsel %vm1140_vm0, %v11281_v52, %v11282_v30 }
 0x56d   : > { %v7930_v50 = vsel %vm1140_vm0, %v11286_v36, %v11287_v16  ;;  %v7579_v16 = vmax.f32 %v7467_v43, 0.0 }
 0x570   : > { %v11290_v46 = vpop.permute.xlu0 %11289 }
 0x571   : > { %v11292_v32 = vunpack.i.h.bf16 %v11290_v46  ;;  %v11291_v25 = vunpack.i.l.bf16 %v11290_v46  ;;  %v7571_v46 = vmax.f32 %v7459_v62, 0.0 }
 0x572   : > { %v11300_v45 = vpop.permute.xlu1 %11299 }
 0x573   : > { %v7932_v8 = vsel %vm1140_vm0, %v11291_v25, %v11292_v32  ;;  %v11302_v18 = vunpack.i.h.bf16 %v11300_v45  ;;  %v11301_v38 = vunpack.i.l.bf16 %v11300_v45  ;;  %v17517_v32 = vmax.f32 %v16000_v37, 0.0 }
 0x574   : > { %v8044_v54 = vmax.f32 %v17516_v48, %v7932_v8  ;;  %v11295_v14 = vpop.permute.xlu0 %11294  ;;  %v17518_v45 = vmax.f32 %v15986_v6, 0.0 }
 0x575   : > { %v7934_v30 = vsel %vm1140_vm0, %v11301_v38, %v11302_v18  ;;  %v11297_v23 = vunpack.i.h.bf16 %v11295_v14  ;;  %v11296_v5 = vunpack.i.l.bf16 %v11295_v14  ;;  %v8040_v39 = vmax.f32 %v17517_v32, %v7928_v20 }
 0x576   : > { %v8042_v4 = vmax.f32 %v17518_v45, %v7930_v50  ;;  %v8046_v62 = vmax.f32 %v17519_v26, %v7934_v30  ;;  %v11305_v41 = vpop.permute.xlu1 %11304  ;;  %v7583_v18 = vmax.f32 %v7471_v58, 0.0 }
 0x577   : > { %v7929_v59 = vsel %vm1140_vm0, %v11297_v23, %v11286_v36  ;;  %v7927_v48 = vsel %vm1140_vm0, %v11296_v5, %v11281_v52  ;;  %v11307_v29 = vunpack.i.h.bf16 %v11305_v41  ;;  %v11306_v8 = vunpack.i.l.bf16 %v11305_v41 }
 0x578   : > { %v8092_v53 = vmax.f32 %v8040_v39, %v8044_v54  ;;  %v8094_v14 = vmax.f32 %v8042_v4, %v8046_v62  ;;  %v8041_v43 = vmax.f32 %v7575_v12, %v7929_v59  ;;  %v11310_v21 = vpop.permute.xlu0 %11309  ;;  %v8039_v37 = vmax.f32 %v7571_v46, %v7927_v48 }
 0x579   : > { %v7933_v20 = vsel %vm1140_vm0, %v11307_v29, %v11301_v38  ;;  %v7931_v6 = vsel %vm1140_vm0, %v11306_v8, %v11291_v25  ;;  %v11312_v50 = vunpack.i.h.bf16 %v11310_v21  ;;  %v11311_v32 = vunpack.i.l.bf16 %v11310_v21 }
 0x57a   : > { %v8045_v61 = vmax.f32 %v7583_v18, %v7933_v20  ;;  %v8043_v30 = vmax.f32 %v7579_v16, %v7931_v6  ;;  %v11315_v45 = vpop.permute.xlu1 %11314  ;;  %v8118_v23 = vpack.c.bf16 %v8094_v14, %v8092_v53  ;;  %v7451_v5 = vadd.f32 %v16405_v11, %v7317_v10  ;;  %v12078_v53 = vld [vmem:[%s16988_s7 + $0xe0] sm:$0xff]   ;;  %v12080_v20 = vld [vmem:[%s16988_s7 + $0xe8] sm:$0xff]  }
 0x57b   : > { %v11317_v52 = vunpack.i.h.bf16 %v11315_v45  ;;  %v11316_v36 = vunpack.i.l.bf16 %v11315_v45  ;;  %v7455_v39 = vadd.f32 %v16405_v11, %v7321_v47  ;;  %v7341_v4 = vmul.f32 %v16397_v33, %v16012_v9 }
 0x57c   : > { %v8093_v46 = vmax.f32 %v8041_v43, %v8045_v61  ;;  %v8091_v58 = vmax.f32 %v8039_v37, %v8043_v30  ;;  %v11320_v38 = vpop.permute.xlu0 %11319  ;;  %10146 = vmatprep.mubr.msk.bf16.mxu0 %vm3884_vm1, %v8118_v23  ;;  %v7345_v25 = vmul.f32 %v16397_v33, %v16021_v35  ;;  %v7555_v10 = vmax.f32 %v16417_v3, 0.0 }
 0x57d   : > { %v11322_v21 = vunpack.i.h.bf16 %v11320_v38  ;;  %v11321_v54 = vunpack.i.l.bf16 %v11320_v38  ;;  %v7559_v47 = vmax.f32 %v16421_v17, 0.0  ;;  %v7920_v9 = vsel %vm1140_vm0, %v11311_v32, %v11312_v50 }
 0x57e   : > { %v8117_v12 = vpack.c.bf16 %v8093_v46, %v8091_v58  ;;  %v11325_v16 = vpop.permute.xlu1 %11324  ;;  %v7922_v26 = vsel %vm1140_vm0, %v11316_v36, %v11317_v52  ;;  %v7563_v59 = vmax.f32 %v7451_v5, 0.0  ;;  %v7567_v48 = vmax.f32 %v7455_v39, 0.0 }
 0x57f   : > { %v7924_v62 = vsel %vm1140_vm0, %v11321_v54, %v11322_v21  ;;  %v11327_v41 = vunpack.i.h.bf16 %v11325_v16  ;;  %v11326_v35 = vunpack.i.l.bf16 %v11325_v16  ;;  %v16461_v29 = vadd.f32 %v16405_v11, %v7341_v4 }
 0x580   : > { %v17520_v8 = vmax.f32 %v16091_v57, 0.0  ;;  %v11330_v18 = vpop.permute.xlu0 %11329  ;;  %8306 = vmatmul.mubr.bf16.vlgmr.msra.gmra.mrb[168].mxu0 %v8117_v12  ;;  %v16466_v17 = vadd.f32 %v16405_v11, %v7345_v25  ;;  %v7349_v6 = vmul.f32 %v16397_v33, %v16065_v28  ;;  %v17521_v57 = vmax.f32 %v16070_v1, 0.0 }
 0x581   : > { %v7926_v14 = vsel %vm1140_vm0, %v11326_v35, %v11327_v41  ;;  %v11332_v43 = vunpack.i.h.bf16 %v11330_v18  ;;  %v11331_v37 = vunpack.i.l.bf16 %v11330_v18  ;;  %8559 = vmatpush1.bf16.msra.mxu0 %v12078_v53  ;;  %v17522_v61 = vmax.f32 %v16059_v51, 0.0 }
 0x582   : > { %v8036_v3 = vmax.f32 %v17520_v8, %v7924_v62  ;;  %v8032_v50 = vmax.f32 %v17521_v57, %v7920_v9  ;;  %v17523_v45 = vmax.f32 %v16077_v60, 0.0  ;;  %v11335_v5 = vpop.permute.xlu1 %11334  ;;  %8560 = vmatprep.subr.bf16.mxu0 %v17474_v44  ;;  %v7353_v28 = vmul.f32 %v16397_v33, %v16082_v34 }
 0x583   : > { %v8034_v30 = vmax.f32 %v17522_v61, %v7922_v26  ;;  %v7919_v52 = vsel %vm1140_vm0, %v11331_v37, %v11311_v32  ;;  %v7921_v39 = vsel %vm1140_vm0, %v11332_v43, %v11316_v36  ;;  %v11337_v4 = vunpack.i.h.bf16 %v11335_v5  ;;  %v12082_v32 = vld [vmem:[%s16988_s7 + $0xf0] sm:$0xff]  }
 0x584   : > { %v8038_v23 = vmax.f32 %v17523_v45, %v7926_v14  ;;  %v11336_v46 = vunpack.i.l.bf16 %v11335_v5  ;;  %v8088_v1 = vmax.f32 %v8032_v50, %v8036_v3  ;;  %v8031_v38 = vmax.f32 %v7555_v10, %v7919_v52  ;;  %v11340_v51 = vpop.permute.xlu0 %11339 }
 0x585   : > { %v8033_v25 = vmax.f32 %v7559_v47, %v7921_v39  ;;  %v7925_v21 = vsel %vm1140_vm0, %v11337_v4, %v11326_v35  ;;  %v11342_v53 = vunpack.i.h.bf16 %v11340_v51  ;;  %8561 = vmatpush1.bf16.msra.mxu0 %v12080_v20  ;;  %v11341_v9 = vunpack.i.l.bf16 %v11340_v51 }
 0x586   : > { %v8090_v58 = vmax.f32 %v8034_v30, %v8038_v23  ;;  %v7923_v60 = vsel %vm1140_vm0, %v11336_v46, %v11321_v54  ;;  %v8037_v12 = vmax.f32 %v7567_v48, %v7925_v21  ;;  %v11345_v16 = vpop.permute.xlu1 %11344  ;;  %8562 = vmatprep.subr.bf16.mxu0 %v17474_v44  ;;  %v7483_v47 = vadd.f32 %v16405_v11, %v7349_v6  ;;  %v12084_v48 = vld [vmem:[%s16988_s7 + $0x150] sm:$0xff]  }
 0x587   : > { %v8035_v36 = vmax.f32 %v7563_v59, %v7923_v60  ;;  %v11347_v10 = vunpack.i.h.bf16 %v11345_v16  ;;  %v11346_v26 = vunpack.i.l.bf16 %v11345_v16  ;;  %v7587_v35 = vmax.f32 %v16461_v29, 0.0  ;;  %v12083_v59 = vld [vmem:[%s16988_s7 + $0xf8] sm:$0xff]  }
 0x588   : > { %v8116_v34 = vpack.c.bf16 %v8090_v58, %v8088_v1  ;;  %v8089_v62 = vmax.f32 %v8033_v25, %v8037_v12  ;;  %v11350_v41 = vpop.permute.xlu0 %11349  ;;  %v7591_v18 = vmax.f32 %v16466_v17, 0.0  ;;  %v7487_v14 = vadd.f32 %v16405_v11, %v7353_v28 }
 0x589   : > { %v8087_v54 = vmax.f32 %v8031_v38, %v8035_v36  ;;  %v11352_v8 = vunpack.i.h.bf16 %v11350_v41  ;;  %v11351_v3 = vunpack.i.l.bf16 %v11350_v41  ;;  %8563 = vmatpush1.bf16.msra.mxu0 %v12082_v32  ;;  %v7936_v37 = vsel %vm1140_vm0, %v11341_v9, %v11342_v53 }
 0x58a   : > { %10161 = vmatprep.mubr.msk.bf16.mxu1 %vm3884_vm1, %v8116_v34  ;;  %v11360_v20 = vpop.permute.xlu1 %11359  ;;  %8564 = vmatprep.subr.bf16.mxu0 %v17474_v44  ;;  %v7938_v29 = vsel %vm1140_vm0, %v11346_v26, %v11347_v10  ;;  %v7595_v61 = vmax.f32 %v7483_v47, 0.0  ;;  %v7357_v30 = vmul.f32 %v16397_v33, %v16116_v22  ;;  %v7361_v17 = vmul.f32 %v16397_v33, %v16127_v40  ;;  %v12085_v22 = vld [vmem:[%s16988_s7 + $0x100] sm:$0xff]   ;;  %v12086_v40 = vld [vmem:[%s16988_s7 + $0x158] sm:$0xff]  }
 0x58b   : > { %v8115_v43 = vpack.c.bf16 %v8089_v62, %v8087_v54  ;;  %v7940_v6 = vsel %vm1140_vm0, %v11351_v3, %v11352_v8  ;;  %v11362_v57 = vunpack.i.h.bf16 %v11360_v20  ;;  %v11361_v50 = vunpack.i.l.bf16 %v11360_v20 }
 0x58c   : > { %v17524_v45 = vmax.f32 %v16155_v19, 0.0  ;;  %v11355_v5 = vpop.permute.xlu0 %11354  ;;  %v7365_v52 = vmul.f32 %v16397_v33, %v16161_v2  ;;  %v7599_v19 = vmax.f32 %v7487_v14, 0.0  ;;  %v17525_v28 = vmax.f32 %v16148_v31, 0.0 }
 0x58d   : > { %8434 = vmatmul.mubr.bf16.vlgmr.msra.gmra.mrb[168].mxu1 %v8115_v43  ;;  %v7942_v39 = vsel %vm1140_vm0, %v11361_v50, %v11362_v57  ;;  %8565 = vmatpush1.bf16.msra.mxu0 %v12083_v59  ;;  %v11357_v4 = vunpack.i.h.bf16 %v11355_v5  ;;  %v11356_v46 = vunpack.i.l.bf16 %v11355_v5  ;;  %v17526_v2 = vmax.f32 %v16138_v56, 0.0 }
 0x58e   : > { %v8052_v23 = vmax.f32 %v17524_v45, %v7940_v6  ;;  %8718 = vmatpush1.bf16.msra.mxu1 %v12084_v48  ;;  %v8048_v1 = vmax.f32 %v17525_v28, %v7936_v37  ;;  %v17527_v38 = vmax.f32 %v16144_v63, 0.0  ;;  %v11365_v25 = vpop.permute.xlu1 %11364  ;;  %8566 = vmatprep.subr.bf16.mxu0 %v17474_v44  ;;  %v7369_v31 = vmul.f32 %v16397_v33, %v16169_v55  ;;  %v12090_v6 = vld [vmem:[%s16988_s7 + $0x168] sm:$0xff]  }
 0x58f   : > { %v8050_v58 = vmax.f32 %v17526_v2, %v7938_v29  ;;  %8719 = vmatprep.subr.bf16.mxu1 %v17474_v44  ;;  %v7937_v60 = vsel %vm1140_vm0, %v11357_v4, %v11346_v26  ;;  %v7935_v21 = vsel %vm1140_vm0, %v11356_v46, %v11341_v9  ;;  %v11367_v53 = vunpack.i.h.bf16 %v11365_v25  ;;  %v12087_v9 = vld [vmem:[%s16988_s7 + $0x108] sm:$0xff]   ;;  %v12088_v26 = vld [vmem:[%s16988_s7 + $0x160] sm:$0xff]   ;;  %v12089_v29 = vld [vmem:[%s16988_s7 + $0x110] sm:$0xff]  }
 0x590   : > { %v8054_v51 = vmax.f32 %v17527_v38, %v7942_v39  ;;  %v11366_v32 = vunpack.i.l.bf16 %v11365_v25  ;;  %v8096_v36 = vmax.f32 %v8048_v1, %v8052_v23  ;;  %v8049_v12 = vmax.f32 %v7591_v18, %v7937_v60  ;;  %v11370_v16 = vpop.permute.xlu0 %11369  ;;  %v12091_v1 = vld [vmem:[%s16988_s7 + $0x118] sm:$0xff]   ;;  %v12092_v2 = vld [vmem:[%s16988_s7 + $0x170] sm:$0xff]  }
 0x591   : > { %v8047_v63 = vmax.f32 %v7587_v35, %v7935_v21  ;;  %v7941_v34 = vsel %vm1140_vm0, %v11367_v53, %v11361_v50  ;;  %8567 = vmatpush1.bf16.msra.mxu0 %v12085_v22  ;;  %v7491_v41 = vadd.f32 %v16405_v11, %v7357_v30  ;;  %v7495_v35 = vadd.f32 %v16405_v11, %v7361_v17 }
 0x592   : > { %v8098_v56 = vmax.f32 %v8050_v58, %v8054_v51  ;;  %v7939_v10 = vsel %vm1140_vm0, %v11366_v32, %v11351_v3  ;;  %8720 = vmatpush1.bf16.msra.mxu1 %v12086_v40  ;;  %v8053_v55 = vmax.f32 %v7599_v19, %v7941_v34  ;;  %v11375_v54 = vpop.permute.xlu1 %11374  ;;  %8568 = vmatprep.subr.bf16.mxu0 %v17474_v44  ;;  %v11372_v8 = vunpack.i.h.bf16 %v11370_v16 }
 0x593   : > { %v8051_v47 = vmax.f32 %v7595_v61, %v7939_v10  ;;  %8721 = vmatprep.subr.bf16.mxu1 %v17474_v44  ;;  %v11371_v3 = vunpack.i.l.bf16 %v11370_v16  ;;  %v11377_v18 = vunpack.i.h.bf16 %v11375_v54  ;;  %v11376_v14 = vunpack.i.l.bf16 %v11375_v54 }
 0x594   : > { %v8120_v62 = vpack.c.bf16 %v8098_v56, %v8096_v36  ;;  %v8097_v59 = vmax.f32 %v8049_v12, %v8053_v55  ;;  %v11380_v43 = vpop.permute.xlu0 %11379  ;;  %v7499_v57 = vadd.f32 %v16405_v11, %v7365_v52  ;;  %v7503_v50 = vadd.f32 %v16405_v11, %v7369_v31  ;;  %v12093_v55 = vld [vmem:[%s16988_s7 + $0x120] sm:$0xff]  }
 0x595   : > { %v8095_v48 = vmax.f32 %v8047_v63, %v8051_v47  ;;  %8569 = vmatpush1.bf16.msra.mxu0 %v12087_v9  ;;  %v11382_v37 = vunpack.i.h.bf16 %v11380_v43  ;;  %v11381_v20 = vunpack.i.l.bf16 %v11380_v43  ;;  %v7603_v17 = vmax.f32 %v7491_v41, 0.0  ;;  %v17532_v41 = vld [vmem:[#allocation50_spill] sm:$0xff] }
 0x596   : > { %10204 = vmatprep.mubr.msk.bf16.mxu0 %vm3884_vm1, %v8120_v62  ;;  %8722 = vmatpush1.bf16.msra.mxu1 %v12088_v26  ;;  %v11390_v61 = vpop.permute.xlu1 %11389  ;;  %v7607_v5 = vmax.f32 %v7495_v35, 0.0  ;;  %v7944_v39 = vsel %vm1140_vm0, %v11371_v3, %v11372_v8  ;;  %v7946_v4 = vsel %vm1140_vm0, %v11376_v14, %v11377_v18  ;;  %v7611_v58 = vmax.f32 %v7499_v57, 0.0  ;;  %v17533_v8 = vld [vmem:[#allocation16_spill] sm:$0xff] }
 0x597   : > { %8570 = vmatprep.subr.bf16.mxu0 %v17474_v44  ;;  %8723 = vmatprep.subr.bf16.mxu1 %v17474_v44  ;;  %v16556_v30 = vpack.c.bf16 %v8097_v59, %v8095_v48  ;;  %v11392_v45 = vunpack.i.h.bf16 %v11390_v61  ;;  %v11391_v23 = vunpack.i.l.bf16 %v11390_v61  ;;  %v7945_v46 = vsel %vm1140_vm0, %v11382_v37, %v11376_v14  ;;  %v17534_v59 = vld [vmem:[#allocation46_spill] sm:$0xff] }
 0x598   : > { %v11385_v52 = vpop.permute.xlu0 %11384  ;;  %v7943_v22 = vsel %vm1140_vm0, %v11381_v20, %v11371_v3  ;;  %v7615_v38 = vmax.f32 %v7503_v50, 0.0  ;;  %v7377_v51 = vmul.f32 %v16397_v33, %v16207_v7  ;;  %v17528_v25 = vmax.f32 %v16203_v27, 0.0  ;;  %v12095_v20 = vld [vmem:[%s16988_s7 + $0x128] sm:$0xff]  }
 0x599   : > { %v7950_v40 = vsel %vm1140_vm0, %v11391_v23, %v11392_v45  ;;  %8571 = vmatpush1.bf16.msra.mxu0 %v12089_v29  ;;  %v11387_v19 = vunpack.i.h.bf16 %v11385_v52  ;;  %v11386_v28 = vunpack.i.l.bf16 %v11385_v52  ;;  %v17529_v53 = vmax.f32 %v16179_v49, 0.0  ;;  %v12096_v29 = vld [vmem:[%s16988_s7 + $0x180] sm:$0xff]   ;;  %v12097_v52 = vld [vmem:[%s16988_s7 + $0x130] sm:$0xff]  }
 0x59a   : > { %8724 = vmatpush1.bf16.msra.mxu1 %v12090_v6  ;;  %v8062_v60 = vmax.f32 %v17528_v25, %v7950_v40  ;;  %v11395_v21 = vpop.permute.xlu1 %11394  ;;  %8572 = vmatprep.subr.bf16.mxu0 %v17474_v44  ;;  %v17530_v12 = vmax.f32 %v16190_v15, 0.0  ;;  %v8057_v63 = vmax.f32 %v7607_v5, %v7945_v46  ;;  %v8055_v7 = vmax.f32 %v7603_v17, %v7943_v22  ;;  %v12094_v15 = vld [vmem:[%s16988_s7 + $0x178] sm:$0xff]   ;;  %v12098_v22 = vld [vmem:[%s16988_s7 + $0x188] sm:$0xff]  }
 0x59b   : > { %8725 = vmatprep.subr.bf16.mxu1 %v17474_v44  ;;  %v8058_v32 = vmax.f32 %v17529_v53, %v7946_v4  ;;  %v7948_v31 = vsel %vm1140_vm0, %v11386_v28, %v11387_v19  ;;  %v11397_v36 = vunpack.i.h.bf16 %v11395_v21  ;;  %v11396_v56 = vunpack.i.l.bf16 %v11395_v21 }
 0x59c   : > { %v8056_v16 = vmax.f32 %v17530_v12, %v7944_v39  ;;  %v17531_v27 = vmax.f32 %v16216_v13, 0.0  ;;  %v16582_v10 = vpop.permute.xlu0 %11399  ;;  %v7373_v35 = vmul.f32 %v16397_v33, %v17532_v41  ;;  %v7381_v3 = vmul.f32 %v16397_v33, %v17533_v8  ;;  %v12099_v12 = vld [vmem:[%s16988_s7 + $0x138] sm:$0xff]   ;;  %v17536_v41 = vld [vmem:[#allocation55_spill] sm:$0xff] }
 0x59d   : > { %v8102_v9 = vmax.f32 %v8058_v32, %v8062_v60  ;;  %v7949_v26 = vsel %vm1140_vm0, %v11397_v36, %v11391_v23  ;;  %v7947_v49 = vsel %vm1140_vm0, %v11396_v56, %v11386_v28  ;;  %8573 = vmatpush1.bf16.msra.mxu0 %v12091_v1  ;;  %v7385_v48 = vmul.f32 %v16397_v33, %v17534_v59  ;;  %v17537_v59 = vld [vmem:[#allocation18_spill] sm:$0xff] }
 0x59e   : > { %v8060_v34 = vmax.f32 %v17531_v27, %v7948_v31  ;;  %8726 = vmatpush1.bf16.msra.mxu1 %v12092_v2  ;;  %v8061_v13 = vmax.f32 %v7615_v38, %v7949_v26  ;;  %v8059_v54 = vmax.f32 %v7611_v58, %v7947_v49  ;;  %v16592_v62 = vpop.permute.xlu1 %11404  ;;  %8574 = vmatprep.subr.bf16.mxu0 %v17474_v44  ;;  %v11401_v5 = vunpack.i.l.bf16 %v16582_v10 }
 0x59f   : > { %8727 = vmatprep.subr.bf16.mxu1 %v17474_v44  ;;  %v7511_v6 = vadd.f32 %v16405_v11, %v7377_v51  ;;  %v7507_v61 = vadd.f32 %v16405_v11, %v7373_v35  ;;  %v7515_v17 = vadd.f32 %v16405_v11, %v7381_v3  ;;  %v7519_v45 = vadd.f32 %v16405_v11, %v7385_v48 }
 0x5a0   : > { %v8100_v47 = vmax.f32 %v8056_v16, %v8060_v34  ;;  %v8101_v18 = vmax.f32 %v8057_v63, %v8061_v13  ;;  %v8099_v14 = vmax.f32 %v8055_v7, %v8059_v54  ;;  %v16602_v43 = vpop.permute.xlu0 %11409  ;;  %v11406_v39 = vunpack.i.l.bf16 %v16592_v62  ;;  %v12100_v16 = vld [vmem:[%s16988_s7 + $0x190] sm:$0xff]   ;;  %v12101_v54 = vld [vmem:[%s16988_s7 + $0x140] sm:$0xff]  }
 0x5a1   : > { %8575 = vmatpush1.bf16.msra.mxu0 %v12093_v55  ;;  %v7623_v40 = vmax.f32 %v7511_v6, 0.0  ;;  %v11411_v19 = vunpack.i.l.bf16 %v16602_v43  ;;  %v7619_v25 = vmax.f32 %v7507_v61, 0.0  ;;  %v7627_v60 = vmax.f32 %v7515_v17, 0.0  ;;  %v17535_v55 = vld [vmem:[#allocation58_spill] sm:$0xff] }
 0x5a2   : > { %v8122_v37 = vpack.c.bf16 %v8102_v9, %v8100_v47  ;;  %8728 = vmatpush1.bf16.msra.mxu1 %v12094_v15  ;;  %v11420_v57 = vpop.permute.xlu1 %11419  ;;  %8576 = vmatprep.subr.bf16.mxu0 %v17474_v44  ;;  %v16613_v50 = vpack.c.bf16 %v8101_v18, %v8099_v14  ;;  %v7631_v21 = vmax.f32 %v7519_v45, 0.0  ;;  %v11407_v34 = vunpack.i.h.bf16 %v16592_v62  ;;  %v12102_v62 = vld [vmem:[%s16988_s7 + $0x198] sm:$0xff]   ;;  %v12103_v45 = vld [vmem:[%s16988_s7 + $0x148] sm:$0xff]  }
 0x5a3   : > { %8729 = vmatprep.subr.bf16.mxu1 %v17474_v44  ;;  %v11421_v28 = vunpack.i.l.bf16 %v11420_v57  ;;  %v11422_v32 = vunpack.i.h.bf16 %v11420_v57  ;;  %v11412_v9 = vunpack.i.h.bf16 %v16602_v43  ;;  %v7389_v15 = vmul.f32 %v16397_v33, %v17535_v55  ;;  %v17538_v43 = vld [vmem:[#allocation20_spill] sm:$0xff] }
 0x5a4   : > { %10247 = vmatprep.mubr.msk.bf16.mxu1 %vm3884_vm1, %v8122_v37  ;;  %v11415_v23 = vpop.permute.xlu0 %11414  ;;  %v11402_v47 = vunpack.i.h.bf16 %v16582_v10  ;;  %v7393_v35 = vmul.f32 %v16397_v33, %v17536_v41  ;;  %v7397_v48 = vmul.f32 %v16397_v33, %v17537_v59  ;;  %v7954_v18 = vsel %vm1140_vm0, %v11406_v39, %v11407_v34 }
 0x5a5   : > { %8577 = vmatpush1.bf16.msra.mxu0 %v12095_v20  ;;  %v11417_v4 = vunpack.i.h.bf16 %v11415_v23  ;;  %v11416_v46 = vunpack.i.l.bf16 %v11415_v23  ;;  %v7958_v13 = vsel %vm1140_vm0, %v11421_v28, %v11422_v32  ;;  %v7956_v14 = vsel %vm1140_vm0, %v11411_v19, %v11412_v9  ;;  %v17539_v20 = vld [vmem:[#allocation83_spill] sm:$0xff] }
 0x5a6   : > { %8730 = vmatpush1.bf16.msra.mxu1 %v12096_v29  ;;  %v11425_v1 = vpop.permute.xlu1 %11424  ;;  %8578 = vmatprep.subr.bf16.mxu0 %v17474_v44  ;;  %v7401_v37 = vmul.f32 %v16397_v33, %v17538_v43  ;;  %v17540_v29 = vmax.f32 %v17539_v20, 0.0  ;;  %v7523_v57 = vadd.f32 %v16405_v11, %v7389_v15  ;;  %v7952_v61 = vsel %vm1140_vm0, %v11401_v5, %v11402_v47  ;;  %v12104_v23 = vld [vmem:[%s16988_s7 + $0x1a0] sm:$0xff]  }
 0x5a7   : > { %8731 = vmatprep.subr.bf16.mxu1 %v17474_v44  ;;  %v7953_v2 = vsel %vm1140_vm0, %v11417_v4, %v11406_v39  ;;  %v7951_v58 = vsel %vm1140_vm0, %v11416_v46, %v11401_v5  ;;  %v11427_v38 = vunpack.i.h.bf16 %v11425_v1  ;;  %v11426_v51 = vunpack.i.l.bf16 %v11425_v1  ;;  %v17541_v4 = vld [vmem:[#allocation17_spill] sm:$0xff] }
 0x5a8   : > { %v16632_v53 = vpop.permute.xlu0 %11429  ;;  %v8065_v31 = vmax.f32 %v7623_v40, %v7953_v2  ;;  %v8063_v63 = vmax.f32 %v7619_v25, %v7951_v58  ;;  %v8070_v6 = vmax.f32 %v17540_v29, %v7958_v13  ;;  %v7527_v39 = vadd.f32 %v16405_v11, %v7393_v35 }
 0x5a9   : > { %v7957_v36 = vsel %vm1140_vm0, %v11427_v38, %v11421_v28  ;;  %v7955_v56 = vsel %vm1140_vm0, %v11426_v51, %v11411_v19  ;;  %8579 = vmatpush1.bf16.msra.mxu0 %v12097_v52  ;;  %v17542_v46 = vmax.f32 %v17541_v4, 0.0  ;;  %v7531_v1 = vadd.f32 %v16405_v11, %v7397_v48  ;;  %v17545_v38 = vld [vmem:[#allocation81_spill] sm:$0xff]  ;;  %v17549_v4 = vld [vmem:[#allocation86_spill] sm:$0xff] }
 0x5aa   : > { %8732 = vmatpush1.bf16.msra.mxu1 %v12098_v22  ;;  %v8069_v7 = vmax.f32 %v7631_v21, %v7957_v36  ;;  %v8067_v27 = vmax.f32 %v7627_v60, %v7955_v56  ;;  %8580 = vmatprep.subr.bf16.mxu0 %v17474_v44  ;;  %v16658_v8 = vpop.permute.xlu1 %11434  ;;  %v17543_v22 = vld [vmem:[#allocation82_spill] sm:$0xff]  ;;  %v7535_v58 = vadd.f32 %v16405_v11, %v7401_v37  ;;  %v17546_v51 = vmax.f32 %v17545_v38, 0.0  ;;  %v12107_v48 = vld [vmem:[%s16988_s7 + $0x1b0] sm:$0xff]  }
 0x5ab   : > { %8733 = vmatprep.subr.bf16.mxu1 %v17474_v44  ;;  %v8066_v52 = vmax.f32 %v17542_v46, %v7954_v18  ;;  %v17544_v40 = vmax.f32 %v17543_v22, 0.0  ;;  %v11436_v2 = vunpack.i.l.bf16 %v16658_v8  ;;  %v11431_v21 = vunpack.i.l.bf16 %v16632_v53  ;;  %v12108_v18 = vld [vmem:[%s16988_s7 + $0x1c8] sm:$0xff]   ;;  %v17551_v22 = vld [vmem:[#allocation66_spill] sm:$0xff] }
 0x5ac   : > { %v8105_v26 = vmax.f32 %v8065_v31, %v8069_v7  ;;  %v8103_v49 = vmax.f32 %v8063_v63, %v8067_v27  ;;  %v11440_v3 = vpop.permute.xlu0 %11439  ;;  %v8064_v25 = vmax.f32 %v17546_v51, %v7952_v61  ;;  %v7635_v31 = vmax.f32 %v7523_v57, 0.0  ;;  %v12106_v63 = vld [vmem:[%s16988_s7 + $0x1c0] sm:$0xff]   ;;  %v17554_v51 = vld [vmem:[#allocation85_spill] sm:$0xff] }
 0x5ad   : > { %8581 = vmatpush1.bf16.msra.mxu0 %v12099_v12  ;;  %v11442_v17 = vunpack.i.h.bf16 %v11440_v3  ;;  %v8068_v19 = vmax.f32 %v17544_v40, %v7956_v14  ;;  %v11441_v5 = vunpack.i.l.bf16 %v11440_v3  ;;  %v8106_v60 = vmax.f32 %v8066_v52, %v8070_v6 }
 0x5ae   : > { %8734 = vmatpush1.bf16.msra.mxu1 %v12100_v16  ;;  %8582 = vmatprep.subr.bf16.mxu0 %v17474_v44  ;;  %v16662_v10 = vpack.c.bf16 %v8105_v26, %v8103_v49  ;;  %v12105_v16 = vld [vmem:[%s16988_s7 + $0x1a8] sm:$0xff]   ;;  %v7639_v7 = vmax.f32 %v7527_v39, 0.0  ;;  %v11437_v34 = vunpack.i.h.bf16 %v16658_v8  ;;  %v7643_v13 = vmax.f32 %v7531_v1, 0.0  ;;  %v12109_v39 = vld [vmem:[%s16988_s7 + $0x1b8] sm:$0xff]   ;;  %v17553_v1 = vld [vmem:[#allocation59_spill] sm:$0xff] }
 0x5af   : > { %8735 = vmatprep.subr.bf16.mxu1 %v17474_v44  ;;  %v7961_v36 = vsel %vm1140_vm0, %v11442_v17, %v11436_v2  ;;  %v8104_v27 = vmax.f32 %v8064_v25, %v8068_v19  ;;  %v7959_v9 = vsel %vm1140_vm0, %v11441_v5, %v11431_v21  ;;  %v11432_v35 = vunpack.i.h.bf16 %v16632_v53  ;;  %v17548_v17 = vld [vmem:[#allocation21_spill] sm:$0xff] }
 0x5b0   : > { %v11445_v32 = vpop.permute.xlu0 %11444  ;;  %v7962_v53 = vsel %vm1140_vm0, %v11436_v2, %v11437_v34  ;;  %v17547_v20 = vmax.f32 %v16321_v42, 0.0  ;;  %v12110_v42 = vld [vmem:[%s16988_s7 + $0x1d0] sm:$0xff]   ;;  %v17550_v46 = vmax.f32 %v17549_v4, 0.0  ;;  %v17552_v40 = vmax.f32 %v17551_v22, 0.0  ;;  %v12123_v4 = vld [vmem:[%s16988_s7 + $0x208] sm:$0xff]  }
 0x5b1   : > { %8583 = vmatpush1.bf16.msra.mxu0 %v12101_v54  ;;  %v11447_v49 = vunpack.i.h.bf16 %v11445_v32  ;;  %v11446_v55 = vunpack.i.l.bf16 %v11445_v32  ;;  %v7647_v54 = vmax.f32 %v7535_v58, 0.0  ;;  %v8124_v41 = vpack.c.bf16 %v8106_v60, %v8104_v27  ;;  %v12126_v22 = vld [vmem:[%s16988_s7 + $0x268] sm:$0xff]  }
 0x5b2   : > { %8736 = vmatpush1.bf16.msra.mxu1 %v12102_v62  ;;  %v11450_v28 = vpop.permute.xlu1 %11449  ;;  %8584 = vmatprep.subr.bf16.mxu0 %v17474_v44  ;;  %v8073_v62 = vmax.f32 %v7639_v7, %v7961_v36  ;;  %v8074_v52 = vmax.f32 %v17550_v46, %v7962_v53  ;;  %v7405_v2 = vmul.f32 %v16397_v33, %v17553_v1  ;;  %v17555_v25 = vmax.f32 %v17554_v51, 0.0  ;;  %v12112_v36 = vld [vmem:[%s16988_s7 + $0x230] sm:$0xff]   ;;  %v12124_v46 = vld [vmem:[%s16988_s7 + $0x260] sm:$0xff]  }
 0x5b3   : > { %8737 = vmatprep.subr.bf16.mxu1 %v17474_v44  ;;  %v11452_v56 = vunpack.i.h.bf16 %v11450_v28  ;;  %v11451_v12 = vunpack.i.l.bf16 %v11450_v28  ;;  %v7964_v37 = vsel %vm1140_vm0, %v11446_v55, %v11447_v49  ;;  %v7413_v58 = vmul.f32 %v16397_v33, %v16350_v24  ;;  %v12113_v49 = vld [vmem:[%s16988_s7 + $0x1e0] sm:$0xff]   ;;  %v12128_v1 = vld [vmem:[%s16988_s7 + $0x270] sm:$0xff]  }
 0x5b4   : > { %v8076_v19 = vmax.f32 %v17552_v40, %v7964_v37  ;;  %v7417_v38 = vmul.f32 %v16397_v33, %v16356_v0 }
 0x5b5   : > { %8585 = vmatpush1.bf16.msra.mxu0 %v12103_v45  ;;  %v7966_v8 = vsel %vm1140_vm0, %v11451_v12, %v11452_v56  ;;  %v7409_v45 = vmul.f32 %v16397_v33, %v17548_v17  ;;  %v7539_v33 = vadd.f32 %v16405_v11, %v7405_v2 }
 0x5b6   : > { %8738 = vmatpush1.bf16.msra.mxu1 %v12104_v23  ;;  %v11455_v26 = vpop.permute.xlu1 %11454  ;;  %8876 = vmatprep.subr.bf16.mxu0 %v17474_v44  ;;  %v8078_v29 = vmax.f32 %v17547_v20, %v7966_v8  ;;  %v7960_v23 = vsel %vm1140_vm0, %v11431_v21, %v11432_v35 }
 0x5b7   : > { %8739 = vmatprep.subr.bf16.mxu1 %v17474_v44  ;;  %v11457_v15 = vunpack.i.h.bf16 %v11455_v26  ;;  %v11456_v47 = vunpack.i.l.bf16 %v11455_v26  ;;  %v8072_v60 = vmax.f32 %v17555_v25, %v7960_v23  ;;  %v7543_v24 = vadd.f32 %v16405_v11, %v7409_v45  ;;  %v12119_v45 = vld [vmem:[%s16988_s7 + $0x1f8] sm:$0xff]   ;;  %v12120_v23 = vld [vmem:[%s16988_s7 + $0x250] sm:$0xff]   ;;  %v12129_v25 = vld [vmem:[%s16988_s7 + $0x220] sm:$0xff]  }
 0x5b8   : > { %8591 = vmatmul.mubr.bf16.vlgmr.msra.gmra.mrb[172].mxu0 %v16556_v30  ;;  %v8071_v30 = vmax.f32 %v7635_v31, %v7959_v9  ;;  %v16722_v61 = vpop.permute.xlu0 %11459  ;;  %v8110_v21 = vmax.f32 %v8074_v52, %v8078_v29  ;;  %v12111_v31 = vld [vmem:[%s16988_s7 + $0x1d8] sm:$0xff]   ;;  %v7651_v35 = vmax.f32 %v7539_v33, 0.0  ;;  %v12125_v52 = vld [vmem:[%s16988_s7 + $0x210] sm:$0xff]   ;;  %v12131_v33 = vld [vmem:[%s16988_s7 + $0x228] sm:$0xff]  }
 0x5b9   : > { %v7965_v3 = vsel %vm1140_vm0, %v11457_v15, %v11451_v12  ;;  %v7963_v59 = vsel %vm1140_vm0, %v11456_v47, %v11446_v55  ;;  %8877 = vmatpush1.bf16.msra.mxu0 %v12106_v63  ;;  %10290 = vmatprep.mubr.msk.bf16.mxu0 %vm3884_vm1, %v8124_v41  ;;  %v8108_v56 = vmax.f32 %v8072_v60, %v8076_v19  ;;  %v11461_v27 = vunpack.i.l.bf16 %v16722_v61  ;;  %v12127_v19 = vld [vmem:[%s16988_s7 + $0x218] sm:$0xff]  }
 0x5ba   : > { %8740 = vmatpush1.bf16.msra.mxu1 %v12105_v16  ;;  %v8077_v14 = vmax.f32 %v7647_v54, %v7965_v3  ;;  %v8075_v43 = vmax.f32 %v7643_v13, %v7963_v59  ;;  %8878 = vmatprep.subr.bf16.mxu0 %v17474_v44  ;;  %v16737_v5 = vpop.permute.xlu1 %11464  ;;  %v7547_v12 = vadd.f32 %v16405_v11, %v7413_v58  ;;  %v7655_v55 = vmax.f32 %v7543_v24, 0.0  ;;  %v12130_v60 = vld [vmem:[%s16988_s7 + $0x278] sm:$0xff]  }
 0x5bb   : > { %8741 = vmatprep.subr.bf16.mxu1 %v17474_v44  ;;  %v7551_v16 = vadd.f32 %v16405_v11, %v7417_v38  ;;  %v8126_v63 = vpack.c.bf16 %v8110_v21, %v8108_v56  ;;  %v11466_v34 = vunpack.i.l.bf16 %v16737_v5  ;;  %v12114_v11 = vld [vmem:[%s16988_s7 + $0x238] sm:$0xff]   ;;  %v11467_v2 = vunpack.i.h.bf16 %v16737_v5  ;;  %v12132_v5 = vld [vmem:[%s16988_s7 + $0x280] sm:$0xff]  }
 0x5bc   : > { %v8109_v6 = vmax.f32 %v8073_v62, %v8077_v14  ;;  %v8107_v57 = vmax.f32 %v8071_v30, %v8075_v43  ;;  %v7659_v8 = vmax.f32 %v7547_v12, 0.0  ;;  %v12115_v30 = vld [vmem:[%s16988_s7 + $0x1e8] sm:$0xff]   ;;  %v12116_v14 = vld [vmem:[%s16988_s7 + $0x240] sm:$0xff]   ;;  %v11462_v38 = vunpack.i.h.bf16 %v16722_v61 }
 0x5bd   : > { %8879 = vmatpush1.bf16.msra.mxu0 %v12108_v18  ;;  %v7663_v3 = vmax.f32 %v7551_v16, 0.0  ;;  %v7970_v21 = vsel %vm1140_vm0, %v11466_v34, %v11467_v2  ;;  %v17562_v61 = vld [vmem:[#allocation28_spill] sm:$0xff] }
 0x5be   : > { %8742 = vmatpush1.bf16.msra.mxu1 %v12107_v48  ;;  %8880 = vmatprep.subr.bf16.mxu0 %v17474_v44  ;;  %v16741_v28 = vpack.c.bf16 %v8109_v6, %v8107_v57  ;;  %v12117_v6 = vld [vmem:[%s16988_s7 + $0x1f0] sm:$0xff]   ;;  %v12118_v57 = vld [vmem:[%s16988_s7 + $0x248] sm:$0xff]  }
 0x5bf   : > { %8743 = vmatprep.subr.bf16.mxu1 %v17474_v44 }
 0x5c0   : > { %v16751_v32 = vpop.permute.xlu0 %11469 }
 0x5c1   : > { %8881 = vmatpush1.bf16.msra.mxu0 %v12110_v42  ;;  %v12122_v42 = vld [vmem:[%s16988_s7 + $0x258] sm:$0xff]   ;;  %v11472_v58 = vunpack.i.h.bf16 %v16751_v32 }
 0x5c2   : > { %8744 = vmatpush1.bf16.msra.mxu1 %v12109_v39  ;;  %v16760_v0 = vpop.permute.xlu1 %11474  ;;  %8882 = vmatprep.subr.bf16.mxu0 %v17474_v44  ;;  %v12121_v39 = vld [vmem:[%s16988_s7 + $0x200] sm:$0xff]  }
 0x5c3   : > { %9035 = vmatprep.subr.bf16.mxu1 %v17474_v44  ;;  %v11476_v15 = vunpack.i.l.bf16 %v16760_v0  ;;  %v11477_v40 = vunpack.i.h.bf16 %v16760_v0  ;;  %v7968_v0 = vsel %vm1140_vm0, %v11461_v27, %v11462_v38 }
 0x5c4   : > { %v11480_v7 = vpop.permute.xlu0 %11479 }
 0x5c5   : > { %8750 = vmatmul.mubr.bf16.vlgmr.msra.gmra.mrb[172].mxu1 %v16613_v50  ;;  %8883 = vmatpush1.bf16.msra.mxu0 %v12111_v31  ;;  %v11482_v9 = vunpack.i.h.bf16 %v11480_v7  ;;  %v11481_v26 = vunpack.i.l.bf16 %v11480_v7  ;;  %v11471_v50 = vunpack.i.l.bf16 %v16751_v32  ;;  %v7974_v51 = vsel %vm1140_vm0, %v11476_v15, %v11477_v40  ;;  %v17558_v32 = vld [vmem:[#allocation22_spill] sm:$0xff] }
 0x5c6   : > { %9036 = vmatpush1.bf16.msra.mxu1 %v12112_v36  ;;  %10333 = vmatprep.mubr.msk.bf16.mxu1 %vm3884_vm1, %v8126_v63  ;;  %v11485_v47 = vpop.permute.xlu1 %11484  ;;  %v17556_v36 = vld [vmem:[#allocation67_spill] sm:$0xff]  ;;  %v17559_v12 = vmax.f32 %v17558_v32, 0.0  ;;  %v17560_v63 = vld [vmem:[#allocation25_spill] sm:$0xff] }
 0x5c7   : > { %8884 = vmatprep.subr.bf16.mxu0 %v17474_v44  ;;  %v7969_v13 = vsel %vm1140_vm0, %v11482_v9, %v11466_v34  ;;  %v7967_v54 = vsel %vm1140_vm0, %v11481_v26, %v11461_v27  ;;  %v11487_v62 = vunpack.i.h.bf16 %v11485_v47  ;;  %v11486_v41 = vunpack.i.l.bf16 %v11485_v47  ;;  %9037 = vmatprep.subr.bf16.mxu1 %v17474_v44  ;;  %v12136_v47 = vld [vmem:[%s16988_s7 + $0x2a8] sm:$0xff]   ;;  %v10377_v32 = vld [vmem:[%s16989_s8] ss:$0 sm:$0xff] }
 0x5c8   : > { %v8081_v59 = vmax.f32 %v7655_v55, %v7969_v13  ;;  %v8079_v43 = vmax.f32 %v7651_v35, %v7967_v54  ;;  %v7972_v31 = vsel %vm1140_vm0, %v11471_v50, %v11472_v58  ;;  %v17557_v24 = vmax.f32 %v17556_v36, 0.0  ;;  %v12138_v13 = vld [vmem:[%s16988_s7 + $0x2b0] sm:$0xff]   ;;  %v12139_v54 = vld [vmem:[%s16988_s7 + $0x2b8] sm:$0xff]  }
 0x5c9   : > { %v7973_v48 = vsel %vm1140_vm0, %v11487_v62, %v11476_v15  ;;  %v7971_v18 = vsel %vm1140_vm0, %v11486_v41, %v11471_v50  ;;  %8885 = vmatpush1.bf16.msra.mxu0 %v12113_v49  ;;  %v8082_v16 = vmax.f32 %v17559_v12, %v7970_v21  ;;  %v17561_v7 = vmax.f32 %v17560_v63, 0.0  ;;  %v12133_v49 = vld [vmem:[%s16988_s7 + $0x288] sm:$0xff]   ;;  %v12135_v15 = vld [vmem:[%s16988_s7 + $0x290] sm:$0xff]   ;;  %v12140_v62 = vld [vmem:[%s16988_s7 + $0x2c0] sm:$0xff]  }
 0x5ca   : > { %9038 = vmatpush1.bf16.msra.mxu1 %v12114_v11  ;;  %v8085_v53 = vmax.f32 %v7663_v3, %v7973_v48  ;;  %v8083_v37 = vmax.f32 %v7659_v8, %v7971_v18  ;;  %8886 = vmatprep.subr.bf16.mxu0 %v17474_v44  ;;  %v8086_v56 = vmax.f32 %v17557_v24, %v7974_v51  ;;  %v17563_v27 = vmax.f32 %v17562_v61, 0.0  ;;  %v12134_v11 = vld [vmem:[%s16988_s7 + $0x2a0] sm:$0xff]   ;;  %v12141_v41 = vld [vmem:[%s16988_s7 + $0x2c8] sm:$0xff]   ;;  %v12142_v35 = vld [vmem:[%s16988_s7 + $0x2d0] sm:$0xff]  }
 0x5cb   : > { %9039 = vmatprep.subr.bf16.mxu1 %v17474_v44  ;;  %v8084_v34 = vmax.f32 %v17561_v7, %v7972_v31  ;;  %v12144_v8 = vld [vmem:[%s16988_s7 + $0x2e0] sm:$0xff]   ;;  %v12145_v3 = vld [vmem:[%s16988_s7 + $0x2e8] sm:$0xff]   ;;  %v12147_v48 = vld [vmem:[%s16988_s7 + $0x2f8] sm:$0xff]  }
 0x5cc   : > { %v8113_v20 = vmax.f32 %v8081_v59, %v8085_v53  ;;  %v8111_v29 = vmax.f32 %v8079_v43, %v8083_v37  ;;  %v8080_v9 = vmax.f32 %v17563_v27, %v7968_v0  ;;  %v8114_v26 = vmax.f32 %v8082_v16, %v8086_v56  ;;  %v12146_v59 = vld [vmem:[%s16988_s7 + $0x2f0] sm:$0xff]   ;;  %v12148_v18 = vld [vmem:[%s16988_s7 + $0x300] sm:$0xff]  }
 0x5cd   : > { %8887 = vmatpush1.bf16.msra.mxu0 %v12115_v30  ;;  %v12149_v30 = vld [vmem:[%s16988_s7 + $0x308] sm:$0xff]  }
 0x5ce   : > { %9040 = vmatpush1.bf16.msra.mxu1 %v12116_v14  ;;  %8888 = vmatprep.subr.bf16.mxu0 %v17474_v44  ;;  %v16809_v17 = vpack.c.bf16 %v8113_v20, %v8111_v29  ;;  %v8112_v55 = vmax.f32 %v8080_v9, %v8084_v34 }
 0x5cf   : > { %9041 = vmatprep.subr.bf16.mxu1 %v17474_v44 }
 0x5d0   : > { %v8128_v50 = vpack.c.bf16 %v8114_v26, %v8112_v55 }
 0x5d1   : > { %8889 = vmatpush1.bf16.msra.mxu0 %v12117_v6 }
 0x5d2   : > { %9042 = vmatpush1.bf16.msra.mxu1 %v12118_v57  ;;  %8890 = vmatprep.subr.bf16.mxu0 %v17474_v44 }
 0x5d3   : > { %9043 = vmatprep.subr.bf16.mxu1 %v17474_v44 }
 0x5d5   : > { %8891 = vmatpush1.bf16.msra.mxu0 %v12119_v45 }
 0x5d6   : > { %9044 = vmatpush1.bf16.msra.mxu1 %v12120_v23  ;;  %8892 = vmatprep.subr.bf16.mxu0 %v17474_v44 }
 0x5d7   : > { %9045 = vmatprep.subr.bf16.mxu1 %v17474_v44 }
 0x5d9   : > { %8893 = vmatpush1.bf16.msra.mxu0 %v12121_v39 }
 0x5da   : > { %9046 = vmatpush1.bf16.msra.mxu1 %v12122_v42  ;;  %8894 = vmatprep.subr.bf16.mxu0 %v17474_v44 }
 0x5db   : > { %9047 = vmatprep.subr.bf16.mxu1 %v17474_v44 }
 0x5dd   : > { %8895 = vmatpush1.bf16.msra.mxu0 %v12123_v4 }
 0x5de   : > { %9048 = vmatpush1.bf16.msra.mxu1 %v12124_v46  ;;  %8896 = vmatprep.subr.bf16.mxu0 %v17474_v44 }
 0x5df   : > { %9049 = vmatprep.subr.bf16.mxu1 %v17474_v44 }
 0x5e1   : > { %8897 = vmatpush1.bf16.msra.mxu0 %v12125_v52 }
 0x5e2   : > { %9050 = vmatpush1.bf16.msra.mxu1 %v12126_v22  ;;  %8898 = vmatprep.subr.bf16.mxu0 %v17474_v44 }
 0x5e3   : > { %9051 = vmatprep.subr.bf16.mxu1 %v17474_v44 }
 0x5e5   : > { %8899 = vmatpush1.bf16.msra.mxu0 %v12127_v19 }
 0x5e6   : > { %9052 = vmatpush1.bf16.msra.mxu1 %v12128_v1  ;;  %8900 = vmatprep.subr.bf16.mxu0 %v17474_v44 }
 0x5e7   : > { %9053 = vmatprep.subr.bf16.mxu1 %v17474_v44 }
 0x5e9   : > { %8901 = vmatpush1.bf16.msra.mxu0 %v12129_v25 }
 0x5ea   : > { %9054 = vmatpush1.bf16.msra.mxu1 %v12130_v60  ;;  %8902 = vmatprep.subr.bf16.mxu0 %v17474_v44 }
 0x5eb   : > { %9055 = vmatprep.subr.bf16.mxu1 %v17474_v44 }
 0x5ed   : > { %8903 = vmatpush1.bf16.msra.mxu0 %v12131_v33 }
 0x5ee   : > { %9056 = vmatpush1.bf16.msra.mxu1 %v12132_v5  ;;  %9194 = vmatprep.subr.bf16.mxu0 %v17474_v44 }
 0x5ef   : > { %9057 = vmatprep.subr.bf16.mxu1 %v17474_v44 }
 0x5f0   : > { %8909 = vmatmul.mubr.bf16.vlgmr.msra.gmra.mrb[176].mxu0 %v16662_v10  ;;  %v12137_v10 = vld [vmem:[%s16988_s7 + $0x298] sm:$0xff]  }
 0x5f1   : > { %9195 = vmatpush1.bf16.msra.mxu0 %v12134_v11  ;;  %10376 = vmatprep.mubr.msk.bf16.mxu0 %vm3884_vm1, %v8128_v50 }
 0x5f2   : > { %9058 = vmatpush1.bf16.msra.mxu1 %v12133_v49  ;;  %9196 = vmatprep.subr.bf16.mxu0 %v17474_v44 }
 0x5f3   : > { %9059 = vmatprep.subr.bf16.mxu1 %v17474_v44 }
 0x5f5   : > { %9197 = vmatpush1.bf16.msra.mxu0 %v12136_v47 }
 0x5f6   : > { %9060 = vmatpush1.bf16.msra.mxu1 %v12135_v15  ;;  %9198 = vmatprep.subr.bf16.mxu0 %v17474_v44 }
 0x5f7   : > { %9061 = vmatprep.subr.bf16.mxu1 %v17474_v44 }
 0x5f9   : > { %9199 = vmatpush1.bf16.msra.mxu0 %v12138_v13 }
 0x5fa   : > { %9062 = vmatpush1.bf16.msra.mxu1 %v12137_v10  ;;  %9200 = vmatprep.subr.bf16.mxu0 %v17474_v44 }
 0x5fd   : > { %9068 = vmatmul.mubr.bf16.vlgmr.msra.gmra.mrb[176].mxu1 %v16741_v28  ;;  %9201 = vmatpush1.bf16.msra.mxu0 %v12139_v54  ;;  %v12143_v28 = vld [vmem:[%s16988_s7 + $0x2d8] sm:$0xff]  }
 0x5fe   : > { %9202 = vmatprep.subr.bf16.mxu0 %v17474_v44 }
 0x601   : > { %9203 = vmatpush1.bf16.msra.mxu0 %v12140_v62 }
 0x602   : > { %9204 = vmatprep.subr.bf16.mxu0 %v17474_v44 }
 0x605   : > { %9205 = vmatpush1.bf16.msra.mxu0 %v12141_v41 }
 0x606   : > { %9206 = vmatprep.subr.bf16.mxu0 %v17474_v44 }
 0x609   : > { %9207 = vmatpush1.bf16.msra.mxu0 %v12142_v35 }
 0x60a   : > { %9208 = vmatprep.subr.bf16.mxu0 %v17474_v44 }
 0x60d   : > { %9209 = vmatpush1.bf16.msra.mxu0 %v12143_v28 }
 0x60e   : > { %9210 = vmatprep.subr.bf16.mxu0 %v17474_v44 }
 0x611   : > { %9211 = vmatpush1.bf16.msra.mxu0 %v12144_v8 }
 0x612   : > { %9212 = vmatprep.subr.bf16.mxu0 %v17474_v44 }
 0x615   : > { %9213 = vmatpush1.bf16.msra.mxu0 %v12145_v3 }
 0x616   : > { %9214 = vmatprep.subr.bf16.mxu0 %v17474_v44 }
 0x619   : > { %9215 = vmatpush1.bf16.msra.mxu0 %v12146_v59 }
 0x61a   : > { %9216 = vmatprep.subr.bf16.mxu0 %v17474_v44 }
 0x61d   : > { %9217 = vmatpush1.bf16.msra.mxu0 %v12147_v48 }
 0x61e   : > { %9218 = vmatprep.subr.bf16.mxu0 %v17474_v44 }
 0x621   : > { %9219 = vmatpush1.bf16.msra.mxu0 %v12148_v18 }
 0x622   : > { %9220 = vmatprep.subr.bf16.mxu0 %v17474_v44 }
 0x625   : > { %9221 = vmatpush1.bf16.msra.mxu0 %v12149_v30 }
 0x628   : > { %9227 = vmatmul.mubr.bf16.vlgmr.msra.gmra.mrb[180].mxu0 %v16809_v17 }
 0x653   : > { %v8307_v14 = vpop.f32.mrb[168].mxu0 }
 0x654   : > { %v8309_v43 = vpop.f32.mrb[169].mxu0 }
 0x655   : > { %v8310_v53 = vpop.f32.mrb[170].mxu0 }
 0x656   : > { %v8312_v37 = vpop.f32.mrb[171].mxu0 }
 0x660   : > { %v8435_v20 = vpop.f32.mrb[168].mxu1 }
 0x661   : > { %v8436_v29 = vadd.f32 %v8435_v20, %v8307_v14  ;;  %v8437_v6 = vpop.f32.mrb[169].mxu1 }
 0x662   : > { %v8438_v57 = vpop.f32.mrb[170].mxu1 }
 0x663   : > { %v8439_v45 = vadd.f32 %v8438_v57, %v8310_v53  ;;  %v8440_v23 = vpop.f32.mrb[171].mxu1 }
 0x68b   : > { %v8592_v39 = vpop.f32.mrb[172].mxu0 }
 0x68c   : > { %v8599_v42 = vadd.f32 %v8592_v39, %v8436_v29  ;;  %v8594_v4 = vpop.f32.mrb[173].mxu0 }
 0x68d   : > { %v8595_v46 = vpop.f32.mrb[174].mxu0 }
 0x68e   : > { %v8600_v52 = vadd.f32 %v8595_v46, %v8439_v45  ;;  %v8597_v22 = vpop.f32.mrb[175].mxu0 }
 0x698   : > { %v8751_v44 = vpop.f32.mrb[172].mxu1 }
 0x699   : > { %v8758_v40 = vadd.f32 %v8751_v44, %v8599_v42  ;;  %v8753_v19 = vpop.f32.mrb[173].mxu1 }
 0x69a   : > { %v8754_v17 = vpop.f32.mrb[174].mxu1 }
 0x69b   : > { %v8759_v1 = vadd.f32 %v8754_v17, %v8600_v52  ;;  %v8756_v2 = vpop.f32.mrb[175].mxu1 }
 0x6c3   : > { %v8910_v58 = vpop.f32.mrb[176].mxu0 }
 0x6c4   : > { %v8917_v38 = vadd.f32 %v8910_v58, %v8758_v40  ;;  %v8912_v51 = vpop.f32.mrb[177].mxu0 }
 0x6c5   : > { %v8913_v25 = vpop.f32.mrb[178].mxu0 }
 0x6c6   : > { %v8918_v60 = vadd.f32 %v8913_v25, %v8759_v1  ;;  %v8915_v21 = vpop.f32.mrb[179].mxu0 }
 0x6d0   : > { %v9069_v31 = vpop.f32.mrb[176].mxu1 }
 0x6d1   : > { %v9076_v36 = vadd.f32 %v9069_v31, %v8917_v38  ;;  %v9071_v24 = vpop.f32.mrb[177].mxu1 }
 0x6d2   : > { %v9072_v56 = vpop.f32.mrb[178].mxu1 }
 0x6d3   : > { %v9077_v0 = vadd.f32 %v9072_v56, %v8918_v60  ;;  %v9074_v33 = vpop.f32.mrb[179].mxu1 }
 0x6fb   : > { %v9228_v5 = vpop.f32.mrb[180].mxu0 }
 0x6fc   : > { %v9235_v12 = vadd.f32 %v9228_v5, %v9076_v36  ;;  %v9230_v16 = vpop.f32.mrb[181].mxu0 }
 0x6fd   : > { %v9231_v63 = vpop.f32.mrb[182].mxu0 }
 0x6fe   : > { %v9244_v7 = vadd.f32 %v10377_v32, %v9235_v12  ;;  %v9236_v34 = vadd.f32 %v9231_v63, %v9077_v0  ;;  %v9233_v61 = vpop.f32.mrb[183].mxu0 }
 0x700   : > { %9246 = vst [vmem:[%s589_s24] sm:$0xff] %v9244_v7  ;;  %v9245_v27 = vadd.f32 %v10377_v32, %v9236_v34 }
 0x702   : > { %9247 = vst [vmem:[%s589_s24 + $0x8] sm:$0xff] %v9245_v27 }
 0x703 PF: > { %p16_p9 = scmp.ge.s32.totalorder %s12243_s13, 4   ;;  %s17564_s30 = smov %s12168_s10 }
 0x704   : > { %s17565_s10 = smov %s12252_s16  ;;  %s17566_s11 = smov %s12243_s13 }
 0x705   :  { %18 = sbr.rel (!%p16_p9) target bundleno = 2 (0x2), region = 139 }

</bundles_post_ra>
